<compile_context>
chip_gen: v5e
topology: v5e:2x2
jax: 0.10.0
libtpu: 0.0.40
codegen_flags: <defaults>
</compile_context>

<pallas_src>
import functools

import jax
import jax.numpy as jnp
from jax import lax
from jax.experimental import pallas as pl
from jax.experimental.pallas import tpu as pltpu

LRELU_SLOPE = 0.2
BN_EPS = 1e-5
TM_MAX = 512                      # patch rows per matmul tile (multiple of 16)
VMEM_LIMIT = 32 * 1024 * 1024     # per-call scoped VMEM cap (safe on v7x 64 MiB)


def _round_up(x, m):
    return (x + m - 1) // m * m


# ------------------------------- Pallas kernels -------------------------------

def _conv_mm_kernel(*refs, has_bias, apply_lrelu, want_stats, real_m, tm):
    """One M-tile of (patches @ weight [+ bias]), optional fused LeakyReLU(0.2),
    optional per-tile BatchNorm partial statistics (sum / sum-of-squares)."""
    i = 0
    a_ref = refs[i]; i += 1
    w_ref = refs[i]; i += 1
    b_ref = None
    if has_bias:
        b_ref = refs[i]; i += 1
    o_ref = refs[i]; i += 1
    sum_ref = sq_ref = None
    if want_stats:
        sum_ref, sq_ref = refs[i], refs[i + 1]

    acc = jnp.dot(a_ref[...], w_ref[...], preferred_element_type=jnp.float32)
    if has_bias:
        acc = acc + b_ref[...]

    if want_stats:
        # Mask rows that only exist because M was padded up to a tile multiple.
        row = pl.program_id(0) * tm + lax.broadcasted_iota(jnp.int32, (tm, 1), 0)
        y = jnp.where(row < real_m, acc, 0.0)
        sum_ref[...] = jnp.sum(y, axis=0, keepdims=True)[None]       # (1,1,Np)
        sq_ref[...] = jnp.sum(y * y, axis=0, keepdims=True)[None]    # (1,1,Np)

    if apply_lrelu:
        acc = jnp.where(acc > 0, acc, LRELU_SLOPE * acc)
    o_ref[...] = acc.astype(o_ref.dtype)


def _scale_shift_lrelu_kernel(x_ref, s_ref, t_ref, o_ref):
    """y = x * scale + shift (folded BatchNorm affine) followed by LeakyReLU(0.2)."""
    y = x_ref[...].astype(jnp.float32) * s_ref[...] + t_ref[...]
    o_ref[...] = jnp.where(y > 0, y, LRELU_SLOPE * y).astype(o_ref.dtype)


# --------------------------- pallas_call wrappers ------------------------------

def _pallas_conv_matmul(a, w, bias, *, tm, real_m, apply_lrelu, want_stats, out_dtype):
    m_pad, kp = a.shape
    _, np_ = w.shape
    grid_m = m_pad // tm
    has_bias = bias is not None

    in_specs = [pl.BlockSpec((tm, kp), lambda i: (i, 0)),     # patch tile
                pl.BlockSpec((kp, np_), lambda i: (0, 0))]    # weight resident
    args = [a, w]
    if has_bias:
        in_specs.append(pl.BlockSpec((1, np_), lambda i: (0, 0)))
        args.append(bias)

    out_shapes = [jax.ShapeDtypeStruct((m_pad, np_), out_dtype)]
    out_specs = [pl.BlockSpec((tm, np_), lambda i: (i, 0))]
    if want_stats:
        for _ in range(2):
            out_shapes.append(jax.ShapeDtypeStruct((grid_m, 1, np_), jnp.float32))
            out_specs.append(pl.BlockSpec((1, 1, np_), lambda i: (i, 0, 0)))

    kernel = functools.partial(
        _conv_mm_kernel, has_bias=has_bias, apply_lrelu=apply_lrelu,
        want_stats=want_stats, real_m=real_m, tm=tm)

    res = pl.pallas_call(
        kernel,
        grid=(grid_m,),
        in_specs=in_specs,
        out_specs=tuple(out_specs) if want_stats else out_specs[0],
        out_shape=tuple(out_shapes) if want_stats else out_shapes[0],
        compiler_params=pltpu.CompilerParams(
            dimension_semantics=("parallel",),
            vmem_limit_bytes=VMEM_LIMIT),
    )(*args)

    if want_stats:
        return res[0], (res[1], res[2])
    return res, None


def _pallas_bn_lrelu(x, scale, shift, *, tm, out_dtype):
    m_pad, np_ = x.shape
    return pl.pallas_call(
        _scale_shift_lrelu_kernel,
        grid=(m_pad // tm,),
        in_specs=[pl.BlockSpec((tm, np_), lambda i: (i, 0)),
                  pl.BlockSpec((1, np_), lambda i: (0, 0)),
                  pl.BlockSpec((1, np_), lambda i: (0, 0))],
        out_specs=pl.BlockSpec((tm, np_), lambda i: (i, 0)),
        out_shape=jax.ShapeDtypeStruct((m_pad, np_), out_dtype),
        compiler_params=pltpu.CompilerParams(
            dimension_semantics=("parallel",),
            vmem_limit_bytes=VMEM_LIMIT),
    )(x, scale, shift)


# --------------------------- conv block (im2col glue) --------------------------

def _im2col(x_nhwc, kh_, kw_, stride, pad_hw):
    (pt, pb), (pleft, pright) = pad_hw
    x_p = jnp.pad(x_nhwc, ((0, 0), (pt, pb), (pleft, pright), (0, 0)))
    n, hp, wp, c = x_p.shape
    oh = (hp - kh_) // stride + 1
    ow = (wp - kw_) // stride + 1
    cols = []
    for kh in range(kh_):
        for kw in range(kw_):
            cols.append(x_p[:, kh:kh + stride * (oh - 1) + 1:stride,
                               kw:kw + stride * (ow - 1) + 1:stride, :])
    patches = jnp.concatenate(cols, axis=-1).reshape(n * oh * ow, kh_ * kw_ * c)
    return patches, (n, oh, ow)


def _conv_block(x_nhwc, w_oihw, bias, stride, pad_hw, *, fuse_lrelu, bn_params,
                out_dtype):
    """4x4 Conv2d (+ optional fused LeakyReLU, + optional BatchNorm+LeakyReLU)."""
    cout, cin, kh_, kw_ = w_oihw.shape
    patches, (n, oh, ow) = _im2col(x_nhwc, kh_, kw_, stride, pad_hw)
    m, k = patches.shape

    kp = _round_up(k, 128)       # lane-align contraction dim (layer 1: 96 -> 128)
    np_ = _round_up(cout, 128)   # lane-dense stores / full MXU column utilization
    tm = min(TM_MAX, _round_up(m, 16))
    m_pad = _round_up(m, tm)

    a = jnp.pad(patches, ((0, m_pad - m), (0, kp - k))).astype(jnp.bfloat16)
    # (Cout,Cin,KH,KW) -> (KH,KW,Cin,Cout) -> (K,Cout): matches im2col tap order.
    wm = jnp.transpose(w_oihw, (2, 3, 1, 0)).reshape(k, cout)
    wm = jnp.pad(wm, ((0, kp - k), (0, np_ - cout))).astype(jnp.bfloat16)
    b = None
    if bias is not None:
        b = jnp.pad(bias.astype(jnp.float32), (0, np_ - cout)).reshape(1, np_)

    want_stats = bn_params is not None
    conv_dtype = jnp.float32 if want_stats else out_dtype
    out, stats = _pallas_conv_matmul(
        a, wm, b, tm=tm, real_m=m, apply_lrelu=fuse_lrelu,
        want_stats=want_stats, out_dtype=conv_dtype)

    if want_stats:
        gamma, beta = bn_params
        sums, sqs = stats
        mean = jnp.sum(sums, axis=(0, 1)) / m                       # (Np,)
        var = jnp.maximum(jnp.sum(sqs, axis=(0, 1)) / m - mean * mean, 0.0)
        g = jnp.pad(gamma.astype(jnp.float32), (0, np_ - cout), constant_values=1.0)
        be = jnp.pad(beta.astype(jnp.float32), (0, np_ - cout))
        scale = g * lax.rsqrt(var + BN_EPS)
        shift = be - mean * scale
        out = _pallas_bn_lrelu(out, scale.reshape(1, np_), shift.reshape(1, np_),
                               tm=tm, out_dtype=out_dtype)

    return out[:m, :cout].reshape(n, oh, ow, cout)


# --------------------------- module: params + forward ---------------------------

def init_params(in_channels=3):
    """Deterministic synthetic parameters with the same shapes as the PyTorch module."""
    key = jax.random.PRNGKey(42)
    chans = [(in_channels * 2, 32), (32, 64), (64, 128), (128, 256)]
    params = {}
    k = key
    for idx, (ci, co) in enumerate(chans, start=1):
        k, kw, kb = jax.random.split(k, 3)
        params[f"w{idx}"] = 0.05 * jax.random.normal(kw, (co, ci, 4, 4), jnp.float32)
        params[f"b{idx}"] = 0.01 * jax.random.normal(kb, (co,), jnp.float32)
        if idx > 1:  # BatchNorm affine params (PyTorch init: gamma=1, beta=0)
            params[f"g{idx}"] = jnp.ones((co,), jnp.float32)
            params[f"be{idx}"] = jnp.zeros((co,), jnp.float32)
    k, kw = jax.random.split(k)
    params["w5"] = 0.05 * jax.random.normal(kw, (1, 256, 4, 4), jnp.float32)  # bias=False
    return params


@jax.jit
def discriminator_funiegan_forward(img_A, img_B, params):
    """PyTorch-equivalent forward. Inputs/outputs are NCHW (like torch)."""
    x = jnp.concatenate([img_A, img_B], axis=1)                       # cat on C
    x = jnp.transpose(x, (0, 2, 3, 1)).astype(jnp.bfloat16)           # NCHW -> NHWC
    pad1 = ((1, 1), (1, 1))
    # block 1: conv(6->32, k4 s2 p1) + LeakyReLU fused in the matmul epilogue (no BN)
    x = _conv_block(x, params["w1"], params["b1"], 2, pad1,
                    fuse_lrelu=True, bn_params=None, out_dtype=jnp.bfloat16)
    # blocks 2-4: conv (+ fused BN partial stats) -> tiled scale/shift + LeakyReLU
    for idx in (2, 3, 4):
        x = _conv_block(x, params[f"w{idx}"], params[f"b{idx}"], 2, pad1,
                        fuse_lrelu=False,
                        bn_params=(params[f"g{idx}"], params[f"be{idx}"]),
                        out_dtype=jnp.bfloat16)
    # ZeroPad2d((1,0,1,0)) folded with final conv padding=1 -> ((2,1),(2,1)); no bias.
    x = _conv_block(x, params["w5"], None, 1, ((2, 1), (2, 1)),
                    fuse_lrelu=False, bn_params=None, out_dtype=jnp.float32)
    return jnp.transpose(x, (0, 3, 1, 2))                             # NHWC -> NCHW


# --------------------------- pure-JAX f32 reference -----------------------------

def _reference_forward(img_A, img_B, params):
    def conv(x, w, b, stride, pad):
        out = lax.conv_general_dilated(x, w, (stride, stride), pad,
                                       dimension_numbers=("NCHW", "OIHW", "NCHW"))
        return out if b is None else out + b.reshape(1, -1, 1, 1)

    def lrelu(x):
        return jnp.where(x > 0, x, LRELU_SLOPE * x)

    def bn(x, g, be):
        mean = jnp.mean(x, axis=(0, 2, 3), keepdims=True)
        var = jnp.mean(jnp.square(x - mean), axis=(0, 2, 3), keepdims=True)
        return (x - mean) * lax.rsqrt(var + BN_EPS) * g.reshape(1, -1, 1, 1) \
            + be.reshape(1, -1, 1, 1)

    x = jnp.concatenate([img_A, img_B], axis=1)
    x = lrelu(conv(x, params["w1"], params["b1"], 2, ((1, 1), (1, 1))))
    for idx in (2, 3, 4):
        x = conv(x, params[f"w{idx}"], params[f"b{idx}"], 2, ((1, 1), (1, 1)))
        x = lrelu(bn(x, params[f"g{idx}"], params[f"be{idx}"]))
    return conv(x, params["w5"], None, 1, ((2, 1), (2, 1)))


if __name__ == "__main__":
    key = jax.random.PRNGKey(0)
    ka, kb = jax.random.split(key)
    N, C, H, W = 2, 3, 64, 64
    img_A = jax.random.normal(ka, (N, C, H, W), jnp.float32)
    img_B = jax.random.normal(kb, (N, C, H, W), jnp.float32)
    params = init_params(in_channels=C)

    out = jax.block_until_ready(discriminator_funiegan_forward(img_A, img_B, params))
    ref = jax.block_until_ready(_reference_forward(img_A, img_B, params))

    assert out.shape == (N, 1, H // 16, W // 16), out.shape
    # bf16 MXU operands / bf16 inter-layer activations => looser tolerance vs f32 ref.
    assert jnp.allclose(out, ref, atol=1e-1, rtol=5e-2), float(jnp.max(jnp.abs(out - ref)))
    print("KERNEL_OK")
</pallas_src>

<mosaic_0001>
module attributes {stable_mosaic.version = 11 : i64} {
  func.func @_conv_mm_kernel(%arg0: i32, %arg1: memref<512x128xbf16, #tpu.memory_space<vmem>>, %arg2: memref<128x128xbf16, #tpu.memory_space<vmem>>, %arg3: memref<1x128xf32, #tpu.memory_space<vmem>>, %arg4: memref<512x128xbf16, #tpu.memory_space<vmem>>) attributes {dimension_semantics = [#tpu.dimension_semantics<parallel>], iteration_bounds = array<i64: 4>, scalar_prefetch = 0 : i64, scratch_operands = 0 : i64, tpu.core_type = #tpu.core_type<tc>, window_params = [{transform_indices = @transform_0, window_bounds = array<i64: 512, 128>}, {pipeline_mode = #tpu.pipeline_mode<synchronous>, transform_indices = @transform_1, window_bounds = array<i64: 128, 128>}, {pipeline_mode = #tpu.pipeline_mode<synchronous>, transform_indices = @transform_2, window_bounds = array<i64: 1, 128>}, {transform_indices = @transform_3, window_bounds = array<i64: 512, 128>}]} {
    %c0 = arith.constant 0 : index
    %c0_0 = arith.constant 0 : index
    %0 = vector.load %arg1[%c0, %c0_0] : memref<512x128xbf16, #tpu.memory_space<vmem>>, vector<512x128xbf16>
    %c0_1 = arith.constant 0 : index
    %c0_2 = arith.constant 0 : index
    %1 = vector.load %arg2[%c0_1, %c0_2] : memref<128x128xbf16, #tpu.memory_space<vmem>>, vector<128x128xbf16>
    %cst = arith.constant dense<0.000000e+00> : vector<512x128xf32>
    %2 = tpu.matmul %0, %1, %cst {dimension_numbers = #tpu.dot_dimension_numbers<[1], [0], [0], [1], [0, 0, 1, 1], [], []>} : vector<512x128xbf16>, vector<128x128xbf16>, vector<512x128xf32> -> vector<512x128xf32>
    %c0_3 = arith.constant 0 : index
    %c0_4 = arith.constant 0 : index
    %3 = vector.load %arg3[%c0_3, %c0_4] : memref<1x128xf32, #tpu.memory_space<vmem>>, vector<1x128xf32>
    %4 = vector.broadcast %3 : vector<1x128xf32> to vector<512x128xf32>
    %5 = arith.addf %2, %4 : vector<512x128xf32>
    %cst_5 = arith.constant 0.000000e+00 : f32
    %6 = vector.broadcast %cst_5 : f32 to vector<512x128xf32>
    %7 = arith.cmpf ogt, %5, %6 : vector<512x128xf32>
    %cst_6 = arith.constant 2.000000e-01 : f32
    %8 = vector.broadcast %cst_6 : f32 to vector<512x128xf32>
    %9 = arith.mulf %8, %5 : vector<512x128xf32>
    %10 = arith.select %7, %5, %9 : vector<512x128xi1>, vector<512x128xf32>
    %11 = arith.truncf %10 : vector<512x128xf32> to vector<512x128xbf16>
    %c0_7 = arith.constant 0 : index
    %c0_8 = arith.constant 0 : index
    %12 = vector.load %arg4[%c0_7, %c0_8] : memref<512x128xbf16, #tpu.memory_space<vmem>>, vector<512x128xbf16>
    tpu.vector_store %arg4[%c0_7, %c0_8], %11 {strides = array<i32>} : memref<512x128xbf16, #tpu.memory_space<vmem>>, vector<512x128xbf16>,
    return
  }
  func.func @transform_0(%arg0: i32) -> (i32, i32) {
    %c0_i32 = arith.constant 0 : i32
    %c0_i32_0 = arith.constant 0 : i32
    return %arg0, %c0_i32 : i32, i32
  }
  func.func @transform_1(%arg0: i32) -> (i32, i32) {
    %c0_i32 = arith.constant 0 : i32
    %c0_i32_0 = arith.constant 0 : i32
    %c0_i32_1 = arith.constant 0 : i32
    return %c0_i32, %c0_i32_0 : i32, i32
  }
  func.func @transform_2(%arg0: i32) -> (i32, i32) {
    %c0_i32 = arith.constant 0 : i32
    %c0_i32_0 = arith.constant 0 : i32
    %c0_i32_1 = arith.constant 0 : i32
    return %c0_i32, %c0_i32_0 : i32, i32
  }
  func.func @transform_3(%arg0: i32) -> (i32, i32) {
    %c0_i32 = arith.constant 0 : i32
    %c0_i32_0 = arith.constant 0 : i32
    return %arg0, %c0_i32 : i32, i32
  }
}

module attributes {stable_mosaic.version = 11 : i64} {
  func.func @_conv_mm_kernel(%arg0: i32, %arg1: memref<512x512xbf16, #tpu.memory_space<vmem>>, %arg2: memref<512x128xbf16, #tpu.memory_space<vmem>>, %arg3: memref<1x128xf32, #tpu.memory_space<vmem>>, %arg4: memref<512x128xf32, #tpu.memory_space<vmem>>, %arg5: memref<1x1x128xf32, #tpu.memory_space<vmem>>, %arg6: memref<1x1x128xf32, #tpu.memory_space<vmem>>) attributes {dimension_semantics = [#tpu.dimension_semantics<parallel>], iteration_bounds = array<i64: 1>, scalar_prefetch = 0 : i64, scratch_operands = 0 : i64, tpu.core_type = #tpu.core_type<tc>, window_params = [{transform_indices = @transform_0, window_bounds = array<i64: 512, 512>}, {pipeline_mode = #tpu.pipeline_mode<synchronous>, transform_indices = @transform_1, window_bounds = array<i64: 512, 128>}, {pipeline_mode = #tpu.pipeline_mode<synchronous>, transform_indices = @transform_2, window_bounds = array<i64: 1, 128>}, {transform_indices = @transform_3, window_bounds = array<i64: 512, 128>}, {transform_indices = @transform_4, window_bounds = array<i64: 1, 1, 128>}, {transform_indices = @transform_5, window_bounds = array<i64: 1, 1, 128>}]} {
    %c0 = arith.constant 0 : index
    %c0_0 = arith.constant 0 : index
    %0 = vector.load %arg1[%c0, %c0_0] : memref<512x512xbf16, #tpu.memory_space<vmem>>, vector<512x512xbf16>
    %c0_1 = arith.constant 0 : index
    %c0_2 = arith.constant 0 : index
    %1 = vector.load %arg2[%c0_1, %c0_2] : memref<512x128xbf16, #tpu.memory_space<vmem>>, vector<512x128xbf16>
    %cst = arith.constant dense<0.000000e+00> : vector<512x128xf32>
    %2 = tpu.matmul %0, %1, %cst {dimension_numbers = #tpu.dot_dimension_numbers<[1], [0], [0], [1], [0, 0, 1, 1], [], []>} : vector<512x512xbf16>, vector<512x128xbf16>, vector<512x128xf32> -> vector<512x128xf32>
    %c0_3 = arith.constant 0 : index
    %c0_4 = arith.constant 0 : index
    %3 = vector.load %arg3[%c0_3, %c0_4] : memref<1x128xf32, #tpu.memory_space<vmem>>, vector<1x128xf32>
    %4 = vector.broadcast %3 : vector<1x128xf32> to vector<512x128xf32>
    %5 = arith.addf %2, %4 : vector<512x128xf32>
    %c512_i32 = arith.constant 512 : i32
    %6 = arith.muli %arg0, %c512_i32 : i32
    %7 = tpu.iota {dimensions = array<i32: 0>} : vector<512x1xi32>
    %8 = vector.broadcast %6 : i32 to vector<512x1xi32>
    %9 = arith.addi %8, %7 : vector<512x1xi32>
    %c512_i32_5 = arith.constant 512 : i32
    %10 = vector.broadcast %c512_i32_5 : i32 to vector<512x1xi32>
    %11 = arith.cmpi slt, %9, %10 : vector<512x1xi32>
    %cst_6 = arith.constant 0.000000e+00 : f32
    %12 = vector.shape_cast %11 : vector<512x1xi1> to vector<512x1xi1>
    %13 = vector.broadcast %12 : vector<512x1xi1> to vector<512x128xi1>
    %14 = vector.broadcast %cst_6 : f32 to vector<512x128xf32>
    %15 = arith.select %13, %5, %14 : vector<512x128xi1>, vector<512x128xf32>
    %cst_7 = arith.constant dense<0.000000e+00> : vector<128xf32>
    %16 = vector.multi_reduction <add>, %15, %cst_7 [0] : vector<512x128xf32> to vector<128xf32>
    %17 = vector.shape_cast %16 : vector<128xf32> to vector<1x128xf32>
    %18 = vector.shape_cast %17 : vector<1x128xf32> to vector<1x1x128xf32>
    %c0_8 = arith.constant 0 : index
    %c0_9 = arith.constant 0 : index
    %c0_10 = arith.constant 0 : index
    %19 = vector.load %arg5[%c0_8, %c0_9, %c0_10] : memref<1x1x128xf32, #tpu.memory_space<vmem>>, vector<1x1x128xf32>
    tpu.vector_store %arg5[%c0_8, %c0_9, %c0_10], %18 {strides = array<i32>} : memref<1x1x128xf32, #tpu.memory_space<vmem>>, vector<1x1x128xf32>,
    %20 = arith.mulf %15, %15 : vector<512x128xf32>
    %cst_11 = arith.constant dense<0.000000e+00> : vector<128xf32>
    %21 = vector.multi_reduction <add>, %20, %cst_11 [0] : vector<512x128xf32> to vector<128xf32>
    %22 = vector.shape_cast %21 : vector<128xf32> to vector<1x128xf32>
    %23 = vector.shape_cast %22 : vector<1x128xf32> to vector<1x1x128xf32>
    %c0_12 = arith.constant 0 : index
    %c0_13 = arith.constant 0 : index
    %c0_14 = arith.constant 0 : index
    %24 = vector.load %arg6[%c0_12, %c0_13, %c0_14] : memref<1x1x128xf32, #tpu.memory_space<vmem>>, vector<1x1x128xf32>
    tpu.vector_store %arg6[%c0_12, %c0_13, %c0_14], %23 {strides = array<i32>} : memref<1x1x128xf32, #tpu.memory_space<vmem>>, vector<1x1x128xf32>,
    %c0_15 = arith.constant 0 : index
    %c0_16 = arith.constant 0 : index
    %25 = vector.load %arg4[%c0_15, %c0_16] : memref<512x128xf32, #tpu.memory_space<vmem>>, vector<512x128xf32>
    tpu.vector_store %arg4[%c0_15, %c0_16], %5 {strides = array<i32>} : memref<512x128xf32, #tpu.memory_space<vmem>>, vector<512x128xf32>,
    return
  }
  func.func @transform_0(%arg0: i32) -> (i32, i32) {
    %c0_i32 = arith.constant 0 : i32
    %c0_i32_0 = arith.constant 0 : i32
    return %arg0, %c0_i32 : i32, i32
  }
  func.func @transform_1(%arg0: i32) -> (i32, i32) {
    %c0_i32 = arith.constant 0 : i32
    %c0_i32_0 = arith.constant 0 : i32
    %c0_i32_1 = arith.constant 0 : i32
    return %c0_i32, %c0_i32_0 : i32, i32
  }
  func.func @transform_2(%arg0: i32) -> (i32, i32) {
    %c0_i32 = arith.constant 0 : i32
    %c0_i32_0 = arith.constant 0 : i32
    %c0_i32_1 = arith.constant 0 : i32
    return %c0_i32, %c0_i32_0 : i32, i32
  }
  func.func @transform_3(%arg0: i32) -> (i32, i32) {
    %c0_i32 = arith.constant 0 : i32
    %c0_i32_0 = arith.constant 0 : i32
    return %arg0, %c0_i32 : i32, i32
  }
  func.func @transform_4(%arg0: i32) -> (i32, i32, i32) {
    %c0_i32 = arith.constant 0 : i32
    %c0_i32_0 = arith.constant 0 : i32
    %c0_i32_1 = arith.constant 0 : i32
    return %arg0, %c0_i32, %c0_i32_0 : i32, i32, i32
  }
  func.func @transform_5(%arg0: i32) -> (i32, i32, i32) {
    %c0_i32 = arith.constant 0 : i32
    %c0_i32_0 = arith.constant 0 : i32
    %c0_i32_1 = arith.constant 0 : i32
    return %arg0, %c0_i32, %c0_i32_0 : i32, i32, i32
  }
}

module attributes {stable_mosaic.version = 11 : i64} {
  func.func @_scale_shift_lrelu_kernel(%arg0: i32, %arg1: memref<512x128xf32, #tpu.memory_space<vmem>>, %arg2: memref<1x128xf32, #tpu.memory_space<vmem>>, %arg3: memref<1x128xf32, #tpu.memory_space<vmem>>, %arg4: memref<512x128xbf16, #tpu.memory_space<vmem>>) attributes {dimension_semantics = [#tpu.dimension_semantics<parallel>], iteration_bounds = array<i64: 1>, scalar_prefetch = 0 : i64, scratch_operands = 0 : i64, tpu.core_type = #tpu.core_type<tc>, window_params = [{transform_indices = @transform_0, window_bounds = array<i64: 512, 128>}, {pipeline_mode = #tpu.pipeline_mode<synchronous>, transform_indices = @transform_1, window_bounds = array<i64: 1, 128>}, {pipeline_mode = #tpu.pipeline_mode<synchronous>, transform_indices = @transform_2, window_bounds = array<i64: 1, 128>}, {transform_indices = @transform_3, window_bounds = array<i64: 512, 128>}]} {
    %c0 = arith.constant 0 : index
    %c0_0 = arith.constant 0 : index
    %0 = vector.load %arg1[%c0, %c0_0] : memref<512x128xf32, #tpu.memory_space<vmem>>, vector<512x128xf32>
    %c0_1 = arith.constant 0 : index
    %c0_2 = arith.constant 0 : index
    %1 = vector.load %arg2[%c0_1, %c0_2] : memref<1x128xf32, #tpu.memory_space<vmem>>, vector<1x128xf32>
    %2 = vector.broadcast %1 : vector<1x128xf32> to vector<512x128xf32>
    %3 = arith.mulf %0, %2 : vector<512x128xf32>
    %c0_3 = arith.constant 0 : index
    %c0_4 = arith.constant 0 : index
    %4 = vector.load %arg3[%c0_3, %c0_4] : memref<1x128xf32, #tpu.memory_space<vmem>>, vector<1x128xf32>
    %5 = vector.broadcast %4 : vector<1x128xf32> to vector<512x128xf32>
    %6 = arith.addf %3, %5 : vector<512x128xf32>
    %cst = arith.constant 0.000000e+00 : f32
    %7 = vector.broadcast %cst : f32 to vector<512x128xf32>
    %8 = arith.cmpf ogt, %6, %7 : vector<512x128xf32>
    %cst_5 = arith.constant 2.000000e-01 : f32
    %9 = vector.broadcast %cst_5 : f32 to vector<512x128xf32>
    %10 = arith.mulf %9, %6 : vector<512x128xf32>
    %11 = arith.select %8, %6, %10 : vector<512x128xi1>, vector<512x128xf32>
    %12 = arith.truncf %11 : vector<512x128xf32> to vector<512x128xbf16>
    %c0_6 = arith.constant 0 : index
    %c0_7 = arith.constant 0 : index
    %13 = vector.load %arg4[%c0_6, %c0_7] : memref<512x128xbf16, #tpu.memory_space<vmem>>, vector<512x128xbf16>
    tpu.vector_store %arg4[%c0_6, %c0_7], %12 {strides = array<i32>} : memref<512x128xbf16, #tpu.memory_space<vmem>>, vector<512x128xbf16>,
    return
  }
  func.func @transform_0(%arg0: i32) -> (i32, i32) {
    %c0_i32 = arith.constant 0 : i32
    %c0_i32_0 = arith.constant 0 : i32
    return %arg0, %c0_i32 : i32, i32
  }
  func.func @transform_1(%arg0: i32) -> (i32, i32) {
    %c0_i32 = arith.constant 0 : i32
    %c0_i32_0 = arith.constant 0 : i32
    %c0_i32_1 = arith.constant 0 : i32
    return %c0_i32, %c0_i32_0 : i32, i32
  }
  func.func @transform_2(%arg0: i32) -> (i32, i32) {
    %c0_i32 = arith.constant 0 : i32
    %c0_i32_0 = arith.constant 0 : i32
    %c0_i32_1 = arith.constant 0 : i32
    return %c0_i32, %c0_i32_0 : i32, i32
  }
  func.func @transform_3(%arg0: i32) -> (i32, i32) {
    %c0_i32 = arith.constant 0 : i32
    %c0_i32_0 = arith.constant 0 : i32
    return %arg0, %c0_i32 : i32, i32
  }
}

module attributes {stable_mosaic.version = 11 : i64} {
  func.func @_conv_mm_kernel(%arg0: i32, %arg1: memref<128x1024xbf16, #tpu.memory_space<vmem>>, %arg2: memref<1024x128xbf16, #tpu.memory_space<vmem>>, %arg3: memref<1x128xf32, #tpu.memory_space<vmem>>, %arg4: memref<128x128xf32, #tpu.memory_space<vmem>>, %arg5: memref<1x1x128xf32, #tpu.memory_space<vmem>>, %arg6: memref<1x1x128xf32, #tpu.memory_space<vmem>>) attributes {dimension_semantics = [#tpu.dimension_semantics<parallel>], iteration_bounds = array<i64: 1>, scalar_prefetch = 0 : i64, scratch_operands = 0 : i64, tpu.core_type = #tpu.core_type<tc>, window_params = [{transform_indices = @transform_0, window_bounds = array<i64: 128, 1024>}, {pipeline_mode = #tpu.pipeline_mode<synchronous>, transform_indices = @transform_1, window_bounds = array<i64: 1024, 128>}, {pipeline_mode = #tpu.pipeline_mode<synchronous>, transform_indices = @transform_2, window_bounds = array<i64: 1, 128>}, {transform_indices = @transform_3, window_bounds = array<i64: 128, 128>}, {transform_indices = @transform_4, window_bounds = array<i64: 1, 1, 128>}, {transform_indices = @transform_5, window_bounds = array<i64: 1, 1, 128>}]} {
    %c0 = arith.constant 0 : index
    %c0_0 = arith.constant 0 : index
    %0 = vector.load %arg1[%c0, %c0_0] : memref<128x1024xbf16, #tpu.memory_space<vmem>>, vector<128x1024xbf16>
    %c0_1 = arith.constant 0 : index
    %c0_2 = arith.constant 0 : index
    %1 = vector.load %arg2[%c0_1, %c0_2] : memref<1024x128xbf16, #tpu.memory_space<vmem>>, vector<1024x128xbf16>
    %cst = arith.constant dense<0.000000e+00> : vector<128x128xf32>
    %2 = tpu.matmul %0, %1, %cst {dimension_numbers = #tpu.dot_dimension_numbers<[1], [0], [0], [1], [0, 0, 1, 1], [], []>} : vector<128x1024xbf16>, vector<1024x128xbf16>, vector<128x128xf32> -> vector<128x128xf32>
    %c0_3 = arith.constant 0 : index
    %c0_4 = arith.constant 0 : index
    %3 = vector.load %arg3[%c0_3, %c0_4] : memref<1x128xf32, #tpu.memory_space<vmem>>, vector<1x128xf32>
    %4 = vector.broadcast %3 : vector<1x128xf32> to vector<128x128xf32>
    %5 = arith.addf %2, %4 : vector<128x128xf32>
    %c128_i32 = arith.constant 128 : i32
    %6 = arith.muli %arg0, %c128_i32 : i32
    %7 = tpu.iota {dimensions = array<i32: 0>} : vector<128x1xi32>
    %8 = vector.broadcast %6 : i32 to vector<128x1xi32>
    %9 = arith.addi %8, %7 : vector<128x1xi32>
    %c128_i32_5 = arith.constant 128 : i32
    %10 = vector.broadcast %c128_i32_5 : i32 to vector<128x1xi32>
    %11 = arith.cmpi slt, %9, %10 : vector<128x1xi32>
    %cst_6 = arith.constant 0.000000e+00 : f32
    %12 = vector.shape_cast %11 : vector<128x1xi1> to vector<128x1xi1>
    %13 = vector.broadcast %12 : vector<128x1xi1> to vector<128x128xi1>
    %14 = vector.broadcast %cst_6 : f32 to vector<128x128xf32>
    %15 = arith.select %13, %5, %14 : vector<128x128xi1>, vector<128x128xf32>
    %cst_7 = arith.constant dense<0.000000e+00> : vector<128xf32>
    %16 = vector.multi_reduction <add>, %15, %cst_7 [0] : vector<128x128xf32> to vector<128xf32>
    %17 = vector.shape_cast %16 : vector<128xf32> to vector<1x128xf32>
    %18 = vector.shape_cast %17 : vector<1x128xf32> to vector<1x1x128xf32>
    %c0_8 = arith.constant 0 : index
    %c0_9 = arith.constant 0 : index
    %c0_10 = arith.constant 0 : index
    %19 = vector.load %arg5[%c0_8, %c0_9, %c0_10] : memref<1x1x128xf32, #tpu.memory_space<vmem>>, vector<1x1x128xf32>
    tpu.vector_store %arg5[%c0_8, %c0_9, %c0_10], %18 {strides = array<i32>} : memref<1x1x128xf32, #tpu.memory_space<vmem>>, vector<1x1x128xf32>,
    %20 = arith.mulf %15, %15 : vector<128x128xf32>
    %cst_11 = arith.constant dense<0.000000e+00> : vector<128xf32>
    %21 = vector.multi_reduction <add>, %20, %cst_11 [0] : vector<128x128xf32> to vector<128xf32>
    %22 = vector.shape_cast %21 : vector<128xf32> to vector<1x128xf32>
    %23 = vector.shape_cast %22 : vector<1x128xf32> to vector<1x1x128xf32>
    %c0_12 = arith.constant 0 : index
    %c0_13 = arith.constant 0 : index
    %c0_14 = arith.constant 0 : index
    %24 = vector.load %arg6[%c0_12, %c0_13, %c0_14] : memref<1x1x128xf32, #tpu.memory_space<vmem>>, vector<1x1x128xf32>
    tpu.vector_store %arg6[%c0_12, %c0_13, %c0_14], %23 {strides = array<i32>} : memref<1x1x128xf32, #tpu.memory_space<vmem>>, vector<1x1x128xf32>,
    %c0_15 = arith.constant 0 : index
    %c0_16 = arith.constant 0 : index
    %25 = vector.load %arg4[%c0_15, %c0_16] : memref<128x128xf32, #tpu.memory_space<vmem>>, vector<128x128xf32>
    tpu.vector_store %arg4[%c0_15, %c0_16], %5 {strides = array<i32>} : memref<128x128xf32, #tpu.memory_space<vmem>>, vector<128x128xf32>,
    return
  }
  func.func @transform_0(%arg0: i32) -> (i32, i32) {
    %c0_i32 = arith.constant 0 : i32
    %c0_i32_0 = arith.constant 0 : i32
    return %arg0, %c0_i32 : i32, i32
  }
  func.func @transform_1(%arg0: i32) -> (i32, i32) {
    %c0_i32 = arith.constant 0 : i32
    %c0_i32_0 = arith.constant 0 : i32
    %c0_i32_1 = arith.constant 0 : i32
    return %c0_i32, %c0_i32_0 : i32, i32
  }
  func.func @transform_2(%arg0: i32) -> (i32, i32) {
    %c0_i32 = arith.constant 0 : i32
    %c0_i32_0 = arith.constant 0 : i32
    %c0_i32_1 = arith.constant 0 : i32
    return %c0_i32, %c0_i32_0 : i32, i32
  }
  func.func @transform_3(%arg0: i32) -> (i32, i32) {
    %c0_i32 = arith.constant 0 : i32
    %c0_i32_0 = arith.constant 0 : i32
    return %arg0, %c0_i32 : i32, i32
  }
  func.func @transform_4(%arg0: i32) -> (i32, i32, i32) {
    %c0_i32 = arith.constant 0 : i32
    %c0_i32_0 = arith.constant 0 : i32
    %c0_i32_1 = arith.constant 0 : i32
    return %arg0, %c0_i32, %c0_i32_0 : i32, i32, i32
  }
  func.func @transform_5(%arg0: i32) -> (i32, i32, i32) {
    %c0_i32 = arith.constant 0 : i32
    %c0_i32_0 = arith.constant 0 : i32
    %c0_i32_1 = arith.constant 0 : i32
    return %arg0, %c0_i32, %c0_i32_0 : i32, i32, i32
  }
}

module attributes {stable_mosaic.version = 11 : i64} {
  func.func @_scale_shift_lrelu_kernel(%arg0: i32, %arg1: memref<128x128xf32, #tpu.memory_space<vmem>>, %arg2: memref<1x128xf32, #tpu.memory_space<vmem>>, %arg3: memref<1x128xf32, #tpu.memory_space<vmem>>, %arg4: memref<128x128xbf16, #tpu.memory_space<vmem>>) attributes {dimension_semantics = [#tpu.dimension_semantics<parallel>], iteration_bounds = array<i64: 1>, scalar_prefetch = 0 : i64, scratch_operands = 0 : i64, tpu.core_type = #tpu.core_type<tc>, window_params = [{transform_indices = @transform_0, window_bounds = array<i64: 128, 128>}, {pipeline_mode = #tpu.pipeline_mode<synchronous>, transform_indices = @transform_1, window_bounds = array<i64: 1, 128>}, {pipeline_mode = #tpu.pipeline_mode<synchronous>, transform_indices = @transform_2, window_bounds = array<i64: 1, 128>}, {transform_indices = @transform_3, window_bounds = array<i64: 128, 128>}]} {
    %c0 = arith.constant 0 : index
    %c0_0 = arith.constant 0 : index
    %0 = vector.load %arg1[%c0, %c0_0] : memref<128x128xf32, #tpu.memory_space<vmem>>, vector<128x128xf32>
    %c0_1 = arith.constant 0 : index
    %c0_2 = arith.constant 0 : index
    %1 = vector.load %arg2[%c0_1, %c0_2] : memref<1x128xf32, #tpu.memory_space<vmem>>, vector<1x128xf32>
    %2 = vector.broadcast %1 : vector<1x128xf32> to vector<128x128xf32>
    %3 = arith.mulf %0, %2 : vector<128x128xf32>
    %c0_3 = arith.constant 0 : index
    %c0_4 = arith.constant 0 : index
    %4 = vector.load %arg3[%c0_3, %c0_4] : memref<1x128xf32, #tpu.memory_space<vmem>>, vector<1x128xf32>
    %5 = vector.broadcast %4 : vector<1x128xf32> to vector<128x128xf32>
    %6 = arith.addf %3, %5 : vector<128x128xf32>
    %cst = arith.constant 0.000000e+00 : f32
    %7 = vector.broadcast %cst : f32 to vector<128x128xf32>
    %8 = arith.cmpf ogt, %6, %7 : vector<128x128xf32>
    %cst_5 = arith.constant 2.000000e-01 : f32
    %9 = vector.broadcast %cst_5 : f32 to vector<128x128xf32>
    %10 = arith.mulf %9, %6 : vector<128x128xf32>
    %11 = arith.select %8, %6, %10 : vector<128x128xi1>, vector<128x128xf32>
    %12 = arith.truncf %11 : vector<128x128xf32> to vector<128x128xbf16>
    %c0_6 = arith.constant 0 : index
    %c0_7 = arith.constant 0 : index
    %13 = vector.load %arg4[%c0_6, %c0_7] : memref<128x128xbf16, #tpu.memory_space<vmem>>, vector<128x128xbf16>
    tpu.vector_store %arg4[%c0_6, %c0_7], %12 {strides = array<i32>} : memref<128x128xbf16, #tpu.memory_space<vmem>>, vector<128x128xbf16>,
    return
  }
  func.func @transform_0(%arg0: i32) -> (i32, i32) {
    %c0_i32 = arith.constant 0 : i32
    %c0_i32_0 = arith.constant 0 : i32
    return %arg0, %c0_i32 : i32, i32
  }
  func.func @transform_1(%arg0: i32) -> (i32, i32) {
    %c0_i32 = arith.constant 0 : i32
    %c0_i32_0 = arith.constant 0 : i32
    %c0_i32_1 = arith.constant 0 : i32
    return %c0_i32, %c0_i32_0 : i32, i32
  }
  func.func @transform_2(%arg0: i32) -> (i32, i32) {
    %c0_i32 = arith.constant 0 : i32
    %c0_i32_0 = arith.constant 0 : i32
    %c0_i32_1 = arith.constant 0 : i32
    return %c0_i32, %c0_i32_0 : i32, i32
  }
  func.func @transform_3(%arg0: i32) -> (i32, i32) {
    %c0_i32 = arith.constant 0 : i32
    %c0_i32_0 = arith.constant 0 : i32
    return %arg0, %c0_i32 : i32, i32
  }
}

module attributes {stable_mosaic.version = 11 : i64} {
  func.func @_conv_mm_kernel(%arg0: i32, %arg1: memref<32x2048xbf16, #tpu.memory_space<vmem>>, %arg2: memref<2048x256xbf16, #tpu.memory_space<vmem>>, %arg3: memref<1x256xf32, #tpu.memory_space<vmem>>, %arg4: memref<32x256xf32, #tpu.memory_space<vmem>>, %arg5: memref<1x1x256xf32, #tpu.memory_space<vmem>>, %arg6: memref<1x1x256xf32, #tpu.memory_space<vmem>>) attributes {dimension_semantics = [#tpu.dimension_semantics<parallel>], iteration_bounds = array<i64: 1>, scalar_prefetch = 0 : i64, scratch_operands = 0 : i64, tpu.core_type = #tpu.core_type<tc>, window_params = [{transform_indices = @transform_0, window_bounds = array<i64: 32, 2048>}, {pipeline_mode = #tpu.pipeline_mode<synchronous>, transform_indices = @transform_1, window_bounds = array<i64: 2048, 256>}, {pipeline_mode = #tpu.pipeline_mode<synchronous>, transform_indices = @transform_2, window_bounds = array<i64: 1, 256>}, {transform_indices = @transform_3, window_bounds = array<i64: 32, 256>}, {transform_indices = @transform_4, window_bounds = array<i64: 1, 1, 256>}, {transform_indices = @transform_5, window_bounds = array<i64: 1, 1, 256>}]} {
    %c0 = arith.constant 0 : index
    %c0_0 = arith.constant 0 : index
    %0 = vector.load %arg1[%c0, %c0_0] : memref<32x2048xbf16, #tpu.memory_space<vmem>>, vector<32x2048xbf16>
    %c0_1 = arith.constant 0 : index
    %c0_2 = arith.constant 0 : index
    %1 = vector.load %arg2[%c0_1, %c0_2] : memref<2048x256xbf16, #tpu.memory_space<vmem>>, vector<2048x256xbf16>
    %cst = arith.constant dense<0.000000e+00> : vector<32x256xf32>
    %2 = tpu.matmul %0, %1, %cst {dimension_numbers = #tpu.dot_dimension_numbers<[1], [0], [0], [1], [0, 0, 1, 1], [], []>} : vector<32x2048xbf16>, vector<2048x256xbf16>, vector<32x256xf32> -> vector<32x256xf32>
    %c0_3 = arith.constant 0 : index
    %c0_4 = arith.constant 0 : index
    %3 = vector.load %arg3[%c0_3, %c0_4] : memref<1x256xf32, #tpu.memory_space<vmem>>, vector<1x256xf32>
    %4 = vector.broadcast %3 : vector<1x256xf32> to vector<32x256xf32>
    %5 = arith.addf %2, %4 : vector<32x256xf32>
    %c32_i32 = arith.constant 32 : i32
    %6 = arith.muli %arg0, %c32_i32 : i32
    %7 = tpu.iota {dimensions = array<i32: 0>} : vector<32x1xi32>
    %8 = vector.broadcast %6 : i32 to vector<32x1xi32>
    %9 = arith.addi %8, %7 : vector<32x1xi32>
    %c32_i32_5 = arith.constant 32 : i32
    %10 = vector.broadcast %c32_i32_5 : i32 to vector<32x1xi32>
    %11 = arith.cmpi slt, %9, %10 : vector<32x1xi32>
    %cst_6 = arith.constant 0.000000e+00 : f32
    %12 = vector.shape_cast %11 : vector<32x1xi1> to vector<32x1xi1>
    %13 = vector.broadcast %12 : vector<32x1xi1> to vector<32x256xi1>
    %14 = vector.broadcast %cst_6 : f32 to vector<32x256xf32>
    %15 = arith.select %13, %5, %14 : vector<32x256xi1>, vector<32x256xf32>
    %cst_7 = arith.constant dense<0.000000e+00> : vector<256xf32>
    %16 = vector.multi_reduction <add>, %15, %cst_7 [0] : vector<32x256xf32> to vector<256xf32>
    %17 = vector.shape_cast %16 : vector<256xf32> to vector<1x256xf32>
    %18 = vector.shape_cast %17 : vector<1x256xf32> to vector<1x1x256xf32>
    %c0_8 = arith.constant 0 : index
    %c0_9 = arith.constant 0 : index
    %c0_10 = arith.constant 0 : index
    %19 = vector.load %arg5[%c0_8, %c0_9, %c0_10] : memref<1x1x256xf32, #tpu.memory_space<vmem>>, vector<1x1x256xf32>
    tpu.vector_store %arg5[%c0_8, %c0_9, %c0_10], %18 {strides = array<i32>} : memref<1x1x256xf32, #tpu.memory_space<vmem>>, vector<1x1x256xf32>,
    %20 = arith.mulf %15, %15 : vector<32x256xf32>
    %cst_11 = arith.constant dense<0.000000e+00> : vector<256xf32>
    %21 = vector.multi_reduction <add>, %20, %cst_11 [0] : vector<32x256xf32> to vector<256xf32>
    %22 = vector.shape_cast %21 : vector<256xf32> to vector<1x256xf32>
    %23 = vector.shape_cast %22 : vector<1x256xf32> to vector<1x1x256xf32>
    %c0_12 = arith.constant 0 : index
    %c0_13 = arith.constant 0 : index
    %c0_14 = arith.constant 0 : index
    %24 = vector.load %arg6[%c0_12, %c0_13, %c0_14] : memref<1x1x256xf32, #tpu.memory_space<vmem>>, vector<1x1x256xf32>
    tpu.vector_store %arg6[%c0_12, %c0_13, %c0_14], %23 {strides = array<i32>} : memref<1x1x256xf32, #tpu.memory_space<vmem>>, vector<1x1x256xf32>,
    %c0_15 = arith.constant 0 : index
    %c0_16 = arith.constant 0 : index
    %25 = vector.load %arg4[%c0_15, %c0_16] : memref<32x256xf32, #tpu.memory_space<vmem>>, vector<32x256xf32>
    tpu.vector_store %arg4[%c0_15, %c0_16], %5 {strides = array<i32>} : memref<32x256xf32, #tpu.memory_space<vmem>>, vector<32x256xf32>,
    return
  }
  func.func @transform_0(%arg0: i32) -> (i32, i32) {
    %c0_i32 = arith.constant 0 : i32
    %c0_i32_0 = arith.constant 0 : i32
    return %arg0, %c0_i32 : i32, i32
  }
  func.func @transform_1(%arg0: i32) -> (i32, i32) {
    %c0_i32 = arith.constant 0 : i32
    %c0_i32_0 = arith.constant 0 : i32
    %c0_i32_1 = arith.constant 0 : i32
    return %c0_i32, %c0_i32_0 : i32, i32
  }
  func.func @transform_2(%arg0: i32) -> (i32, i32) {
    %c0_i32 = arith.constant 0 : i32
    %c0_i32_0 = arith.constant 0 : i32
    %c0_i32_1 = arith.constant 0 : i32
    return %c0_i32, %c0_i32_0 : i32, i32
  }
  func.func @transform_3(%arg0: i32) -> (i32, i32) {
    %c0_i32 = arith.constant 0 : i32
    %c0_i32_0 = arith.constant 0 : i32
    return %arg0, %c0_i32 : i32, i32
  }
  func.func @transform_4(%arg0: i32) -> (i32, i32, i32) {
    %c0_i32 = arith.constant 0 : i32
    %c0_i32_0 = arith.constant 0 : i32
    %c0_i32_1 = arith.constant 0 : i32
    return %arg0, %c0_i32, %c0_i32_0 : i32, i32, i32
  }
  func.func @transform_5(%arg0: i32) -> (i32, i32, i32) {
    %c0_i32 = arith.constant 0 : i32
    %c0_i32_0 = arith.constant 0 : i32
    %c0_i32_1 = arith.constant 0 : i32
    return %arg0, %c0_i32, %c0_i32_0 : i32, i32, i32
  }
}

module attributes {stable_mosaic.version = 11 : i64} {
  func.func @_scale_shift_lrelu_kernel(%arg0: i32, %arg1: memref<32x256xf32, #tpu.memory_space<vmem>>, %arg2: memref<1x256xf32, #tpu.memory_space<vmem>>, %arg3: memref<1x256xf32, #tpu.memory_space<vmem>>, %arg4: memref<32x256xbf16, #tpu.memory_space<vmem>>) attributes {dimension_semantics = [#tpu.dimension_semantics<parallel>], iteration_bounds = array<i64: 1>, scalar_prefetch = 0 : i64, scratch_operands = 0 : i64, tpu.core_type = #tpu.core_type<tc>, window_params = [{transform_indices = @transform_0, window_bounds = array<i64: 32, 256>}, {pipeline_mode = #tpu.pipeline_mode<synchronous>, transform_indices = @transform_1, window_bounds = array<i64: 1, 256>}, {pipeline_mode = #tpu.pipeline_mode<synchronous>, transform_indices = @transform_2, window_bounds = array<i64: 1, 256>}, {transform_indices = @transform_3, window_bounds = array<i64: 32, 256>}]} {
    %c0 = arith.constant 0 : index
    %c0_0 = arith.constant 0 : index
    %0 = vector.load %arg1[%c0, %c0_0] : memref<32x256xf32, #tpu.memory_space<vmem>>, vector<32x256xf32>
    %c0_1 = arith.constant 0 : index
    %c0_2 = arith.constant 0 : index
    %1 = vector.load %arg2[%c0_1, %c0_2] : memref<1x256xf32, #tpu.memory_space<vmem>>, vector<1x256xf32>
    %2 = vector.broadcast %1 : vector<1x256xf32> to vector<32x256xf32>
    %3 = arith.mulf %0, %2 : vector<32x256xf32>
    %c0_3 = arith.constant 0 : index
    %c0_4 = arith.constant 0 : index
    %4 = vector.load %arg3[%c0_3, %c0_4] : memref<1x256xf32, #tpu.memory_space<vmem>>, vector<1x256xf32>
    %5 = vector.broadcast %4 : vector<1x256xf32> to vector<32x256xf32>
    %6 = arith.addf %3, %5 : vector<32x256xf32>
    %cst = arith.constant 0.000000e+00 : f32
    %7 = vector.broadcast %cst : f32 to vector<32x256xf32>
    %8 = arith.cmpf ogt, %6, %7 : vector<32x256xf32>
    %cst_5 = arith.constant 2.000000e-01 : f32
    %9 = vector.broadcast %cst_5 : f32 to vector<32x256xf32>
    %10 = arith.mulf %9, %6 : vector<32x256xf32>
    %11 = arith.select %8, %6, %10 : vector<32x256xi1>, vector<32x256xf32>
    %12 = arith.truncf %11 : vector<32x256xf32> to vector<32x256xbf16>
    %c0_6 = arith.constant 0 : index
    %c0_7 = arith.constant 0 : index
    %13 = vector.load %arg4[%c0_6, %c0_7] : memref<32x256xbf16, #tpu.memory_space<vmem>>, vector<32x256xbf16>
    tpu.vector_store %arg4[%c0_6, %c0_7], %12 {strides = array<i32>} : memref<32x256xbf16, #tpu.memory_space<vmem>>, vector<32x256xbf16>,
    return
  }
  func.func @transform_0(%arg0: i32) -> (i32, i32) {
    %c0_i32 = arith.constant 0 : i32
    %c0_i32_0 = arith.constant 0 : i32
    return %arg0, %c0_i32 : i32, i32
  }
  func.func @transform_1(%arg0: i32) -> (i32, i32) {
    %c0_i32 = arith.constant 0 : i32
    %c0_i32_0 = arith.constant 0 : i32
    %c0_i32_1 = arith.constant 0 : i32
    return %c0_i32, %c0_i32_0 : i32, i32
  }
  func.func @transform_2(%arg0: i32) -> (i32, i32) {
    %c0_i32 = arith.constant 0 : i32
    %c0_i32_0 = arith.constant 0 : i32
    %c0_i32_1 = arith.constant 0 : i32
    return %c0_i32, %c0_i32_0 : i32, i32
  }
  func.func @transform_3(%arg0: i32) -> (i32, i32) {
    %c0_i32 = arith.constant 0 : i32
    %c0_i32_0 = arith.constant 0 : i32
    return %arg0, %c0_i32 : i32, i32
  }
}

module attributes {stable_mosaic.version = 11 : i64} {
  func.func @_conv_mm_kernel(%arg0: i32, %arg1: memref<32x4096xbf16, #tpu.memory_space<vmem>>, %arg2: memref<4096x128xbf16, #tpu.memory_space<vmem>>, %arg3: memref<32x128xf32, #tpu.memory_space<vmem>>) attributes {dimension_semantics = [#tpu.dimension_semantics<parallel>], iteration_bounds = array<i64: 1>, scalar_prefetch = 0 : i64, scratch_operands = 0 : i64, tpu.core_type = #tpu.core_type<tc>, window_params = [{transform_indices = @transform_0, window_bounds = array<i64: 32, 4096>}, {pipeline_mode = #tpu.pipeline_mode<synchronous>, transform_indices = @transform_1, window_bounds = array<i64: 4096, 128>}, {transform_indices = @transform_2, window_bounds = array<i64: 32, 128>}]} {
    %c0 = arith.constant 0 : index
    %c0_0 = arith.constant 0 : index
    %0 = vector.load %arg1[%c0, %c0_0] : memref<32x4096xbf16, #tpu.memory_space<vmem>>, vector<32x4096xbf16>
    %c0_1 = arith.constant 0 : index
    %c0_2 = arith.constant 0 : index
    %1 = vector.load %arg2[%c0_1, %c0_2] : memref<4096x128xbf16, #tpu.memory_space<vmem>>, vector<4096x128xbf16>
    %cst = arith.constant dense<0.000000e+00> : vector<32x128xf32>
    %2 = tpu.matmul %0, %1, %cst {dimension_numbers = #tpu.dot_dimension_numbers<[1], [0], [0], [1], [0, 0, 1, 1], [], []>} : vector<32x4096xbf16>, vector<4096x128xbf16>, vector<32x128xf32> -> vector<32x128xf32>
    %c0_3 = arith.constant 0 : index
    %c0_4 = arith.constant 0 : index
    %3 = vector.load %arg3[%c0_3, %c0_4] : memref<32x128xf32, #tpu.memory_space<vmem>>, vector<32x128xf32>
    tpu.vector_store %arg3[%c0_3, %c0_4], %2 {strides = array<i32>} : memref<32x128xf32, #tpu.memory_space<vmem>>, vector<32x128xf32>,
    return
  }
  func.func @transform_0(%arg0: i32) -> (i32, i32) {
    %c0_i32 = arith.constant 0 : i32
    %c0_i32_0 = arith.constant 0 : i32
    return %arg0, %c0_i32 : i32, i32
  }
  func.func @transform_1(%arg0: i32) -> (i32, i32) {
    %c0_i32 = arith.constant 0 : i32
    %c0_i32_0 = arith.constant 0 : i32
    %c0_i32_1 = arith.constant 0 : i32
    return %c0_i32, %c0_i32_0 : i32, i32
  }
  func.func @transform_2(%arg0: i32) -> (i32, i32) {
    %c0_i32 = arith.constant 0 : i32
    %c0_i32_0 = arith.constant 0 : i32
    return %arg0, %c0_i32 : i32, i32
  }
}

</mosaic_0001>

<bundles_post_ra>
// kernel: discriminator_funiegan_forward.8
= control target key start
LH: loop header
LB: loop body
LE: loop exit
PB: predicated region body
PF: predicated region fallthrough
CT: control target
= control target key end

     0   :  { %s1506_s12 = smov 0   ;;  %s1691_s0 = inlined_call_operand.vmem [shape: bf16[2048,128], index: 0, kind: input, shape index: {}]   ;;  %s1692_s1 = inlined_call_operand.vmem [shape: bf16[128,128], index: 1, kind: input, shape index: {}]   ;;  %s1693_s2 = inlined_call_operand.vmem [shape: f32[1,128], index: 2, kind: input, shape index: {}]   ;;  %s1694_s3 = inlined_call_operand.vmem [shape: bf16[2048,128], index: 3, kind: output, shape index: {}]  }
   0x1 LB: > { %s1043_s13 = sadd.s32 4294967295, %s1484_s12   ;;  %p1047_p0 = scmp.ge.s32.totalorder %s1484_s12, 1  ;;  %s1484_s12 = sphi %s1506_s12, %s13_s12  }
   0x2   : > { %p138_p1 = scmp.lt.s32.totalorder %s1484_s12, 5 }
   0x4   : > { %p139_p2 = pnand %p1047_p0, %p138_p1 }
   0x5   : > { %s1048_s22 = sshll.u32 (!%p139_p2), %s1043_s13, 6 }
   0x6   : > { %142 = sbr.rel (%p139_p2) target bundleno = 305 (0x131), region = 32  ;;  %p163_p3 = scmp.lt.s32.totalorder (!%p139_p2), %s1048_s22, 255 }
   0xb   : > { %v1253_v0 = vld [vmem:[%s1692_s1 + $0x38] sm:$0xff]  ;;  %v1252_v1 = vld [vmem:[%s1692_s1 + $0x30] sm:$0xff]  ;;  %v1251_v2 = vld [vmem:[%s1692_s1 + $0x28] sm:$0xff]  ;;  %s1696_s22 = smov (!%p163_p3, %s1048_s22), 255 }
   0xc   : > { %498 = vmatpush.bf16.msra.mxu0 %v1253_v0  ;;  %1445 = vmatpush.bf16.msra.mxu1 %v1253_v0  ;;  %v1250_v3 = vld [vmem:[%s1692_s1 + $0x20] sm:$0xff]  ;;  %v1249_v4 = vld [vmem:[%s1692_s1 + $0x18] sm:$0xff]  ;;  %v1248_v5 = vld [vmem:[%s1692_s1 + $0x10] sm:$0xff]  ;;  %s1049_s29 = sshll.u32 %s1696_s22, 2 }
   0xd   : > { %1446 = vmatpush.bf16.msra.mxu2 %v1253_v0  ;;  %1447 = vmatpush.bf16.msra.mxu3 %v1253_v0  ;;  %v1247_v6 = vld [vmem:[%s1692_s1 + $0x8] sm:$0xff]  ;;  %v1246_v7 = vld [vmem:[%s1692_s1] sm:$0xff]  ;;  %s1546_s7 = scalar_lea.vmem %s1691_s0, %s1049_s29  ;;  %s1596_s13 = scalar_lea.vmem %s1694_s3, %s1049_s29 }
   0xe   : > { %v1214_v8 = vld [vmem:[%s1546_s7] sm:$0xff]  ;;  %v1215_v12 = vld [vmem:[%s1546_s7 + $0x8] sm:$0xff]  ;;  %v1216_v16 = vld [vmem:[%s1546_s7 + $0x10] sm:$0xff] }
   0xf   : > { %v1222_v9 = vld [vmem:[%s1546_s7 + $0x40] sm:$0xff]  ;;  %v1223_v13 = vld [vmem:[%s1546_s7 + $0x48] sm:$0xff]  ;;  %v1224_v17 = vld [vmem:[%s1546_s7 + $0x50] sm:$0xff] }
  0x10   : > { %499 = vmatpush.bf16.msra.mxu0 %v1252_v1  ;;  %1448 = vmatpush.bf16.msra.mxu1 %v1252_v1  ;;  %v1230_v10 = vld [vmem:[%s1546_s7 + $0x80] sm:$0xff]  ;;  %v1231_v14 = vld [vmem:[%s1546_s7 + $0x88] sm:$0xff]  ;;  %v1232_v18 = vld [vmem:[%s1546_s7 + $0x90] sm:$0xff] }
  0x11   : > { %1449 = vmatpush.bf16.msra.mxu2 %v1252_v1  ;;  %1450 = vmatpush.bf16.msra.mxu3 %v1252_v1  ;;  %v1238_v11 = vld [vmem:[%s1546_s7 + $0xc0] sm:$0xff]  ;;  %v1239_v15 = vld [vmem:[%s1546_s7 + $0xc8] sm:$0xff]  ;;  %v1240_v19 = vld [vmem:[%s1546_s7 + $0xd0] sm:$0xff] }
  0x12   : > { %v1217_v20 = vld [vmem:[%s1546_s7 + $0x18] sm:$0xff]  ;;  %v1218_v24 = vld [vmem:[%s1546_s7 + $0x20] sm:$0xff]  ;;  %v1219_v28 = vld [vmem:[%s1546_s7 + $0x28] sm:$0xff] }
  0x13   : > { %v1225_v21 = vld [vmem:[%s1546_s7 + $0x58] sm:$0xff]  ;;  %v1226_v25 = vld [vmem:[%s1546_s7 + $0x60] sm:$0xff]  ;;  %v1227_v29 = vld [vmem:[%s1546_s7 + $0x68] sm:$0xff] }
  0x14   : > { %500 = vmatpush.bf16.msra.mxu0 %v1251_v2  ;;  %1451 = vmatpush.bf16.msra.mxu1 %v1251_v2  ;;  %v1233_v22 = vld [vmem:[%s1546_s7 + $0x98] sm:$0xff]  ;;  %v1234_v26 = vld [vmem:[%s1546_s7 + $0xa0] sm:$0xff]  ;;  %v1235_v30 = vld [vmem:[%s1546_s7 + $0xa8] sm:$0xff] }
  0x15   : > { %1452 = vmatpush.bf16.msra.mxu2 %v1251_v2  ;;  %1453 = vmatpush.bf16.msra.mxu3 %v1251_v2  ;;  %v1241_v23 = vld [vmem:[%s1546_s7 + $0xd8] sm:$0xff]  ;;  %v1242_v27 = vld [vmem:[%s1546_s7 + $0xe0] sm:$0xff]  ;;  %v1243_v31 = vld [vmem:[%s1546_s7 + $0xe8] sm:$0xff] }
  0x16   : > { %v1220_v32 = vld [vmem:[%s1546_s7 + $0x30] sm:$0xff]  ;;  %v1221_v36 = vld [vmem:[%s1546_s7 + $0x38] sm:$0xff]  ;;  %v1583_v42 = vld [vmem:[%s1693_s2] ss:$0 sm:$0xff] }
  0x17   : > { %v1228_v33 = vld [vmem:[%s1546_s7 + $0x70] sm:$0xff]  ;;  %v1229_v37 = vld [vmem:[%s1546_s7 + $0x78] sm:$0xff] }
  0x18   : > { %501 = vmatpush.bf16.msra.mxu0 %v1250_v3  ;;  %1454 = vmatpush.bf16.msra.mxu1 %v1250_v3  ;;  %v1236_v34 = vld [vmem:[%s1546_s7 + $0xb0] sm:$0xff]  ;;  %v1237_v38 = vld [vmem:[%s1546_s7 + $0xb8] sm:$0xff] }
  0x19   : > { %1455 = vmatpush.bf16.msra.mxu2 %v1250_v3  ;;  %1456 = vmatpush.bf16.msra.mxu3 %v1250_v3  ;;  %v1244_v35 = vld [vmem:[%s1546_s7 + $0xf0] sm:$0xff]  ;;  %v1245_v39 = vld [vmem:[%s1546_s7 + $0xf8] sm:$0xff] }
  0x1c   : > { %502 = vmatpush.bf16.msra.mxu0 %v1249_v4  ;;  %1457 = vmatpush.bf16.msra.mxu1 %v1249_v4 }
  0x1d   : > { %1458 = vmatpush.bf16.msra.mxu2 %v1249_v4  ;;  %1459 = vmatpush.bf16.msra.mxu3 %v1249_v4 }
  0x20   : > { %503 = vmatpush.bf16.msra.mxu0 %v1248_v5  ;;  %1460 = vmatpush.bf16.msra.mxu1 %v1248_v5 }
  0x21   : > { %1461 = vmatpush.bf16.msra.mxu2 %v1248_v5  ;;  %1462 = vmatpush.bf16.msra.mxu3 %v1248_v5 }
  0x24   : > { %504 = vmatpush.bf16.msra.mxu0 %v1247_v6  ;;  %1463 = vmatpush.bf16.msra.mxu1 %v1247_v6 }
  0x25   : > { %1464 = vmatpush.bf16.msra.mxu2 %v1247_v6  ;;  %1465 = vmatpush.bf16.msra.mxu3 %v1247_v6 }
  0x28   : > { %505 = vmatpush.bf16.msra.mxu0 %v1246_v7  ;;  %1466 = vmatpush.bf16.msra.mxu1 %v1246_v7 }
  0x29   : > { %1467 = vmatpush.bf16.msra.mxu2 %v1246_v7  ;;  %1468 = vmatpush.bf16.msra.mxu3 %v1246_v7 }
  0x2b   : > { %506 = vmatmul.bf16.vlgmr.msra.gmra.mxu0 %v1214_v8  ;;  %546 = vmatmul.bf16.vlgmr.msra.gmra.mxu1 %v1222_v9 }
  0x2c   : > { %586 = vmatmul.bf16.vlgmr.msra.gmra.mxu2 %v1230_v10  ;;  %626 = vmatmul.bf16.vlgmr.msra.gmra.mxu3 %v1238_v11 }
  0x3b   : > { %511 = vmatmul.bf16.gmra.mxu0 %v1215_v12  ;;  %551 = vmatmul.bf16.gmra.mxu1 %v1223_v13 }
  0x3c   : > { %591 = vmatmul.bf16.gmra.mxu2 %v1231_v14  ;;  %631 = vmatmul.bf16.gmra.mxu3 %v1239_v15 }
  0x4b   : > { %516 = vmatmul.bf16.gmra.mxu0 %v1216_v16  ;;  %556 = vmatmul.bf16.gmra.mxu1 %v1224_v17 }
  0x4c   : > { %596 = vmatmul.bf16.gmra.mxu2 %v1232_v18  ;;  %636 = vmatmul.bf16.gmra.mxu3 %v1240_v19 }
  0x5b   : > { %521 = vmatmul.bf16.gmra.mxu0 %v1217_v20  ;;  %561 = vmatmul.bf16.gmra.mxu1 %v1225_v21 }
  0x5c   : > { %601 = vmatmul.bf16.gmra.mxu2 %v1233_v22  ;;  %641 = vmatmul.bf16.gmra.mxu3 %v1241_v23 }
  0x6b   : > { %526 = vmatmul.bf16.gmra.mxu0 %v1218_v24  ;;  %566 = vmatmul.bf16.gmra.mxu1 %v1226_v25 }
  0x6c   : > { %606 = vmatmul.bf16.gmra.mxu2 %v1234_v26  ;;  %646 = vmatmul.bf16.gmra.mxu3 %v1242_v27 }
  0x7b   : > { %531 = vmatmul.bf16.gmra.mxu0 %v1219_v28  ;;  %571 = vmatmul.bf16.gmra.mxu1 %v1227_v29 }
  0x7c   : > { %611 = vmatmul.bf16.gmra.mxu2 %v1235_v30  ;;  %651 = vmatmul.bf16.gmra.mxu3 %v1243_v31 }
  0x8b   : > { %536 = vmatmul.bf16.gmra.mxu0 %v1220_v32  ;;  %576 = vmatmul.bf16.gmra.mxu1 %v1228_v33 }
  0x8c   : > { %616 = vmatmul.bf16.gmra.mxu2 %v1236_v34  ;;  %656 = vmatmul.bf16.gmra.mxu3 %v1244_v35 }
  0x9b   : > { %541 = vmatmul.bf16.gmra.mxu0 %v1221_v36  ;;  %581 = vmatmul.bf16.gmra.mxu1 %v1229_v37 }
  0x9c   : > { %621 = vmatmul.bf16.gmra.mxu2 %v1237_v38  ;;  %661 = vmatmul.bf16.gmra.mxu3 %v1245_v39 }
  0xa8   : > { %v507_v40 = vpop.f32.mrf.mxu0  ;;  %v547_v41 = vpop.f32.mrf.mxu1 }
  0xa9   : > { %v508_v43 = vadd.f32 %v1583_v42, %v507_v40  ;;  %v548_v44 = vadd.f32 %v1583_v42, %v547_v41 }
  0xab   : > { %v731_v49 = vmul.f32 0.2, %v508_v43  ;;  %v747_v50 = vmul.f32 0.2, %v548_v44  ;;  %vm667_vm0 = vcmp.gt.f32.partialorder %v508_v43, 0.0  ;;  %vm683_vm1 = vcmp.gt.f32.partialorder %v548_v44, 0.0 }
  0xad   : > { %v795_v57 = vsel %vm667_vm0, %v508_v43, %v731_v49  ;;  %v811_v58 = vsel %vm683_vm1, %v548_v44, %v747_v50 }
  0xaf   : > { %v587_v45 = vpop.f32.mrf.mxu2  ;;  %v627_v46 = vpop.f32.mrf.mxu3 }
  0xb0   : > { %v509_v47 = vpop.f32.mrf.mxu0  ;;  %v549_v48 = vpop.f32.mrf.mxu1  ;;  %v588_v55 = vadd.f32 %v1583_v42, %v587_v45  ;;  %v628_v56 = vadd.f32 %v1583_v42, %v627_v46 }
  0xb1   : > { %v510_v51 = vadd.f32 %v1583_v42, %v509_v47  ;;  %v550_v52 = vadd.f32 %v1583_v42, %v549_v48 }
  0xb2   : > { %v763_v1 = vmul.f32 0.2, %v588_v55  ;;  %v779_v2 = vmul.f32 0.2, %v628_v56  ;;  %vm699_vm4 = vcmp.gt.f32.partialorder %v588_v55, 0.0  ;;  %vm715_vm5 = vcmp.gt.f32.partialorder %v628_v56, 0.0 }
  0xb3   : > { %vm668_vm2 = vcmp.gt.f32.partialorder %v510_v51, 0.0  ;;  %v732_v53 = vmul.f32 0.2, %v510_v51  ;;  %vm684_vm3 = vcmp.gt.f32.partialorder %v550_v52, 0.0  ;;  %v748_v54 = vmul.f32 0.2, %v550_v52 }
  0xb4   : > { %v827_v9 = vsel %vm699_vm4, %v588_v55, %v763_v1  ;;  %v843_v10 = vsel %vm715_vm5, %v628_v56, %v779_v2 }
  0xb5   : > { %v796_v59 = vsel %vm668_vm2, %v510_v51, %v732_v53  ;;  %v812_v60 = vsel %vm684_vm3, %v550_v52, %v748_v54 }
  0xb6   : > { %v1257_v61 = vpack.c.bf16 %v796_v59, %v795_v57  ;;  %v1297_v62 = vpack.c.bf16 %v812_v60, %v811_v58 }
  0xb7   : > { %v589_v63 = vpop.f32.mrf.mxu2  ;;  %v629_v0 = vpop.f32.mrf.mxu3 }
  0xb8   : > { %1258 = vst [vmem:[%s1596_s13] sm:$0xff] %v1257_v61   ;;  %v590_v3 = vadd.f32 %v1583_v42, %v589_v63  ;;  %v630_v4 = vadd.f32 %v1583_v42, %v629_v0  ;;  %v512_v5 = vpop.f32.mrf.mxu0  ;;  %v552_v6 = vpop.f32.mrf.mxu1 }
  0xb9   : > { %1421 = vst [vmem:[%s1596_s13 + $0x40] sm:$0xff] %v1297_v62   ;;  %v513_v15 = vadd.f32 %v1583_v42, %v512_v5  ;;  %v553_v16 = vadd.f32 %v1583_v42, %v552_v6 }
  0xba   : > { %vm700_vm6 = vcmp.gt.f32.partialorder %v590_v3, 0.0  ;;  %v764_v7 = vmul.f32 0.2, %v590_v3  ;;  %vm716_vm7 = vcmp.gt.f32.partialorder %v630_v4, 0.0  ;;  %v780_v8 = vmul.f32 0.2, %v630_v4 }
  0xbb   : > { %v733_v21 = vmul.f32 0.2, %v513_v15  ;;  %v749_v22 = vmul.f32 0.2, %v553_v16  ;;  %vm669_vm8 = vcmp.gt.f32.partialorder %v513_v15, 0.0  ;;  %vm685_vm9 = vcmp.gt.f32.partialorder %v553_v16, 0.0 }
  0xbc   : > { %v828_v11 = vsel %vm700_vm6, %v590_v3, %v764_v7  ;;  %v844_v12 = vsel %vm716_vm7, %v630_v4, %v780_v8 }
  0xbd   : > { %v1337_v13 = vpack.c.bf16 %v828_v11, %v827_v9  ;;  %v1377_v14 = vpack.c.bf16 %v844_v12, %v843_v10  ;;  %v797_v29 = vsel %vm669_vm8, %v513_v15, %v733_v21  ;;  %v813_v30 = vsel %vm685_vm9, %v553_v16, %v749_v22 }
  0xbf   : > { %1429 = vst [vmem:[%s1596_s13 + $0x80] sm:$0xff] %v1337_v13   ;;  %v592_v17 = vpop.f32.mrf.mxu2  ;;  %v632_v18 = vpop.f32.mrf.mxu3 }
  0xc0   : > { %1437 = vst [vmem:[%s1596_s13 + $0xc0] sm:$0xff] %v1377_v14   ;;  %v514_v19 = vpop.f32.mrf.mxu0  ;;  %v554_v20 = vpop.f32.mrf.mxu1  ;;  %v593_v27 = vadd.f32 %v1583_v42, %v592_v17  ;;  %v633_v28 = vadd.f32 %v1583_v42, %v632_v18 }
  0xc1   : > { %v515_v23 = vadd.f32 %v1583_v42, %v514_v19  ;;  %v555_v24 = vadd.f32 %v1583_v42, %v554_v20 }
  0xc2   : > { %v765_v37 = vmul.f32 0.2, %v593_v27  ;;  %v781_v38 = vmul.f32 0.2, %v633_v28  ;;  %vm701_vm12 = vcmp.gt.f32.partialorder %v593_v27, 0.0  ;;  %vm717_vm13 = vcmp.gt.f32.partialorder %v633_v28, 0.0 }
  0xc3   : > { %vm670_vm10 = vcmp.gt.f32.partialorder %v515_v23, 0.0  ;;  %v734_v25 = vmul.f32 0.2, %v515_v23  ;;  %vm686_vm11 = vcmp.gt.f32.partialorder %v555_v24, 0.0  ;;  %v750_v26 = vmul.f32 0.2, %v555_v24 }
  0xc4   : > { %v829_v46 = vsel %vm701_vm12, %v593_v27, %v765_v37  ;;  %v845_v47 = vsel %vm717_vm13, %v633_v28, %v781_v38 }
  0xc5   : > { %v798_v31 = vsel %vm670_vm10, %v515_v23, %v734_v25  ;;  %v814_v32 = vsel %vm686_vm11, %v555_v24, %v750_v26 }
  0xc6   : > { %v1262_v33 = vpack.c.bf16 %v798_v31, %v797_v29  ;;  %v1302_v34 = vpack.c.bf16 %v814_v32, %v813_v30 }
  0xc7   : > { %v594_v35 = vpop.f32.mrf.mxu2  ;;  %v634_v36 = vpop.f32.mrf.mxu3 }
  0xc8   : > { %1414 = vst [vmem:[%s1596_s13 + $0x8] sm:$0xff] %v1262_v33   ;;  %v595_v39 = vadd.f32 %v1583_v42, %v594_v35  ;;  %v635_v40 = vadd.f32 %v1583_v42, %v634_v36  ;;  %v517_v41 = vpop.f32.mrf.mxu0  ;;  %v557_v43 = vpop.f32.mrf.mxu1 }
  0xc9   : > { %1422 = vst [vmem:[%s1596_s13 + $0x48] sm:$0xff] %v1302_v34   ;;  %v518_v52 = vadd.f32 %v1583_v42, %v517_v41  ;;  %v558_v53 = vadd.f32 %v1583_v42, %v557_v43 }
  0xca   : > { %vm702_vm14 = vcmp.gt.f32.partialorder %v595_v39, 0.0  ;;  %v766_v44 = vmul.f32 0.2, %v595_v39  ;;  %vm718_vm15 = vcmp.gt.f32.partialorder %v635_v40, 0.0  ;;  %v782_v45 = vmul.f32 0.2, %v635_v40 }
  0xcb   : > { %v735_v58 = vmul.f32 0.2, %v518_v52  ;;  %v751_v59 = vmul.f32 0.2, %v558_v53  ;;  %vm671_vm0 = vcmp.gt.f32.partialorder %v518_v52, 0.0  ;;  %vm687_vm1 = vcmp.gt.f32.partialorder %v558_v53, 0.0 }
  0xcc   : > { %v830_v48 = vsel %vm702_vm14, %v595_v39, %v766_v44  ;;  %v846_v49 = vsel %vm718_vm15, %v635_v40, %v782_v45 }
  0xcd   : > { %v1342_v50 = vpack.c.bf16 %v830_v48, %v829_v46  ;;  %v1382_v51 = vpack.c.bf16 %v846_v49, %v845_v47  ;;  %v799_v2 = vsel %vm671_vm0, %v518_v52, %v735_v58  ;;  %v815_v3 = vsel %vm687_vm1, %v558_v53, %v751_v59 }
  0xcf   : > { %1430 = vst [vmem:[%s1596_s13 + $0x88] sm:$0xff] %v1342_v50   ;;  %v597_v54 = vpop.f32.mrf.mxu2  ;;  %v637_v55 = vpop.f32.mrf.mxu3 }
  0xd0   : > { %1438 = vst [vmem:[%s1596_s13 + $0xc8] sm:$0xff] %v1382_v51   ;;  %v519_v56 = vpop.f32.mrf.mxu0  ;;  %v559_v57 = vpop.f32.mrf.mxu1  ;;  %v598_v0 = vadd.f32 %v1583_v42, %v597_v54  ;;  %v638_v1 = vadd.f32 %v1583_v42, %v637_v55 }
  0xd1   : > { %v520_v60 = vadd.f32 %v1583_v42, %v519_v56  ;;  %v560_v61 = vadd.f32 %v1583_v42, %v559_v57 }
  0xd2   : > { %v767_v10 = vmul.f32 0.2, %v598_v0  ;;  %v783_v11 = vmul.f32 0.2, %v638_v1  ;;  %vm703_vm4 = vcmp.gt.f32.partialorder %v598_v0, 0.0  ;;  %vm719_vm5 = vcmp.gt.f32.partialorder %v638_v1, 0.0 }
  0xd3   : > { %vm672_vm2 = vcmp.gt.f32.partialorder %v520_v60, 0.0  ;;  %v736_v62 = vmul.f32 0.2, %v520_v60  ;;  %vm688_vm3 = vcmp.gt.f32.partialorder %v560_v61, 0.0  ;;  %v752_v63 = vmul.f32 0.2, %v560_v61 }
  0xd4   : > { %v831_v18 = vsel %vm703_vm4, %v598_v0, %v767_v10  ;;  %v847_v19 = vsel %vm719_vm5, %v638_v1, %v783_v11 }
  0xd5   : > { %v800_v4 = vsel %vm672_vm2, %v520_v60, %v736_v62  ;;  %v816_v5 = vsel %vm688_vm3, %v560_v61, %v752_v63 }
  0xd6   : > { %v1267_v6 = vpack.c.bf16 %v800_v4, %v799_v2  ;;  %v1307_v7 = vpack.c.bf16 %v816_v5, %v815_v3 }
  0xd7   : > { %v599_v8 = vpop.f32.mrf.mxu2  ;;  %v639_v9 = vpop.f32.mrf.mxu3 }
  0xd8   : > { %1415 = vst [vmem:[%s1596_s13 + $0x10] sm:$0xff] %v1267_v6   ;;  %v600_v12 = vadd.f32 %v1583_v42, %v599_v8  ;;  %v640_v13 = vadd.f32 %v1583_v42, %v639_v9  ;;  %v522_v14 = vpop.f32.mrf.mxu0  ;;  %v562_v15 = vpop.f32.mrf.mxu1 }
  0xd9   : > { %1423 = vst [vmem:[%s1596_s13 + $0x50] sm:$0xff] %v1307_v7   ;;  %v523_v24 = vadd.f32 %v1583_v42, %v522_v14  ;;  %v563_v25 = vadd.f32 %v1583_v42, %v562_v15 }
  0xda   : > { %vm704_vm6 = vcmp.gt.f32.partialorder %v600_v12, 0.0  ;;  %v768_v16 = vmul.f32 0.2, %v600_v12  ;;  %vm720_vm7 = vcmp.gt.f32.partialorder %v640_v13, 0.0  ;;  %v784_v17 = vmul.f32 0.2, %v640_v13 }
  0xdb   : > { %v737_v30 = vmul.f32 0.2, %v523_v24  ;;  %v753_v31 = vmul.f32 0.2, %v563_v25  ;;  %vm673_vm8 = vcmp.gt.f32.partialorder %v523_v24, 0.0  ;;  %vm689_vm9 = vcmp.gt.f32.partialorder %v563_v25, 0.0 }
  0xdc   : > { %v832_v20 = vsel %vm704_vm6, %v600_v12, %v768_v16  ;;  %v848_v21 = vsel %vm720_vm7, %v640_v13, %v784_v17 }
  0xdd   : > { %v1347_v22 = vpack.c.bf16 %v832_v20, %v831_v18  ;;  %v1387_v23 = vpack.c.bf16 %v848_v21, %v847_v19  ;;  %v801_v38 = vsel %vm673_vm8, %v523_v24, %v737_v30  ;;  %v817_v39 = vsel %vm689_vm9, %v563_v25, %v753_v31 }
  0xdf   : > { %1431 = vst [vmem:[%s1596_s13 + $0x90] sm:$0xff] %v1347_v22   ;;  %v602_v26 = vpop.f32.mrf.mxu2  ;;  %v642_v27 = vpop.f32.mrf.mxu3 }
  0xe0   : > { %1439 = vst [vmem:[%s1596_s13 + $0xd0] sm:$0xff] %v1387_v23   ;;  %v524_v28 = vpop.f32.mrf.mxu0  ;;  %v564_v29 = vpop.f32.mrf.mxu1  ;;  %v603_v36 = vadd.f32 %v1583_v42, %v602_v26  ;;  %v643_v37 = vadd.f32 %v1583_v42, %v642_v27 }
  0xe1   : > { %v525_v32 = vadd.f32 %v1583_v42, %v524_v28  ;;  %v565_v33 = vadd.f32 %v1583_v42, %v564_v29 }
  0xe2   : > { %v769_v47 = vmul.f32 0.2, %v603_v36  ;;  %v785_v48 = vmul.f32 0.2, %v643_v37  ;;  %vm705_vm12 = vcmp.gt.f32.partialorder %v603_v36, 0.0  ;;  %vm721_vm13 = vcmp.gt.f32.partialorder %v643_v37, 0.0 }
  0xe3   : > { %vm674_vm10 = vcmp.gt.f32.partialorder %v525_v32, 0.0  ;;  %v738_v34 = vmul.f32 0.2, %v525_v32  ;;  %vm690_vm11 = vcmp.gt.f32.partialorder %v565_v33, 0.0  ;;  %v754_v35 = vmul.f32 0.2, %v565_v33 }
  0xe4   : > { %v833_v55 = vsel %vm705_vm12, %v603_v36, %v769_v47  ;;  %v849_v56 = vsel %vm721_vm13, %v643_v37, %v785_v48 }
  0xe5   : > { %v802_v40 = vsel %vm674_vm10, %v525_v32, %v738_v34  ;;  %v818_v41 = vsel %vm690_vm11, %v565_v33, %v754_v35 }
  0xe6   : > { %v1272_v43 = vpack.c.bf16 %v802_v40, %v801_v38  ;;  %v1312_v44 = vpack.c.bf16 %v818_v41, %v817_v39 }
  0xe7   : > { %v604_v45 = vpop.f32.mrf.mxu2  ;;  %v644_v46 = vpop.f32.mrf.mxu3 }
  0xe8   : > { %1416 = vst [vmem:[%s1596_s13 + $0x18] sm:$0xff] %v1272_v43   ;;  %v605_v49 = vadd.f32 %v1583_v42, %v604_v45  ;;  %v645_v50 = vadd.f32 %v1583_v42, %v644_v46  ;;  %v527_v51 = vpop.f32.mrf.mxu0  ;;  %v567_v52 = vpop.f32.mrf.mxu1 }
  0xe9   : > { %1424 = vst [vmem:[%s1596_s13 + $0x58] sm:$0xff] %v1312_v44   ;;  %v528_v61 = vadd.f32 %v1583_v42, %v527_v51  ;;  %v568_v62 = vadd.f32 %v1583_v42, %v567_v52 }
  0xea   : > { %vm706_vm14 = vcmp.gt.f32.partialorder %v605_v49, 0.0  ;;  %v770_v53 = vmul.f32 0.2, %v605_v49  ;;  %vm722_vm15 = vcmp.gt.f32.partialorder %v645_v50, 0.0  ;;  %v786_v54 = vmul.f32 0.2, %v645_v50 }
  0xeb   : > { %v739_v3 = vmul.f32 0.2, %v528_v61  ;;  %v755_v4 = vmul.f32 0.2, %v568_v62  ;;  %vm675_vm0 = vcmp.gt.f32.partialorder %v528_v61, 0.0  ;;  %vm691_vm1 = vcmp.gt.f32.partialorder %v568_v62, 0.0 }
  0xec   : > { %v834_v57 = vsel %vm706_vm14, %v605_v49, %v770_v53  ;;  %v850_v58 = vsel %vm722_vm15, %v645_v50, %v786_v54 }
  0xed   : > { %v1352_v59 = vpack.c.bf16 %v834_v57, %v833_v55  ;;  %v1392_v60 = vpack.c.bf16 %v850_v58, %v849_v56  ;;  %v803_v11 = vsel %vm675_vm0, %v528_v61, %v739_v3  ;;  %v819_v12 = vsel %vm691_vm1, %v568_v62, %v755_v4 }
  0xef   : > { %1432 = vst [vmem:[%s1596_s13 + $0x98] sm:$0xff] %v1352_v59   ;;  %v607_v63 = vpop.f32.mrf.mxu2  ;;  %v647_v0 = vpop.f32.mrf.mxu3 }
  0xf0   : > { %1440 = vst [vmem:[%s1596_s13 + $0xd8] sm:$0xff] %v1392_v60   ;;  %v529_v1 = vpop.f32.mrf.mxu0  ;;  %v569_v2 = vpop.f32.mrf.mxu1  ;;  %v608_v9 = vadd.f32 %v1583_v42, %v607_v63  ;;  %v648_v10 = vadd.f32 %v1583_v42, %v647_v0 }
  0xf1   : > { %v530_v5 = vadd.f32 %v1583_v42, %v529_v1  ;;  %v570_v6 = vadd.f32 %v1583_v42, %v569_v2 }
  0xf2   : > { %v771_v19 = vmul.f32 0.2, %v608_v9  ;;  %v787_v20 = vmul.f32 0.2, %v648_v10  ;;  %vm707_vm4 = vcmp.gt.f32.partialorder %v608_v9, 0.0  ;;  %vm723_vm5 = vcmp.gt.f32.partialorder %v648_v10, 0.0 }
  0xf3   : > { %vm676_vm2 = vcmp.gt.f32.partialorder %v530_v5, 0.0  ;;  %v740_v7 = vmul.f32 0.2, %v530_v5  ;;  %vm692_vm3 = vcmp.gt.f32.partialorder %v570_v6, 0.0  ;;  %v756_v8 = vmul.f32 0.2, %v570_v6 }
  0xf4   : > { %v835_v27 = vsel %vm707_vm4, %v608_v9, %v771_v19  ;;  %v851_v28 = vsel %vm723_vm5, %v648_v10, %v787_v20 }
  0xf5   : > { %v804_v13 = vsel %vm676_vm2, %v530_v5, %v740_v7  ;;  %v820_v14 = vsel %vm692_vm3, %v570_v6, %v756_v8 }
  0xf6   : > { %v1277_v15 = vpack.c.bf16 %v804_v13, %v803_v11  ;;  %v1317_v16 = vpack.c.bf16 %v820_v14, %v819_v12 }
  0xf7   : > { %v609_v17 = vpop.f32.mrf.mxu2  ;;  %v649_v18 = vpop.f32.mrf.mxu3 }
  0xf8   : > { %1417 = vst [vmem:[%s1596_s13 + $0x20] sm:$0xff] %v1277_v15   ;;  %v610_v21 = vadd.f32 %v1583_v42, %v609_v17  ;;  %v650_v22 = vadd.f32 %v1583_v42, %v649_v18  ;;  %v532_v23 = vpop.f32.mrf.mxu0  ;;  %v572_v24 = vpop.f32.mrf.mxu1 }
  0xf9   : > { %1425 = vst [vmem:[%s1596_s13 + $0x60] sm:$0xff] %v1317_v16   ;;  %v533_v33 = vadd.f32 %v1583_v42, %v532_v23  ;;  %v573_v34 = vadd.f32 %v1583_v42, %v572_v24 }
  0xfa   : > { %vm708_vm6 = vcmp.gt.f32.partialorder %v610_v21, 0.0  ;;  %v772_v25 = vmul.f32 0.2, %v610_v21  ;;  %vm724_vm7 = vcmp.gt.f32.partialorder %v650_v22, 0.0  ;;  %v788_v26 = vmul.f32 0.2, %v650_v22 }
  0xfb   : > { %v741_v39 = vmul.f32 0.2, %v533_v33  ;;  %v757_v40 = vmul.f32 0.2, %v573_v34  ;;  %vm677_vm8 = vcmp.gt.f32.partialorder %v533_v33, 0.0  ;;  %vm693_vm9 = vcmp.gt.f32.partialorder %v573_v34, 0.0 }
  0xfc   : > { %v836_v29 = vsel %vm708_vm6, %v610_v21, %v772_v25  ;;  %v852_v30 = vsel %vm724_vm7, %v650_v22, %v788_v26 }
  0xfd   : > { %v1357_v31 = vpack.c.bf16 %v836_v29, %v835_v27  ;;  %v1397_v32 = vpack.c.bf16 %v852_v30, %v851_v28  ;;  %v805_v48 = vsel %vm677_vm8, %v533_v33, %v741_v39  ;;  %v821_v49 = vsel %vm693_vm9, %v573_v34, %v757_v40 }
  0xff   : > { %1433 = vst [vmem:[%s1596_s13 + $0xa0] sm:$0xff] %v1357_v31   ;;  %v612_v35 = vpop.f32.mrf.mxu2  ;;  %v652_v36 = vpop.f32.mrf.mxu3 }
 0x100   : > { %1441 = vst [vmem:[%s1596_s13 + $0xe0] sm:$0xff] %v1397_v32   ;;  %v534_v37 = vpop.f32.mrf.mxu0  ;;  %v574_v38 = vpop.f32.mrf.mxu1  ;;  %v613_v46 = vadd.f32 %v1583_v42, %v612_v35  ;;  %v653_v47 = vadd.f32 %v1583_v42, %v652_v36 }
 0x101   : > { %v535_v41 = vadd.f32 %v1583_v42, %v534_v37  ;;  %v575_v43 = vadd.f32 %v1583_v42, %v574_v38 }
 0x102   : > { %v773_v56 = vmul.f32 0.2, %v613_v46  ;;  %v789_v57 = vmul.f32 0.2, %v653_v47  ;;  %vm709_vm12 = vcmp.gt.f32.partialorder %v613_v46, 0.0  ;;  %vm725_vm13 = vcmp.gt.f32.partialorder %v653_v47, 0.0 }
 0x103   : > { %vm678_vm10 = vcmp.gt.f32.partialorder %v535_v41, 0.0  ;;  %v742_v44 = vmul.f32 0.2, %v535_v41  ;;  %vm694_vm11 = vcmp.gt.f32.partialorder %v575_v43, 0.0  ;;  %v758_v45 = vmul.f32 0.2, %v575_v43 }
 0x104   : > { %v837_v0 = vsel %vm709_vm12, %v613_v46, %v773_v56  ;;  %v853_v1 = vsel %vm725_vm13, %v653_v47, %v789_v57 }
 0x105   : > { %v806_v50 = vsel %vm678_vm10, %v535_v41, %v742_v44  ;;  %v822_v51 = vsel %vm694_vm11, %v575_v43, %v758_v45 }
 0x106   : > { %v1282_v52 = vpack.c.bf16 %v806_v50, %v805_v48  ;;  %v1322_v53 = vpack.c.bf16 %v822_v51, %v821_v49 }
 0x107   : > { %v614_v54 = vpop.f32.mrf.mxu2  ;;  %v654_v55 = vpop.f32.mrf.mxu3 }
 0x108   : > { %1418 = vst [vmem:[%s1596_s13 + $0x28] sm:$0xff] %v1282_v52   ;;  %v615_v58 = vadd.f32 %v1583_v42, %v614_v54  ;;  %v655_v59 = vadd.f32 %v1583_v42, %v654_v55  ;;  %v537_v60 = vpop.f32.mrf.mxu0  ;;  %v577_v61 = vpop.f32.mrf.mxu1 }
 0x109   : > { %1426 = vst [vmem:[%s1596_s13 + $0x68] sm:$0xff] %v1322_v53   ;;  %v538_v6 = vadd.f32 %v1583_v42, %v537_v60  ;;  %v578_v7 = vadd.f32 %v1583_v42, %v577_v61 }
 0x10a   : > { %vm710_vm14 = vcmp.gt.f32.partialorder %v615_v58, 0.0  ;;  %v774_v62 = vmul.f32 0.2, %v615_v58  ;;  %vm726_vm15 = vcmp.gt.f32.partialorder %v655_v59, 0.0  ;;  %v790_v63 = vmul.f32 0.2, %v655_v59 }
 0x10b   : > { %v743_v12 = vmul.f32 0.2, %v538_v6  ;;  %v759_v13 = vmul.f32 0.2, %v578_v7  ;;  %vm679_vm0 = vcmp.gt.f32.partialorder %v538_v6, 0.0  ;;  %vm695_vm1 = vcmp.gt.f32.partialorder %v578_v7, 0.0 }
 0x10c   : > { %v838_v2 = vsel %vm710_vm14, %v615_v58, %v774_v62  ;;  %v854_v3 = vsel %vm726_vm15, %v655_v59, %v790_v63 }
 0x10d   : > { %v1362_v4 = vpack.c.bf16 %v838_v2, %v837_v0  ;;  %v1402_v5 = vpack.c.bf16 %v854_v3, %v853_v1  ;;  %v807_v20 = vsel %vm679_vm0, %v538_v6, %v743_v12  ;;  %v823_v21 = vsel %vm695_vm1, %v578_v7, %v759_v13 }
 0x10f   : > { %1434 = vst [vmem:[%s1596_s13 + $0xa8] sm:$0xff] %v1362_v4   ;;  %v617_v8 = vpop.f32.mrf.mxu2  ;;  %v657_v9 = vpop.f32.mrf.mxu3 }
 0x110   : > { %1442 = vst [vmem:[%s1596_s13 + $0xe8] sm:$0xff] %v1402_v5   ;;  %v539_v10 = vpop.f32.mrf.mxu0  ;;  %v579_v11 = vpop.f32.mrf.mxu1  ;;  %v618_v18 = vadd.f32 %v1583_v42, %v617_v8  ;;  %v658_v19 = vadd.f32 %v1583_v42, %v657_v9 }
 0x111   : > { %v540_v14 = vadd.f32 %v1583_v42, %v539_v10  ;;  %v580_v15 = vadd.f32 %v1583_v42, %v579_v11 }
 0x112   : > { %v775_v28 = vmul.f32 0.2, %v618_v18  ;;  %v791_v29 = vmul.f32 0.2, %v658_v19  ;;  %vm711_vm4 = vcmp.gt.f32.partialorder %v618_v18, 0.0  ;;  %vm727_vm5 = vcmp.gt.f32.partialorder %v658_v19, 0.0 }
 0x113   : > { %vm680_vm2 = vcmp.gt.f32.partialorder %v540_v14, 0.0  ;;  %v744_v16 = vmul.f32 0.2, %v540_v14  ;;  %vm696_vm3 = vcmp.gt.f32.partialorder %v580_v15, 0.0  ;;  %v760_v17 = vmul.f32 0.2, %v580_v15 }
 0x114   : > { %v839_v36 = vsel %vm711_vm4, %v618_v18, %v775_v28  ;;  %v855_v37 = vsel %vm727_vm5, %v658_v19, %v791_v29 }
 0x115   : > { %v808_v22 = vsel %vm680_vm2, %v540_v14, %v744_v16  ;;  %v824_v23 = vsel %vm696_vm3, %v580_v15, %v760_v17 }
 0x116   : > { %v1287_v24 = vpack.c.bf16 %v808_v22, %v807_v20  ;;  %v1327_v25 = vpack.c.bf16 %v824_v23, %v823_v21 }
 0x117   : > { %v619_v26 = vpop.f32.mrf.mxu2  ;;  %v659_v27 = vpop.f32.mrf.mxu3 }
 0x118   : > { %1419 = vst [vmem:[%s1596_s13 + $0x30] sm:$0xff] %v1287_v24   ;;  %v620_v30 = vadd.f32 %v1583_v42, %v619_v26  ;;  %v660_v31 = vadd.f32 %v1583_v42, %v659_v27  ;;  %v542_v32 = vpop.f32.mrf.mxu0  ;;  %v582_v33 = vpop.f32.mrf.mxu1 }
 0x119   : > { %1427 = vst [vmem:[%s1596_s13 + $0x70] sm:$0xff] %v1327_v25   ;;  %v543_v43 = vadd.f32 %v1583_v42, %v542_v32  ;;  %v583_v44 = vadd.f32 %v1583_v42, %v582_v33 }
 0x11a   : > { %vm712_vm6 = vcmp.gt.f32.partialorder %v620_v30, 0.0  ;;  %v776_v34 = vmul.f32 0.2, %v620_v30  ;;  %vm728_vm7 = vcmp.gt.f32.partialorder %v660_v31, 0.0  ;;  %v792_v35 = vmul.f32 0.2, %v660_v31 }
 0x11b   : > { %v745_v49 = vmul.f32 0.2, %v543_v43  ;;  %v761_v50 = vmul.f32 0.2, %v583_v44  ;;  %vm681_vm8 = vcmp.gt.f32.partialorder %v543_v43, 0.0  ;;  %vm697_vm9 = vcmp.gt.f32.partialorder %v583_v44, 0.0 }
 0x11c   : > { %v840_v38 = vsel %vm712_vm6, %v620_v30, %v776_v34  ;;  %v856_v39 = vsel %vm728_vm7, %v660_v31, %v792_v35 }
 0x11d   : > { %v1367_v40 = vpack.c.bf16 %v840_v38, %v839_v36  ;;  %v1407_v41 = vpack.c.bf16 %v856_v39, %v855_v37  ;;  %v809_v57 = vsel %vm681_vm8, %v543_v43, %v745_v49  ;;  %v825_v58 = vsel %vm697_vm9, %v583_v44, %v761_v50 }
 0x11f   : > { %1435 = vst [vmem:[%s1596_s13 + $0xb0] sm:$0xff] %v1367_v40   ;;  %v622_v45 = vpop.f32.mrf.mxu2  ;;  %v662_v46 = vpop.f32.mrf.mxu3 }
 0x120   : > { %1443 = vst [vmem:[%s1596_s13 + $0xf0] sm:$0xff] %v1407_v41   ;;  %v544_v47 = vpop.f32.mrf.mxu0  ;;  %v584_v48 = vpop.f32.mrf.mxu1  ;;  %v623_v55 = vadd.f32 %v1583_v42, %v622_v45  ;;  %v663_v56 = vadd.f32 %v1583_v42, %v662_v46 }
 0x121   : > { %v545_v51 = vadd.f32 %v1583_v42, %v544_v47  ;;  %v585_v52 = vadd.f32 %v1583_v42, %v584_v48 }
 0x122   : > { %v777_v1 = vmul.f32 0.2, %v623_v55  ;;  %v793_v2 = vmul.f32 0.2, %v663_v56  ;;  %vm713_vm12 = vcmp.gt.f32.partialorder %v623_v55, 0.0  ;;  %vm729_vm13 = vcmp.gt.f32.partialorder %v663_v56, 0.0 }
 0x123   : > { %vm682_vm10 = vcmp.gt.f32.partialorder %v545_v51, 0.0  ;;  %v746_v53 = vmul.f32 0.2, %v545_v51  ;;  %vm698_vm11 = vcmp.gt.f32.partialorder %v585_v52, 0.0  ;;  %v762_v54 = vmul.f32 0.2, %v585_v52 }
 0x124   : > { %v841_v7 = vsel %vm713_vm12, %v623_v55, %v777_v1  ;;  %v857_v8 = vsel %vm729_vm13, %v663_v56, %v793_v2 }
 0x125   : > { %v810_v59 = vsel %vm682_vm10, %v545_v51, %v746_v53  ;;  %v826_v60 = vsel %vm698_vm11, %v585_v52, %v762_v54 }
 0x126   : > { %v1292_v61 = vpack.c.bf16 %v810_v59, %v809_v57  ;;  %v1332_v62 = vpack.c.bf16 %v826_v60, %v825_v58 }
 0x127   : > { %v624_v63 = vpop.f32.mrf.mxu2  ;;  %v664_v0 = vpop.f32.mrf.mxu3 }
 0x128   : > { %1420 = vst [vmem:[%s1596_s13 + $0x38] sm:$0xff] %v1292_v61   ;;  %v625_v3 = vadd.f32 %v1583_v42, %v624_v63  ;;  %v665_v4 = vadd.f32 %v1583_v42, %v664_v0 }
 0x129   : > { %1428 = vst [vmem:[%s1596_s13 + $0x78] sm:$0xff] %v1332_v62  }
 0x12a   : > { %vm714_vm14 = vcmp.gt.f32.partialorder %v625_v3, 0.0  ;;  %v778_v5 = vmul.f32 0.2, %v625_v3  ;;  %vm730_vm15 = vcmp.gt.f32.partialorder %v665_v4, 0.0  ;;  %v794_v6 = vmul.f32 0.2, %v665_v4 }
 0x12c   : > { %v842_v9 = vsel %vm714_vm14, %v625_v3, %v778_v5  ;;  %v858_v10 = vsel %vm730_vm15, %v665_v4, %v794_v6 }
 0x12d   : > { %v1372_v11 = vpack.c.bf16 %v842_v9, %v841_v7  ;;  %v1412_v12 = vpack.c.bf16 %v858_v10, %v857_v8 }
 0x12f   : > { %1436 = vst [vmem:[%s1596_s13 + $0xb8] sm:$0xff] %v1372_v11  }
 0x130   : > { %1444 = vst [vmem:[%s1596_s13 + $0xf8] sm:$0xff] %v1412_v12  }
 0x131 PF: > { %s13_s12 = sadd.s32 1, %s1484_s12  }
 0x132   : > { %p10_p4 = scmp.ge.s32.totalorder %s13_s12, 6  }
 0x134   :  { %12 = sbr.rel (!%p10_p4) target bundleno = 1 (0x1), region = 62 }

// kernel: discriminator_funiegan_forward.10
= control target key start
LH: loop header
LB: loop body
LE: loop exit
PB: predicated region body
PF: predicated region fallthrough
CT: control target
= control target key end

     0   :  { %s1178_s0 = inlined_call_operand.vmem [shape: f32[512,128], index: 0, kind: input, shape index: {}]   ;;  %s1179_s1 = inlined_call_operand.vmem [shape: f32[1,128], index: 1, kind: input, shape index: {}]   ;;  %s1180_s2 = inlined_call_operand.vmem [shape: f32[1,128], index: 2, kind: input, shape index: {}]   ;;  %s1181_s3 = inlined_call_operand.vmem [shape: bf16[512,128], index: 3, kind: output, shape index: {}]  }
   0x1   :  { %v14_v0 = vld [vmem:[%s1178_s0] sm:$0xff]  ;;  %v15_v1 = vld [vmem:[%s1178_s0 + $0x8] sm:$0xff]  ;;  %v16_v4 = vld [vmem:[%s1178_s0 + $0x10] sm:$0xff] }
   0x2   :  { %v760_v2 = vld [vmem:[%s1179_s1] ss:$0 sm:$0xff]  ;;  %v17_v5 = vld [vmem:[%s1178_s0 + $0x18] sm:$0xff]  ;;  %v19_v11 = vld [vmem:[%s1178_s0 + $0x28] sm:$0xff] }
   0x3   :  { %v765_v3 = vld [vmem:[%s1180_s2] ss:$0 sm:$0xff]  ;;  %v82_v7 = vmul.f32 %v760_v2, %v14_v0  ;;  %v83_v8 = vmul.f32 %v760_v2, %v15_v1  ;;  %v84_v9 = vmul.f32 %v760_v2, %v16_v4  ;;  %v85_v10 = vmul.f32 %v760_v2, %v17_v5  ;;  %v20_v12 = vld [vmem:[%s1178_s0 + $0x30] sm:$0xff]  ;;  %v21_v13 = vld [vmem:[%s1178_s0 + $0x38] sm:$0xff] }
   0x4   :  { %v18_v6 = vld [vmem:[%s1178_s0 + $0x20] sm:$0xff]  ;;  %v87_v15 = vmul.f32 %v760_v2, %v19_v11  ;;  %v88_v16 = vmul.f32 %v760_v2, %v20_v12  ;;  %v89_v17 = vmul.f32 %v760_v2, %v21_v13  ;;  %v23_v37 = vld [vmem:[%s1178_s0 + $0x48] sm:$0xff]  ;;  %v24_v38 = vld [vmem:[%s1178_s0 + $0x50] sm:$0xff] }
   0x5   :  { %v86_v14 = vmul.f32 %v760_v2, %v18_v6  ;;  %v150_v18 = vadd.f32 %v765_v3, %v82_v7  ;;  %v151_v19 = vadd.f32 %v765_v3, %v83_v8  ;;  %v152_v20 = vadd.f32 %v765_v3, %v84_v9  ;;  %v22_v32 = vld [vmem:[%s1178_s0 + $0x40] sm:$0xff]  ;;  %v25_v39 = vld [vmem:[%s1178_s0 + $0x58] sm:$0xff]  ;;  %v27_v51 = vld [vmem:[%s1178_s0 + $0x68] sm:$0xff] }
   0x6   :  { %v153_v21 = vadd.f32 %v765_v3, %v85_v10  ;;  %v155_v23 = vadd.f32 %v765_v3, %v87_v15  ;;  %v156_v24 = vadd.f32 %v765_v3, %v88_v16  ;;  %v157_v25 = vadd.f32 %v765_v3, %v89_v17  ;;  %v26_v50 = vld [vmem:[%s1178_s0 + $0x60] sm:$0xff]  ;;  %v28_v63 = vld [vmem:[%s1178_s0 + $0x70] sm:$0xff]  ;;  %v29_v0 = vld [vmem:[%s1178_s0 + $0x78] sm:$0xff] }
   0x7   :  { %v154_v22 = vadd.f32 %v765_v3, %v86_v14  ;;  %vm214_vm0 = vcmp.gt.f32.partialorder %v150_v18, 0.0  ;;  %vm215_vm1 = vcmp.gt.f32.partialorder %v151_v19, 0.0  ;;  %v278_v26 = vmul.f32 0.2, %v150_v18  ;;  %v30_v12 = vld [vmem:[%s1178_s0 + $0x80] sm:$0xff]  ;;  %v31_v13 = vld [vmem:[%s1178_s0 + $0x88] sm:$0xff] }
   0x8   :  { %v279_v27 = vmul.f32 0.2, %v151_v19  ;;  %vm216_vm2 = vcmp.gt.f32.partialorder %v152_v20, 0.0  ;;  %vm217_vm3 = vcmp.gt.f32.partialorder %v153_v21, 0.0  ;;  %v280_v28 = vmul.f32 0.2, %v152_v20 }
   0x9   :  { %v281_v29 = vmul.f32 0.2, %v153_v21  ;;  %v342_v30 = vsel %vm214_vm0, %v150_v18, %v278_v26  ;;  %vm218_vm4 = vcmp.gt.f32.partialorder %v154_v22, 0.0  ;;  %vm219_vm5 = vcmp.gt.f32.partialorder %v155_v23, 0.0  ;;  %v32_v17 = vld [vmem:[%s1178_s0 + $0x90] sm:$0xff]  ;;  %v33_v18 = vld [vmem:[%s1178_s0 + $0x98] sm:$0xff] }
   0xa   :  { %v343_v31 = vsel %vm215_vm1, %v151_v19, %v279_v27  ;;  %v344_v34 = vsel %vm216_vm2, %v152_v20, %v280_v28  ;;  %v282_v36 = vmul.f32 0.2, %v154_v22  ;;  %v283_v41 = vmul.f32 0.2, %v155_v23 }
   0xb   :  { %v541_v33 = vpack.c.bf16 %v343_v31, %v342_v30  ;;  %v345_v35 = vsel %vm217_vm3, %v153_v21, %v281_v29  ;;  %vm220_vm6 = vcmp.gt.f32.partialorder %v156_v24, 0.0  ;;  %vm221_vm7 = vcmp.gt.f32.partialorder %v157_v25, 0.0  ;;  %v34_v30 = vld [vmem:[%s1178_s0 + $0xa0] sm:$0xff]  ;;  %v35_v31 = vld [vmem:[%s1178_s0 + $0xa8] sm:$0xff] }
   0xc   :  { %v546_v40 = vpack.c.bf16 %v345_v35, %v344_v34  ;;  %v346_v42 = vsel %vm218_vm4, %v154_v22, %v282_v36  ;;  %v284_v43 = vmul.f32 0.2, %v156_v24  ;;  %v285_v44 = vmul.f32 0.2, %v157_v25 }
   0xd   :  { %542 = vst [vmem:[%s1181_s3] sm:$0xff] %v541_v33   ;;  %v90_v45 = vmul.f32 %v760_v2, %v22_v32  ;;  %v347_v46 = vsel %vm219_vm5, %v155_v23, %v283_v41  ;;  %v91_v47 = vmul.f32 %v760_v2, %v23_v37  ;;  %v92_v48 = vmul.f32 %v760_v2, %v24_v38 }
   0xe   :  { %698 = vst [vmem:[%s1181_s3 + $0x8] sm:$0xff] %v546_v40   ;;  %v93_v49 = vmul.f32 %v760_v2, %v25_v39  ;;  %v551_v52 = vpack.c.bf16 %v347_v46, %v346_v42  ;;  %v348_v53 = vsel %vm220_vm6, %v156_v24, %v284_v43  ;;  %v349_v54 = vsel %vm221_vm7, %v157_v25, %v285_v44  ;;  %v36_v44 = vld [vmem:[%s1178_s0 + $0xb0] sm:$0xff] }
   0xf   :  { %v158_v55 = vadd.f32 %v765_v3, %v90_v45  ;;  %v556_v56 = vpack.c.bf16 %v349_v54, %v348_v53  ;;  %v159_v57 = vadd.f32 %v765_v3, %v91_v47  ;;  %v160_v58 = vadd.f32 %v765_v3, %v92_v48  ;;  %v37_v45 = vld [vmem:[%s1178_s0 + $0xb8] sm:$0xff] }
  0x10   :  { %v161_v59 = vadd.f32 %v765_v3, %v93_v49  ;;  %699 = vst [vmem:[%s1181_s3 + $0x10] sm:$0xff] %v551_v52   ;;  %v94_v61 = vmul.f32 %v760_v2, %v26_v50  ;;  %v95_v62 = vmul.f32 %v760_v2, %v27_v51  ;;  %v96_v10 = vmul.f32 %v760_v2, %v28_v63 }
  0x11   :  { %vm222_vm8 = vcmp.gt.f32.partialorder %v158_v55, 0.0  ;;  %v286_v60 = vmul.f32 0.2, %v158_v55  ;;  %700 = vst [vmem:[%s1181_s3 + $0x18] sm:$0xff] %v556_v56   ;;  %vm223_vm9 = vcmp.gt.f32.partialorder %v159_v57, 0.0  ;;  %vm224_vm10 = vcmp.gt.f32.partialorder %v160_v58, 0.0 }
  0x12   :  { %v287_v1 = vmul.f32 0.2, %v159_v57  ;;  %vm225_vm11 = vcmp.gt.f32.partialorder %v161_v59, 0.0  ;;  %v288_v5 = vmul.f32 0.2, %v160_v58  ;;  %v162_v7 = vadd.f32 %v765_v3, %v94_v61  ;;  %v38_v56 = vld [vmem:[%s1178_s0 + $0xc0] sm:$0xff] }
  0x13   :  { %v350_v4 = vsel %vm222_vm8, %v158_v55, %v286_v60  ;;  %v289_v6 = vmul.f32 0.2, %v161_v59  ;;  %v163_v9 = vadd.f32 %v765_v3, %v95_v62  ;;  %v97_v11 = vmul.f32 %v760_v2, %v29_v0  ;;  %v40_v61 = vld [vmem:[%s1178_s0 + $0xd0] sm:$0xff]  ;;  %v41_v62 = vld [vmem:[%s1178_s0 + $0xd8] sm:$0xff] }
  0x14   :  { %v351_v8 = vsel %vm223_vm9, %v159_v57, %v287_v1  ;;  %v352_v15 = vsel %vm224_vm10, %v160_v58, %v288_v5  ;;  %vm226_vm12 = vcmp.gt.f32.partialorder %v162_v7, 0.0  ;;  %v290_v20 = vmul.f32 0.2, %v162_v7  ;;  %v39_v57 = vld [vmem:[%s1178_s0 + $0xc8] sm:$0xff] }
  0x15   :  { %v561_v14 = vpack.c.bf16 %v351_v8, %v350_v4  ;;  %v353_v16 = vsel %vm225_vm11, %v161_v59, %v289_v6  ;;  %vm227_vm13 = vcmp.gt.f32.partialorder %v163_v9, 0.0  ;;  %v291_v21 = vmul.f32 0.2, %v163_v9 }
  0x16   :  { %v566_v19 = vpack.c.bf16 %v353_v16, %v352_v15  ;;  %v164_v22 = vadd.f32 %v765_v3, %v96_v10  ;;  %v165_v23 = vadd.f32 %v765_v3, %v97_v11  ;;  %v98_v24 = vmul.f32 %v760_v2, %v30_v12  ;;  %v42_v12 = vld [vmem:[%s1178_s0 + $0xe0] sm:$0xff] }
  0x17   :  { %701 = vst [vmem:[%s1181_s3 + $0x20] sm:$0xff] %v561_v14   ;;  %v99_v25 = vmul.f32 %v760_v2, %v31_v13  ;;  %v354_v26 = vsel %vm226_vm12, %v162_v7, %v290_v20  ;;  %v355_v27 = vsel %vm227_vm13, %v163_v9, %v291_v21  ;;  %v100_v28 = vmul.f32 %v760_v2, %v32_v17  ;;  %v43_v13 = vld [vmem:[%s1178_s0 + $0xe8] sm:$0xff] }
  0x18   :  { %702 = vst [vmem:[%s1181_s3 + $0x28] sm:$0xff] %v566_v19   ;;  %v101_v29 = vmul.f32 %v760_v2, %v33_v18  ;;  %v571_v32 = vpack.c.bf16 %v355_v27, %v354_v26  ;;  %vm228_vm14 = vcmp.gt.f32.partialorder %v164_v22, 0.0  ;;  %vm229_vm15 = vcmp.gt.f32.partialorder %v165_v23, 0.0  ;;  %v44_v26 = vld [vmem:[%s1178_s0 + $0xf0] sm:$0xff]  ;;  %v45_v27 = vld [vmem:[%s1178_s0 + $0xf8] sm:$0xff] }
  0x19   :  { %v292_v33 = vmul.f32 0.2, %v164_v22  ;;  %v293_v34 = vmul.f32 0.2, %v165_v23  ;;  %v166_v35 = vadd.f32 %v765_v3, %v98_v24  ;;  %v167_v36 = vadd.f32 %v765_v3, %v99_v25 }
  0x1a   :  { %v168_v37 = vadd.f32 %v765_v3, %v100_v28  ;;  %703 = vst [vmem:[%s1181_s3 + $0x30] sm:$0xff] %v571_v32   ;;  %v169_v39 = vadd.f32 %v765_v3, %v101_v29  ;;  %v102_v40 = vmul.f32 %v760_v2, %v34_v30  ;;  %v103_v41 = vmul.f32 %v760_v2, %v35_v31 }
  0x1b   :  { %v356_v38 = vsel %vm228_vm14, %v164_v22, %v292_v33  ;;  %v357_v42 = vsel %vm229_vm15, %v165_v23, %v293_v34  ;;  %vm230_vm0 = vcmp.gt.f32.partialorder %v166_v35, 0.0  ;;  %vm231_vm1 = vcmp.gt.f32.partialorder %v167_v36, 0.0 }
  0x1c   :  { %v294_v43 = vmul.f32 0.2, %v166_v35  ;;  %v576_v46 = vpack.c.bf16 %v357_v42, %v356_v38  ;;  %v295_v47 = vmul.f32 0.2, %v167_v36  ;;  %vm232_vm2 = vcmp.gt.f32.partialorder %v168_v37, 0.0  ;;  %v46_v38 = vld [vmem:[%s1178_s0 + $0x100] sm:$0xff] }
  0x1d   :  { %vm233_vm3 = vcmp.gt.f32.partialorder %v169_v39, 0.0  ;;  %v296_v49 = vmul.f32 0.2, %v168_v37  ;;  %v297_v50 = vmul.f32 0.2, %v169_v39  ;;  %v170_v51 = vadd.f32 %v765_v3, %v102_v40 }
  0x1e   :  { %v358_v48 = vsel %vm230_vm0, %v166_v35, %v294_v43  ;;  %704 = vst [vmem:[%s1181_s3 + $0x38] sm:$0xff] %v576_v46   ;;  %v359_v52 = vsel %vm231_vm1, %v167_v36, %v295_v47  ;;  %v171_v53 = vadd.f32 %v765_v3, %v103_v41  ;;  %v104_v54 = vmul.f32 %v760_v2, %v36_v44  ;;  %v48_v43 = vld [vmem:[%s1178_s0 + $0x110] sm:$0xff]  ;;  %v49_v44 = vld [vmem:[%s1178_s0 + $0x118] sm:$0xff] }
  0x1f   :  { %v105_v55 = vmul.f32 %v760_v2, %v37_v45  ;;  %v581_v58 = vpack.c.bf16 %v359_v52, %v358_v48  ;;  %v360_v59 = vsel %vm232_vm2, %v168_v37, %v296_v49  ;;  %v361_v60 = vsel %vm233_vm3, %v169_v39, %v297_v50  ;;  %v47_v39 = vld [vmem:[%s1178_s0 + $0x108] sm:$0xff] }
  0x20   :  { %vm234_vm4 = vcmp.gt.f32.partialorder %v170_v51, 0.0  ;;  %v586_v63 = vpack.c.bf16 %v361_v60, %v360_v59  ;;  %vm235_vm5 = vcmp.gt.f32.partialorder %v171_v53, 0.0  ;;  %v298_v0 = vmul.f32 0.2, %v170_v51 }
  0x21   :  { %v299_v1 = vmul.f32 0.2, %v171_v53  ;;  %705 = vst [vmem:[%s1181_s3 + $0x40] sm:$0xff] %v581_v58   ;;  %v172_v4 = vadd.f32 %v765_v3, %v104_v54  ;;  %v173_v5 = vadd.f32 %v765_v3, %v105_v55  ;;  %v106_v6 = vmul.f32 %v760_v2, %v38_v56  ;;  %v50_v56 = vld [vmem:[%s1178_s0 + $0x120] sm:$0xff] }
  0x22   :  { %v107_v7 = vmul.f32 %v760_v2, %v39_v57  ;;  %706 = vst [vmem:[%s1181_s3 + $0x48] sm:$0xff] %v586_v63   ;;  %v362_v8 = vsel %vm234_vm4, %v170_v51, %v298_v0  ;;  %v108_v10 = vmul.f32 %v760_v2, %v40_v61  ;;  %v109_v11 = vmul.f32 %v760_v2, %v41_v62  ;;  %v51_v57 = vld [vmem:[%s1178_s0 + $0x128] sm:$0xff] }
  0x23   :  { %v363_v9 = vsel %vm235_vm5, %v171_v53, %v299_v1  ;;  %vm236_vm6 = vcmp.gt.f32.partialorder %v172_v4, 0.0  ;;  %vm237_vm7 = vcmp.gt.f32.partialorder %v173_v5, 0.0  ;;  %v300_v15 = vmul.f32 0.2, %v172_v4 }
  0x24   :  { %v591_v14 = vpack.c.bf16 %v363_v9, %v362_v8  ;;  %v301_v16 = vmul.f32 0.2, %v173_v5  ;;  %v174_v17 = vadd.f32 %v765_v3, %v106_v6  ;;  %v175_v18 = vadd.f32 %v765_v3, %v107_v7  ;;  %v52_v8 = vld [vmem:[%s1178_s0 + $0x130] sm:$0xff]  ;;  %v53_v9 = vld [vmem:[%s1178_s0 + $0x138] sm:$0xff] }
  0x25   :  { %v176_v19 = vadd.f32 %v765_v3, %v108_v10  ;;  %v364_v20 = vsel %vm236_vm6, %v172_v4, %v300_v15  ;;  %v177_v21 = vadd.f32 %v765_v3, %v109_v11  ;;  %v110_v22 = vmul.f32 %v760_v2, %v42_v12 }
  0x26   :  { %707 = vst [vmem:[%s1181_s3 + $0x50] sm:$0xff] %v591_v14   ;;  %v111_v23 = vmul.f32 %v760_v2, %v43_v13  ;;  %v365_v24 = vsel %vm237_vm7, %v173_v5, %v301_v16  ;;  %vm238_vm8 = vcmp.gt.f32.partialorder %v174_v17, 0.0  ;;  %vm239_vm9 = vcmp.gt.f32.partialorder %v175_v18, 0.0 }
  0x27   :  { %v302_v25 = vmul.f32 0.2, %v174_v17  ;;  %v596_v28 = vpack.c.bf16 %v365_v24, %v364_v20  ;;  %v303_v29 = vmul.f32 0.2, %v175_v18  ;;  %vm240_vm10 = vcmp.gt.f32.partialorder %v176_v19, 0.0  ;;  %v54_v20 = vld [vmem:[%s1178_s0 + $0x140] sm:$0xff] }
  0x28   :  { %vm241_vm11 = vcmp.gt.f32.partialorder %v177_v21, 0.0  ;;  %v304_v31 = vmul.f32 0.2, %v176_v19  ;;  %v305_v32 = vmul.f32 0.2, %v177_v21  ;;  %v178_v33 = vadd.f32 %v765_v3, %v110_v22 }
  0x29   :  { %v366_v30 = vsel %vm238_vm8, %v174_v17, %v302_v25  ;;  %708 = vst [vmem:[%s1181_s3 + $0x58] sm:$0xff] %v596_v28   ;;  %v367_v34 = vsel %vm239_vm9, %v175_v18, %v303_v29  ;;  %v179_v35 = vadd.f32 %v765_v3, %v111_v23  ;;  %v112_v36 = vmul.f32 %v760_v2, %v44_v26  ;;  %v56_v25 = vld [vmem:[%s1178_s0 + $0x150] sm:$0xff]  ;;  %v57_v26 = vld [vmem:[%s1178_s0 + $0x158] sm:$0xff] }
  0x2a   :  { %v113_v37 = vmul.f32 %v760_v2, %v45_v27  ;;  %v601_v40 = vpack.c.bf16 %v367_v34, %v366_v30  ;;  %v368_v41 = vsel %vm240_vm10, %v176_v19, %v304_v31  ;;  %v369_v42 = vsel %vm241_vm11, %v177_v21, %v305_v32  ;;  %v55_v21 = vld [vmem:[%s1178_s0 + $0x148] sm:$0xff] }
  0x2b   :  { %vm242_vm12 = vcmp.gt.f32.partialorder %v178_v33, 0.0  ;;  %v606_v45 = vpack.c.bf16 %v369_v42, %v368_v41  ;;  %vm243_vm13 = vcmp.gt.f32.partialorder %v179_v35, 0.0  ;;  %v306_v46 = vmul.f32 0.2, %v178_v33 }
  0x2c   :  { %v307_v47 = vmul.f32 0.2, %v179_v35  ;;  %709 = vst [vmem:[%s1181_s3 + $0x60] sm:$0xff] %v601_v40   ;;  %v180_v48 = vadd.f32 %v765_v3, %v112_v36  ;;  %v181_v49 = vadd.f32 %v765_v3, %v113_v37  ;;  %v114_v50 = vmul.f32 %v760_v2, %v46_v38  ;;  %v58_v38 = vld [vmem:[%s1178_s0 + $0x160] sm:$0xff] }
  0x2d   :  { %v115_v51 = vmul.f32 %v760_v2, %v47_v39  ;;  %710 = vst [vmem:[%s1181_s3 + $0x68] sm:$0xff] %v606_v45   ;;  %v370_v52 = vsel %vm242_vm12, %v178_v33, %v306_v46  ;;  %v116_v54 = vmul.f32 %v760_v2, %v48_v43  ;;  %v117_v55 = vmul.f32 %v760_v2, %v49_v44  ;;  %v59_v39 = vld [vmem:[%s1178_s0 + $0x168] sm:$0xff] }
  0x2e   :  { %v371_v53 = vsel %vm243_vm13, %v179_v35, %v307_v47  ;;  %vm244_vm14 = vcmp.gt.f32.partialorder %v180_v48, 0.0  ;;  %vm245_vm15 = vcmp.gt.f32.partialorder %v181_v49, 0.0  ;;  %v308_v59 = vmul.f32 0.2, %v180_v48 }
  0x2f   :  { %v611_v58 = vpack.c.bf16 %v371_v53, %v370_v52  ;;  %v309_v60 = vmul.f32 0.2, %v181_v49  ;;  %v182_v61 = vadd.f32 %v765_v3, %v114_v50  ;;  %v183_v62 = vadd.f32 %v765_v3, %v115_v51  ;;  %v60_v52 = vld [vmem:[%s1178_s0 + $0x170] sm:$0xff]  ;;  %v61_v53 = vld [vmem:[%s1178_s0 + $0x178] sm:$0xff] }
  0x30   :  { %v184_v63 = vadd.f32 %v765_v3, %v116_v54  ;;  %v372_v0 = vsel %vm244_vm14, %v180_v48, %v308_v59  ;;  %v185_v1 = vadd.f32 %v765_v3, %v117_v55  ;;  %v118_v4 = vmul.f32 %v760_v2, %v50_v56 }
  0x31   :  { %711 = vst [vmem:[%s1181_s3 + $0x70] sm:$0xff] %v611_v58   ;;  %v119_v5 = vmul.f32 %v760_v2, %v51_v57  ;;  %v373_v6 = vsel %vm245_vm15, %v181_v49, %v309_v60  ;;  %vm246_vm0 = vcmp.gt.f32.partialorder %v182_v61, 0.0  ;;  %vm247_vm1 = vcmp.gt.f32.partialorder %v183_v62, 0.0 }
  0x32   :  { %v310_v7 = vmul.f32 0.2, %v182_v61  ;;  %v616_v10 = vpack.c.bf16 %v373_v6, %v372_v0  ;;  %v311_v11 = vmul.f32 0.2, %v183_v62  ;;  %vm248_vm2 = vcmp.gt.f32.partialorder %v184_v63, 0.0  ;;  %v62_v0 = vld [vmem:[%s1178_s0 + $0x180] sm:$0xff] }
  0x33   :  { %vm249_vm3 = vcmp.gt.f32.partialorder %v185_v1, 0.0  ;;  %v312_v13 = vmul.f32 0.2, %v184_v63  ;;  %v313_v14 = vmul.f32 0.2, %v185_v1  ;;  %v186_v15 = vadd.f32 %v765_v3, %v118_v4 }
  0x34   :  { %v374_v12 = vsel %vm246_vm0, %v182_v61, %v310_v7  ;;  %712 = vst [vmem:[%s1181_s3 + $0x78] sm:$0xff] %v616_v10   ;;  %v375_v16 = vsel %vm247_vm1, %v183_v62, %v311_v11  ;;  %v187_v17 = vadd.f32 %v765_v3, %v119_v5  ;;  %v120_v18 = vmul.f32 %v760_v2, %v52_v8  ;;  %v64_v7 = vld [vmem:[%s1178_s0 + $0x190] sm:$0xff]  ;;  %v65_v8 = vld [vmem:[%s1178_s0 + $0x198] sm:$0xff] }
  0x35   :  { %v121_v19 = vmul.f32 %v760_v2, %v53_v9  ;;  %v621_v22 = vpack.c.bf16 %v375_v16, %v374_v12  ;;  %v376_v23 = vsel %vm248_vm2, %v184_v63, %v312_v13  ;;  %v377_v24 = vsel %vm249_vm3, %v185_v1, %v313_v14  ;;  %v63_v1 = vld [vmem:[%s1178_s0 + $0x188] sm:$0xff] }
  0x36   :  { %vm250_vm4 = vcmp.gt.f32.partialorder %v186_v15, 0.0  ;;  %v626_v27 = vpack.c.bf16 %v377_v24, %v376_v23  ;;  %vm251_vm5 = vcmp.gt.f32.partialorder %v187_v17, 0.0  ;;  %v314_v28 = vmul.f32 0.2, %v186_v15 }
  0x37   :  { %v315_v29 = vmul.f32 0.2, %v187_v17  ;;  %713 = vst [vmem:[%s1181_s3 + $0x80] sm:$0xff] %v621_v22   ;;  %v188_v30 = vadd.f32 %v765_v3, %v120_v18  ;;  %v189_v31 = vadd.f32 %v765_v3, %v121_v19  ;;  %v122_v32 = vmul.f32 %v760_v2, %v54_v20  ;;  %v66_v20 = vld [vmem:[%s1178_s0 + $0x1a0] sm:$0xff] }
  0x38   :  { %v123_v33 = vmul.f32 %v760_v2, %v55_v21  ;;  %714 = vst [vmem:[%s1181_s3 + $0x88] sm:$0xff] %v626_v27   ;;  %v378_v34 = vsel %vm250_vm4, %v186_v15, %v314_v28  ;;  %v124_v36 = vmul.f32 %v760_v2, %v56_v25  ;;  %v125_v37 = vmul.f32 %v760_v2, %v57_v26  ;;  %v67_v21 = vld [vmem:[%s1178_s0 + $0x1a8] sm:$0xff] }
  0x39   :  { %v379_v35 = vsel %vm251_vm5, %v187_v17, %v315_v29  ;;  %vm252_vm6 = vcmp.gt.f32.partialorder %v188_v30, 0.0  ;;  %vm253_vm7 = vcmp.gt.f32.partialorder %v189_v31, 0.0  ;;  %v316_v41 = vmul.f32 0.2, %v188_v30 }
  0x3a   :  { %v631_v40 = vpack.c.bf16 %v379_v35, %v378_v34  ;;  %v317_v42 = vmul.f32 0.2, %v189_v31  ;;  %v190_v43 = vadd.f32 %v765_v3, %v122_v32  ;;  %v191_v44 = vadd.f32 %v765_v3, %v123_v33  ;;  %v68_v34 = vld [vmem:[%s1178_s0 + $0x1b0] sm:$0xff]  ;;  %v69_v35 = vld [vmem:[%s1178_s0 + $0x1b8] sm:$0xff] }
  0x3b   :  { %v192_v45 = vadd.f32 %v765_v3, %v124_v36  ;;  %v380_v46 = vsel %vm252_vm6, %v188_v30, %v316_v41  ;;  %v193_v47 = vadd.f32 %v765_v3, %v125_v37  ;;  %v126_v48 = vmul.f32 %v760_v2, %v58_v38 }
  0x3c   :  { %715 = vst [vmem:[%s1181_s3 + $0x90] sm:$0xff] %v631_v40   ;;  %v127_v49 = vmul.f32 %v760_v2, %v59_v39  ;;  %v381_v50 = vsel %vm253_vm7, %v189_v31, %v317_v42  ;;  %vm254_vm8 = vcmp.gt.f32.partialorder %v190_v43, 0.0  ;;  %vm255_vm9 = vcmp.gt.f32.partialorder %v191_v44, 0.0 }
  0x3d   :  { %v318_v51 = vmul.f32 0.2, %v190_v43  ;;  %v636_v54 = vpack.c.bf16 %v381_v50, %v380_v46  ;;  %v319_v55 = vmul.f32 0.2, %v191_v44  ;;  %vm256_vm10 = vcmp.gt.f32.partialorder %v192_v45, 0.0  ;;  %v70_v46 = vld [vmem:[%s1178_s0 + $0x1c0] sm:$0xff] }
  0x3e   :  { %vm257_vm11 = vcmp.gt.f32.partialorder %v193_v47, 0.0  ;;  %v320_v57 = vmul.f32 0.2, %v192_v45  ;;  %v321_v58 = vmul.f32 0.2, %v193_v47  ;;  %v194_v59 = vadd.f32 %v765_v3, %v126_v48 }
  0x3f   :  { %v382_v56 = vsel %vm254_vm8, %v190_v43, %v318_v51  ;;  %716 = vst [vmem:[%s1181_s3 + $0x98] sm:$0xff] %v636_v54   ;;  %v383_v60 = vsel %vm255_vm9, %v191_v44, %v319_v55  ;;  %v195_v61 = vadd.f32 %v765_v3, %v127_v49  ;;  %v128_v62 = vmul.f32 %v760_v2, %v60_v52  ;;  %v72_v51 = vld [vmem:[%s1178_s0 + $0x1d0] sm:$0xff]  ;;  %v73_v52 = vld [vmem:[%s1178_s0 + $0x1d8] sm:$0xff] }
  0x40   :  { %v129_v63 = vmul.f32 %v760_v2, %v61_v53  ;;  %v641_v4 = vpack.c.bf16 %v383_v60, %v382_v56  ;;  %v384_v5 = vsel %vm256_vm10, %v192_v45, %v320_v57  ;;  %v385_v6 = vsel %vm257_vm11, %v193_v47, %v321_v58  ;;  %v71_v47 = vld [vmem:[%s1178_s0 + $0x1c8] sm:$0xff] }
  0x41   :  { %vm258_vm12 = vcmp.gt.f32.partialorder %v194_v59, 0.0  ;;  %v646_v9 = vpack.c.bf16 %v385_v6, %v384_v5  ;;  %vm259_vm13 = vcmp.gt.f32.partialorder %v195_v61, 0.0  ;;  %v322_v10 = vmul.f32 0.2, %v194_v59 }
  0x42   :  { %v323_v11 = vmul.f32 0.2, %v195_v61  ;;  %717 = vst [vmem:[%s1181_s3 + $0xa0] sm:$0xff] %v641_v4   ;;  %v196_v12 = vadd.f32 %v765_v3, %v128_v62  ;;  %v197_v13 = vadd.f32 %v765_v3, %v129_v63  ;;  %v130_v14 = vmul.f32 %v760_v2, %v62_v0  ;;  %v74_v0 = vld [vmem:[%s1178_s0 + $0x1e0] sm:$0xff] }
  0x43   :  { %v131_v15 = vmul.f32 %v760_v2, %v63_v1  ;;  %718 = vst [vmem:[%s1181_s3 + $0xa8] sm:$0xff] %v646_v9   ;;  %v386_v16 = vsel %vm258_vm12, %v194_v59, %v322_v10  ;;  %v132_v18 = vmul.f32 %v760_v2, %v64_v7  ;;  %v133_v19 = vmul.f32 %v760_v2, %v65_v8  ;;  %v75_v1 = vld [vmem:[%s1178_s0 + $0x1e8] sm:$0xff] }
  0x44   :  { %v387_v17 = vsel %vm259_vm13, %v195_v61, %v323_v11  ;;  %vm260_vm14 = vcmp.gt.f32.partialorder %v196_v12, 0.0  ;;  %vm261_vm15 = vcmp.gt.f32.partialorder %v197_v13, 0.0  ;;  %v324_v23 = vmul.f32 0.2, %v196_v12 }
  0x45   :  { %v651_v22 = vpack.c.bf16 %v387_v17, %v386_v16  ;;  %v325_v24 = vmul.f32 0.2, %v197_v13  ;;  %v198_v25 = vadd.f32 %v765_v3, %v130_v14  ;;  %v199_v26 = vadd.f32 %v765_v3, %v131_v15  ;;  %v76_v16 = vld [vmem:[%s1178_s0 + $0x1f0] sm:$0xff]  ;;  %v77_v17 = vld [vmem:[%s1178_s0 + $0x1f8] sm:$0xff] }
  0x46   :  { %v200_v27 = vadd.f32 %v765_v3, %v132_v18  ;;  %v388_v28 = vsel %vm260_vm14, %v196_v12, %v324_v23  ;;  %v201_v29 = vadd.f32 %v765_v3, %v133_v19  ;;  %v134_v30 = vmul.f32 %v760_v2, %v66_v20 }
  0x47   :  { %719 = vst [vmem:[%s1181_s3 + $0xb0] sm:$0xff] %v651_v22   ;;  %v135_v31 = vmul.f32 %v760_v2, %v67_v21  ;;  %v389_v32 = vsel %vm261_vm15, %v197_v13, %v325_v24  ;;  %vm262_vm0 = vcmp.gt.f32.partialorder %v198_v25, 0.0  ;;  %vm263_vm1 = vcmp.gt.f32.partialorder %v199_v26, 0.0 }
  0x48   :  { %v326_v33 = vmul.f32 0.2, %v198_v25  ;;  %v656_v36 = vpack.c.bf16 %v389_v32, %v388_v28  ;;  %v327_v37 = vmul.f32 0.2, %v199_v26  ;;  %vm264_vm2 = vcmp.gt.f32.partialorder %v200_v27, 0.0 }
  0x49   :  { %vm265_vm3 = vcmp.gt.f32.partialorder %v201_v29, 0.0  ;;  %v328_v39 = vmul.f32 0.2, %v200_v27  ;;  %v329_v40 = vmul.f32 0.2, %v201_v29  ;;  %v202_v41 = vadd.f32 %v765_v3, %v134_v30 }
  0x4a   :  { %v390_v38 = vsel %vm262_vm0, %v198_v25, %v326_v33  ;;  %720 = vst [vmem:[%s1181_s3 + $0xb8] sm:$0xff] %v656_v36   ;;  %v391_v42 = vsel %vm263_vm1, %v199_v26, %v327_v37  ;;  %v203_v43 = vadd.f32 %v765_v3, %v135_v31  ;;  %v136_v44 = vmul.f32 %v760_v2, %v68_v34 }
  0x4b   :  { %v137_v45 = vmul.f32 %v760_v2, %v69_v35  ;;  %v661_v48 = vpack.c.bf16 %v391_v42, %v390_v38  ;;  %v392_v49 = vsel %vm264_vm2, %v200_v27, %v328_v39  ;;  %v393_v50 = vsel %vm265_vm3, %v201_v29, %v329_v40 }
  0x4c   :  { %vm266_vm4 = vcmp.gt.f32.partialorder %v202_v41, 0.0  ;;  %v666_v53 = vpack.c.bf16 %v393_v50, %v392_v49  ;;  %vm267_vm5 = vcmp.gt.f32.partialorder %v203_v43, 0.0  ;;  %v330_v54 = vmul.f32 0.2, %v202_v41 }
  0x4d   :  { %v331_v55 = vmul.f32 0.2, %v203_v43  ;;  %721 = vst [vmem:[%s1181_s3 + $0xc0] sm:$0xff] %v661_v48   ;;  %v204_v56 = vadd.f32 %v765_v3, %v136_v44  ;;  %v205_v57 = vadd.f32 %v765_v3, %v137_v45  ;;  %v138_v58 = vmul.f32 %v760_v2, %v70_v46 }
  0x4e   :  { %v139_v59 = vmul.f32 %v760_v2, %v71_v47  ;;  %722 = vst [vmem:[%s1181_s3 + $0xc8] sm:$0xff] %v666_v53   ;;  %v394_v60 = vsel %vm266_vm4, %v202_v41, %v330_v54  ;;  %v140_v62 = vmul.f32 %v760_v2, %v72_v51  ;;  %v141_v63 = vmul.f32 %v760_v2, %v73_v52 }
  0x4f   :  { %v395_v61 = vsel %vm267_vm5, %v203_v43, %v331_v55  ;;  %vm268_vm6 = vcmp.gt.f32.partialorder %v204_v56, 0.0  ;;  %vm269_vm7 = vcmp.gt.f32.partialorder %v205_v57, 0.0  ;;  %v332_v5 = vmul.f32 0.2, %v204_v56 }
  0x50   :  { %v671_v4 = vpack.c.bf16 %v395_v61, %v394_v60  ;;  %v333_v6 = vmul.f32 0.2, %v205_v57  ;;  %v206_v7 = vadd.f32 %v765_v3, %v138_v58  ;;  %v207_v8 = vadd.f32 %v765_v3, %v139_v59 }
  0x51   :  { %v208_v9 = vadd.f32 %v765_v3, %v140_v62  ;;  %v396_v10 = vsel %vm268_vm6, %v204_v56, %v332_v5  ;;  %v209_v11 = vadd.f32 %v765_v3, %v141_v63  ;;  %v142_v12 = vmul.f32 %v760_v2, %v74_v0 }
  0x52   :  { %723 = vst [vmem:[%s1181_s3 + $0xd0] sm:$0xff] %v671_v4   ;;  %v143_v13 = vmul.f32 %v760_v2, %v75_v1  ;;  %v397_v14 = vsel %vm269_vm7, %v205_v57, %v333_v6  ;;  %vm270_vm8 = vcmp.gt.f32.partialorder %v206_v7, 0.0  ;;  %vm271_vm9 = vcmp.gt.f32.partialorder %v207_v8, 0.0 }
  0x53   :  { %v334_v15 = vmul.f32 0.2, %v206_v7  ;;  %v676_v18 = vpack.c.bf16 %v397_v14, %v396_v10  ;;  %v335_v19 = vmul.f32 0.2, %v207_v8  ;;  %vm272_vm10 = vcmp.gt.f32.partialorder %v208_v9, 0.0 }
  0x54   :  { %vm273_vm11 = vcmp.gt.f32.partialorder %v209_v11, 0.0  ;;  %v336_v21 = vmul.f32 0.2, %v208_v9  ;;  %v337_v22 = vmul.f32 0.2, %v209_v11  ;;  %v210_v23 = vadd.f32 %v765_v3, %v142_v12 }
  0x55   :  { %v398_v20 = vsel %vm270_vm8, %v206_v7, %v334_v15  ;;  %724 = vst [vmem:[%s1181_s3 + $0xd8] sm:$0xff] %v676_v18   ;;  %v399_v24 = vsel %vm271_vm9, %v207_v8, %v335_v19  ;;  %v211_v25 = vadd.f32 %v765_v3, %v143_v13  ;;  %v144_v26 = vmul.f32 %v760_v2, %v76_v16 }
  0x56   :  { %v145_v27 = vmul.f32 %v760_v2, %v77_v17  ;;  %v681_v28 = vpack.c.bf16 %v399_v24, %v398_v20  ;;  %v400_v29 = vsel %vm272_vm10, %v208_v9, %v336_v21  ;;  %v401_v30 = vsel %vm273_vm11, %v209_v11, %v337_v22 }
  0x57   :  { %vm274_vm12 = vcmp.gt.f32.partialorder %v210_v23, 0.0  ;;  %v686_v31 = vpack.c.bf16 %v401_v30, %v400_v29  ;;  %vm275_vm13 = vcmp.gt.f32.partialorder %v211_v25, 0.0  ;;  %v338_v32 = vmul.f32 0.2, %v210_v23 }
  0x58   :  { %v339_v33 = vmul.f32 0.2, %v211_v25  ;;  %725 = vst [vmem:[%s1181_s3 + $0xe0] sm:$0xff] %v681_v28   ;;  %v212_v34 = vadd.f32 %v765_v3, %v144_v26  ;;  %v213_v35 = vadd.f32 %v765_v3, %v145_v27 }
  0x59   :  { %726 = vst [vmem:[%s1181_s3 + $0xe8] sm:$0xff] %v686_v31   ;;  %v402_v2 = vsel %vm274_vm12, %v210_v23, %v338_v32 }
  0x5a   :  { %v403_v36 = vsel %vm275_vm13, %v211_v25, %v339_v33  ;;  %vm276_vm14 = vcmp.gt.f32.partialorder %v212_v34, 0.0  ;;  %vm277_vm15 = vcmp.gt.f32.partialorder %v213_v35, 0.0  ;;  %v340_v38 = vmul.f32 0.2, %v212_v34 }
  0x5b   :  { %v691_v37 = vpack.c.bf16 %v403_v36, %v402_v2  ;;  %v341_v39 = vmul.f32 0.2, %v213_v35 }
  0x5c   :  { %v404_v40 = vsel %vm276_vm14, %v212_v34, %v340_v38 }
  0x5d   :  { %727 = vst [vmem:[%s1181_s3 + $0xf0] sm:$0xff] %v691_v37   ;;  %v405_v41 = vsel %vm277_vm15, %v213_v35, %v341_v39 }
  0x5e   :  { %v696_v42 = vpack.c.bf16 %v405_v41, %v404_v40 }
  0x60   :  { %728 = vst [vmem:[%s1181_s3 + $0xf8] sm:$0xff] %v696_v42  }

// kernel: discriminator_funiegan_forward.9
= control target key start
LH: loop header
LB: loop body
LE: loop exit
PB: predicated region body
PF: predicated region fallthrough
CT: control target
= control target key end

     0   :  { %s4386_s1 = inlined_call_operand.vmem [shape: bf16[512,128], index: 1, kind: input, shape index: {}]   ;;  %s4387_s2 = inlined_call_operand.vmem [shape: f32[1,128], index: 2, kind: input, shape index: {}]   ;;  %s4388_s0 = inlined_call_operand.vmem [shape: bf16[512,512], index: 0, kind: input, shape index: {}]   ;;  %s4389_s3 = inlined_call_operand.vmem [shape: f32[512,128], index: 3, kind: output, shape index: {0}]   ;;  %s4390_s4 = inlined_call_operand.vmem [shape: f32[1,1,128], index: 4, kind: output, shape index: {1}]   ;;  %s4391_s5 = inlined_call_operand.vmem [shape: f32[1,1,128], index: 5, kind: output, shape index: {2}]  }
   0x1   :  { %v3163_v0 = vld [vmem:[%s4386_s1 + $0x38] sm:$0xff]  ;;  %v3162_v4 = vld [vmem:[%s4386_s1 + $0x30] sm:$0xff]  ;;  %v3161_v8 = vld [vmem:[%s4386_s1 + $0x28] sm:$0xff] }
   0x2   :  { %v3171_v1 = vld [vmem:[%s4386_s1 + $0x78] sm:$0xff]  ;;  %1045 = vmatpush.bf16.msra.mxu0 %v3163_v0  ;;  %v3170_v5 = vld [vmem:[%s4386_s1 + $0x70] sm:$0xff]  ;;  %v3169_v9 = vld [vmem:[%s4386_s1 + $0x68] sm:$0xff] }
   0x3   :  { %v3179_v2 = vld [vmem:[%s4386_s1 + $0xb8] sm:$0xff]  ;;  %1214 = vmatpush.bf16.msra.mxu1 %v3171_v1  ;;  %v3178_v6 = vld [vmem:[%s4386_s1 + $0xb0] sm:$0xff]  ;;  %v3177_v10 = vld [vmem:[%s4386_s1 + $0xa8] sm:$0xff] }
   0x4   :  { %v3187_v3 = vld [vmem:[%s4386_s1 + $0xf8] sm:$0xff]  ;;  %1383 = vmatpush.bf16.msra.mxu2 %v3179_v2  ;;  %v3186_v7 = vld [vmem:[%s4386_s1 + $0xf0] sm:$0xff]  ;;  %v3185_v11 = vld [vmem:[%s4386_s1 + $0xe8] sm:$0xff] }
   0x5   :  { %1552 = vmatpush.bf16.msra.mxu3 %v3187_v3  ;;  %v3160_v12 = vld [vmem:[%s4386_s1 + $0x20] sm:$0xff]  ;;  %v3159_v16 = vld [vmem:[%s4386_s1 + $0x18] sm:$0xff]  ;;  %v3158_v20 = vld [vmem:[%s4386_s1 + $0x10] sm:$0xff] }
   0x6   :  { %1046 = vmatpush.bf16.msra.mxu0 %v3162_v4  ;;  %v3168_v13 = vld [vmem:[%s4386_s1 + $0x60] sm:$0xff]  ;;  %v3167_v17 = vld [vmem:[%s4386_s1 + $0x58] sm:$0xff]  ;;  %v3166_v21 = vld [vmem:[%s4386_s1 + $0x50] sm:$0xff] }
   0x7   :  { %1215 = vmatpush.bf16.msra.mxu1 %v3170_v5  ;;  %v3176_v14 = vld [vmem:[%s4386_s1 + $0xa0] sm:$0xff]  ;;  %v3175_v18 = vld [vmem:[%s4386_s1 + $0x98] sm:$0xff]  ;;  %v3174_v22 = vld [vmem:[%s4386_s1 + $0x90] sm:$0xff] }
   0x8   :  { %1384 = vmatpush.bf16.msra.mxu2 %v3178_v6  ;;  %v3184_v15 = vld [vmem:[%s4386_s1 + $0xe0] sm:$0xff]  ;;  %v3183_v19 = vld [vmem:[%s4386_s1 + $0xd8] sm:$0xff]  ;;  %v3182_v23 = vld [vmem:[%s4386_s1 + $0xd0] sm:$0xff] }
   0x9   :  { %1553 = vmatpush.bf16.msra.mxu3 %v3186_v7  ;;  %v3157_v24 = vld [vmem:[%s4386_s1 + $0x8] sm:$0xff]  ;;  %v3156_v28 = vld [vmem:[%s4386_s1] sm:$0xff]  ;;  %v3030_v33 = vld [vmem:[%s4388_s0 + $0xc] sm:$0xf0] }
   0xa   :  { %1047 = vmatpush.bf16.msra.mxu0 %v3161_v8  ;;  %v3165_v25 = vld [vmem:[%s4386_s1 + $0x48] sm:$0xff]  ;;  %v3164_v29 = vld [vmem:[%s4386_s1 + $0x40] sm:$0xff]  ;;  %v2392_v35 = vld [vmem:[%s4388_s0 + $0x10] sm:$0xf0] }
   0xb   :  { %1216 = vmatpush.bf16.msra.mxu1 %v3169_v9  ;;  %v3173_v26 = vld [vmem:[%s4386_s1 + $0x88] sm:$0xff]  ;;  %v3172_v30 = vld [vmem:[%s4386_s1 + $0x80] sm:$0xff]  ;;  %v3031_v37 = vld [vmem:[%s4388_s0 + $0x14] sm:$0xf0] }
   0xc   :  { %1385 = vmatpush.bf16.msra.mxu2 %v3177_v10  ;;  %v3181_v27 = vld [vmem:[%s4386_s1 + $0xc8] sm:$0xff]  ;;  %v3180_v31 = vld [vmem:[%s4386_s1 + $0xc0] sm:$0xff]  ;;  %v2400_v39 = vld [vmem:[%s4388_s0 + $0x18] sm:$0xf0] }
   0xd   :  { %1554 = vmatpush.bf16.msra.mxu3 %v3185_v11  ;;  %v2390_v32 = vld [vmem:[%s4388_s0] sm:$0xf]  ;;  %v3028_v34 = vld [vmem:[%s4388_s0 + $0x4] sm:$0xf]  ;;  %v2398_v36 = vld [vmem:[%s4388_s0 + $0x8] sm:$0xf] }
   0xe   :  { %1048 = vmatpush.bf16.msra.mxu0 %v3160_v12  ;;  %v3029_v38 = vld [vmem:[%s4388_s0 + $0xc] sm:$0xf]  ;;  %v2391_v40 = vor.u32 %v3030_v33, %v2390_v32  ;;  %v2395_v41 = vor.u32 %v3028_v34, %v2392_v35  ;;  %v2399_v42 = vor.u32 %v3031_v37, %v2398_v36  ;;  %v2406_v44 = vld [vmem:[%s4388_s0 + $0x20] sm:$0xf]  ;;  %v3034_v45 = vld [vmem:[%s4388_s0 + $0x2c] sm:$0xf0] }
   0xf   :  { %1217 = vmatpush.bf16.msra.mxu1 %v3168_v13  ;;  %v2403_v43 = vor.u32 %v3029_v38, %v2400_v39  ;;  %v3032_v46 = vld [vmem:[%s4388_s0 + $0x24] sm:$0xf]  ;;  %v2408_v47 = vld [vmem:[%s4388_s0 + $0x30] sm:$0xf0]  ;;  %v2414_v48 = vld [vmem:[%s4388_s0 + $0x28] sm:$0xf]  ;;  %v2407_v52 = vor.u32 %v3034_v45, %v2406_v44 }
  0x10   :  { %1386 = vmatpush.bf16.msra.mxu2 %v3176_v14  ;;  %v3035_v49 = vld [vmem:[%s4388_s0 + $0x34] sm:$0xf0]  ;;  %v3033_v50 = vld [vmem:[%s4388_s0 + $0x2c] sm:$0xf]  ;;  %v2416_v51 = vld [vmem:[%s4388_s0 + $0x38] sm:$0xf0]  ;;  %v2411_v53 = vor.u32 %v3032_v46, %v2408_v47 }
  0x11   :  { %1555 = vmatpush.bf16.msra.mxu3 %v3184_v15  ;;  %v2415_v54 = vor.u32 %v3035_v49, %v2414_v48  ;;  %v2419_v55 = vor.u32 %v3033_v50, %v2416_v51  ;;  %v2422_v56 = vld [vmem:[%s4388_s0 + $0x40] sm:$0xf]  ;;  %v3038_v57 = vld [vmem:[%s4388_s0 + $0x4c] sm:$0xf0]  ;;  %v3036_v58 = vld [vmem:[%s4388_s0 + $0x44] sm:$0xf] }
  0x12   :  { %1049 = vmatpush.bf16.msra.mxu0 %v3159_v16  ;;  %v2424_v59 = vld [vmem:[%s4388_s0 + $0x50] sm:$0xf0]  ;;  %v2430_v60 = vld [vmem:[%s4388_s0 + $0x48] sm:$0xf]  ;;  %v3039_v61 = vld [vmem:[%s4388_s0 + $0x54] sm:$0xf0]  ;;  %v2423_v0 = vor.u32 %v3038_v57, %v2422_v56 }
  0x13   :  { %1218 = vmatpush.bf16.msra.mxu1 %v3167_v17  ;;  %v3037_v62 = vld [vmem:[%s4388_s0 + $0x4c] sm:$0xf]  ;;  %v2432_v63 = vld [vmem:[%s4388_s0 + $0x58] sm:$0xf0]  ;;  %v2427_v1 = vor.u32 %v3036_v58, %v2424_v59  ;;  %v2431_v2 = vor.u32 %v3039_v61, %v2430_v60  ;;  %v2438_v4 = vld [vmem:[%s4388_s0 + $0x60] sm:$0xf] }
  0x14   :  { %1387 = vmatpush.bf16.msra.mxu2 %v3175_v18  ;;  %v2435_v3 = vor.u32 %v3037_v62, %v2432_v63  ;;  %v3042_v5 = vld [vmem:[%s4388_s0 + $0x6c] sm:$0xf0]  ;;  %v3040_v6 = vld [vmem:[%s4388_s0 + $0x64] sm:$0xf]  ;;  %v2440_v7 = vld [vmem:[%s4388_s0 + $0x70] sm:$0xf0] }
  0x15   :  { %1556 = vmatpush.bf16.msra.mxu3 %v3183_v19  ;;  %v2446_v8 = vld [vmem:[%s4388_s0 + $0x68] sm:$0xf]  ;;  %v3043_v9 = vld [vmem:[%s4388_s0 + $0x74] sm:$0xf0]  ;;  %v3041_v10 = vld [vmem:[%s4388_s0 + $0x6c] sm:$0xf]  ;;  %v2439_v12 = vor.u32 %v3042_v5, %v2438_v4  ;;  %v2443_v13 = vor.u32 %v3040_v6, %v2440_v7 }
  0x16   :  { %1050 = vmatpush.bf16.msra.mxu0 %v3158_v20  ;;  %v2448_v11 = vld [vmem:[%s4388_s0 + $0x78] sm:$0xf0]  ;;  %v2447_v14 = vor.u32 %v3043_v9, %v2446_v8  ;;  %v2454_v16 = vld [vmem:[%s4388_s0 + $0x80] sm:$0xf]  ;;  %v3046_v17 = vld [vmem:[%s4388_s0 + $0x8c] sm:$0xf0] }
  0x17   :  { %1219 = vmatpush.bf16.msra.mxu1 %v3166_v21  ;;  %v2451_v15 = vor.u32 %v3041_v10, %v2448_v11  ;;  %v3044_v18 = vld [vmem:[%s4388_s0 + $0x84] sm:$0xf]  ;;  %v2456_v19 = vld [vmem:[%s4388_s0 + $0x90] sm:$0xf0]  ;;  %v2462_v20 = vld [vmem:[%s4388_s0 + $0x88] sm:$0xf] }
  0x18   :  { %1388 = vmatpush.bf16.msra.mxu2 %v3174_v22  ;;  %v3047_v21 = vld [vmem:[%s4388_s0 + $0x94] sm:$0xf0]  ;;  %v3045_v22 = vld [vmem:[%s4388_s0 + $0x8c] sm:$0xf]  ;;  %v2478_v32 = vld [vmem:[%s4388_s0 + $0xa8] sm:$0xf] }
  0x19   :  { %1557 = vmatpush.bf16.msra.mxu3 %v3182_v23  ;;  %v2464_v23 = vld [vmem:[%s4388_s0 + $0x98] sm:$0xf0]  ;;  %v3051_v33 = vld [vmem:[%s4388_s0 + $0xb4] sm:$0xf0]  ;;  %v3049_v34 = vld [vmem:[%s4388_s0 + $0xac] sm:$0xf] }
  0x1a   :  { %1051 = vmatpush.bf16.msra.mxu0 %v3157_v24  ;;  %v2455_v24 = vor.u32 %v3046_v17, %v2454_v16  ;;  %v2480_v35 = vld [vmem:[%s4388_s0 + $0xb8] sm:$0xf0]  ;;  %v2479_v38 = vor.u32 %v3051_v33, %v2478_v32  ;;  %v2494_v44 = vld [vmem:[%s4388_s0 + $0xc8] sm:$0xf]  ;;  %v3055_v45 = vld [vmem:[%s4388_s0 + $0xd4] sm:$0xf0] }
  0x1b   :  { %1220 = vmatpush.bf16.msra.mxu1 %v3165_v25  ;;  %v2459_v25 = vor.u32 %v3044_v18, %v2456_v19  ;;  %v2483_v39 = vor.u32 %v3049_v34, %v2480_v35  ;;  %v3053_v46 = vld [vmem:[%s4388_s0 + $0xcc] sm:$0xf]  ;;  %v2496_v47 = vld [vmem:[%s4388_s0 + $0xd8] sm:$0xf0]  ;;  %v2495_v50 = vor.u32 %v3055_v45, %v2494_v44  ;;  %v2510_v56 = vld [vmem:[%s4388_s0 + $0xe8] sm:$0xf] }
  0x1c   :  { %1389 = vmatpush.bf16.msra.mxu2 %v3173_v26  ;;  %v2463_v26 = vor.u32 %v3047_v21, %v2462_v20  ;;  %v2499_v51 = vor.u32 %v3053_v46, %v2496_v47  ;;  %v3059_v57 = vld [vmem:[%s4388_s0 + $0xf4] sm:$0xf0]  ;;  %v3057_v58 = vld [vmem:[%s4388_s0 + $0xec] sm:$0xf]  ;;  %v2512_v59 = vld [vmem:[%s4388_s0 + $0xf8] sm:$0xf0] }
  0x1d   :  { %1558 = vmatpush.bf16.msra.mxu3 %v3181_v27  ;;  %v2467_v27 = vor.u32 %v3045_v22, %v2464_v23  ;;  %v2511_v62 = vor.u32 %v3059_v57, %v2510_v56  ;;  %v2515_v63 = vor.u32 %v3057_v58, %v2512_v59  ;;  %v2520_v4 = vld [vmem:[%s4388_s0 + $0x110] sm:$0xf0]  ;;  %v2526_v5 = vld [vmem:[%s4388_s0 + $0x108] sm:$0xf]  ;;  %v3063_v6 = vld [vmem:[%s4388_s0 + $0x114] sm:$0xf0] }
  0x1e   :  { %1052 = vmatpush.bf16.msra.mxu0 %v3156_v28  ;;  %v2470_v28 = vld [vmem:[%s4388_s0 + $0xa0] sm:$0xf]  ;;  %v3061_v7 = vld [vmem:[%s4388_s0 + $0x10c] sm:$0xf]  ;;  %v2528_v8 = vld [vmem:[%s4388_s0 + $0x118] sm:$0xf0] }
  0x1f   :  { %1221 = vmatpush.bf16.msra.mxu1 %v3164_v29  ;;  %v3050_v29 = vld [vmem:[%s4388_s0 + $0xac] sm:$0xf0]  ;;  %v2550_v56 = vld [vmem:[%s4388_s0 + $0x140] sm:$0xf]  ;;  %v3068_v58 = vld [vmem:[%s4388_s0 + $0x144] sm:$0xf] }
  0x20   :  { %1390 = vmatpush.bf16.msra.mxu2 %v3172_v30  ;;  %v3048_v30 = vld [vmem:[%s4388_s0 + $0xa4] sm:$0xf]  ;;  %v2471_v36 = vor.u32 %v3050_v29, %v2470_v28  ;;  %v2542_v28 = vld [vmem:[%s4388_s0 + $0x128] sm:$0xf]  ;;  %v3067_v29 = vld [vmem:[%s4388_s0 + $0x134] sm:$0xf0] }
  0x21   :  { %1559 = vmatpush.bf16.msra.mxu3 %v3180_v31  ;;  %1053 = vmatmul.bf16.vlgmr.msra.gmra.mxu0 %v2391_v40  ;;  %v2472_v31 = vld [vmem:[%s4388_s0 + $0xb0] sm:$0xf0]  ;;  %v2486_v40 = vld [vmem:[%s4388_s0 + $0xc0] sm:$0xf]  ;;  %v3070_v57 = vld [vmem:[%s4388_s0 + $0x14c] sm:$0xf0] }
  0x22   :  { %1222 = vmatmul.bf16.vlgmr.msra.gmra.mxu1 %v2395_v41  ;;  %v2475_v37 = vor.u32 %v3048_v30, %v2472_v31  ;;  %v3054_v41 = vld [vmem:[%s4388_s0 + $0xcc] sm:$0xf0]  ;;  %v3065_v30 = vld [vmem:[%s4388_s0 + $0x12c] sm:$0xf]  ;;  %v2544_v31 = vld [vmem:[%s4388_s0 + $0x138] sm:$0xf0] }
  0x23   :  { %1391 = vmatmul.bf16.vlgmr.msra.gmra.mxu2 %v2399_v42  ;;  %v3052_v42 = vld [vmem:[%s4388_s0 + $0xc4] sm:$0xf]  ;;  %v2487_v48 = vor.u32 %v3054_v41, %v2486_v40  ;;  %v2543_v40 = vor.u32 %v3067_v29, %v2542_v28  ;;  %v2547_v41 = vor.u32 %v3065_v30, %v2544_v31  ;;  %v3074_v28 = vld [vmem:[%s4388_s0 + $0x16c] sm:$0xf0] }
  0x24   :  { %1560 = vmatmul.bf16.vlgmr.msra.gmra.mxu3 %v2403_v43  ;;  %v2488_v43 = vld [vmem:[%s4388_s0 + $0xd0] sm:$0xf0]  ;;  %v3072_v29 = vld [vmem:[%s4388_s0 + $0x164] sm:$0xf] }
  0x25   :  { %v2491_v49 = vor.u32 %v3052_v42, %v2488_v43 }
  0x31   :  { %1058 = vmatmul.bf16.gmra.mxu0 %v2407_v52  ;;  %v2502_v52 = vld [vmem:[%s4388_s0 + $0xe0] sm:$0xf] }
  0x32   :  { %1227 = vmatmul.bf16.gmra.mxu1 %v2411_v53  ;;  %v3058_v53 = vld [vmem:[%s4388_s0 + $0xec] sm:$0xf0] }
  0x33   :  { %1396 = vmatmul.bf16.gmra.mxu2 %v2415_v54  ;;  %v3056_v54 = vld [vmem:[%s4388_s0 + $0xe4] sm:$0xf]  ;;  %v2503_v60 = vor.u32 %v3058_v53, %v2502_v52 }
  0x34   :  { %1565 = vmatmul.bf16.gmra.mxu3 %v2419_v55  ;;  %v2504_v55 = vld [vmem:[%s4388_s0 + $0xf0] sm:$0xf0] }
  0x35   :  { %v2507_v61 = vor.u32 %v3056_v54, %v2504_v55 }
  0x41   :  { %1063 = vmatmul.bf16.gmra.mxu0 %v2423_v0  ;;  %v3512_v0 = vld [vmem:[%s4387_s2] ss:$0 sm:$0xff] }
  0x42   :  { %1232 = vmatmul.bf16.gmra.mxu1 %v2427_v1  ;;  %v2518_v1 = vld [vmem:[%s4388_s0 + $0x100] sm:$0xf] }
  0x43   :  { %1401 = vmatmul.bf16.gmra.mxu2 %v2431_v2  ;;  %v3062_v2 = vld [vmem:[%s4388_s0 + $0x10c] sm:$0xf0] }
  0x44   :  { %1570 = vmatmul.bf16.gmra.mxu3 %v2435_v3  ;;  %v3060_v3 = vld [vmem:[%s4388_s0 + $0x104] sm:$0xf]  ;;  %v2519_v9 = vor.u32 %v3062_v2, %v2518_v1  ;;  %v3069_v1 = vld [vmem:[%s4388_s0 + $0x14c] sm:$0xf]  ;;  %v2560_v2 = vld [vmem:[%s4388_s0 + $0x158] sm:$0xf0] }
  0x45   :  { %v2523_v10 = vor.u32 %v3060_v3, %v2520_v4 }
  0x51   :  { %1068 = vmatmul.bf16.gmra.mxu0 %v2439_v12 }
  0x52   :  { %1237 = vmatmul.bf16.gmra.mxu1 %v2443_v13  ;;  %v2527_v13 = vor.u32 %v3063_v6, %v2526_v5 }
  0x53   :  { %1406 = vmatmul.bf16.gmra.mxu2 %v2447_v14  ;;  %v2531_v14 = vor.u32 %v3061_v7, %v2528_v8  ;;  %v2551_v7 = vor.u32 %v3070_v57, %v2550_v56 }
  0x54   :  { %1575 = vmatmul.bf16.gmra.mxu3 %v2451_v15 }
  0x61   :  { %1073 = vmatmul.bf16.gmra.mxu0 %v2455_v24  ;;  %v2534_v24 = vld [vmem:[%s4388_s0 + $0x120] sm:$0xf] }
  0x62   :  { %1242 = vmatmul.bf16.gmra.mxu1 %v2459_v25  ;;  %v3066_v25 = vld [vmem:[%s4388_s0 + $0x12c] sm:$0xf0] }
  0x63   :  { %1411 = vmatmul.bf16.gmra.mxu2 %v2463_v26  ;;  %v3064_v26 = vld [vmem:[%s4388_s0 + $0x124] sm:$0xf]  ;;  %v2535_v35 = vor.u32 %v3066_v25, %v2534_v24 }
  0x64   :  { %1580 = vmatmul.bf16.gmra.mxu3 %v2467_v27  ;;  %v2536_v27 = vld [vmem:[%s4388_s0 + $0x130] sm:$0xf0] }
  0x71   :  { %1078 = vmatmul.bf16.gmra.mxu0 %v2471_v36  ;;  %v2539_v36 = vor.u32 %v3064_v26, %v2536_v27  ;;  %v2566_v27 = vld [vmem:[%s4388_s0 + $0x160] sm:$0xf] }
  0x72   :  { %1247 = vmatmul.bf16.gmra.mxu1 %v2475_v37 }
  0x73   :  { %1416 = vmatmul.bf16.gmra.mxu2 %v2479_v38 }
  0x74   :  { %1585 = vmatmul.bf16.gmra.mxu3 %v2483_v39 }
  0x81   :  { %1083 = vmatmul.bf16.gmra.mxu0 %v2487_v48 }
  0x82   :  { %1252 = vmatmul.bf16.gmra.mxu1 %v2491_v49 }
  0x83   :  { %1421 = vmatmul.bf16.gmra.mxu2 %v2495_v50 }
  0x84   :  { %1590 = vmatmul.bf16.gmra.mxu3 %v2499_v51 }
  0x91   :  { %1088 = vmatmul.bf16.gmra.mxu0 %v2503_v60 }
  0x92   :  { %1257 = vmatmul.bf16.gmra.mxu1 %v2507_v61  ;;  %v2552_v61 = vld [vmem:[%s4388_s0 + $0x150] sm:$0xf0] }
  0x93   :  { %1426 = vmatmul.bf16.gmra.mxu2 %v2511_v62  ;;  %v2558_v62 = vld [vmem:[%s4388_s0 + $0x148] sm:$0xf]  ;;  %v2555_v8 = vor.u32 %v3068_v58, %v2552_v61  ;;  %v2582_v61 = vld [vmem:[%s4388_s0 + $0x180] sm:$0xf] }
  0x94   :  { %1595 = vmatmul.bf16.gmra.mxu3 %v2515_v63  ;;  %v3071_v63 = vld [vmem:[%s4388_s0 + $0x154] sm:$0xf0] }
  0x9e   :  { %v1054_v11 = vpop.f32.mrf.mxu0 }
  0x9f   :  { %v1223_v12 = vpop.f32.mrf.mxu1  ;;  %v1055_v15 = vadd.f32 %v3512_v0, %v1054_v11 }
  0xa1   :  { %1093 = vmatmul.bf16.gmra.mxu0 %v2519_v9  ;;  %v1224_v16 = vadd.f32 %v1223_v12, %v1055_v15  ;;  %v2559_v12 = vor.u32 %v3071_v63, %v2558_v62  ;;  %v3078_v62 = vld [vmem:[%s4388_s0 + $0x18c] sm:$0xf0]  ;;  %v3076_v63 = vld [vmem:[%s4388_s0 + $0x184] sm:$0xf] }
  0xa2   :  { %1262 = vmatmul.bf16.gmra.mxu1 %v2523_v10 }
  0xa3   :  { %1431 = vmatmul.bf16.gmra.mxu2 %v2527_v13  ;;  %v2563_v13 = vor.u32 %v3069_v1, %v2560_v2 }
  0xa4   :  { %1600 = vmatmul.bf16.gmra.mxu3 %v2531_v14 }
  0xa6   :  { %v1392_v17 = vpop.f32.mrf.mxu2  ;;  %v1056_v20 = vpop.f32.mrf.mxu0 }
  0xa7   :  { %v1561_v18 = vpop.f32.mrf.mxu3  ;;  %v1393_v19 = vadd.f32 %v1392_v17, %v1224_v16  ;;  %v1225_v21 = vpop.f32.mrf.mxu1  ;;  %v1057_v23 = vadd.f32 %v3512_v0, %v1056_v20 }
  0xa9   :  { %v1562_v22 = vadd.f32 %v1561_v18, %v1393_v19  ;;  %v1226_v32 = vadd.f32 %v1225_v21, %v1057_v23 }
  0xab   :  { %2312 = vst [vmem:[%s4389_s3] sm:$0xff] %v1562_v22  ;;  %v2178_v44 = vmul.f32 %v1562_v22, %v1562_v22 }
  0xae   :  { %v1394_v33 = vpop.f32.mrf.mxu2  ;;  %v1059_v38 = vpop.f32.mrf.mxu0 }
  0xaf   :  { %v1563_v34 = vpop.f32.mrf.mxu3  ;;  %v1395_v37 = vadd.f32 %v1394_v33, %v1226_v32  ;;  %v1228_v39 = vpop.f32.mrf.mxu1  ;;  %v1060_v42 = vadd.f32 %v3512_v0, %v1059_v38  ;;  %v2568_v32 = vld [vmem:[%s4388_s0 + $0x170] sm:$0xf0]  ;;  %v2574_v33 = vld [vmem:[%s4388_s0 + $0x168] sm:$0xf] }
  0xb1   :  { %v1564_v43 = vadd.f32 %v1563_v34, %v1395_v37  ;;  %1098 = vmatmul.bf16.gmra.mxu0 %v2535_v35  ;;  %v1229_v47 = vadd.f32 %v1228_v39, %v1060_v42  ;;  %v3075_v34 = vld [vmem:[%s4388_s0 + $0x174] sm:$0xf0]  ;;  %v3073_v35 = vld [vmem:[%s4388_s0 + $0x16c] sm:$0xf]  ;;  %v2571_v42 = vor.u32 %v3072_v29, %v2568_v32  ;;  %v2598_v32 = vld [vmem:[%s4388_s0 + $0x1a0] sm:$0xf] }
  0xb2   :  { %1267 = vmatmul.bf16.gmra.mxu1 %v2539_v36  ;;  %v2576_v36 = vld [vmem:[%s4388_s0 + $0x178] sm:$0xf0] }
  0xb3   :  { %v2108_v45 = vadd.f32 %v1564_v43, %v1562_v22  ;;  %v2179_v46 = vmul.f32 %v1564_v43, %v1564_v43  ;;  %2313 = vst [vmem:[%s4389_s3 + $0x8] sm:$0xff] %v1564_v43  ;;  %1436 = vmatmul.bf16.gmra.mxu2 %v2543_v40 }
  0xb4   :  { %1605 = vmatmul.bf16.gmra.mxu3 %v2547_v41  ;;  %v2567_v41 = vor.u32 %v3074_v28, %v2566_v27 }
  0xb5   :  { %v2242_v48 = vadd.f32 %v2179_v46, %v2178_v44  ;;  %v2575_v46 = vor.u32 %v3075_v34, %v2574_v33  ;;  %v3082_v33 = vld [vmem:[%s4388_s0 + $0x1ac] sm:$0xf0]  ;;  %v3080_v34 = vld [vmem:[%s4388_s0 + $0x1a4] sm:$0xf] }
  0xb6   :  { %v1397_v49 = vpop.f32.mrf.mxu2  ;;  %v1061_v52 = vpop.f32.mrf.mxu0 }
  0xb7   :  { %v1566_v50 = vpop.f32.mrf.mxu3  ;;  %v1398_v51 = vadd.f32 %v1397_v49, %v1229_v47  ;;  %v1230_v53 = vpop.f32.mrf.mxu1  ;;  %v1062_v55 = vadd.f32 %v3512_v0, %v1061_v52  ;;  %v2579_v47 = vor.u32 %v3073_v35, %v2576_v36 }
  0xb9   :  { %v1567_v54 = vadd.f32 %v1566_v50, %v1398_v51  ;;  %v1231_v4 = vadd.f32 %v1230_v53, %v1062_v55 }
  0xbb   :  { %v2109_v59 = vadd.f32 %v2108_v45, %v1567_v54  ;;  %v2180_v60 = vmul.f32 %v1567_v54, %v1567_v54  ;;  %2314 = vst [vmem:[%s4389_s3 + $0x10] sm:$0xff] %v1567_v54 }
  0xbd   :  { %v2243_v3 = vadd.f32 %v2242_v48, %v2180_v60 }
  0xbe   :  { %v1399_v5 = vpop.f32.mrf.mxu2  ;;  %v1064_v10 = vpop.f32.mrf.mxu0 }
  0xbf   :  { %v1568_v6 = vpop.f32.mrf.mxu3  ;;  %v1400_v9 = vadd.f32 %v1399_v5, %v1231_v4  ;;  %v1233_v11 = vpop.f32.mrf.mxu1  ;;  %v1065_v14 = vadd.f32 %v3512_v0, %v1064_v10  ;;  %v2590_v4 = vld [vmem:[%s4388_s0 + $0x188] sm:$0xf]  ;;  %v3079_v5 = vld [vmem:[%s4388_s0 + $0x194] sm:$0xf0] }
  0xc1   :  { %v1569_v15 = vadd.f32 %v1568_v6, %v1400_v9  ;;  %1103 = vmatmul.bf16.gmra.mxu0 %v2551_v7  ;;  %v1234_v18 = vadd.f32 %v1233_v11, %v1065_v14  ;;  %v3077_v6 = vld [vmem:[%s4388_s0 + $0x18c] sm:$0xf]  ;;  %v2592_v7 = vld [vmem:[%s4388_s0 + $0x198] sm:$0xf0] }
  0xc2   :  { %1272 = vmatmul.bf16.gmra.mxu1 %v2555_v8 }
  0xc3   :  { %v2110_v16 = vadd.f32 %v2109_v59, %v1569_v15  ;;  %v2181_v17 = vmul.f32 %v1569_v15, %v1569_v15  ;;  %2315 = vst [vmem:[%s4389_s3 + $0x18] sm:$0xff] %v1569_v15  ;;  %1441 = vmatmul.bf16.gmra.mxu2 %v2559_v12  ;;  %v2583_v12 = vor.u32 %v3078_v62, %v2582_v61 }
  0xc4   :  { %1610 = vmatmul.bf16.gmra.mxu3 %v2563_v13 }
  0xc5   :  { %v2244_v19 = vadd.f32 %v2243_v3, %v2181_v17  ;;  %v2584_v3 = vld [vmem:[%s4388_s0 + $0x190] sm:$0xf0]  ;;  %v2591_v17 = vor.u32 %v3079_v5, %v2590_v4  ;;  %v3086_v4 = vld [vmem:[%s4388_s0 + $0x1cc] sm:$0xf0]  ;;  %v3084_v5 = vld [vmem:[%s4388_s0 + $0x1c4] sm:$0xf] }
  0xc6   :  { %v1402_v20 = vpop.f32.mrf.mxu2  ;;  %v1066_v23 = vpop.f32.mrf.mxu0  ;;  %v2587_v13 = vor.u32 %v3076_v63, %v2584_v3  ;;  %v2614_v3 = vld [vmem:[%s4388_s0 + $0x1c0] sm:$0xf] }
  0xc7   :  { %v1571_v21 = vpop.f32.mrf.mxu3  ;;  %v1403_v22 = vadd.f32 %v1402_v20, %v1234_v18  ;;  %v1235_v24 = vpop.f32.mrf.mxu1  ;;  %v1067_v26 = vadd.f32 %v3512_v0, %v1066_v23  ;;  %v2595_v18 = vor.u32 %v3077_v6, %v2592_v7 }
  0xc9   :  { %v1572_v25 = vadd.f32 %v1571_v21, %v1403_v22  ;;  %v1236_v38 = vadd.f32 %v1235_v24, %v1067_v26 }
  0xcb   :  { %v2111_v30 = vadd.f32 %v2110_v16, %v1572_v25  ;;  %v2182_v31 = vmul.f32 %v1572_v25, %v1572_v25  ;;  %2316 = vst [vmem:[%s4389_s3 + $0x20] sm:$0xff] %v1572_v25 }
  0xcd   :  { %v2245_v37 = vadd.f32 %v2244_v19, %v2182_v31 }
  0xce   :  { %v1404_v39 = vpop.f32.mrf.mxu2  ;;  %v1069_v44 = vpop.f32.mrf.mxu0 }
  0xcf   :  { %v1573_v40 = vpop.f32.mrf.mxu3  ;;  %v1405_v43 = vadd.f32 %v1404_v39, %v1236_v38  ;;  %v1238_v45 = vpop.f32.mrf.mxu1  ;;  %v1070_v48 = vadd.f32 %v3512_v0, %v1069_v44  ;;  %v2606_v38 = vld [vmem:[%s4388_s0 + $0x1a8] sm:$0xf]  ;;  %v3083_v39 = vld [vmem:[%s4388_s0 + $0x1b4] sm:$0xf0] }
  0xd1   :  { %v1574_v49 = vadd.f32 %v1573_v40, %v1405_v43  ;;  %1108 = vmatmul.bf16.gmra.mxu0 %v2567_v41  ;;  %v1239_v52 = vadd.f32 %v1238_v45, %v1070_v48  ;;  %v3081_v40 = vld [vmem:[%s4388_s0 + $0x1ac] sm:$0xf]  ;;  %v2608_v41 = vld [vmem:[%s4388_s0 + $0x1b8] sm:$0xf0] }
  0xd2   :  { %1277 = vmatmul.bf16.gmra.mxu1 %v2571_v42 }
  0xd3   :  { %v2112_v50 = vadd.f32 %v2111_v30, %v1574_v49  ;;  %v2183_v51 = vmul.f32 %v1574_v49, %v1574_v49  ;;  %2317 = vst [vmem:[%s4389_s3 + $0x28] sm:$0xff] %v1574_v49  ;;  %1446 = vmatmul.bf16.gmra.mxu2 %v2575_v46  ;;  %v2599_v46 = vor.u32 %v3082_v33, %v2598_v32 }
  0xd4   :  { %1615 = vmatmul.bf16.gmra.mxu3 %v2579_v47 }
  0xd5   :  { %v2246_v53 = vadd.f32 %v2245_v37, %v2183_v51  ;;  %v2600_v37 = vld [vmem:[%s4388_s0 + $0x1b0] sm:$0xf0]  ;;  %v2607_v51 = vor.u32 %v3083_v39, %v2606_v38  ;;  %v3090_v38 = vld [vmem:[%s4388_s0 + $0x1ec] sm:$0xf0]  ;;  %v3088_v39 = vld [vmem:[%s4388_s0 + $0x1e4] sm:$0xf] }
  0xd6   :  { %v1407_v54 = vpop.f32.mrf.mxu2  ;;  %v1071_v57 = vpop.f32.mrf.mxu0  ;;  %v2603_v47 = vor.u32 %v3080_v34, %v2600_v37  ;;  %v2630_v37 = vld [vmem:[%s4388_s0 + $0x1e0] sm:$0xf] }
  0xd7   :  { %v1576_v55 = vpop.f32.mrf.mxu3  ;;  %v1408_v56 = vadd.f32 %v1407_v54, %v1239_v52  ;;  %v1240_v58 = vpop.f32.mrf.mxu1  ;;  %v1072_v60 = vadd.f32 %v3512_v0, %v1071_v57  ;;  %v2611_v52 = vor.u32 %v3081_v40, %v2608_v41 }
  0xd9   :  { %v1577_v59 = vadd.f32 %v1576_v55, %v1408_v56  ;;  %v1241_v9 = vadd.f32 %v1240_v58, %v1072_v60 }
  0xdb   :  { %v2113_v1 = vadd.f32 %v2112_v50, %v1577_v59  ;;  %v2184_v2 = vmul.f32 %v1577_v59, %v1577_v59  ;;  %2318 = vst [vmem:[%s4389_s3 + $0x30] sm:$0xff] %v1577_v59 }
  0xdd   :  { %v2247_v8 = vadd.f32 %v2246_v53, %v2184_v2 }
  0xde   :  { %v1409_v10 = vpop.f32.mrf.mxu2  ;;  %v1074_v15 = vpop.f32.mrf.mxu0 }
  0xdf   :  { %v1578_v11 = vpop.f32.mrf.mxu3  ;;  %v1410_v14 = vadd.f32 %v1409_v10, %v1241_v9  ;;  %v1243_v16 = vpop.f32.mrf.mxu1  ;;  %v1075_v19 = vadd.f32 %v3512_v0, %v1074_v15  ;;  %v2622_v9 = vld [vmem:[%s4388_s0 + $0x1c8] sm:$0xf]  ;;  %v3087_v10 = vld [vmem:[%s4388_s0 + $0x1d4] sm:$0xf0] }
  0xe1   :  { %v1579_v20 = vadd.f32 %v1578_v11, %v1410_v14  ;;  %1113 = vmatmul.bf16.gmra.mxu0 %v2583_v12  ;;  %v1244_v23 = vadd.f32 %v1243_v16, %v1075_v19  ;;  %v3085_v11 = vld [vmem:[%s4388_s0 + $0x1cc] sm:$0xf]  ;;  %v2624_v12 = vld [vmem:[%s4388_s0 + $0x1d8] sm:$0xf0] }
  0xe2   :  { %1282 = vmatmul.bf16.gmra.mxu1 %v2587_v13 }
  0xe3   :  { %v2114_v21 = vadd.f32 %v2113_v1, %v1579_v20  ;;  %v2185_v22 = vmul.f32 %v1579_v20, %v1579_v20  ;;  %2319 = vst [vmem:[%s4389_s3 + $0x38] sm:$0xff] %v1579_v20  ;;  %1451 = vmatmul.bf16.gmra.mxu2 %v2591_v17  ;;  %v2615_v17 = vor.u32 %v3086_v4, %v2614_v3 }
  0xe4   :  { %1620 = vmatmul.bf16.gmra.mxu3 %v2595_v18 }
  0xe5   :  { %v2248_v24 = vadd.f32 %v2247_v8, %v2185_v22  ;;  %v2616_v8 = vld [vmem:[%s4388_s0 + $0x1d0] sm:$0xf0]  ;;  %v2623_v22 = vor.u32 %v3087_v10, %v2622_v9  ;;  %v3094_v9 = vld [vmem:[%s4388_s0 + $0x20c] sm:$0xf0]  ;;  %v3092_v10 = vld [vmem:[%s4388_s0 + $0x204] sm:$0xf] }
  0xe6   :  { %v1412_v25 = vpop.f32.mrf.mxu2  ;;  %v1076_v28 = vpop.f32.mrf.mxu0  ;;  %v2619_v18 = vor.u32 %v3084_v5, %v2616_v8  ;;  %v2646_v8 = vld [vmem:[%s4388_s0 + $0x200] sm:$0xf] }
  0xe7   :  { %v1581_v26 = vpop.f32.mrf.mxu3  ;;  %v1413_v27 = vadd.f32 %v1412_v25, %v1244_v23  ;;  %v1245_v29 = vpop.f32.mrf.mxu1  ;;  %v1077_v31 = vadd.f32 %v3512_v0, %v1076_v28  ;;  %v2627_v23 = vor.u32 %v3085_v11, %v2624_v12 }
  0xe9   :  { %v1582_v30 = vadd.f32 %v1581_v26, %v1413_v27  ;;  %v1246_v43 = vadd.f32 %v1245_v29, %v1077_v31 }
  0xeb   :  { %v2115_v35 = vadd.f32 %v2114_v21, %v1582_v30  ;;  %v2186_v36 = vmul.f32 %v1582_v30, %v1582_v30  ;;  %2320 = vst [vmem:[%s4389_s3 + $0x40] sm:$0xff] %v1582_v30 }
  0xed   :  { %v2249_v42 = vadd.f32 %v2248_v24, %v2186_v36 }
  0xee   :  { %v1414_v44 = vpop.f32.mrf.mxu2  ;;  %v1079_v49 = vpop.f32.mrf.mxu0 }
  0xef   :  { %v1583_v45 = vpop.f32.mrf.mxu3  ;;  %v1415_v48 = vadd.f32 %v1414_v44, %v1246_v43  ;;  %v1248_v50 = vpop.f32.mrf.mxu1  ;;  %v1080_v53 = vadd.f32 %v3512_v0, %v1079_v49  ;;  %v2638_v43 = vld [vmem:[%s4388_s0 + $0x1e8] sm:$0xf]  ;;  %v3091_v44 = vld [vmem:[%s4388_s0 + $0x1f4] sm:$0xf0] }
  0xf1   :  { %v1584_v54 = vadd.f32 %v1583_v45, %v1415_v48  ;;  %1118 = vmatmul.bf16.gmra.mxu0 %v2599_v46  ;;  %v1249_v57 = vadd.f32 %v1248_v50, %v1080_v53  ;;  %v3089_v45 = vld [vmem:[%s4388_s0 + $0x1ec] sm:$0xf]  ;;  %v2640_v46 = vld [vmem:[%s4388_s0 + $0x1f8] sm:$0xf0] }
  0xf2   :  { %1287 = vmatmul.bf16.gmra.mxu1 %v2603_v47 }
  0xf3   :  { %v2116_v55 = vadd.f32 %v2115_v35, %v1584_v54  ;;  %v2187_v56 = vmul.f32 %v1584_v54, %v1584_v54  ;;  %2321 = vst [vmem:[%s4389_s3 + $0x48] sm:$0xff] %v1584_v54  ;;  %1456 = vmatmul.bf16.gmra.mxu2 %v2607_v51  ;;  %v2631_v51 = vor.u32 %v3090_v38, %v2630_v37 }
  0xf4   :  { %1625 = vmatmul.bf16.gmra.mxu3 %v2611_v52 }
  0xf5   :  { %v2250_v58 = vadd.f32 %v2249_v42, %v2187_v56  ;;  %v2632_v42 = vld [vmem:[%s4388_s0 + $0x1f0] sm:$0xf0]  ;;  %v2639_v56 = vor.u32 %v3091_v44, %v2638_v43  ;;  %v3098_v43 = vld [vmem:[%s4388_s0 + $0x22c] sm:$0xf0]  ;;  %v3096_v44 = vld [vmem:[%s4388_s0 + $0x224] sm:$0xf] }
  0xf6   :  { %v1417_v59 = vpop.f32.mrf.mxu2  ;;  %v1081_v62 = vpop.f32.mrf.mxu0  ;;  %v2635_v52 = vor.u32 %v3088_v39, %v2632_v42  ;;  %v2662_v42 = vld [vmem:[%s4388_s0 + $0x220] sm:$0xf] }
  0xf7   :  { %v1586_v60 = vpop.f32.mrf.mxu3  ;;  %v1418_v61 = vadd.f32 %v1417_v59, %v1249_v57  ;;  %v1250_v63 = vpop.f32.mrf.mxu1  ;;  %v1082_v2 = vadd.f32 %v3512_v0, %v1081_v62  ;;  %v2643_v57 = vor.u32 %v3089_v45, %v2640_v46 }
  0xf9   :  { %v1587_v1 = vadd.f32 %v1586_v60, %v1418_v61  ;;  %v1251_v14 = vadd.f32 %v1250_v63, %v1082_v2 }
  0xfb   :  { %v2117_v6 = vadd.f32 %v2116_v55, %v1587_v1  ;;  %v2188_v7 = vmul.f32 %v1587_v1, %v1587_v1  ;;  %2322 = vst [vmem:[%s4389_s3 + $0x50] sm:$0xff] %v1587_v1 }
  0xfd   :  { %v2251_v13 = vadd.f32 %v2250_v58, %v2188_v7 }
  0xfe   :  { %v1419_v15 = vpop.f32.mrf.mxu2  ;;  %v1084_v20 = vpop.f32.mrf.mxu0 }
  0xff   :  { %v1588_v16 = vpop.f32.mrf.mxu3  ;;  %v1420_v19 = vadd.f32 %v1419_v15, %v1251_v14  ;;  %v1253_v21 = vpop.f32.mrf.mxu1  ;;  %v1085_v24 = vadd.f32 %v3512_v0, %v1084_v20  ;;  %v2654_v14 = vld [vmem:[%s4388_s0 + $0x208] sm:$0xf]  ;;  %v3095_v15 = vld [vmem:[%s4388_s0 + $0x214] sm:$0xf0] }
 0x101   :  { %v1589_v25 = vadd.f32 %v1588_v16, %v1420_v19  ;;  %1123 = vmatmul.bf16.gmra.mxu0 %v2615_v17  ;;  %v1254_v28 = vadd.f32 %v1253_v21, %v1085_v24  ;;  %v3093_v16 = vld [vmem:[%s4388_s0 + $0x20c] sm:$0xf]  ;;  %v2656_v17 = vld [vmem:[%s4388_s0 + $0x218] sm:$0xf0] }
 0x102   :  { %1292 = vmatmul.bf16.gmra.mxu1 %v2619_v18 }
 0x103   :  { %v2118_v26 = vadd.f32 %v2117_v6, %v1589_v25  ;;  %v2189_v27 = vmul.f32 %v1589_v25, %v1589_v25  ;;  %2323 = vst [vmem:[%s4389_s3 + $0x58] sm:$0xff] %v1589_v25  ;;  %1461 = vmatmul.bf16.gmra.mxu2 %v2623_v22  ;;  %v2647_v22 = vor.u32 %v3094_v9, %v2646_v8 }
 0x104   :  { %1630 = vmatmul.bf16.gmra.mxu3 %v2627_v23 }
 0x105   :  { %v2252_v29 = vadd.f32 %v2251_v13, %v2189_v27  ;;  %v2648_v13 = vld [vmem:[%s4388_s0 + $0x210] sm:$0xf0]  ;;  %v2655_v27 = vor.u32 %v3095_v15, %v2654_v14  ;;  %v3102_v14 = vld [vmem:[%s4388_s0 + $0x24c] sm:$0xf0]  ;;  %v3100_v15 = vld [vmem:[%s4388_s0 + $0x244] sm:$0xf] }
 0x106   :  { %v1422_v30 = vpop.f32.mrf.mxu2  ;;  %v1086_v33 = vpop.f32.mrf.mxu0  ;;  %v2651_v23 = vor.u32 %v3092_v10, %v2648_v13  ;;  %v2678_v13 = vld [vmem:[%s4388_s0 + $0x240] sm:$0xf] }
 0x107   :  { %v1591_v31 = vpop.f32.mrf.mxu3  ;;  %v1423_v32 = vadd.f32 %v1422_v30, %v1254_v28  ;;  %v1255_v34 = vpop.f32.mrf.mxu1  ;;  %v1087_v36 = vadd.f32 %v3512_v0, %v1086_v33  ;;  %v2659_v28 = vor.u32 %v3093_v16, %v2656_v17 }
 0x109   :  { %v1592_v35 = vadd.f32 %v1591_v31, %v1423_v32  ;;  %v1256_v48 = vadd.f32 %v1255_v34, %v1087_v36 }
 0x10b   :  { %v2119_v40 = vadd.f32 %v2118_v26, %v1592_v35  ;;  %v2190_v41 = vmul.f32 %v1592_v35, %v1592_v35  ;;  %2324 = vst [vmem:[%s4389_s3 + $0x60] sm:$0xff] %v1592_v35 }
 0x10d   :  { %v2253_v47 = vadd.f32 %v2252_v29, %v2190_v41 }
 0x10e   :  { %v1424_v49 = vpop.f32.mrf.mxu2  ;;  %v1089_v54 = vpop.f32.mrf.mxu0 }
 0x10f   :  { %v1593_v50 = vpop.f32.mrf.mxu3  ;;  %v1425_v53 = vadd.f32 %v1424_v49, %v1256_v48  ;;  %v1258_v55 = vpop.f32.mrf.mxu1  ;;  %v1090_v58 = vadd.f32 %v3512_v0, %v1089_v54  ;;  %v2670_v48 = vld [vmem:[%s4388_s0 + $0x228] sm:$0xf]  ;;  %v3099_v49 = vld [vmem:[%s4388_s0 + $0x234] sm:$0xf0] }
 0x111   :  { %v1594_v59 = vadd.f32 %v1593_v50, %v1425_v53  ;;  %1128 = vmatmul.bf16.gmra.mxu0 %v2631_v51  ;;  %v1259_v62 = vadd.f32 %v1258_v55, %v1090_v58  ;;  %v3097_v50 = vld [vmem:[%s4388_s0 + $0x22c] sm:$0xf]  ;;  %v2672_v51 = vld [vmem:[%s4388_s0 + $0x238] sm:$0xf0] }
 0x112   :  { %1297 = vmatmul.bf16.gmra.mxu1 %v2635_v52 }
 0x113   :  { %v2120_v60 = vadd.f32 %v2119_v40, %v1594_v59  ;;  %v2191_v61 = vmul.f32 %v1594_v59, %v1594_v59  ;;  %2325 = vst [vmem:[%s4389_s3 + $0x68] sm:$0xff] %v1594_v59  ;;  %1466 = vmatmul.bf16.gmra.mxu2 %v2639_v56  ;;  %v2663_v56 = vor.u32 %v3098_v43, %v2662_v42 }
 0x114   :  { %1635 = vmatmul.bf16.gmra.mxu3 %v2643_v57 }
 0x115   :  { %v2254_v63 = vadd.f32 %v2253_v47, %v2191_v61  ;;  %v2664_v47 = vld [vmem:[%s4388_s0 + $0x230] sm:$0xf0]  ;;  %v2671_v61 = vor.u32 %v3099_v49, %v2670_v48  ;;  %v3106_v48 = vld [vmem:[%s4388_s0 + $0x26c] sm:$0xf0]  ;;  %v3104_v49 = vld [vmem:[%s4388_s0 + $0x264] sm:$0xf] }
 0x116   :  { %v1427_v1 = vpop.f32.mrf.mxu2  ;;  %v1091_v4 = vpop.f32.mrf.mxu0  ;;  %v2667_v57 = vor.u32 %v3096_v44, %v2664_v47  ;;  %v2694_v47 = vld [vmem:[%s4388_s0 + $0x260] sm:$0xf] }
 0x117   :  { %v1596_v2 = vpop.f32.mrf.mxu3  ;;  %v1428_v3 = vadd.f32 %v1427_v1, %v1259_v62  ;;  %v1260_v5 = vpop.f32.mrf.mxu1  ;;  %v1092_v7 = vadd.f32 %v3512_v0, %v1091_v4  ;;  %v2675_v62 = vor.u32 %v3097_v50, %v2672_v51 }
 0x119   :  { %v1597_v6 = vadd.f32 %v1596_v2, %v1428_v3  ;;  %v1261_v19 = vadd.f32 %v1260_v5, %v1092_v7 }
 0x11b   :  { %v2121_v11 = vadd.f32 %v2120_v60, %v1597_v6  ;;  %v2192_v12 = vmul.f32 %v1597_v6, %v1597_v6  ;;  %2326 = vst [vmem:[%s4389_s3 + $0x70] sm:$0xff] %v1597_v6 }
 0x11d   :  { %v2255_v18 = vadd.f32 %v2254_v63, %v2192_v12 }
 0x11e   :  { %v1429_v20 = vpop.f32.mrf.mxu2  ;;  %v1094_v25 = vpop.f32.mrf.mxu0 }
 0x11f   :  { %v1598_v21 = vpop.f32.mrf.mxu3  ;;  %v1430_v24 = vadd.f32 %v1429_v20, %v1261_v19  ;;  %v1263_v26 = vpop.f32.mrf.mxu1  ;;  %v1095_v29 = vadd.f32 %v3512_v0, %v1094_v25  ;;  %v2686_v19 = vld [vmem:[%s4388_s0 + $0x248] sm:$0xf]  ;;  %v3103_v20 = vld [vmem:[%s4388_s0 + $0x254] sm:$0xf0] }
 0x121   :  { %v1599_v30 = vadd.f32 %v1598_v21, %v1430_v24  ;;  %1133 = vmatmul.bf16.gmra.mxu0 %v2647_v22  ;;  %v1264_v33 = vadd.f32 %v1263_v26, %v1095_v29  ;;  %v3101_v21 = vld [vmem:[%s4388_s0 + $0x24c] sm:$0xf]  ;;  %v2688_v22 = vld [vmem:[%s4388_s0 + $0x258] sm:$0xf0] }
 0x122   :  { %1302 = vmatmul.bf16.gmra.mxu1 %v2651_v23 }
 0x123   :  { %v2122_v31 = vadd.f32 %v2121_v11, %v1599_v30  ;;  %v2193_v32 = vmul.f32 %v1599_v30, %v1599_v30  ;;  %2327 = vst [vmem:[%s4389_s3 + $0x78] sm:$0xff] %v1599_v30  ;;  %1471 = vmatmul.bf16.gmra.mxu2 %v2655_v27  ;;  %v2679_v27 = vor.u32 %v3102_v14, %v2678_v13 }
 0x124   :  { %1640 = vmatmul.bf16.gmra.mxu3 %v2659_v28 }
 0x125   :  { %v2256_v34 = vadd.f32 %v2255_v18, %v2193_v32  ;;  %v2680_v18 = vld [vmem:[%s4388_s0 + $0x250] sm:$0xf0]  ;;  %v2687_v32 = vor.u32 %v3103_v20, %v2686_v19  ;;  %v3110_v19 = vld [vmem:[%s4388_s0 + $0x28c] sm:$0xf0]  ;;  %v3108_v20 = vld [vmem:[%s4388_s0 + $0x284] sm:$0xf] }
 0x126   :  { %v1432_v35 = vpop.f32.mrf.mxu2  ;;  %v1096_v38 = vpop.f32.mrf.mxu0  ;;  %v2683_v28 = vor.u32 %v3100_v15, %v2680_v18  ;;  %v2710_v18 = vld [vmem:[%s4388_s0 + $0x280] sm:$0xf] }
 0x127   :  { %v1601_v36 = vpop.f32.mrf.mxu3  ;;  %v1433_v37 = vadd.f32 %v1432_v35, %v1264_v33  ;;  %v1265_v39 = vpop.f32.mrf.mxu1  ;;  %v1097_v41 = vadd.f32 %v3512_v0, %v1096_v38  ;;  %v2691_v33 = vor.u32 %v3101_v21, %v2688_v22 }
 0x129   :  { %v1602_v40 = vadd.f32 %v1601_v36, %v1433_v37  ;;  %v1266_v53 = vadd.f32 %v1265_v39, %v1097_v41 }
 0x12b   :  { %v2123_v45 = vadd.f32 %v2122_v31, %v1602_v40  ;;  %v2194_v46 = vmul.f32 %v1602_v40, %v1602_v40  ;;  %2328 = vst [vmem:[%s4389_s3 + $0x80] sm:$0xff] %v1602_v40 }
 0x12d   :  { %v2257_v52 = vadd.f32 %v2256_v34, %v2194_v46 }
 0x12e   :  { %v1434_v54 = vpop.f32.mrf.mxu2  ;;  %v1099_v59 = vpop.f32.mrf.mxu0 }
 0x12f   :  { %v1603_v55 = vpop.f32.mrf.mxu3  ;;  %v1435_v58 = vadd.f32 %v1434_v54, %v1266_v53  ;;  %v1268_v60 = vpop.f32.mrf.mxu1  ;;  %v1100_v63 = vadd.f32 %v3512_v0, %v1099_v59  ;;  %v2702_v53 = vld [vmem:[%s4388_s0 + $0x268] sm:$0xf]  ;;  %v3107_v54 = vld [vmem:[%s4388_s0 + $0x274] sm:$0xf0] }
 0x131   :  { %v1604_v1 = vadd.f32 %v1603_v55, %v1435_v58  ;;  %1138 = vmatmul.bf16.gmra.mxu0 %v2663_v56  ;;  %v1269_v4 = vadd.f32 %v1268_v60, %v1100_v63  ;;  %v3105_v55 = vld [vmem:[%s4388_s0 + $0x26c] sm:$0xf]  ;;  %v2704_v56 = vld [vmem:[%s4388_s0 + $0x278] sm:$0xf0] }
 0x132   :  { %1307 = vmatmul.bf16.gmra.mxu1 %v2667_v57 }
 0x133   :  { %v2124_v2 = vadd.f32 %v2123_v45, %v1604_v1  ;;  %v2195_v3 = vmul.f32 %v1604_v1, %v1604_v1  ;;  %2329 = vst [vmem:[%s4389_s3 + $0x88] sm:$0xff] %v1604_v1  ;;  %1476 = vmatmul.bf16.gmra.mxu2 %v2671_v61  ;;  %v2695_v61 = vor.u32 %v3106_v48, %v2694_v47 }
 0x134   :  { %1645 = vmatmul.bf16.gmra.mxu3 %v2675_v62 }
 0x135   :  { %v2258_v5 = vadd.f32 %v2257_v52, %v2195_v3  ;;  %v2696_v52 = vld [vmem:[%s4388_s0 + $0x270] sm:$0xf0]  ;;  %v2703_v3 = vor.u32 %v3107_v54, %v2702_v53  ;;  %v3114_v53 = vld [vmem:[%s4388_s0 + $0x2ac] sm:$0xf0]  ;;  %v3112_v54 = vld [vmem:[%s4388_s0 + $0x2a4] sm:$0xf] }
 0x136   :  { %v1437_v6 = vpop.f32.mrf.mxu2  ;;  %v1101_v9 = vpop.f32.mrf.mxu0  ;;  %v2699_v62 = vor.u32 %v3104_v49, %v2696_v52  ;;  %v2726_v52 = vld [vmem:[%s4388_s0 + $0x2a0] sm:$0xf] }
 0x137   :  { %v1606_v7 = vpop.f32.mrf.mxu3  ;;  %v1438_v8 = vadd.f32 %v1437_v6, %v1269_v4  ;;  %v1270_v10 = vpop.f32.mrf.mxu1  ;;  %v1102_v12 = vadd.f32 %v3512_v0, %v1101_v9  ;;  %v2707_v4 = vor.u32 %v3105_v55, %v2704_v56 }
 0x139   :  { %v1607_v11 = vadd.f32 %v1606_v7, %v1438_v8  ;;  %v1271_v24 = vadd.f32 %v1270_v10, %v1102_v12 }
 0x13b   :  { %v2125_v16 = vadd.f32 %v2124_v2, %v1607_v11  ;;  %v2196_v17 = vmul.f32 %v1607_v11, %v1607_v11  ;;  %2330 = vst [vmem:[%s4389_s3 + $0x90] sm:$0xff] %v1607_v11 }
 0x13d   :  { %v2259_v23 = vadd.f32 %v2258_v5, %v2196_v17 }
 0x13e   :  { %v1439_v25 = vpop.f32.mrf.mxu2  ;;  %v1104_v30 = vpop.f32.mrf.mxu0 }
 0x13f   :  { %v1608_v26 = vpop.f32.mrf.mxu3  ;;  %v1440_v29 = vadd.f32 %v1439_v25, %v1271_v24  ;;  %v1273_v31 = vpop.f32.mrf.mxu1  ;;  %v1105_v34 = vadd.f32 %v3512_v0, %v1104_v30  ;;  %v2718_v24 = vld [vmem:[%s4388_s0 + $0x288] sm:$0xf]  ;;  %v3111_v25 = vld [vmem:[%s4388_s0 + $0x294] sm:$0xf0] }
 0x141   :  { %v1609_v35 = vadd.f32 %v1608_v26, %v1440_v29  ;;  %1143 = vmatmul.bf16.gmra.mxu0 %v2679_v27  ;;  %v1274_v38 = vadd.f32 %v1273_v31, %v1105_v34  ;;  %v3109_v26 = vld [vmem:[%s4388_s0 + $0x28c] sm:$0xf]  ;;  %v2720_v27 = vld [vmem:[%s4388_s0 + $0x298] sm:$0xf0] }
 0x142   :  { %1312 = vmatmul.bf16.gmra.mxu1 %v2683_v28 }
 0x143   :  { %v2126_v36 = vadd.f32 %v2125_v16, %v1609_v35  ;;  %v2197_v37 = vmul.f32 %v1609_v35, %v1609_v35  ;;  %2331 = vst [vmem:[%s4389_s3 + $0x98] sm:$0xff] %v1609_v35  ;;  %1481 = vmatmul.bf16.gmra.mxu2 %v2687_v32  ;;  %v2711_v32 = vor.u32 %v3110_v19, %v2710_v18 }
 0x144   :  { %1650 = vmatmul.bf16.gmra.mxu3 %v2691_v33 }
 0x145   :  { %v2260_v39 = vadd.f32 %v2259_v23, %v2197_v37  ;;  %v2712_v23 = vld [vmem:[%s4388_s0 + $0x290] sm:$0xf0]  ;;  %v2719_v37 = vor.u32 %v3111_v25, %v2718_v24  ;;  %v3118_v24 = vld [vmem:[%s4388_s0 + $0x2cc] sm:$0xf0]  ;;  %v3116_v25 = vld [vmem:[%s4388_s0 + $0x2c4] sm:$0xf] }
 0x146   :  { %v1442_v40 = vpop.f32.mrf.mxu2  ;;  %v1106_v43 = vpop.f32.mrf.mxu0  ;;  %v2715_v33 = vor.u32 %v3108_v20, %v2712_v23  ;;  %v2742_v23 = vld [vmem:[%s4388_s0 + $0x2c0] sm:$0xf] }
 0x147   :  { %v1611_v41 = vpop.f32.mrf.mxu3  ;;  %v1443_v42 = vadd.f32 %v1442_v40, %v1274_v38  ;;  %v1275_v44 = vpop.f32.mrf.mxu1  ;;  %v1107_v46 = vadd.f32 %v3512_v0, %v1106_v43  ;;  %v2723_v38 = vor.u32 %v3109_v26, %v2720_v27 }
 0x149   :  { %v1612_v45 = vadd.f32 %v1611_v41, %v1443_v42  ;;  %v1276_v58 = vadd.f32 %v1275_v44, %v1107_v46 }
 0x14b   :  { %v2127_v50 = vadd.f32 %v2126_v36, %v1612_v45  ;;  %v2198_v51 = vmul.f32 %v1612_v45, %v1612_v45  ;;  %2332 = vst [vmem:[%s4389_s3 + $0xa0] sm:$0xff] %v1612_v45 }
 0x14d   :  { %v2261_v57 = vadd.f32 %v2260_v39, %v2198_v51 }
 0x14e   :  { %v1444_v59 = vpop.f32.mrf.mxu2  ;;  %v1109_v1 = vpop.f32.mrf.mxu0 }
 0x14f   :  { %v1613_v60 = vpop.f32.mrf.mxu3  ;;  %v1445_v63 = vadd.f32 %v1444_v59, %v1276_v58  ;;  %v1278_v2 = vpop.f32.mrf.mxu1  ;;  %v1110_v5 = vadd.f32 %v3512_v0, %v1109_v1  ;;  %v3115_v58 = vld [vmem:[%s4388_s0 + $0x2b4] sm:$0xf0]  ;;  %v3113_v59 = vld [vmem:[%s4388_s0 + $0x2ac] sm:$0xf] }
 0x151   :  { %v1614_v6 = vadd.f32 %v1613_v60, %v1445_v63  ;;  %1148 = vmatmul.bf16.gmra.mxu0 %v2695_v61  ;;  %v1279_v9 = vadd.f32 %v1278_v2, %v1110_v5  ;;  %v2736_v60 = vld [vmem:[%s4388_s0 + $0x2b8] sm:$0xf0]  ;;  %v2727_v2 = vor.u32 %v3114_v53, %v2726_v52 }
 0x152   :  { %1317 = vmatmul.bf16.gmra.mxu1 %v2699_v62 }
 0x153   :  { %v2128_v7 = vadd.f32 %v2127_v50, %v1614_v6  ;;  %v2199_v8 = vmul.f32 %v1614_v6, %v1614_v6  ;;  %2333 = vst [vmem:[%s4389_s3 + $0xa8] sm:$0xff] %v1614_v6  ;;  %1486 = vmatmul.bf16.gmra.mxu2 %v2703_v3 }
 0x154   :  { %1655 = vmatmul.bf16.gmra.mxu3 %v2707_v4 }
 0x155   :  { %v2262_v10 = vadd.f32 %v2261_v57, %v2199_v8  ;;  %v2734_v57 = vld [vmem:[%s4388_s0 + $0x2a8] sm:$0xf]  ;;  %v2739_v8 = vor.u32 %v3113_v59, %v2736_v60 }
 0x156   :  { %v1447_v11 = vpop.f32.mrf.mxu2  ;;  %v1111_v14 = vpop.f32.mrf.mxu0 }
 0x157   :  { %v1616_v12 = vpop.f32.mrf.mxu3  ;;  %v1448_v13 = vadd.f32 %v1447_v11, %v1279_v9  ;;  %v1280_v15 = vpop.f32.mrf.mxu1  ;;  %v1112_v17 = vadd.f32 %v3512_v0, %v1111_v14  ;;  %v3954_v9 = vld [vmem:[%s4387_s2] ss:$0 sm:$0xff] }
 0x159   :  { %v1617_v16 = vadd.f32 %v1616_v12, %v1448_v13  ;;  %v1281_v29 = vadd.f32 %v1280_v15, %v1112_v17 }
 0x15b   :  { %v2129_v21 = vadd.f32 %v2128_v7, %v1617_v16  ;;  %v2200_v22 = vmul.f32 %v1617_v16, %v1617_v16  ;;  %2334 = vst [vmem:[%s4389_s3 + $0xb0] sm:$0xff] %v1617_v16  ;;  %v2735_v7 = vor.u32 %v3115_v58, %v2734_v57  ;;  %v3122_v57 = vld [vmem:[%s4388_s0 + $0x2ec] sm:$0xf0]  ;;  %v3120_v58 = vld [vmem:[%s4388_s0 + $0x2e4] sm:$0xf] }
 0x15d   :  { %v2263_v28 = vadd.f32 %v2262_v10, %v2200_v22 }
 0x15e   :  { %v1449_v30 = vpop.f32.mrf.mxu2  ;;  %v1114_v35 = vpop.f32.mrf.mxu0 }
 0x15f   :  { %v1618_v31 = vpop.f32.mrf.mxu3  ;;  %v1450_v34 = vadd.f32 %v1449_v30, %v1281_v29  ;;  %v1283_v36 = vpop.f32.mrf.mxu1  ;;  %v1115_v39 = vadd.f32 %v3512_v0, %v1114_v35  ;;  %v2750_v29 = vld [vmem:[%s4388_s0 + $0x2c8] sm:$0xf]  ;;  %v3119_v30 = vld [vmem:[%s4388_s0 + $0x2d4] sm:$0xf0] }
 0x161   :  { %v1619_v40 = vadd.f32 %v1618_v31, %v1450_v34  ;;  %1153 = vmatmul.bf16.gmra.mxu0 %v2711_v32  ;;  %v1284_v43 = vadd.f32 %v1283_v36, %v1115_v39  ;;  %v3117_v31 = vld [vmem:[%s4388_s0 + $0x2cc] sm:$0xf]  ;;  %v2752_v32 = vld [vmem:[%s4388_s0 + $0x2d8] sm:$0xf0] }
 0x162   :  { %1322 = vmatmul.bf16.gmra.mxu1 %v2715_v33 }
 0x163   :  { %v2130_v41 = vadd.f32 %v2129_v21, %v1619_v40  ;;  %v2201_v42 = vmul.f32 %v1619_v40, %v1619_v40  ;;  %2335 = vst [vmem:[%s4389_s3 + $0xb8] sm:$0xff] %v1619_v40  ;;  %1491 = vmatmul.bf16.gmra.mxu2 %v2719_v37  ;;  %v2743_v37 = vor.u32 %v3118_v24, %v2742_v23 }
 0x164   :  { %1660 = vmatmul.bf16.gmra.mxu3 %v2723_v38 }
 0x165   :  { %v2264_v44 = vadd.f32 %v2263_v28, %v2201_v42  ;;  %v2744_v28 = vld [vmem:[%s4388_s0 + $0x2d0] sm:$0xf0]  ;;  %v2751_v42 = vor.u32 %v3119_v30, %v2750_v29  ;;  %v3126_v29 = vld [vmem:[%s4388_s0 + $0x30c] sm:$0xf0]  ;;  %v3124_v30 = vld [vmem:[%s4388_s0 + $0x304] sm:$0xf] }
 0x166   :  { %v1452_v45 = vpop.f32.mrf.mxu2  ;;  %v1116_v48 = vpop.f32.mrf.mxu0  ;;  %v2747_v38 = vor.u32 %v3116_v25, %v2744_v28  ;;  %v2774_v28 = vld [vmem:[%s4388_s0 + $0x300] sm:$0xf] }
 0x167   :  { %v1621_v46 = vpop.f32.mrf.mxu3  ;;  %v1453_v47 = vadd.f32 %v1452_v45, %v1284_v43  ;;  %v1285_v49 = vpop.f32.mrf.mxu1  ;;  %v1117_v51 = vadd.f32 %v3512_v0, %v1116_v48  ;;  %v2728_v0 = vld [vmem:[%s4388_s0 + $0x2b0] sm:$0xf0]  ;;  %v2755_v43 = vor.u32 %v3117_v31, %v2752_v32 }
 0x168   :  { %v2731_v3 = vor.u32 %v3112_v54, %v2728_v0  ;;  %v2758_v0 = vld [vmem:[%s4388_s0 + $0x2e0] sm:$0xf] }
 0x169   :  { %v1622_v50 = vadd.f32 %v1621_v46, %v1453_v47  ;;  %v1286_v62 = vadd.f32 %v1285_v49, %v1117_v51 }
 0x16b   :  { %v2131_v55 = vadd.f32 %v2130_v41, %v1622_v50  ;;  %v2202_v56 = vmul.f32 %v1622_v50, %v1622_v50  ;;  %2336 = vst [vmem:[%s4389_s3 + $0xc0] sm:$0xff] %v1622_v50 }
 0x16d   :  { %v2265_v61 = vadd.f32 %v2264_v44, %v2202_v56 }
 0x16e   :  { %v1454_v63 = vpop.f32.mrf.mxu2  ;;  %v1119_v5 = vpop.f32.mrf.mxu0 }
 0x16f   :  { %v1623_v1 = vpop.f32.mrf.mxu3  ;;  %v1455_v4 = vadd.f32 %v1454_v63, %v1286_v62  ;;  %v1288_v6 = vpop.f32.mrf.mxu1  ;;  %v1120_v10 = vadd.f32 %v3954_v9, %v1119_v5  ;;  %v2766_v62 = vld [vmem:[%s4388_s0 + $0x2e8] sm:$0xf]  ;;  %v3123_v63 = vld [vmem:[%s4388_s0 + $0x2f4] sm:$0xf0] }
 0x171   :  { %v1624_v11 = vadd.f32 %v1623_v1, %v1455_v4  ;;  %1158 = vmatmul.bf16.gmra.mxu0 %v2727_v2  ;;  %v1289_v14 = vadd.f32 %v1288_v6, %v1120_v10  ;;  %v3121_v1 = vld [vmem:[%s4388_s0 + $0x2ec] sm:$0xf]  ;;  %v2768_v2 = vld [vmem:[%s4388_s0 + $0x2f8] sm:$0xf0] }
 0x172   :  { %1327 = vmatmul.bf16.gmra.mxu1 %v2731_v3 }
 0x173   :  { %v2132_v12 = vadd.f32 %v2131_v55, %v1624_v11  ;;  %v2203_v13 = vmul.f32 %v1624_v11, %v1624_v11  ;;  %2337 = vst [vmem:[%s4389_s3 + $0xc8] sm:$0xff] %v1624_v11  ;;  %1496 = vmatmul.bf16.gmra.mxu2 %v2735_v7  ;;  %v2759_v7 = vor.u32 %v3122_v57, %v2758_v0 }
 0x174   :  { %1665 = vmatmul.bf16.gmra.mxu3 %v2739_v8 }
 0x175   :  { %v2266_v15 = vadd.f32 %v2265_v61, %v2203_v13  ;;  %v2760_v61 = vld [vmem:[%s4388_s0 + $0x2f0] sm:$0xf0]  ;;  %v2767_v13 = vor.u32 %v3123_v63, %v2766_v62  ;;  %v3130_v62 = vld [vmem:[%s4388_s0 + $0x32c] sm:$0xf0]  ;;  %v3128_v63 = vld [vmem:[%s4388_s0 + $0x324] sm:$0xf] }
 0x176   :  { %v1457_v16 = vpop.f32.mrf.mxu2  ;;  %v1121_v19 = vpop.f32.mrf.mxu0  ;;  %v2763_v8 = vor.u32 %v3120_v58, %v2760_v61  ;;  %v2790_v61 = vld [vmem:[%s4388_s0 + $0x320] sm:$0xf] }
 0x177   :  { %v1626_v17 = vpop.f32.mrf.mxu3  ;;  %v1458_v18 = vadd.f32 %v1457_v16, %v1289_v14  ;;  %v1290_v20 = vpop.f32.mrf.mxu1  ;;  %v1122_v22 = vadd.f32 %v3954_v9, %v1121_v19  ;;  %v2771_v14 = vor.u32 %v3121_v1, %v2768_v2 }
 0x179   :  { %v1627_v21 = vadd.f32 %v1626_v17, %v1458_v18  ;;  %v1291_v34 = vadd.f32 %v1290_v20, %v1122_v22 }
 0x17b   :  { %v2133_v26 = vadd.f32 %v2132_v12, %v1627_v21  ;;  %v2204_v27 = vmul.f32 %v1627_v21, %v1627_v21  ;;  %2338 = vst [vmem:[%s4389_s3 + $0xd0] sm:$0xff] %v1627_v21 }
 0x17d   :  { %v2267_v33 = vadd.f32 %v2266_v15, %v2204_v27 }
 0x17e   :  { %v1459_v35 = vpop.f32.mrf.mxu2  ;;  %v1124_v40 = vpop.f32.mrf.mxu0 }
 0x17f   :  { %v1628_v36 = vpop.f32.mrf.mxu3  ;;  %v1460_v39 = vadd.f32 %v1459_v35, %v1291_v34  ;;  %v1293_v41 = vpop.f32.mrf.mxu1  ;;  %v1125_v44 = vadd.f32 %v3954_v9, %v1124_v40  ;;  %v2782_v34 = vld [vmem:[%s4388_s0 + $0x308] sm:$0xf]  ;;  %v3127_v35 = vld [vmem:[%s4388_s0 + $0x314] sm:$0xf0] }
 0x181   :  { %v1629_v45 = vadd.f32 %v1628_v36, %v1460_v39  ;;  %1163 = vmatmul.bf16.gmra.mxu0 %v2743_v37  ;;  %v1294_v48 = vadd.f32 %v1293_v41, %v1125_v44  ;;  %v3125_v36 = vld [vmem:[%s4388_s0 + $0x30c] sm:$0xf]  ;;  %v2784_v37 = vld [vmem:[%s4388_s0 + $0x318] sm:$0xf0] }
 0x182   :  { %1332 = vmatmul.bf16.gmra.mxu1 %v2747_v38 }
 0x183   :  { %v2134_v46 = vadd.f32 %v2133_v26, %v1629_v45  ;;  %v2205_v47 = vmul.f32 %v1629_v45, %v1629_v45  ;;  %2339 = vst [vmem:[%s4389_s3 + $0xd8] sm:$0xff] %v1629_v45  ;;  %1501 = vmatmul.bf16.gmra.mxu2 %v2751_v42  ;;  %v2775_v42 = vor.u32 %v3126_v29, %v2774_v28 }
 0x184   :  { %1670 = vmatmul.bf16.gmra.mxu3 %v2755_v43 }
 0x185   :  { %v2268_v49 = vadd.f32 %v2267_v33, %v2205_v47  ;;  %v2776_v33 = vld [vmem:[%s4388_s0 + $0x310] sm:$0xf0]  ;;  %v2783_v47 = vor.u32 %v3127_v35, %v2782_v34  ;;  %v3134_v34 = vld [vmem:[%s4388_s0 + $0x34c] sm:$0xf0]  ;;  %v3132_v35 = vld [vmem:[%s4388_s0 + $0x344] sm:$0xf] }
 0x186   :  { %v1462_v50 = vpop.f32.mrf.mxu2  ;;  %v1126_v53 = vpop.f32.mrf.mxu0  ;;  %v2779_v43 = vor.u32 %v3124_v30, %v2776_v33  ;;  %v2806_v33 = vld [vmem:[%s4388_s0 + $0x340] sm:$0xf] }
 0x187   :  { %v1631_v51 = vpop.f32.mrf.mxu3  ;;  %v1463_v52 = vadd.f32 %v1462_v50, %v1294_v48  ;;  %v1295_v54 = vpop.f32.mrf.mxu1  ;;  %v1127_v56 = vadd.f32 %v3954_v9, %v1126_v53  ;;  %v2787_v48 = vor.u32 %v3125_v36, %v2784_v37 }
 0x189   :  { %v1632_v55 = vadd.f32 %v1631_v51, %v1463_v52  ;;  %v1296_v4 = vadd.f32 %v1295_v54, %v1127_v56 }
 0x18b   :  { %v2135_v59 = vadd.f32 %v2134_v46, %v1632_v55  ;;  %v2206_v60 = vmul.f32 %v1632_v55, %v1632_v55  ;;  %2340 = vst [vmem:[%s4389_s3 + $0xe0] sm:$0xff] %v1632_v55 }
 0x18d   :  { %v2269_v3 = vadd.f32 %v2268_v49, %v2206_v60 }
 0x18e   :  { %v1464_v5 = vpop.f32.mrf.mxu2  ;;  %v1129_v11 = vpop.f32.mrf.mxu0 }
 0x18f   :  { %v1633_v6 = vpop.f32.mrf.mxu3  ;;  %v1465_v10 = vadd.f32 %v1464_v5, %v1296_v4  ;;  %v1298_v12 = vpop.f32.mrf.mxu1  ;;  %v1130_v15 = vadd.f32 %v3954_v9, %v1129_v11  ;;  %v2798_v4 = vld [vmem:[%s4388_s0 + $0x328] sm:$0xf]  ;;  %v3131_v5 = vld [vmem:[%s4388_s0 + $0x334] sm:$0xf0] }
 0x191   :  { %v1634_v16 = vadd.f32 %v1633_v6, %v1465_v10  ;;  %1168 = vmatmul.bf16.gmra.mxu0 %v2759_v7  ;;  %v1299_v19 = vadd.f32 %v1298_v12, %v1130_v15  ;;  %v3129_v6 = vld [vmem:[%s4388_s0 + $0x32c] sm:$0xf]  ;;  %v2800_v7 = vld [vmem:[%s4388_s0 + $0x338] sm:$0xf0] }
 0x192   :  { %1337 = vmatmul.bf16.gmra.mxu1 %v2763_v8 }
 0x193   :  { %v2136_v17 = vadd.f32 %v2135_v59, %v1634_v16  ;;  %v2207_v18 = vmul.f32 %v1634_v16, %v1634_v16  ;;  %2341 = vst [vmem:[%s4389_s3 + $0xe8] sm:$0xff] %v1634_v16  ;;  %1506 = vmatmul.bf16.gmra.mxu2 %v2767_v13  ;;  %v2791_v13 = vor.u32 %v3130_v62, %v2790_v61 }
 0x194   :  { %1675 = vmatmul.bf16.gmra.mxu3 %v2771_v14 }
 0x195   :  { %v2270_v20 = vadd.f32 %v2269_v3, %v2207_v18  ;;  %v2792_v3 = vld [vmem:[%s4388_s0 + $0x330] sm:$0xf0]  ;;  %v2799_v18 = vor.u32 %v3131_v5, %v2798_v4  ;;  %v3138_v4 = vld [vmem:[%s4388_s0 + $0x36c] sm:$0xf0]  ;;  %v3136_v5 = vld [vmem:[%s4388_s0 + $0x364] sm:$0xf] }
 0x196   :  { %v1467_v21 = vpop.f32.mrf.mxu2  ;;  %v1131_v24 = vpop.f32.mrf.mxu0  ;;  %v2795_v14 = vor.u32 %v3128_v63, %v2792_v3  ;;  %v2822_v3 = vld [vmem:[%s4388_s0 + $0x360] sm:$0xf] }
 0x197   :  { %v1636_v22 = vpop.f32.mrf.mxu3  ;;  %v1468_v23 = vadd.f32 %v1467_v21, %v1299_v19  ;;  %v1300_v25 = vpop.f32.mrf.mxu1  ;;  %v1132_v27 = vadd.f32 %v3954_v9, %v1131_v24  ;;  %v2803_v19 = vor.u32 %v3129_v6, %v2800_v7 }
 0x199   :  { %v1637_v26 = vadd.f32 %v1636_v22, %v1468_v23  ;;  %v1301_v39 = vadd.f32 %v1300_v25, %v1132_v27 }
 0x19b   :  { %v2137_v31 = vadd.f32 %v2136_v17, %v1637_v26  ;;  %v2208_v32 = vmul.f32 %v1637_v26, %v1637_v26  ;;  %2342 = vst [vmem:[%s4389_s3 + $0xf0] sm:$0xff] %v1637_v26 }
 0x19d   :  { %v2271_v38 = vadd.f32 %v2270_v20, %v2208_v32 }
 0x19e   :  { %v1469_v40 = vpop.f32.mrf.mxu2  ;;  %v1134_v45 = vpop.f32.mrf.mxu0 }
 0x19f   :  { %v1638_v41 = vpop.f32.mrf.mxu3  ;;  %v1470_v44 = vadd.f32 %v1469_v40, %v1301_v39  ;;  %v1303_v46 = vpop.f32.mrf.mxu1  ;;  %v1135_v49 = vadd.f32 %v3954_v9, %v1134_v45  ;;  %v2814_v39 = vld [vmem:[%s4388_s0 + $0x348] sm:$0xf]  ;;  %v3135_v40 = vld [vmem:[%s4388_s0 + $0x354] sm:$0xf0] }
 0x1a1   :  { %v1639_v50 = vadd.f32 %v1638_v41, %v1470_v44  ;;  %1173 = vmatmul.bf16.gmra.mxu0 %v2775_v42  ;;  %v1304_v53 = vadd.f32 %v1303_v46, %v1135_v49  ;;  %v3133_v41 = vld [vmem:[%s4388_s0 + $0x34c] sm:$0xf]  ;;  %v2816_v42 = vld [vmem:[%s4388_s0 + $0x358] sm:$0xf0] }
 0x1a2   :  { %1342 = vmatmul.bf16.gmra.mxu1 %v2779_v43 }
 0x1a3   :  { %v2138_v51 = vadd.f32 %v2137_v31, %v1639_v50  ;;  %v2209_v52 = vmul.f32 %v1639_v50, %v1639_v50  ;;  %2343 = vst [vmem:[%s4389_s3 + $0xf8] sm:$0xff] %v1639_v50  ;;  %1511 = vmatmul.bf16.gmra.mxu2 %v2783_v47  ;;  %v2807_v47 = vor.u32 %v3134_v34, %v2806_v33 }
 0x1a4   :  { %1680 = vmatmul.bf16.gmra.mxu3 %v2787_v48 }
 0x1a5   :  { %v2272_v54 = vadd.f32 %v2271_v38, %v2209_v52  ;;  %v2808_v38 = vld [vmem:[%s4388_s0 + $0x350] sm:$0xf0]  ;;  %v2815_v52 = vor.u32 %v3135_v40, %v2814_v39  ;;  %v3142_v39 = vld [vmem:[%s4388_s0 + $0x38c] sm:$0xf0]  ;;  %v3140_v40 = vld [vmem:[%s4388_s0 + $0x384] sm:$0xf] }
 0x1a6   :  { %v1472_v55 = vpop.f32.mrf.mxu2  ;;  %v1136_v57 = vpop.f32.mrf.mxu0  ;;  %v2811_v48 = vor.u32 %v3132_v35, %v2808_v38  ;;  %v2838_v38 = vld [vmem:[%s4388_s0 + $0x380] sm:$0xf] }
 0x1a7   :  { %v1641_v56 = vpop.f32.mrf.mxu3  ;;  %v1473_v0 = vadd.f32 %v1472_v55, %v1304_v53  ;;  %v1305_v58 = vpop.f32.mrf.mxu1  ;;  %v1137_v60 = vadd.f32 %v3954_v9, %v1136_v57  ;;  %v2819_v53 = vor.u32 %v3133_v41, %v2816_v42 }
 0x1a9   :  { %v1642_v59 = vadd.f32 %v1641_v56, %v1473_v0  ;;  %v1306_v10 = vadd.f32 %v1305_v58, %v1137_v60 }
 0x1ab   :  { %v2139_v1 = vadd.f32 %v2138_v51, %v1642_v59  ;;  %v2210_v2 = vmul.f32 %v1642_v59, %v1642_v59  ;;  %2344 = vst [vmem:[%s4389_s3 + $0x100] sm:$0xff] %v1642_v59 }
 0x1ad   :  { %v2273_v8 = vadd.f32 %v2272_v54, %v2210_v2 }
 0x1ae   :  { %v1474_v11 = vpop.f32.mrf.mxu2  ;;  %v1139_v16 = vpop.f32.mrf.mxu0 }
 0x1af   :  { %v1643_v12 = vpop.f32.mrf.mxu3  ;;  %v1475_v15 = vadd.f32 %v1474_v11, %v1306_v10  ;;  %v1308_v17 = vpop.f32.mrf.mxu1  ;;  %v1140_v20 = vadd.f32 %v3954_v9, %v1139_v16  ;;  %v2830_v10 = vld [vmem:[%s4388_s0 + $0x368] sm:$0xf]  ;;  %v3139_v11 = vld [vmem:[%s4388_s0 + $0x374] sm:$0xf0] }
 0x1b1   :  { %v1644_v21 = vadd.f32 %v1643_v12, %v1475_v15  ;;  %1178 = vmatmul.bf16.gmra.mxu0 %v2791_v13  ;;  %v1309_v24 = vadd.f32 %v1308_v17, %v1140_v20  ;;  %v3137_v12 = vld [vmem:[%s4388_s0 + $0x36c] sm:$0xf]  ;;  %v2832_v13 = vld [vmem:[%s4388_s0 + $0x378] sm:$0xf0] }
 0x1b2   :  { %1347 = vmatmul.bf16.gmra.mxu1 %v2795_v14 }
 0x1b3   :  { %v2140_v22 = vadd.f32 %v2139_v1, %v1644_v21  ;;  %v2211_v23 = vmul.f32 %v1644_v21, %v1644_v21  ;;  %2345 = vst [vmem:[%s4389_s3 + $0x108] sm:$0xff] %v1644_v21  ;;  %1516 = vmatmul.bf16.gmra.mxu2 %v2799_v18  ;;  %v2823_v18 = vor.u32 %v3138_v4, %v2822_v3 }
 0x1b4   :  { %1685 = vmatmul.bf16.gmra.mxu3 %v2803_v19 }
 0x1b5   :  { %v2274_v25 = vadd.f32 %v2273_v8, %v2211_v23  ;;  %v2824_v8 = vld [vmem:[%s4388_s0 + $0x370] sm:$0xf0]  ;;  %v2831_v23 = vor.u32 %v3139_v11, %v2830_v10  ;;  %v3146_v10 = vld [vmem:[%s4388_s0 + $0x3ac] sm:$0xf0]  ;;  %v3144_v11 = vld [vmem:[%s4388_s0 + $0x3a4] sm:$0xf] }
 0x1b6   :  { %v1477_v26 = vpop.f32.mrf.mxu2  ;;  %v1141_v29 = vpop.f32.mrf.mxu0  ;;  %v2827_v19 = vor.u32 %v3136_v5, %v2824_v8  ;;  %v2854_v8 = vld [vmem:[%s4388_s0 + $0x3a0] sm:$0xf] }
 0x1b7   :  { %v1646_v27 = vpop.f32.mrf.mxu3  ;;  %v1478_v28 = vadd.f32 %v1477_v26, %v1309_v24  ;;  %v1310_v30 = vpop.f32.mrf.mxu1  ;;  %v1142_v32 = vadd.f32 %v3954_v9, %v1141_v29  ;;  %v2835_v24 = vor.u32 %v3137_v12, %v2832_v13 }
 0x1b9   :  { %v1647_v31 = vadd.f32 %v1646_v27, %v1478_v28  ;;  %v1311_v44 = vadd.f32 %v1310_v30, %v1142_v32 }
 0x1bb   :  { %v2141_v36 = vadd.f32 %v2140_v22, %v1647_v31  ;;  %v2212_v37 = vmul.f32 %v1647_v31, %v1647_v31  ;;  %2346 = vst [vmem:[%s4389_s3 + $0x110] sm:$0xff] %v1647_v31 }
 0x1bd   :  { %v2275_v43 = vadd.f32 %v2274_v25, %v2212_v37 }
 0x1be   :  { %v1479_v45 = vpop.f32.mrf.mxu2  ;;  %v1144_v50 = vpop.f32.mrf.mxu0 }
 0x1bf   :  { %v1648_v46 = vpop.f32.mrf.mxu3  ;;  %v1480_v49 = vadd.f32 %v1479_v45, %v1311_v44  ;;  %v1313_v51 = vpop.f32.mrf.mxu1  ;;  %v1145_v54 = vadd.f32 %v3954_v9, %v1144_v50  ;;  %v2846_v44 = vld [vmem:[%s4388_s0 + $0x388] sm:$0xf]  ;;  %v3143_v45 = vld [vmem:[%s4388_s0 + $0x394] sm:$0xf0] }
 0x1c1   :  { %v1649_v55 = vadd.f32 %v1648_v46, %v1480_v49  ;;  %1183 = vmatmul.bf16.gmra.mxu0 %v2807_v47  ;;  %v1314_v57 = vadd.f32 %v1313_v51, %v1145_v54  ;;  %v3141_v46 = vld [vmem:[%s4388_s0 + $0x38c] sm:$0xf]  ;;  %v2848_v47 = vld [vmem:[%s4388_s0 + $0x398] sm:$0xf0] }
 0x1c2   :  { %1352 = vmatmul.bf16.gmra.mxu1 %v2811_v48 }
 0x1c3   :  { %v2142_v56 = vadd.f32 %v2141_v36, %v1649_v55  ;;  %v2213_v0 = vmul.f32 %v1649_v55, %v1649_v55  ;;  %2347 = vst [vmem:[%s4389_s3 + $0x118] sm:$0xff] %v1649_v55  ;;  %1521 = vmatmul.bf16.gmra.mxu2 %v2815_v52  ;;  %v2839_v52 = vor.u32 %v3142_v39, %v2838_v38 }
 0x1c4   :  { %1690 = vmatmul.bf16.gmra.mxu3 %v2819_v53 }
 0x1c5   :  { %v2276_v58 = vadd.f32 %v2275_v43, %v2213_v0  ;;  %v2840_v43 = vld [vmem:[%s4388_s0 + $0x390] sm:$0xf0]  ;;  %v2847_v0 = vor.u32 %v3143_v45, %v2846_v44  ;;  %v3150_v44 = vld [vmem:[%s4388_s0 + $0x3cc] sm:$0xf0]  ;;  %v3148_v45 = vld [vmem:[%s4388_s0 + $0x3c4] sm:$0xf] }
 0x1c6   :  { %v1482_v59 = vpop.f32.mrf.mxu2  ;;  %v1146_v62 = vpop.f32.mrf.mxu0  ;;  %v2843_v53 = vor.u32 %v3140_v40, %v2840_v43  ;;  %v2870_v43 = vld [vmem:[%s4388_s0 + $0x3c0] sm:$0xf] }
 0x1c7   :  { %v1651_v60 = vpop.f32.mrf.mxu3  ;;  %v1483_v61 = vadd.f32 %v1482_v59, %v1314_v57  ;;  %v1315_v63 = vpop.f32.mrf.mxu1  ;;  %v1147_v2 = vadd.f32 %v3954_v9, %v1146_v62  ;;  %v2851_v57 = vor.u32 %v3141_v46, %v2848_v47 }
 0x1c9   :  { %v1652_v1 = vadd.f32 %v1651_v60, %v1483_v61  ;;  %v1316_v15 = vadd.f32 %v1315_v63, %v1147_v2 }
 0x1cb   :  { %v2143_v6 = vadd.f32 %v2142_v56, %v1652_v1  ;;  %v2214_v7 = vmul.f32 %v1652_v1, %v1652_v1  ;;  %2348 = vst [vmem:[%s4389_s3 + $0x120] sm:$0xff] %v1652_v1 }
 0x1cd   :  { %v2277_v14 = vadd.f32 %v2276_v58, %v2214_v7 }
 0x1ce   :  { %v1484_v16 = vpop.f32.mrf.mxu2  ;;  %v1149_v21 = vpop.f32.mrf.mxu0 }
 0x1cf   :  { %v1653_v17 = vpop.f32.mrf.mxu3  ;;  %v1485_v20 = vadd.f32 %v1484_v16, %v1316_v15  ;;  %v1318_v22 = vpop.f32.mrf.mxu1  ;;  %v1150_v25 = vadd.f32 %v3954_v9, %v1149_v21  ;;  %v2862_v15 = vld [vmem:[%s4388_s0 + $0x3a8] sm:$0xf]  ;;  %v3147_v16 = vld [vmem:[%s4388_s0 + $0x3b4] sm:$0xf0] }
 0x1d1   :  { %v1654_v26 = vadd.f32 %v1653_v17, %v1485_v20  ;;  %1188 = vmatmul.bf16.gmra.mxu0 %v2823_v18  ;;  %v1319_v29 = vadd.f32 %v1318_v22, %v1150_v25  ;;  %v3145_v17 = vld [vmem:[%s4388_s0 + $0x3ac] sm:$0xf]  ;;  %v2864_v18 = vld [vmem:[%s4388_s0 + $0x3b8] sm:$0xf0] }
 0x1d2   :  { %1357 = vmatmul.bf16.gmra.mxu1 %v2827_v19 }
 0x1d3   :  { %v2144_v27 = vadd.f32 %v2143_v6, %v1654_v26  ;;  %v2215_v28 = vmul.f32 %v1654_v26, %v1654_v26  ;;  %2349 = vst [vmem:[%s4389_s3 + $0x128] sm:$0xff] %v1654_v26  ;;  %1526 = vmatmul.bf16.gmra.mxu2 %v2831_v23  ;;  %v2855_v23 = vor.u32 %v3146_v10, %v2854_v8 }
 0x1d4   :  { %1695 = vmatmul.bf16.gmra.mxu3 %v2835_v24 }
 0x1d5   :  { %v2278_v30 = vadd.f32 %v2277_v14, %v2215_v28  ;;  %v2856_v14 = vld [vmem:[%s4388_s0 + $0x3b0] sm:$0xf0]  ;;  %v2863_v28 = vor.u32 %v3147_v16, %v2862_v15  ;;  %v3154_v15 = vld [vmem:[%s4388_s0 + $0x3ec] sm:$0xf0]  ;;  %v3152_v16 = vld [vmem:[%s4388_s0 + $0x3e4] sm:$0xf] }
 0x1d6   :  { %v1487_v31 = vpop.f32.mrf.mxu2  ;;  %v1151_v34 = vpop.f32.mrf.mxu0  ;;  %v2859_v24 = vor.u32 %v3144_v11, %v2856_v14  ;;  %v2886_v14 = vld [vmem:[%s4388_s0 + $0x3e0] sm:$0xf] }
 0x1d7   :  { %v1656_v32 = vpop.f32.mrf.mxu3  ;;  %v1488_v33 = vadd.f32 %v1487_v31, %v1319_v29  ;;  %v1320_v35 = vpop.f32.mrf.mxu1  ;;  %v1152_v37 = vadd.f32 %v3954_v9, %v1151_v34  ;;  %v2867_v29 = vor.u32 %v3145_v17, %v2864_v18 }
 0x1d9   :  { %v1657_v36 = vadd.f32 %v1656_v32, %v1488_v33  ;;  %v1321_v49 = vadd.f32 %v1320_v35, %v1152_v37 }
 0x1db   :  { %v2145_v41 = vadd.f32 %v2144_v27, %v1657_v36  ;;  %v2216_v42 = vmul.f32 %v1657_v36, %v1657_v36  ;;  %2350 = vst [vmem:[%s4389_s3 + $0x130] sm:$0xff] %v1657_v36 }
 0x1dd   :  { %v2279_v48 = vadd.f32 %v2278_v30, %v2216_v42 }
 0x1de   :  { %v1489_v50 = vpop.f32.mrf.mxu2  ;;  %v1154_v55 = vpop.f32.mrf.mxu0 }
 0x1df   :  { %v1658_v51 = vpop.f32.mrf.mxu3  ;;  %v1490_v54 = vadd.f32 %v1489_v50, %v1321_v49  ;;  %v1323_v56 = vpop.f32.mrf.mxu1  ;;  %v1155_v58 = vadd.f32 %v3954_v9, %v1154_v55  ;;  %v2878_v49 = vld [vmem:[%s4388_s0 + $0x3c8] sm:$0xf]  ;;  %v3151_v50 = vld [vmem:[%s4388_s0 + $0x3d4] sm:$0xf0] }
 0x1e1   :  { %v1659_v59 = vadd.f32 %v1658_v51, %v1490_v54  ;;  %1193 = vmatmul.bf16.gmra.mxu0 %v2839_v52  ;;  %v1324_v62 = vadd.f32 %v1323_v56, %v1155_v58  ;;  %v3149_v51 = vld [vmem:[%s4388_s0 + $0x3cc] sm:$0xf]  ;;  %v2880_v52 = vld [vmem:[%s4388_s0 + $0x3d8] sm:$0xf0] }
 0x1e2   :  { %1362 = vmatmul.bf16.gmra.mxu1 %v2843_v53 }
 0x1e3   :  { %v2146_v60 = vadd.f32 %v2145_v41, %v1659_v59  ;;  %v2217_v61 = vmul.f32 %v1659_v59, %v1659_v59  ;;  %2351 = vst [vmem:[%s4389_s3 + $0x138] sm:$0xff] %v1659_v59  ;;  %1531 = vmatmul.bf16.gmra.mxu2 %v2847_v0  ;;  %v2871_v0 = vor.u32 %v3150_v44, %v2870_v43 }
 0x1e4   :  { %1700 = vmatmul.bf16.gmra.mxu3 %v2851_v57 }
 0x1e5   :  { %v2280_v63 = vadd.f32 %v2279_v48, %v2217_v61  ;;  %v2872_v48 = vld [vmem:[%s4388_s0 + $0x3d0] sm:$0xf0]  ;;  %v2879_v61 = vor.u32 %v3151_v50, %v2878_v49 }
 0x1e6   :  { %v1492_v1 = vpop.f32.mrf.mxu2  ;;  %v1156_v4 = vpop.f32.mrf.mxu0  ;;  %v2875_v57 = vor.u32 %v3148_v45, %v2872_v48 }
 0x1e7   :  { %v1661_v2 = vpop.f32.mrf.mxu3  ;;  %v1493_v3 = vadd.f32 %v1492_v1, %v1324_v62  ;;  %v1325_v5 = vpop.f32.mrf.mxu1  ;;  %v1157_v7 = vadd.f32 %v3954_v9, %v1156_v4  ;;  %v2883_v62 = vor.u32 %v3149_v51, %v2880_v52 }
 0x1e9   :  { %v1662_v6 = vadd.f32 %v1661_v2, %v1493_v3  ;;  %v1326_v20 = vadd.f32 %v1325_v5, %v1157_v7 }
 0x1eb   :  { %v2147_v12 = vadd.f32 %v2146_v60, %v1662_v6  ;;  %v2218_v13 = vmul.f32 %v1662_v6, %v1662_v6  ;;  %2352 = vst [vmem:[%s4389_s3 + $0x140] sm:$0xff] %v1662_v6 }
 0x1ed   :  { %v2281_v19 = vadd.f32 %v2280_v63, %v2218_v13 }
 0x1ee   :  { %v1494_v21 = vpop.f32.mrf.mxu2  ;;  %v1159_v26 = vpop.f32.mrf.mxu0 }
 0x1ef   :  { %v1663_v22 = vpop.f32.mrf.mxu3  ;;  %v1495_v25 = vadd.f32 %v1494_v21, %v1326_v20  ;;  %v1328_v27 = vpop.f32.mrf.mxu1  ;;  %v1160_v30 = vadd.f32 %v3954_v9, %v1159_v26  ;;  %v2894_v20 = vld [vmem:[%s4388_s0 + $0x3e8] sm:$0xf]  ;;  %v3155_v21 = vld [vmem:[%s4388_s0 + $0x3f4] sm:$0xf0] }
 0x1f1   :  { %v1664_v31 = vadd.f32 %v1663_v22, %v1495_v25  ;;  %1198 = vmatmul.bf16.gmra.mxu0 %v2855_v23  ;;  %v1329_v34 = vadd.f32 %v1328_v27, %v1160_v30  ;;  %v3153_v22 = vld [vmem:[%s4388_s0 + $0x3ec] sm:$0xf]  ;;  %v2896_v23 = vld [vmem:[%s4388_s0 + $0x3f8] sm:$0xf0] }
 0x1f2   :  { %1367 = vmatmul.bf16.gmra.mxu1 %v2859_v24 }
 0x1f3   :  { %v2148_v32 = vadd.f32 %v2147_v12, %v1664_v31  ;;  %v2219_v33 = vmul.f32 %v1664_v31, %v1664_v31  ;;  %2353 = vst [vmem:[%s4389_s3 + $0x148] sm:$0xff] %v1664_v31  ;;  %1536 = vmatmul.bf16.gmra.mxu2 %v2863_v28  ;;  %v2887_v28 = vor.u32 %v3154_v15, %v2886_v14 }
 0x1f4   :  { %1705 = vmatmul.bf16.gmra.mxu3 %v2867_v29 }
 0x1f5   :  { %v2282_v35 = vadd.f32 %v2281_v19, %v2219_v33  ;;  %v2888_v19 = vld [vmem:[%s4388_s0 + $0x3f0] sm:$0xf0]  ;;  %v2895_v33 = vor.u32 %v3155_v21, %v2894_v20 }
 0x1f6   :  { %v1497_v36 = vpop.f32.mrf.mxu2  ;;  %v1161_v39 = vpop.f32.mrf.mxu0  ;;  %v2891_v29 = vor.u32 %v3152_v16, %v2888_v19 }
 0x1f7   :  { %v1666_v37 = vpop.f32.mrf.mxu3  ;;  %v1498_v38 = vadd.f32 %v1497_v36, %v1329_v34  ;;  %v1330_v40 = vpop.f32.mrf.mxu1  ;;  %v1162_v42 = vadd.f32 %v3954_v9, %v1161_v39  ;;  %v2899_v34 = vor.u32 %v3153_v22, %v2896_v23 }
 0x1f9   :  { %v1667_v41 = vadd.f32 %v1666_v37, %v1498_v38  ;;  %v1331_v54 = vadd.f32 %v1330_v40, %v1162_v42 }
 0x1fb   :  { %v2149_v46 = vadd.f32 %v2148_v32, %v1667_v41  ;;  %v2220_v47 = vmul.f32 %v1667_v41, %v1667_v41  ;;  %2354 = vst [vmem:[%s4389_s3 + $0x150] sm:$0xff] %v1667_v41 }
 0x1fd   :  { %v2283_v53 = vadd.f32 %v2282_v35, %v2220_v47 }
 0x1fe   :  { %v1499_v55 = vpop.f32.mrf.mxu2  ;;  %v1164_v59 = vpop.f32.mrf.mxu0 }
 0x1ff   :  { %v1668_v56 = vpop.f32.mrf.mxu3  ;;  %v1500_v58 = vadd.f32 %v1499_v55, %v1331_v54  ;;  %v1333_v60 = vpop.f32.mrf.mxu1  ;;  %v1165_v63 = vadd.f32 %v3954_v9, %v1164_v59 }
 0x201   :  { %v1669_v1 = vadd.f32 %v1668_v56, %v1500_v58  ;;  %1203 = vmatmul.bf16.gmra.mxu0 %v2871_v0  ;;  %v1334_v4 = vadd.f32 %v1333_v60, %v1165_v63 }
 0x202   :  { %1372 = vmatmul.bf16.gmra.mxu1 %v2875_v57 }
 0x203   :  { %v2150_v2 = vadd.f32 %v2149_v46, %v1669_v1  ;;  %v2221_v3 = vmul.f32 %v1669_v1, %v1669_v1  ;;  %2355 = vst [vmem:[%s4389_s3 + $0x158] sm:$0xff] %v1669_v1  ;;  %1541 = vmatmul.bf16.gmra.mxu2 %v2879_v61 }
 0x204   :  { %1710 = vmatmul.bf16.gmra.mxu3 %v2883_v62 }
 0x205   :  { %v2284_v5 = vadd.f32 %v2283_v53, %v2221_v3 }
 0x206   :  { %v1502_v6 = vpop.f32.mrf.mxu2  ;;  %v1166_v10 = vpop.f32.mrf.mxu0 }
 0x207   :  { %v1671_v7 = vpop.f32.mrf.mxu3  ;;  %v1503_v8 = vadd.f32 %v1502_v6, %v1334_v4  ;;  %v1335_v11 = vpop.f32.mrf.mxu1  ;;  %v1167_v13 = vadd.f32 %v3954_v9, %v1166_v10 }
 0x209   :  { %v1672_v12 = vadd.f32 %v1671_v7, %v1503_v8  ;;  %v1336_v25 = vadd.f32 %v1335_v11, %v1167_v13 }
 0x20b   :  { %v2151_v17 = vadd.f32 %v2150_v2, %v1672_v12  ;;  %v2222_v18 = vmul.f32 %v1672_v12, %v1672_v12  ;;  %2356 = vst [vmem:[%s4389_s3 + $0x160] sm:$0xff] %v1672_v12 }
 0x20d   :  { %v2285_v24 = vadd.f32 %v2284_v5, %v2222_v18 }
 0x20e   :  { %v1504_v26 = vpop.f32.mrf.mxu2  ;;  %v1169_v31 = vpop.f32.mrf.mxu0 }
 0x20f   :  { %v1673_v27 = vpop.f32.mrf.mxu3  ;;  %v1505_v30 = vadd.f32 %v1504_v26, %v1336_v25  ;;  %v1338_v32 = vpop.f32.mrf.mxu1  ;;  %v1170_v35 = vadd.f32 %v3954_v9, %v1169_v31 }
 0x211   :  { %v1674_v36 = vadd.f32 %v1673_v27, %v1505_v30  ;;  %1208 = vmatmul.bf16.gmra.mxu0 %v2887_v28  ;;  %v1339_v39 = vadd.f32 %v1338_v32, %v1170_v35 }
 0x212   :  { %1377 = vmatmul.bf16.gmra.mxu1 %v2891_v29 }
 0x213   :  { %v2152_v37 = vadd.f32 %v2151_v17, %v1674_v36  ;;  %v2223_v38 = vmul.f32 %v1674_v36, %v1674_v36  ;;  %2357 = vst [vmem:[%s4389_s3 + $0x168] sm:$0xff] %v1674_v36  ;;  %1546 = vmatmul.bf16.gmra.mxu2 %v2895_v33 }
 0x214   :  { %1715 = vmatmul.bf16.gmra.mxu3 %v2899_v34 }
 0x215   :  { %v2286_v40 = vadd.f32 %v2285_v24, %v2223_v38 }
 0x216   :  { %v1507_v41 = vpop.f32.mrf.mxu2  ;;  %v1171_v44 = vpop.f32.mrf.mxu0 }
 0x217   :  { %v1676_v42 = vpop.f32.mrf.mxu3  ;;  %v1508_v43 = vadd.f32 %v1507_v41, %v1339_v39  ;;  %v1340_v45 = vpop.f32.mrf.mxu1  ;;  %v1172_v47 = vadd.f32 %v3954_v9, %v1171_v44 }
 0x219   :  { %v1677_v46 = vadd.f32 %v1676_v42, %v1508_v43  ;;  %v1341_v51 = vadd.f32 %v1340_v45, %v1172_v47 }
 0x21b   :  { %v2153_v48 = vadd.f32 %v2152_v37, %v1677_v46  ;;  %v2224_v49 = vmul.f32 %v1677_v46, %v1677_v46  ;;  %2358 = vst [vmem:[%s4389_s3 + $0x170] sm:$0xff] %v1677_v46 }
 0x21d   :  { %v2287_v50 = vadd.f32 %v2286_v40, %v2224_v49 }
 0x21e   :  { %v1509_v52 = vpop.f32.mrf.mxu2  ;;  %v1174_v55 = vpop.f32.mrf.mxu0 }
 0x21f   :  { %v1678_v53 = vpop.f32.mrf.mxu3  ;;  %v1510_v54 = vadd.f32 %v1509_v52, %v1341_v51  ;;  %v1343_v56 = vpop.f32.mrf.mxu1  ;;  %v1175_v0 = vadd.f32 %v3954_v9, %v1174_v55 }
 0x221   :  { %v1679_v57 = vadd.f32 %v1678_v53, %v1510_v54  ;;  %v1344_v60 = vadd.f32 %v1343_v56, %v1175_v0 }
 0x223   :  { %v2154_v58 = vadd.f32 %v2153_v48, %v1679_v57  ;;  %v2225_v59 = vmul.f32 %v1679_v57, %v1679_v57  ;;  %2359 = vst [vmem:[%s4389_s3 + $0x178] sm:$0xff] %v1679_v57 }
 0x225   :  { %v2288_v61 = vadd.f32 %v2287_v50, %v2225_v59 }
 0x226   :  { %v1512_v62 = vpop.f32.mrf.mxu2  ;;  %v1176_v2 = vpop.f32.mrf.mxu0 }
 0x227   :  { %v1681_v63 = vpop.f32.mrf.mxu3  ;;  %v1513_v1 = vadd.f32 %v1512_v62, %v1344_v60  ;;  %v1345_v3 = vpop.f32.mrf.mxu1  ;;  %v1177_v5 = vadd.f32 %v3954_v9, %v1176_v2 }
 0x229   :  { %v1682_v4 = vadd.f32 %v1681_v63, %v1513_v1  ;;  %v1346_v10 = vadd.f32 %v1345_v3, %v1177_v5 }
 0x22b   :  { %v2155_v6 = vadd.f32 %v2154_v58, %v1682_v4  ;;  %v2226_v7 = vmul.f32 %v1682_v4, %v1682_v4  ;;  %2360 = vst [vmem:[%s4389_s3 + $0x180] sm:$0xff] %v1682_v4 }
 0x22d   :  { %v2289_v8 = vadd.f32 %v2288_v61, %v2226_v7 }
 0x22e   :  { %v1514_v11 = vpop.f32.mrf.mxu2  ;;  %v1179_v14 = vpop.f32.mrf.mxu0 }
 0x22f   :  { %v1683_v12 = vpop.f32.mrf.mxu3  ;;  %v1515_v13 = vadd.f32 %v1514_v11, %v1346_v10  ;;  %v1348_v15 = vpop.f32.mrf.mxu1  ;;  %v1180_v16 = vadd.f32 %v3954_v9, %v1179_v14 }
 0x231   :  { %v1684_v17 = vadd.f32 %v1683_v12, %v1515_v13  ;;  %v1349_v20 = vadd.f32 %v1348_v15, %v1180_v16  ;;  %v4329_v13 = vld [vmem:[%s4387_s2] ss:$0 sm:$0xff] }
 0x233   :  { %v2156_v18 = vadd.f32 %v2155_v6, %v1684_v17  ;;  %v2227_v19 = vmul.f32 %v1684_v17, %v1684_v17  ;;  %2361 = vst [vmem:[%s4389_s3 + $0x188] sm:$0xff] %v1684_v17 }
 0x235   :  { %v2290_v21 = vadd.f32 %v2289_v8, %v2227_v19 }
 0x236   :  { %v1517_v22 = vpop.f32.mrf.mxu2  ;;  %v1181_v25 = vpop.f32.mrf.mxu0 }
 0x237   :  { %v1686_v23 = vpop.f32.mrf.mxu3  ;;  %v1518_v24 = vadd.f32 %v1517_v22, %v1349_v20  ;;  %v1350_v26 = vpop.f32.mrf.mxu1  ;;  %v1182_v28 = vadd.f32 %v3954_v9, %v1181_v25 }
 0x239   :  { %v1687_v27 = vadd.f32 %v1686_v23, %v1518_v24  ;;  %v1351_v32 = vadd.f32 %v1350_v26, %v1182_v28 }
 0x23b   :  { %v2157_v29 = vadd.f32 %v2156_v18, %v1687_v27  ;;  %v2228_v30 = vmul.f32 %v1687_v27, %v1687_v27  ;;  %2362 = vst [vmem:[%s4389_s3 + $0x190] sm:$0xff] %v1687_v27 }
 0x23d   :  { %v2291_v31 = vadd.f32 %v2290_v21, %v2228_v30 }
 0x23e   :  { %v1519_v33 = vpop.f32.mrf.mxu2  ;;  %v1184_v36 = vpop.f32.mrf.mxu0 }
 0x23f   :  { %v1688_v34 = vpop.f32.mrf.mxu3  ;;  %v1520_v35 = vadd.f32 %v1519_v33, %v1351_v32  ;;  %v1353_v37 = vpop.f32.mrf.mxu1  ;;  %v1185_v38 = vadd.f32 %v3954_v9, %v1184_v36 }
 0x241   :  { %v1689_v39 = vadd.f32 %v1688_v34, %v1520_v35  ;;  %v1354_v42 = vadd.f32 %v1353_v37, %v1185_v38 }
 0x243   :  { %v2158_v40 = vadd.f32 %v2157_v29, %v1689_v39  ;;  %v2229_v41 = vmul.f32 %v1689_v39, %v1689_v39  ;;  %2363 = vst [vmem:[%s4389_s3 + $0x198] sm:$0xff] %v1689_v39 }
 0x245   :  { %v2292_v43 = vadd.f32 %v2291_v31, %v2229_v41 }
 0x246   :  { %v1522_v44 = vpop.f32.mrf.mxu2  ;;  %v1186_v47 = vpop.f32.mrf.mxu0 }
 0x247   :  { %v1691_v45 = vpop.f32.mrf.mxu3  ;;  %v1523_v46 = vadd.f32 %v1522_v44, %v1354_v42  ;;  %v1355_v48 = vpop.f32.mrf.mxu1  ;;  %v1187_v50 = vadd.f32 %v3954_v9, %v1186_v47 }
 0x249   :  { %v1692_v49 = vadd.f32 %v1691_v45, %v1523_v46  ;;  %v1356_v54 = vadd.f32 %v1355_v48, %v1187_v50 }
 0x24b   :  { %v4305_v51 = vadd.f32 %v2158_v40, %v1692_v49  ;;  %v2230_v52 = vmul.f32 %v1692_v49, %v1692_v49  ;;  %2364 = vst [vmem:[%s4389_s3 + $0x1a0] sm:$0xff] %v1692_v49 }
 0x24d   :  { %v4310_v53 = vadd.f32 %v2292_v43, %v2230_v52 }
 0x24e   :  { %v1524_v55 = vpop.f32.mrf.mxu2  ;;  %v1189_v57 = vpop.f32.mrf.mxu0 }
 0x24f   :  { %v1693_v56 = vpop.f32.mrf.mxu3  ;;  %v1525_v0 = vadd.f32 %v1524_v55, %v1356_v54  ;;  %v1358_v58 = vpop.f32.mrf.mxu1  ;;  %v1190_v59 = vadd.f32 %v3954_v9, %v1189_v57 }
 0x251   :  { %v4313_v60 = vadd.f32 %v1693_v56, %v1525_v0  ;;  %v1359_v61 = vadd.f32 %v1358_v58, %v1190_v59 }
 0x253   :  { %2365 = vst [vmem:[%s4389_s3 + $0x1a8] sm:$0xff] %v4313_v60  ;;  %v2231_v0 = vmul.f32 %v4313_v60, %v4313_v60 }
 0x256   :  { %v1527_v62 = vpop.f32.mrf.mxu2  ;;  %v1191_v2 = vpop.f32.mrf.mxu0 }
 0x257   :  { %v1696_v63 = vpop.f32.mrf.mxu3  ;;  %v1528_v1 = vadd.f32 %v1527_v62, %v1359_v61  ;;  %v1360_v3 = vpop.f32.mrf.mxu1  ;;  %v1192_v5 = vadd.f32 %v3954_v9, %v1191_v2  ;;  %v2160_v62 = vadd.f32 %v4305_v51, %v4313_v60  ;;  %v2294_v2 = vadd.f32 %v4310_v53, %v2231_v0 }
 0x259   :  { %v4319_v4 = vadd.f32 %v1696_v63, %v1528_v1  ;;  %v1361_v6 = vadd.f32 %v1360_v3, %v1192_v5 }
 0x25b   :  { %2366 = vst [vmem:[%s4389_s3 + $0x1b0] sm:$0xff] %v4319_v4  ;;  %v2232_v58 = vmul.f32 %v4319_v4, %v4319_v4 }
 0x25e   :  { %v1529_v7 = vpop.f32.mrf.mxu2  ;;  %v1194_v11 = vpop.f32.mrf.mxu0 }
 0x25f   :  { %v1698_v8 = vpop.f32.mrf.mxu3  ;;  %v1530_v10 = vadd.f32 %v1529_v7, %v1361_v6  ;;  %v1363_v12 = vpop.f32.mrf.mxu1  ;;  %v1195_v14 = vadd.f32 %v4329_v13, %v1194_v11  ;;  %v2161_v6 = vadd.f32 %v2160_v62, %v4319_v4 }
 0x261   :  { %v4332_v15 = vadd.f32 %v1698_v8, %v1530_v10  ;;  %v1364_v9 = vadd.f32 %v1363_v12, %v1195_v14  ;;  %v2295_v8 = vadd.f32 %v2294_v2, %v2232_v58 }
 0x263   :  { %2367 = vst [vmem:[%s4389_s3 + $0x1b8] sm:$0xff] %v4332_v15  ;;  %v2233_v3 = vmul.f32 %v4332_v15, %v4332_v15  ;;  %v2162_v12 = vadd.f32 %v2161_v6, %v4332_v15 }
 0x265   :  { %v2296_v60 = vadd.f32 %v2295_v8, %v2233_v3 }
 0x266   :  { %v1532_v16 = vpop.f32.mrf.mxu2  ;;  %v1196_v19 = vpop.f32.mrf.mxu0 }
 0x267   :  { %v1701_v17 = vpop.f32.mrf.mxu3  ;;  %v1533_v18 = vadd.f32 %v1532_v16, %v1364_v9  ;;  %v1365_v20 = vpop.f32.mrf.mxu1  ;;  %v1197_v22 = vadd.f32 %v4329_v13, %v1196_v19 }
 0x269   :  { %v1702_v21 = vadd.f32 %v1701_v17, %v1533_v18  ;;  %v1366_v23 = vadd.f32 %v1365_v20, %v1197_v22 }
 0x26b   :  { %2368 = vst [vmem:[%s4389_s3 + $0x1c0] sm:$0xff] %v1702_v21  ;;  %v2234_v10 = vmul.f32 %v1702_v21, %v1702_v21  ;;  %v2163_v14 = vadd.f32 %v2162_v12, %v1702_v21 }
 0x26d   :  { %v2297_v9 = vadd.f32 %v2296_v60, %v2234_v10 }
 0x26e   :  { %v1534_v24 = vpop.f32.mrf.mxu2  ;;  %v1199_v27 = vpop.f32.mrf.mxu0 }
 0x26f   :  { %v1703_v25 = vpop.f32.mrf.mxu3  ;;  %v1535_v26 = vadd.f32 %v1534_v24, %v1366_v23  ;;  %v1368_v28 = vpop.f32.mrf.mxu1  ;;  %v1200_v29 = vadd.f32 %v4329_v13, %v1199_v27 }
 0x271   :  { %v1704_v30 = vadd.f32 %v1703_v25, %v1535_v26  ;;  %v1369_v31 = vadd.f32 %v1368_v28, %v1200_v29 }
 0x273   :  { %2369 = vst [vmem:[%s4389_s3 + $0x1c8] sm:$0xff] %v1704_v30  ;;  %v2235_v53 = vmul.f32 %v1704_v30, %v1704_v30  ;;  %v2164_v18 = vadd.f32 %v2163_v14, %v1704_v30 }
 0x275   :  { %v2298_v22 = vadd.f32 %v2297_v9, %v2235_v53 }
 0x276   :  { %v1537_v32 = vpop.f32.mrf.mxu2  ;;  %v1201_v35 = vpop.f32.mrf.mxu0 }
 0x277   :  { %v1706_v33 = vpop.f32.mrf.mxu3  ;;  %v1538_v34 = vadd.f32 %v1537_v32, %v1369_v31  ;;  %v1370_v36 = vpop.f32.mrf.mxu1  ;;  %v1202_v38 = vadd.f32 %v4329_v13, %v1201_v35 }
 0x279   :  { %v1707_v37 = vadd.f32 %v1706_v33, %v1538_v34  ;;  %v1371_v39 = vadd.f32 %v1370_v36, %v1202_v38 }
 0x27b   :  { %2370 = vst [vmem:[%s4389_s3 + $0x1d0] sm:$0xff] %v1707_v37  ;;  %v2236_v19 = vmul.f32 %v1707_v37, %v1707_v37  ;;  %v2165_v23 = vadd.f32 %v2164_v18, %v1707_v37 }
 0x27d   :  { %v2299_v26 = vadd.f32 %v2298_v22, %v2236_v19 }
 0x27e   :  { %v1539_v40 = vpop.f32.mrf.mxu2  ;;  %v1204_v43 = vpop.f32.mrf.mxu0 }
 0x27f   :  { %v1708_v41 = vpop.f32.mrf.mxu3  ;;  %v1540_v42 = vadd.f32 %v1539_v40, %v1371_v39  ;;  %v1373_v44 = vpop.f32.mrf.mxu1  ;;  %v1205_v45 = vadd.f32 %v4329_v13, %v1204_v43 }
 0x281   :  { %v1709_v46 = vadd.f32 %v1708_v41, %v1540_v42  ;;  %v1374_v47 = vadd.f32 %v1373_v44, %v1205_v45 }
 0x283   :  { %2371 = vst [vmem:[%s4389_s3 + $0x1d8] sm:$0xff] %v1709_v46  ;;  %v2237_v24 = vmul.f32 %v1709_v46, %v1709_v46  ;;  %v2166_v27 = vadd.f32 %v2165_v23, %v1709_v46 }
 0x285   :  { %v2300_v29 = vadd.f32 %v2299_v26, %v2237_v24 }
 0x286   :  { %v1542_v48 = vpop.f32.mrf.mxu2  ;;  %v1206_v52 = vpop.f32.mrf.mxu0 }
 0x287   :  { %v1711_v49 = vpop.f32.mrf.mxu3  ;;  %v1543_v50 = vadd.f32 %v1542_v48, %v1374_v47  ;;  %v1375_v54 = vpop.f32.mrf.mxu1  ;;  %v1207_v56 = vadd.f32 %v4329_v13, %v1206_v52 }
 0x289   :  { %v1712_v55 = vadd.f32 %v1711_v49, %v1543_v50  ;;  %v1376_v57 = vadd.f32 %v1375_v54, %v1207_v56 }
 0x28b   :  { %2372 = vst [vmem:[%s4389_s3 + $0x1e0] sm:$0xff] %v1712_v55  ;;  %v2238_v28 = vmul.f32 %v1712_v55, %v1712_v55  ;;  %v2167_v31 = vadd.f32 %v2166_v27, %v1712_v55 }
 0x28d   :  { %v2301_v34 = vadd.f32 %v2300_v29, %v2238_v28 }
 0x28e   :  { %v1544_v59 = vpop.f32.mrf.mxu2  ;;  %v1209_v1 = vpop.f32.mrf.mxu0 }
 0x28f   :  { %v1713_v61 = vpop.f32.mrf.mxu3  ;;  %v1545_v63 = vadd.f32 %v1544_v59, %v1376_v57  ;;  %v1210_v5 = vadd.f32 %v4329_v13, %v1209_v1  ;;  %v1378_v11 = vpop.f32.mrf.mxu1 }
 0x291   :  { %v1714_v7 = vadd.f32 %v1713_v61, %v1545_v63  ;;  %v1379_v51 = vadd.f32 %v1378_v11, %v1210_v5 }
 0x293   :  { %2373 = vst [vmem:[%s4389_s3 + $0x1e8] sm:$0xff] %v1714_v7  ;;  %v2239_v30 = vmul.f32 %v1714_v7, %v1714_v7  ;;  %v2168_v35 = vadd.f32 %v2167_v31, %v1714_v7 }
 0x295   :  { %v2302_v39 = vadd.f32 %v2301_v34, %v2239_v30 }
 0x296   :  { %v1547_v16 = vpop.f32.mrf.mxu2  ;;  %v1211_v20 = vpop.f32.mrf.mxu0 }
 0x297   :  { %v1716_v17 = vpop.f32.mrf.mxu3  ;;  %v1548_v4 = vadd.f32 %v1547_v16, %v1379_v51  ;;  %v1212_v15 = vadd.f32 %v4329_v13, %v1211_v20  ;;  %v1380_v21 = vpop.f32.mrf.mxu1 }
 0x299   :  { %v1717_v25 = vadd.f32 %v1716_v17, %v1548_v4  ;;  %v1381_v32 = vadd.f32 %v1380_v21, %v1212_v15 }
 0x29b   :  { %2374 = vst [vmem:[%s4389_s3 + $0x1f0] sm:$0xff] %v1717_v25  ;;  %v2240_v36 = vmul.f32 %v1717_v25, %v1717_v25  ;;  %v2169_v13 = vadd.f32 %v2168_v35, %v1717_v25 }
 0x29d   :  { %v2303_v41 = vadd.f32 %v2302_v39, %v2240_v36 }
 0x29e   :  { %v1549_v33 = vpop.f32.mrf.mxu2 }
 0x29f   :  { %v1550_v37 = vadd.f32 %v1549_v33, %v1381_v32  ;;  %v1718_v38 = vpop.f32.mrf.mxu3 }
 0x2a1   :  { %v1719_v40 = vadd.f32 %v1718_v38, %v1550_v37 }
 0x2a3   :  { %v2170_v42 = vadd.f32 %v2169_v13, %v1719_v40  ;;  %v2241_v43 = vmul.f32 %v1719_v40, %v1719_v40  ;;  %2375 = vst [vmem:[%s4389_s3 + $0x1f8] sm:$0xff] %v1719_v40 }
 0x2a5   :  { %v2171_v44 = vrot.slane %v2170_v42, 4  ;;  %v2304_v45 = vadd.f32 %v2303_v41, %v2241_v43 }
 0x2a7   :  { %v2172_v46 = vadd.f32 %v2171_v44, %v2170_v42  ;;  %v2305_v47 = vrot.slane %v2304_v45, 4 }
 0x2a9   :  { %v2173_v48 = vrot.slane %v2172_v46, 2  ;;  %v2306_v49 = vadd.f32 %v2305_v47, %v2304_v45 }
 0x2ab   :  { %v2174_v50 = vadd.f32 %v2173_v48, %v2172_v46  ;;  %v2307_v52 = vrot.slane %v2306_v49, 2 }
 0x2ad   :  { %v2175_v54 = vrot.slane %v2174_v50, 1  ;;  %v2308_v55 = vadd.f32 %v2307_v52, %v2306_v49 }
 0x2af   :  { %v2176_v56 = vadd.f32 %v2175_v54, %v2174_v50  ;;  %v2309_v0 = vrot.slane %v2308_v55, 1 }
 0x2b1   :  { %2177 = vst [vmem:[%s4390_s4] sm:$0x1] %v2176_v56  ;;  %v2310_v57 = vadd.f32 %v2309_v0, %v2308_v55 }
 0x2b3   :  { %2311 = vst [vmem:[%s4391_s5] sm:$0x1] %v2310_v57 }

// kernel: discriminator_funiegan_forward.12
= control target key start
LH: loop header
LB: loop body
LE: loop exit
PB: predicated region body
PF: predicated region fallthrough
CT: control target
= control target key end

     0   :  { %s338_s0 = inlined_call_operand.vmem [shape: f32[128,128], index: 0, kind: input, shape index: {}]   ;;  %s339_s1 = inlined_call_operand.vmem [shape: f32[1,128], index: 1, kind: input, shape index: {}]   ;;  %s340_s2 = inlined_call_operand.vmem [shape: f32[1,128], index: 2, kind: input, shape index: {}]   ;;  %s341_s3 = inlined_call_operand.vmem [shape: bf16[128,128], index: 3, kind: output, shape index: {}]  }
   0x1   :  { %v14_v0 = vld [vmem:[%s338_s0] sm:$0xff]  ;;  %v15_v1 = vld [vmem:[%s338_s0 + $0x8] sm:$0xff]  ;;  %v16_v4 = vld [vmem:[%s338_s0 + $0x10] sm:$0xff] }
   0x2   :  { %v232_v2 = vld [vmem:[%s339_s1] ss:$0 sm:$0xff]  ;;  %v17_v5 = vld [vmem:[%s338_s0 + $0x18] sm:$0xff]  ;;  %v19_v11 = vld [vmem:[%s338_s0 + $0x28] sm:$0xff] }
   0x3   :  { %v237_v3 = vld [vmem:[%s340_s2] ss:$0 sm:$0xff]  ;;  %v34_v7 = vmul.f32 %v232_v2, %v14_v0  ;;  %v35_v8 = vmul.f32 %v232_v2, %v15_v1  ;;  %v36_v9 = vmul.f32 %v232_v2, %v16_v4  ;;  %v37_v10 = vmul.f32 %v232_v2, %v17_v5  ;;  %v20_v12 = vld [vmem:[%s338_s0 + $0x30] sm:$0xff]  ;;  %v21_v13 = vld [vmem:[%s338_s0 + $0x38] sm:$0xff] }
   0x4   :  { %v18_v6 = vld [vmem:[%s338_s0 + $0x20] sm:$0xff]  ;;  %v39_v15 = vmul.f32 %v232_v2, %v19_v11  ;;  %v40_v16 = vmul.f32 %v232_v2, %v20_v12  ;;  %v41_v17 = vmul.f32 %v232_v2, %v21_v13  ;;  %v23_v37 = vld [vmem:[%s338_s0 + $0x48] sm:$0xff]  ;;  %v24_v38 = vld [vmem:[%s338_s0 + $0x50] sm:$0xff] }
   0x5   :  { %v38_v14 = vmul.f32 %v232_v2, %v18_v6  ;;  %v54_v18 = vadd.f32 %v237_v3, %v34_v7  ;;  %v55_v19 = vadd.f32 %v237_v3, %v35_v8  ;;  %v56_v20 = vadd.f32 %v237_v3, %v36_v9  ;;  %v22_v32 = vld [vmem:[%s338_s0 + $0x40] sm:$0xff]  ;;  %v25_v39 = vld [vmem:[%s338_s0 + $0x58] sm:$0xff]  ;;  %v27_v51 = vld [vmem:[%s338_s0 + $0x68] sm:$0xff] }
   0x6   :  { %v57_v21 = vadd.f32 %v237_v3, %v37_v10  ;;  %v59_v23 = vadd.f32 %v237_v3, %v39_v15  ;;  %v60_v24 = vadd.f32 %v237_v3, %v40_v16  ;;  %v61_v25 = vadd.f32 %v237_v3, %v41_v17  ;;  %v26_v50 = vld [vmem:[%s338_s0 + $0x60] sm:$0xff]  ;;  %v28_v63 = vld [vmem:[%s338_s0 + $0x70] sm:$0xff]  ;;  %v29_v0 = vld [vmem:[%s338_s0 + $0x78] sm:$0xff] }
   0x7   :  { %v58_v22 = vadd.f32 %v237_v3, %v38_v14  ;;  %vm70_vm0 = vcmp.gt.f32.partialorder %v54_v18, 0.0  ;;  %vm71_vm1 = vcmp.gt.f32.partialorder %v55_v19, 0.0  ;;  %v86_v26 = vmul.f32 0.2, %v54_v18 }
   0x8   :  { %v87_v27 = vmul.f32 0.2, %v55_v19  ;;  %vm72_vm2 = vcmp.gt.f32.partialorder %v56_v20, 0.0  ;;  %vm73_vm3 = vcmp.gt.f32.partialorder %v57_v21, 0.0  ;;  %v88_v28 = vmul.f32 0.2, %v56_v20 }
   0x9   :  { %v89_v29 = vmul.f32 0.2, %v57_v21  ;;  %v102_v30 = vsel %vm70_vm0, %v54_v18, %v86_v26  ;;  %vm74_vm4 = vcmp.gt.f32.partialorder %v58_v22, 0.0  ;;  %vm75_vm5 = vcmp.gt.f32.partialorder %v59_v23, 0.0 }
   0xa   :  { %v103_v31 = vsel %vm71_vm1, %v55_v19, %v87_v27  ;;  %v104_v34 = vsel %vm72_vm2, %v56_v20, %v88_v28  ;;  %v90_v36 = vmul.f32 0.2, %v58_v22  ;;  %v91_v41 = vmul.f32 0.2, %v59_v23 }
   0xb   :  { %v157_v33 = vpack.c.bf16 %v103_v31, %v102_v30  ;;  %v105_v35 = vsel %vm73_vm3, %v57_v21, %v89_v29  ;;  %vm76_vm6 = vcmp.gt.f32.partialorder %v60_v24, 0.0  ;;  %vm77_vm7 = vcmp.gt.f32.partialorder %v61_v25, 0.0 }
   0xc   :  { %v162_v40 = vpack.c.bf16 %v105_v35, %v104_v34  ;;  %v106_v42 = vsel %vm74_vm4, %v58_v22, %v90_v36  ;;  %v92_v43 = vmul.f32 0.2, %v60_v24  ;;  %v93_v44 = vmul.f32 0.2, %v61_v25 }
   0xd   :  { %158 = vst [vmem:[%s341_s3] sm:$0xff] %v157_v33   ;;  %v42_v45 = vmul.f32 %v232_v2, %v22_v32  ;;  %v107_v46 = vsel %vm75_vm5, %v59_v23, %v91_v41  ;;  %v43_v47 = vmul.f32 %v232_v2, %v23_v37  ;;  %v44_v48 = vmul.f32 %v232_v2, %v24_v38 }
   0xe   :  { %194 = vst [vmem:[%s341_s3 + $0x8] sm:$0xff] %v162_v40   ;;  %v45_v49 = vmul.f32 %v232_v2, %v25_v39  ;;  %v167_v52 = vpack.c.bf16 %v107_v46, %v106_v42  ;;  %v108_v53 = vsel %vm76_vm6, %v60_v24, %v92_v43  ;;  %v109_v54 = vsel %vm77_vm7, %v61_v25, %v93_v44 }
   0xf   :  { %v62_v55 = vadd.f32 %v237_v3, %v42_v45  ;;  %v172_v56 = vpack.c.bf16 %v109_v54, %v108_v53  ;;  %v63_v57 = vadd.f32 %v237_v3, %v43_v47  ;;  %v64_v58 = vadd.f32 %v237_v3, %v44_v48 }
  0x10   :  { %v65_v59 = vadd.f32 %v237_v3, %v45_v49  ;;  %195 = vst [vmem:[%s341_s3 + $0x10] sm:$0xff] %v167_v52   ;;  %v46_v61 = vmul.f32 %v232_v2, %v26_v50  ;;  %v47_v62 = vmul.f32 %v232_v2, %v27_v51  ;;  %v48_v10 = vmul.f32 %v232_v2, %v28_v63 }
  0x11   :  { %vm78_vm8 = vcmp.gt.f32.partialorder %v62_v55, 0.0  ;;  %v94_v60 = vmul.f32 0.2, %v62_v55  ;;  %196 = vst [vmem:[%s341_s3 + $0x18] sm:$0xff] %v172_v56   ;;  %vm79_vm9 = vcmp.gt.f32.partialorder %v63_v57, 0.0  ;;  %vm80_vm10 = vcmp.gt.f32.partialorder %v64_v58, 0.0 }
  0x12   :  { %v95_v1 = vmul.f32 0.2, %v63_v57  ;;  %vm81_vm11 = vcmp.gt.f32.partialorder %v65_v59, 0.0  ;;  %v96_v5 = vmul.f32 0.2, %v64_v58  ;;  %v66_v7 = vadd.f32 %v237_v3, %v46_v61 }
  0x13   :  { %v110_v4 = vsel %vm78_vm8, %v62_v55, %v94_v60  ;;  %v97_v6 = vmul.f32 0.2, %v65_v59  ;;  %v67_v9 = vadd.f32 %v237_v3, %v47_v62  ;;  %v49_v11 = vmul.f32 %v232_v2, %v29_v0 }
  0x14   :  { %v111_v8 = vsel %vm79_vm9, %v63_v57, %v95_v1  ;;  %v112_v13 = vsel %vm80_vm10, %v64_v58, %v96_v5  ;;  %vm82_vm12 = vcmp.gt.f32.partialorder %v66_v7, 0.0  ;;  %v98_v16 = vmul.f32 0.2, %v66_v7 }
  0x15   :  { %v177_v12 = vpack.c.bf16 %v111_v8, %v110_v4  ;;  %v113_v14 = vsel %vm81_vm11, %v65_v59, %v97_v6  ;;  %vm83_vm13 = vcmp.gt.f32.partialorder %v67_v9, 0.0  ;;  %v99_v17 = vmul.f32 0.2, %v67_v9 }
  0x16   :  { %v182_v15 = vpack.c.bf16 %v113_v14, %v112_v13  ;;  %v68_v18 = vadd.f32 %v237_v3, %v48_v10  ;;  %v69_v19 = vadd.f32 %v237_v3, %v49_v11  ;;  %v114_v2 = vsel %vm82_vm12, %v66_v7, %v98_v16 }
  0x17   :  { %197 = vst [vmem:[%s341_s3 + $0x20] sm:$0xff] %v177_v12   ;;  %v115_v20 = vsel %vm83_vm13, %v67_v9, %v99_v17 }
  0x18   :  { %198 = vst [vmem:[%s341_s3 + $0x28] sm:$0xff] %v182_v15   ;;  %v187_v21 = vpack.c.bf16 %v115_v20, %v114_v2  ;;  %vm84_vm14 = vcmp.gt.f32.partialorder %v68_v18, 0.0  ;;  %vm85_vm15 = vcmp.gt.f32.partialorder %v69_v19, 0.0  ;;  %v100_v22 = vmul.f32 0.2, %v68_v18 }
  0x19   :  { %v101_v23 = vmul.f32 0.2, %v69_v19 }
  0x1a   :  { %199 = vst [vmem:[%s341_s3 + $0x30] sm:$0xff] %v187_v21   ;;  %v116_v24 = vsel %vm84_vm14, %v68_v18, %v100_v22 }
  0x1b   :  { %v117_v25 = vsel %vm85_vm15, %v69_v19, %v101_v23 }
  0x1c   :  { %v192_v26 = vpack.c.bf16 %v117_v25, %v116_v24 }
  0x1e   :  { %200 = vst [vmem:[%s341_s3 + $0x38] sm:$0xff] %v192_v26  }

// kernel: discriminator_funiegan_forward.11
= control target key start
LH: loop header
LB: loop body
LE: loop exit
PB: predicated region body
PF: predicated region fallthrough
CT: control target
= control target key end

     0   :  { %s2866_s1 = inlined_call_operand.vmem [shape: bf16[1024,128], index: 1, kind: input, shape index: {}]   ;;  %s2867_s2 = inlined_call_operand.vmem [shape: f32[1,128], index: 2, kind: input, shape index: {}]   ;;  %s2868_s0 = inlined_call_operand.vmem [shape: bf16[128,1024], index: 0, kind: input, shape index: {}]   ;;  %s2869_s3 = inlined_call_operand.vmem [shape: f32[128,128], index: 3, kind: output, shape index: {0}]   ;;  %s2870_s4 = inlined_call_operand.vmem [shape: f32[1,1,128], index: 4, kind: output, shape index: {1}]   ;;  %s2871_s5 = inlined_call_operand.vmem [shape: f32[1,1,128], index: 5, kind: output, shape index: {2}]  }
   0x1   :  { %v2079_v0 = vld [vmem:[%s2866_s1 + $0x38] sm:$0xff]  ;;  %v2078_v4 = vld [vmem:[%s2866_s1 + $0x30] sm:$0xff]  ;;  %v2077_v8 = vld [vmem:[%s2866_s1 + $0x28] sm:$0xff] }
   0x2   :  { %v2087_v1 = vld [vmem:[%s2866_s1 + $0x78] sm:$0xff]  ;;  %917 = vmatpush.bf16.msra.mxu0 %v2079_v0  ;;  %v2086_v5 = vld [vmem:[%s2866_s1 + $0x70] sm:$0xff]  ;;  %v2085_v9 = vld [vmem:[%s2866_s1 + $0x68] sm:$0xff] }
   0x3   :  { %v2095_v2 = vld [vmem:[%s2866_s1 + $0xb8] sm:$0xff]  ;;  %966 = vmatpush.bf16.msra.mxu1 %v2087_v1  ;;  %v2094_v6 = vld [vmem:[%s2866_s1 + $0xb0] sm:$0xff]  ;;  %v2093_v10 = vld [vmem:[%s2866_s1 + $0xa8] sm:$0xff] }
   0x4   :  { %v2103_v3 = vld [vmem:[%s2866_s1 + $0xf8] sm:$0xff]  ;;  %1015 = vmatpush.bf16.msra.mxu2 %v2095_v2  ;;  %v2102_v7 = vld [vmem:[%s2866_s1 + $0xf0] sm:$0xff]  ;;  %v2101_v11 = vld [vmem:[%s2866_s1 + $0xe8] sm:$0xff] }
   0x5   :  { %1064 = vmatpush.bf16.msra.mxu3 %v2103_v3  ;;  %v2076_v12 = vld [vmem:[%s2866_s1 + $0x20] sm:$0xff]  ;;  %v2075_v16 = vld [vmem:[%s2866_s1 + $0x18] sm:$0xff]  ;;  %v2074_v20 = vld [vmem:[%s2866_s1 + $0x10] sm:$0xff] }
   0x6   :  { %918 = vmatpush.bf16.msra.mxu0 %v2078_v4  ;;  %v2084_v13 = vld [vmem:[%s2866_s1 + $0x60] sm:$0xff]  ;;  %v2083_v17 = vld [vmem:[%s2866_s1 + $0x58] sm:$0xff]  ;;  %v2082_v21 = vld [vmem:[%s2866_s1 + $0x50] sm:$0xff] }
   0x7   :  { %967 = vmatpush.bf16.msra.mxu1 %v2086_v5  ;;  %v2092_v14 = vld [vmem:[%s2866_s1 + $0xa0] sm:$0xff]  ;;  %v2091_v18 = vld [vmem:[%s2866_s1 + $0x98] sm:$0xff]  ;;  %v2090_v22 = vld [vmem:[%s2866_s1 + $0x90] sm:$0xff] }
   0x8   :  { %1016 = vmatpush.bf16.msra.mxu2 %v2094_v6  ;;  %v2100_v15 = vld [vmem:[%s2866_s1 + $0xe0] sm:$0xff]  ;;  %v2099_v19 = vld [vmem:[%s2866_s1 + $0xd8] sm:$0xff]  ;;  %v2098_v23 = vld [vmem:[%s2866_s1 + $0xd0] sm:$0xff] }
   0x9   :  { %1065 = vmatpush.bf16.msra.mxu3 %v2102_v7  ;;  %v2073_v24 = vld [vmem:[%s2866_s1 + $0x8] sm:$0xff]  ;;  %v2072_v28 = vld [vmem:[%s2866_s1] sm:$0xff]  ;;  %v2127_v40 = vld [vmem:[%s2866_s1 + $0x1b8] sm:$0xff] }
   0xa   :  { %919 = vmatpush.bf16.msra.mxu0 %v2077_v8  ;;  %v2081_v25 = vld [vmem:[%s2866_s1 + $0x48] sm:$0xff]  ;;  %v2080_v29 = vld [vmem:[%s2866_s1 + $0x40] sm:$0xff]  ;;  %v2111_v41 = vld [vmem:[%s2866_s1 + $0x138] sm:$0xff] }
   0xb   :  { %968 = vmatpush.bf16.msra.mxu1 %v2085_v9  ;;  %v2089_v26 = vld [vmem:[%s2866_s1 + $0x88] sm:$0xff]  ;;  %v2088_v30 = vld [vmem:[%s2866_s1 + $0x80] sm:$0xff]  ;;  %v2135_v46 = vld [vmem:[%s2866_s1 + $0x1f8] sm:$0xff] }
   0xc   :  { %1017 = vmatpush.bf16.msra.mxu2 %v2093_v10  ;;  %v2097_v27 = vld [vmem:[%s2866_s1 + $0xc8] sm:$0xff]  ;;  %v2096_v31 = vld [vmem:[%s2866_s1 + $0xc0] sm:$0xff]  ;;  %v2119_v47 = vld [vmem:[%s2866_s1 + $0x178] sm:$0xff] }
   0xd   :  { %1066 = vmatpush.bf16.msra.mxu3 %v2101_v11  ;;  %v1498_v32 = vld [vmem:[%s2868_s0] sm:$0xf]  ;;  %v2008_v34 = vld [vmem:[%s2868_s0 + $0x4] sm:$0xf]  ;;  %v1506_v36 = vld [vmem:[%s2868_s0 + $0x8] sm:$0xf] }
   0xe   :  { %920 = vmatpush.bf16.msra.mxu0 %v2076_v12  ;;  %v2012_v33 = vld [vmem:[%s2868_s0 + $0x1c] sm:$0xf0]  ;;  %v1500_v35 = vld [vmem:[%s2868_s0 + $0x20] sm:$0xf0]  ;;  %v2013_v37 = vld [vmem:[%s2868_s0 + $0x24] sm:$0xf0] }
   0xf   :  { %969 = vmatpush.bf16.msra.mxu1 %v2084_v13  ;;  %v2009_v38 = vld [vmem:[%s2868_s0 + $0xc] sm:$0xf]  ;;  %v1499_v42 = vor.u32 %v2012_v33, %v1498_v32  ;;  %v1503_v43 = vor.u32 %v2008_v34, %v1500_v35  ;;  %v1507_v44 = vor.u32 %v2013_v37, %v1506_v36  ;;  %v2126_v48 = vld [vmem:[%s2866_s1 + $0x1b0] sm:$0xff]  ;;  %v1530_v56 = vld [vmem:[%s2868_s0 + $0x40] sm:$0xf] }
  0x10   :  { %1018 = vmatpush.bf16.msra.mxu2 %v2092_v14  ;;  %v1508_v39 = vld [vmem:[%s2868_s0 + $0x28] sm:$0xf0]  ;;  %v2110_v49 = vld [vmem:[%s2866_s1 + $0x130] sm:$0xff]  ;;  %v2020_v57 = vld [vmem:[%s2868_s0 + $0x5c] sm:$0xf0] }
  0x11   :  { %1067 = vmatpush.bf16.msra.mxu3 %v2100_v15  ;;  %v1511_v45 = vor.u32 %v2009_v38, %v1508_v39  ;;  %v2134_v50 = vld [vmem:[%s2866_s1 + $0x1f0] sm:$0xff]  ;;  %v2125_v52 = vld [vmem:[%s2866_s1 + $0x1a8] sm:$0xff]  ;;  %v2016_v58 = vld [vmem:[%s2868_s0 + $0x44] sm:$0xf]  ;;  %v1531_v0 = vor.u32 %v2020_v57, %v1530_v56 }
  0x12   :  { %921 = vmatpush.bf16.msra.mxu0 %v2075_v16  ;;  %v2118_v51 = vld [vmem:[%s2866_s1 + $0x170] sm:$0xff]  ;;  %v2109_v53 = vld [vmem:[%s2866_s1 + $0x128] sm:$0xff]  ;;  %v1532_v59 = vld [vmem:[%s2868_s0 + $0x60] sm:$0xf0] }
  0x13   :  { %970 = vmatpush.bf16.msra.mxu1 %v2083_v17  ;;  %v2133_v54 = vld [vmem:[%s2866_s1 + $0x1e8] sm:$0xff]  ;;  %v1535_v1 = vor.u32 %v2016_v58, %v1532_v59  ;;  %v2124_v4 = vld [vmem:[%s2866_s1 + $0x1a0] sm:$0xff]  ;;  %v2122_v36 = vld [vmem:[%s2866_s1 + $0x190] sm:$0xff] }
  0x14   :  { %1019 = vmatpush.bf16.msra.mxu2 %v2091_v18  ;;  %v2117_v55 = vld [vmem:[%s2866_s1 + $0x168] sm:$0xff]  ;;  %v2108_v5 = vld [vmem:[%s2866_s1 + $0x120] sm:$0xff]  ;;  %v2106_v37 = vld [vmem:[%s2866_s1 + $0x110] sm:$0xff] }
  0x15   :  { %1068 = vmatpush.bf16.msra.mxu3 %v2099_v19  ;;  %v1538_v60 = vld [vmem:[%s2868_s0 + $0x48] sm:$0xf]  ;;  %v2017_v62 = vld [vmem:[%s2868_s0 + $0x4c] sm:$0xf]  ;;  %v2132_v6 = vld [vmem:[%s2866_s1 + $0x1e0] sm:$0xff] }
  0x16   :  { %922 = vmatpush.bf16.msra.mxu0 %v2074_v20  ;;  %v2021_v61 = vld [vmem:[%s2868_s0 + $0x64] sm:$0xf0]  ;;  %v1540_v63 = vld [vmem:[%s2868_s0 + $0x68] sm:$0xf0]  ;;  %v2116_v7 = vld [vmem:[%s2866_s1 + $0x160] sm:$0xff] }
  0x17   :  { %971 = vmatpush.bf16.msra.mxu1 %v2082_v21  ;;  %v1539_v2 = vor.u32 %v2021_v61, %v1538_v60  ;;  %v1543_v3 = vor.u32 %v2017_v62, %v1540_v63  ;;  %v1562_v8 = vld [vmem:[%s2868_s0 + $0x80] sm:$0xf]  ;;  %v2024_v10 = vld [vmem:[%s2868_s0 + $0x84] sm:$0xf]  ;;  %v1570_v12 = vld [vmem:[%s2868_s0 + $0x88] sm:$0xf] }
  0x18   :  { %1020 = vmatpush.bf16.msra.mxu2 %v2090_v22  ;;  %v2028_v9 = vld [vmem:[%s2868_s0 + $0x9c] sm:$0xf0]  ;;  %v1564_v11 = vld [vmem:[%s2868_s0 + $0xa0] sm:$0xf0]  ;;  %v2029_v13 = vld [vmem:[%s2868_s0 + $0xa4] sm:$0xf0] }
  0x19   :  { %1069 = vmatpush.bf16.msra.mxu3 %v2098_v23  ;;  %v2025_v14 = vld [vmem:[%s2868_s0 + $0x8c] sm:$0xf]  ;;  %v1563_v16 = vor.u32 %v2028_v9, %v1562_v8  ;;  %v1567_v17 = vor.u32 %v2024_v10, %v1564_v11  ;;  %v1571_v18 = vor.u32 %v2029_v13, %v1570_v12  ;;  %v2123_v20 = vld [vmem:[%s2866_s1 + $0x198] sm:$0xff]  ;;  %v2130_v38 = vld [vmem:[%s2866_s1 + $0x1d0] sm:$0xff] }
  0x1a   :  { %923 = vmatpush.bf16.msra.mxu0 %v2073_v24  ;;  %v1572_v15 = vld [vmem:[%s2868_s0 + $0xa8] sm:$0xf0]  ;;  %v2107_v21 = vld [vmem:[%s2866_s1 + $0x118] sm:$0xff]  ;;  %v1594_v24 = vld [vmem:[%s2868_s0 + $0xc0] sm:$0xf] }
  0x1b   :  { %972 = vmatpush.bf16.msra.mxu1 %v2081_v25  ;;  %v1575_v19 = vor.u32 %v2025_v14, %v1572_v15  ;;  %v2131_v22 = vld [vmem:[%s2866_s1 + $0x1d8] sm:$0xff]  ;;  %v2036_v25 = vld [vmem:[%s2868_s0 + $0xdc] sm:$0xf0]  ;;  %v2114_v39 = vld [vmem:[%s2866_s1 + $0x150] sm:$0xff] }
  0x1c   :  { %1021 = vmatpush.bf16.msra.mxu2 %v2089_v26  ;;  %v2115_v23 = vld [vmem:[%s2866_s1 + $0x158] sm:$0xff]  ;;  %v2032_v26 = vld [vmem:[%s2868_s0 + $0xc4] sm:$0xf]  ;;  %v1595_v32 = vor.u32 %v2036_v25, %v1594_v24  ;;  %v1658_v56 = vld [vmem:[%s2868_s0 + $0x140] sm:$0xf] }
  0x1d   :  { %1070 = vmatpush.bf16.msra.mxu3 %v2097_v27  ;;  %v1596_v27 = vld [vmem:[%s2868_s0 + $0xe0] sm:$0xf0]  ;;  %v2052_v57 = vld [vmem:[%s2868_s0 + $0x15c] sm:$0xf0]  ;;  %v1666_v60 = vld [vmem:[%s2868_s0 + $0x148] sm:$0xf] }
  0x1e   :  { %924 = vmatpush.bf16.msra.mxu0 %v2072_v28  ;;  %v1602_v28 = vld [vmem:[%s2868_s0 + $0xc8] sm:$0xf]  ;;  %v1599_v33 = vor.u32 %v2032_v26, %v1596_v27  ;;  %v2048_v58 = vld [vmem:[%s2868_s0 + $0x144] sm:$0xf]  ;;  %v2049_v62 = vld [vmem:[%s2868_s0 + $0x14c] sm:$0xf] }
  0x1f   :  { %973 = vmatpush.bf16.msra.mxu1 %v2080_v29  ;;  %v2037_v29 = vld [vmem:[%s2868_s0 + $0xe4] sm:$0xf0]  ;;  %v1660_v59 = vld [vmem:[%s2868_s0 + $0x160] sm:$0xf0]  ;;  %v1668_v63 = vld [vmem:[%s2868_s0 + $0x168] sm:$0xf0] }
  0x20   :  { %1022 = vmatpush.bf16.msra.mxu2 %v2088_v30  ;;  %v2033_v30 = vld [vmem:[%s2868_s0 + $0xcc] sm:$0xf]  ;;  %v1603_v34 = vor.u32 %v2037_v29, %v1602_v28  ;;  %v2053_v61 = vld [vmem:[%s2868_s0 + $0x164] sm:$0xf0]  ;;  %v1690_v8 = vld [vmem:[%s2868_s0 + $0x180] sm:$0xf] }
  0x21   :  { %1071 = vmatpush.bf16.msra.mxu3 %v2096_v31  ;;  %925 = vmatmul.bf16.vlgmr.msra.gmra.mxu0 %v1499_v42  ;;  %v1604_v31 = vld [vmem:[%s2868_s0 + $0xe8] sm:$0xf0]  ;;  %v2040_v42 = vld [vmem:[%s2868_s0 + $0x104] sm:$0xf]  ;;  %v2060_v9 = vld [vmem:[%s2868_s0 + $0x19c] sm:$0xf0] }
  0x22   :  { %1113 = vmatpush.bf16.msrb.mxu0 %v2111_v41  ;;  %974 = vmatmul.bf16.vlgmr.msra.gmra.mxu1 %v1503_v43  ;;  %v1607_v35 = vor.u32 %v2033_v30, %v1604_v31  ;;  %v2044_v41 = vld [vmem:[%s2868_s0 + $0x11c] sm:$0xf0]  ;;  %v1628_v43 = vld [vmem:[%s2868_s0 + $0x120] sm:$0xf0]  ;;  %v1698_v12 = vld [vmem:[%s2868_s0 + $0x188] sm:$0xf] }
  0x23   :  { %1023 = vmatmul.bf16.vlgmr.msra.gmra.mxu2 %v1507_v44  ;;  %1162 = vmatpush.bf16.msrb.mxu1 %v2119_v47  ;;  %v1634_v44 = vld [vmem:[%s2868_s0 + $0x108] sm:$0xf]  ;;  %v1636_v47 = vld [vmem:[%s2868_s0 + $0x128] sm:$0xf0]  ;;  %v2056_v10 = vld [vmem:[%s2868_s0 + $0x184] sm:$0xf] }
  0x24   :  { %1211 = vmatpush.bf16.msrb.mxu2 %v2127_v40  ;;  %1072 = vmatmul.bf16.vlgmr.msra.gmra.mxu3 %v1511_v45  ;;  %v1626_v40 = vld [vmem:[%s2868_s0 + $0x100] sm:$0xf]  ;;  %v2045_v45 = vld [vmem:[%s2868_s0 + $0x124] sm:$0xf0]  ;;  %v1692_v11 = vld [vmem:[%s2868_s0 + $0x1a0] sm:$0xf0] }
  0x25   :  { %1260 = vmatpush.bf16.msrb.mxu3 %v2135_v46  ;;  %v2041_v46 = vld [vmem:[%s2868_s0 + $0x10c] sm:$0xf]  ;;  %v2061_v13 = vld [vmem:[%s2868_s0 + $0x1a4] sm:$0xf0] }
  0x26   :  { %1114 = vmatpush.bf16.msrb.mxu0 %v2110_v49  ;;  %v1631_v49 = vor.u32 %v2040_v42, %v1628_v43  ;;  %v2057_v14 = vld [vmem:[%s2868_s0 + $0x18c] sm:$0xf]  ;;  %v1730_v24 = vld [vmem:[%s2868_s0 + $0x1c8] sm:$0xf] }
  0x27   :  { %1163 = vmatpush.bf16.msrb.mxu1 %v2118_v51  ;;  %v1639_v51 = vor.u32 %v2041_v46, %v1636_v47  ;;  %v1700_v15 = vld [vmem:[%s2868_s0 + $0x1a8] sm:$0xf0]  ;;  %v2069_v25 = vld [vmem:[%s2868_s0 + $0x1e4] sm:$0xf0] }
  0x28   :  { %1212 = vmatpush.bf16.msrb.mxu2 %v2126_v48  ;;  %v1627_v48 = vor.u32 %v2044_v41, %v1626_v40  ;;  %v2065_v26 = vld [vmem:[%s2868_s0 + $0x1cc] sm:$0xf]  ;;  %v1731_v30 = vor.u32 %v2069_v25, %v1730_v24  ;;  %v1524_v40 = vld [vmem:[%s2868_s0 + $0x38] sm:$0xf0]  ;;  %v1580_v24 = vld [vmem:[%s2868_s0 + $0xb0] sm:$0xf0] }
  0x29   :  { %1261 = vmatpush.bf16.msrb.mxu3 %v2134_v50  ;;  %v1635_v50 = vor.u32 %v2045_v45, %v1634_v44  ;;  %v1732_v27 = vld [vmem:[%s2868_s0 + $0x1e8] sm:$0xf0]  ;;  %v1586_v25 = vld [vmem:[%s2868_s0 + $0x98] sm:$0xf] }
  0x2a   :  { %1115 = vmatpush.bf16.msrb.mxu0 %v2109_v53  ;;  %v2105_v53 = vld [vmem:[%s2866_s1 + $0x108] sm:$0xff]  ;;  %v1735_v31 = vor.u32 %v2065_v26, %v1732_v27  ;;  %v2031_v26 = vld [vmem:[%s2868_s0 + $0xb4] sm:$0xf0]  ;;  %v2027_v27 = vld [vmem:[%s2868_s0 + $0x9c] sm:$0xf] }
  0x2b   :  { %1164 = vmatpush.bf16.msrb.mxu1 %v2117_v55  ;;  %v2113_v55 = vld [vmem:[%s2866_s1 + $0x148] sm:$0xff] }
  0x2c   :  { %1213 = vmatpush.bf16.msrb.mxu2 %v2125_v52  ;;  %v2121_v52 = vld [vmem:[%s2866_s1 + $0x188] sm:$0xff] }
  0x2d   :  { %1262 = vmatpush.bf16.msrb.mxu3 %v2133_v54  ;;  %v2129_v54 = vld [vmem:[%s2866_s1 + $0x1c8] sm:$0xff] }
  0x2e   :  { %1116 = vmatpush.bf16.msrb.mxu0 %v2108_v5  ;;  %v2104_v5 = vld [vmem:[%s2866_s1 + $0x100] sm:$0xff] }
  0x2f   :  { %1165 = vmatpush.bf16.msrb.mxu1 %v2116_v7  ;;  %v2112_v7 = vld [vmem:[%s2866_s1 + $0x140] sm:$0xff] }
  0x30   :  { %1214 = vmatpush.bf16.msrb.mxu2 %v2124_v4  ;;  %v2120_v4 = vld [vmem:[%s2866_s1 + $0x180] sm:$0xff] }
  0x31   :  { %930 = vmatmul.bf16.gmra.mxu0 %v1531_v0  ;;  %1263 = vmatpush.bf16.msrb.mxu3 %v2132_v6  ;;  %v1659_v0 = vor.u32 %v2052_v57, %v1658_v56  ;;  %v2128_v6 = vld [vmem:[%s2866_s1 + $0x1c0] sm:$0xff]  ;;  %v1546_v57 = vld [vmem:[%s2868_s0 + $0x50] sm:$0xf] }
  0x32   :  { %979 = vmatmul.bf16.gmra.mxu1 %v1535_v1  ;;  %1117 = vmatpush.bf16.msrb.mxu0 %v2107_v21  ;;  %v1663_v1 = vor.u32 %v2048_v58, %v1660_v59  ;;  %v2068_v21 = vld [vmem:[%s2868_s0 + $0x1dc] sm:$0xf0]  ;;  %v2022_v58 = vld [vmem:[%s2868_s0 + $0x6c] sm:$0xf0]  ;;  %v2018_v59 = vld [vmem:[%s2868_s0 + $0x54] sm:$0xf] }
  0x33   :  { %1028 = vmatmul.bf16.gmra.mxu2 %v1539_v2  ;;  %1166 = vmatpush.bf16.msrb.mxu1 %v2115_v23  ;;  %v1667_v2 = vor.u32 %v2053_v61, %v1666_v60  ;;  %v1724_v23 = vld [vmem:[%s2868_s0 + $0x1e0] sm:$0xf0]  ;;  %v1548_v60 = vld [vmem:[%s2868_s0 + $0x70] sm:$0xf0]  ;;  %v1554_v61 = vld [vmem:[%s2868_s0 + $0x58] sm:$0xf] }
  0x34   :  { %1077 = vmatmul.bf16.gmra.mxu3 %v1543_v3  ;;  %1215 = vmatpush.bf16.msrb.mxu2 %v2123_v20  ;;  %v1671_v3 = vor.u32 %v2049_v62, %v1668_v63  ;;  %v1722_v20 = vld [vmem:[%s2868_s0 + $0x1c0] sm:$0xf]  ;;  %v2023_v62 = vld [vmem:[%s2868_s0 + $0x74] sm:$0xf0]  ;;  %v2019_v63 = vld [vmem:[%s2868_s0 + $0x5c] sm:$0xf] }
  0x35   :  { %1264 = vmatpush.bf16.msrb.mxu3 %v2131_v22  ;;  %v2064_v22 = vld [vmem:[%s2868_s0 + $0x1c4] sm:$0xf]  ;;  %v1723_v28 = vor.u32 %v2068_v21, %v1722_v20  ;;  %v1578_v21 = vld [vmem:[%s2868_s0 + $0x90] sm:$0xf] }
  0x36   :  { %1118 = vmatpush.bf16.msrb.mxu0 %v2106_v37  ;;  %v1727_v29 = vor.u32 %v2064_v22, %v1724_v23  ;;  %v1522_v37 = vld [vmem:[%s2868_s0 + $0x18] sm:$0xf]  ;;  %v2030_v22 = vld [vmem:[%s2868_s0 + $0xac] sm:$0xf0]  ;;  %v2026_v23 = vld [vmem:[%s2868_s0 + $0x94] sm:$0xf] }
  0x37   :  { %1167 = vmatpush.bf16.msrb.mxu1 %v2114_v39  ;;  %v2011_v39 = vld [vmem:[%s2868_s0 + $0x1c] sm:$0xf] }
  0x38   :  { %1216 = vmatpush.bf16.msrb.mxu2 %v2122_v36  ;;  %v1516_v36 = vld [vmem:[%s2868_s0 + $0x30] sm:$0xf0]  ;;  %v1527_v46 = vor.u32 %v2011_v39, %v1524_v40 }
  0x39   :  { %1265 = vmatpush.bf16.msrb.mxu3 %v2130_v38  ;;  %v2015_v38 = vld [vmem:[%s2868_s0 + $0x34] sm:$0xf0] }
  0x3a   :  { %1119 = vmatpush.bf16.msrb.mxu0 %v2105_v53  ;;  %v1523_v45 = vor.u32 %v2015_v38, %v1522_v37  ;;  %v1587_v37 = vor.u32 %v2031_v26, %v1586_v25 }
  0x3b   :  { %1168 = vmatpush.bf16.msrb.mxu1 %v2113_v55 }
  0x3c   :  { %1217 = vmatpush.bf16.msrb.mxu2 %v2121_v52 }
  0x3d   :  { %1266 = vmatpush.bf16.msrb.mxu3 %v2129_v54 }
  0x3e   :  { %1120 = vmatpush.bf16.msrb.mxu0 %v2104_v5 }
  0x3f   :  { %1169 = vmatpush.bf16.msrb.mxu1 %v2112_v7 }
  0x40   :  { %1218 = vmatpush.bf16.msrb.mxu2 %v2120_v4  ;;  %v1551_v4 = vor.u32 %v2018_v59, %v1548_v60 }
  0x41   :  { %935 = vmatmul.bf16.gmra.mxu0 %v1563_v16  ;;  %1267 = vmatpush.bf16.msrb.mxu3 %v2128_v6  ;;  %v1691_v16 = vor.u32 %v2060_v9, %v1690_v8  ;;  %v1555_v8 = vor.u32 %v2023_v62, %v1554_v61 }
  0x42   :  { %984 = vmatmul.bf16.gmra.mxu1 %v1567_v17  ;;  %v1695_v17 = vor.u32 %v2056_v10, %v1692_v11 }
  0x43   :  { %1033 = vmatmul.bf16.gmra.mxu2 %v1571_v18  ;;  %v1699_v18 = vor.u32 %v2061_v13, %v1698_v12 }
  0x44   :  { %1082 = vmatmul.bf16.gmra.mxu3 %v1575_v19  ;;  %v1703_v19 = vor.u32 %v2057_v14, %v1700_v15 }
  0x51   :  { %940 = vmatmul.bf16.gmra.mxu0 %v1595_v32  ;;  %v2554_v32 = vld [vmem:[%s2867_s2] ss:$0 sm:$0xff] }
  0x52   :  { %989 = vmatmul.bf16.gmra.mxu1 %v1599_v33  ;;  %v1514_v33 = vld [vmem:[%s2868_s0 + $0x10] sm:$0xf] }
  0x53   :  { %1038 = vmatmul.bf16.gmra.mxu2 %v1603_v34  ;;  %v2014_v34 = vld [vmem:[%s2868_s0 + $0x2c] sm:$0xf0] }
  0x54   :  { %1087 = vmatmul.bf16.gmra.mxu3 %v1607_v35  ;;  %v2010_v35 = vld [vmem:[%s2868_s0 + $0x14] sm:$0xf]  ;;  %v1515_v41 = vor.u32 %v2014_v34, %v1514_v33  ;;  %v1583_v33 = vor.u32 %v2026_v23, %v1580_v24  ;;  %v2043_v23 = vld [vmem:[%s2868_s0 + $0x11c] sm:$0xf] }
  0x55   :  { %v1519_v42 = vor.u32 %v2010_v35, %v1516_v36  ;;  %v1652_v24 = vld [vmem:[%s2868_s0 + $0x138] sm:$0xf0] }
  0x61   :  { %945 = vmatmul.bf16.gmra.mxu0 %v1627_v48 }
  0x62   :  { %994 = vmatmul.bf16.gmra.mxu1 %v1631_v49 }
  0x63   :  { %1043 = vmatmul.bf16.gmra.mxu2 %v1635_v50 }
  0x64   :  { %1092 = vmatmul.bf16.gmra.mxu3 %v1639_v51 }
  0x71   :  { %950 = vmatmul.bf16.gmra.mxu0 %v1659_v0  ;;  %v1556_v0 = vld [vmem:[%s2868_s0 + $0x78] sm:$0xf0] }
  0x72   :  { %999 = vmatmul.bf16.gmra.mxu1 %v1663_v1  ;;  %v1559_v9 = vor.u32 %v2019_v63, %v1556_v0 }
  0x73   :  { %1048 = vmatmul.bf16.gmra.mxu2 %v1667_v2 }
  0x74   :  { %1097 = vmatmul.bf16.gmra.mxu3 %v1671_v3  ;;  %v1547_v3 = vor.u32 %v2022_v58, %v1546_v57  ;;  %v2035_v57 = vld [vmem:[%s2868_s0 + $0xdc] sm:$0xf] }
  0x75   :  { %v1620_v58 = vld [vmem:[%s2868_s0 + $0xf8] sm:$0xf0] }
  0x81   :  { %955 = vmatmul.bf16.gmra.mxu0 %v1691_v16 }
  0x82   :  { %1004 = vmatmul.bf16.gmra.mxu1 %v1695_v17 }
  0x83   :  { %1053 = vmatmul.bf16.gmra.mxu2 %v1699_v18 }
  0x84   :  { %1102 = vmatmul.bf16.gmra.mxu3 %v1703_v19 }
  0x91   :  { %960 = vmatmul.bf16.gmra.mxu0 %v1723_v28  ;;  %v1588_v28 = vld [vmem:[%s2868_s0 + $0xb8] sm:$0xf0] }
  0x92   :  { %1009 = vmatmul.bf16.gmra.mxu1 %v1727_v29  ;;  %v1591_v38 = vor.u32 %v2027_v27, %v1588_v28 }
  0x93   :  { %1058 = vmatmul.bf16.gmra.mxu2 %v1731_v30 }
  0x94   :  { %1107 = vmatmul.bf16.gmra.mxu3 %v1735_v31  ;;  %v1579_v31 = vor.u32 %v2030_v22, %v1578_v21  ;;  %v1650_v21 = vld [vmem:[%s2868_s0 + $0x118] sm:$0xf] }
  0x95   :  { %v2047_v22 = vld [vmem:[%s2868_s0 + $0x134] sm:$0xf0] }
  0x9e   :  { %v926_v43 = vpop.f32.mrf.mxu0 }
  0x9f   :  { %v975_v44 = vpop.f32.mrf.mxu1  ;;  %v927_v47 = vadd.f32 %v2554_v32, %v926_v43 }
  0xa1   :  { %v976_v48 = vadd.f32 %v975_v44, %v927_v47  ;;  %1121 = vmatmul.bf16.vlgmr.msrb.gmra.mxu0 %v1515_v41 }
  0xa2   :  { %1170 = vmatmul.bf16.vlgmr.msrb.gmra.mxu1 %v1519_v42 }
  0xa3   :  { %1219 = vmatmul.bf16.vlgmr.msrb.gmra.mxu2 %v1523_v45 }
  0xa4   :  { %1268 = vmatmul.bf16.vlgmr.msrb.gmra.mxu3 %v1527_v46 }
  0xa6   :  { %v1024_v49 = vpop.f32.mrf.mxu2  ;;  %v928_v52 = vpop.f32.mrf.mxu0 }
  0xa7   :  { %v1073_v50 = vpop.f32.mrf.mxu3  ;;  %v1025_v51 = vadd.f32 %v1024_v49, %v976_v48  ;;  %v977_v53 = vpop.f32.mrf.mxu1  ;;  %v929_v54 = vadd.f32 %v2554_v32, %v928_v52  ;;  %v2034_v52 = vld [vmem:[%s2868_s0 + $0xd4] sm:$0xf] }
  0xa9   :  { %v2582_v55 = vadd.f32 %v1073_v50, %v1025_v51  ;;  %v978_v56 = vadd.f32 %v977_v53, %v929_v54  ;;  %v1610_v50 = vld [vmem:[%s2868_s0 + $0xd0] sm:$0xf]  ;;  %v1612_v53 = vld [vmem:[%s2868_s0 + $0xf0] sm:$0xf0]  ;;  %v1618_v54 = vld [vmem:[%s2868_s0 + $0xd8] sm:$0xf] }
  0xaa   :  { %v2038_v51 = vld [vmem:[%s2868_s0 + $0xec] sm:$0xf0]  ;;  %v1615_v62 = vor.u32 %v2034_v52, %v1612_v53  ;;  %v1682_v52 = vld [vmem:[%s2868_s0 + $0x158] sm:$0xf] }
  0xab   :  { %v1611_v61 = vor.u32 %v2038_v51, %v1610_v50  ;;  %v2050_v50 = vld [vmem:[%s2868_s0 + $0x154] sm:$0xf]  ;;  %v2055_v53 = vld [vmem:[%s2868_s0 + $0x174] sm:$0xf0] }
  0xac   :  { %v1676_v51 = vld [vmem:[%s2868_s0 + $0x170] sm:$0xf0] }
  0xae   :  { %v1026_v1 = vpop.f32.mrf.mxu2  ;;  %v931_v6 = vpop.f32.mrf.mxu0 }
  0xaf   :  { %v1075_v2 = vpop.f32.mrf.mxu3  ;;  %v1027_v5 = vadd.f32 %v1026_v1, %v978_v56  ;;  %v980_v7 = vpop.f32.mrf.mxu1  ;;  %v932_v10 = vadd.f32 %v2554_v32, %v931_v6  ;;  %v2039_v56 = vld [vmem:[%s2868_s0 + $0xf4] sm:$0xf0] }
  0xb1   :  { %v2609_v11 = vadd.f32 %v1075_v2, %v1027_v5  ;;  %v981_v12 = vadd.f32 %v980_v7, %v932_v10  ;;  %1126 = vmatmul.bf16.gmra.mxu0 %v1547_v3  ;;  %v1619_v2 = vor.u32 %v2039_v56, %v1618_v54  ;;  %v1623_v3 = vor.u32 %v2035_v57, %v1620_v58  ;;  %v2051_v54 = vld [vmem:[%s2868_s0 + $0x15c] sm:$0xf] }
  0xb2   :  { %1175 = vmatmul.bf16.gmra.mxu1 %v1551_v4  ;;  %v1684_v56 = vld [vmem:[%s2868_s0 + $0x178] sm:$0xf0] }
  0xb3   :  { %1224 = vmatmul.bf16.gmra.mxu2 %v1555_v8 }
  0xb4   :  { %1273 = vmatmul.bf16.gmra.mxu3 %v1559_v9 }
  0xb6   :  { %v1029_v13 = vpop.f32.mrf.mxu2  ;;  %v933_v16 = vpop.f32.mrf.mxu0 }
  0xb7   :  { %v1078_v14 = vpop.f32.mrf.mxu3  ;;  %v1030_v15 = vadd.f32 %v1029_v13, %v981_v12  ;;  %v982_v17 = vpop.f32.mrf.mxu1  ;;  %v934_v18 = vadd.f32 %v2554_v32, %v933_v16  ;;  %v1642_v16 = vld [vmem:[%s2868_s0 + $0x110] sm:$0xf] }
  0xb9   :  { %v2612_v19 = vadd.f32 %v1078_v14, %v1030_v15  ;;  %v983_v20 = vadd.f32 %v982_v17, %v934_v18  ;;  %v2046_v17 = vld [vmem:[%s2868_s0 + $0x12c] sm:$0xf0]  ;;  %v2042_v18 = vld [vmem:[%s2868_s0 + $0x114] sm:$0xf] }
  0xba   :  { %v1643_v27 = vor.u32 %v2046_v17, %v1642_v16  ;;  %v1706_v16 = vld [vmem:[%s2868_s0 + $0x190] sm:$0xf] }
  0xbb   :  { %v2062_v17 = vld [vmem:[%s2868_s0 + $0x1ac] sm:$0xf0] }
  0xbe   :  { %v1031_v29 = vpop.f32.mrf.mxu2  ;;  %v936_v35 = vpop.f32.mrf.mxu0 }
  0xbf   :  { %v1080_v30 = vpop.f32.mrf.mxu3  ;;  %v1032_v34 = vadd.f32 %v1031_v29, %v983_v20  ;;  %v985_v36 = vpop.f32.mrf.mxu1  ;;  %v937_v39 = vadd.f32 %v2554_v32, %v936_v35  ;;  %v1644_v20 = vld [vmem:[%s2868_s0 + $0x130] sm:$0xf0] }
  0xc0   :  { %v1647_v28 = vor.u32 %v2042_v18, %v1644_v20  ;;  %v2058_v18 = vld [vmem:[%s2868_s0 + $0x194] sm:$0xf] }
  0xc1   :  { %v2639_v40 = vadd.f32 %v1080_v30, %v1032_v34  ;;  %v986_v41 = vadd.f32 %v985_v36, %v937_v39  ;;  %1131 = vmatmul.bf16.gmra.mxu0 %v1579_v31  ;;  %v1655_v34 = vor.u32 %v2043_v23, %v1652_v24  ;;  %v1708_v20 = vld [vmem:[%s2868_s0 + $0x1b0] sm:$0xf0]  ;;  %v2059_v23 = vld [vmem:[%s2868_s0 + $0x19c] sm:$0xf] }
  0xc2   :  { %1180 = vmatmul.bf16.gmra.mxu1 %v1583_v33  ;;  %v1651_v33 = vor.u32 %v2047_v22, %v1650_v21  ;;  %v1714_v21 = vld [vmem:[%s2868_s0 + $0x198] sm:$0xf]  ;;  %v1716_v24 = vld [vmem:[%s2868_s0 + $0x1b8] sm:$0xf0] }
  0xc3   :  { %1229 = vmatmul.bf16.gmra.mxu2 %v1587_v37  ;;  %v2063_v22 = vld [vmem:[%s2868_s0 + $0x1b4] sm:$0xf0] }
  0xc4   :  { %1278 = vmatmul.bf16.gmra.mxu3 %v1591_v38 }
  0xc6   :  { %v1034_v42 = vpop.f32.mrf.mxu2  ;;  %v938_v45 = vpop.f32.mrf.mxu0 }
  0xc7   :  { %v1083_v43 = vpop.f32.mrf.mxu3  ;;  %v1035_v44 = vadd.f32 %v1034_v42, %v986_v41  ;;  %v987_v46 = vpop.f32.mrf.mxu1  ;;  %v939_v47 = vadd.f32 %v2554_v32, %v938_v45 }
  0xc9   :  { %v2642_v48 = vadd.f32 %v1083_v43, %v1035_v44  ;;  %v988_v49 = vadd.f32 %v987_v46, %v939_v47  ;;  %v1674_v47 = vld [vmem:[%s2868_s0 + $0x150] sm:$0xf] }
  0xce   :  { %v1036_v59 = vpop.f32.mrf.mxu2  ;;  %v941_v0 = vpop.f32.mrf.mxu0 }
  0xcf   :  { %v1085_v60 = vpop.f32.mrf.mxu3  ;;  %v1037_v63 = vadd.f32 %v1036_v59, %v988_v49  ;;  %v990_v1 = vpop.f32.mrf.mxu1  ;;  %v942_v4 = vadd.f32 %v2554_v32, %v941_v0  ;;  %v2054_v49 = vld [vmem:[%s2868_s0 + $0x16c] sm:$0xf0]  ;;  %v1683_v0 = vor.u32 %v2055_v53, %v1682_v52  ;;  %v2066_v52 = vld [vmem:[%s2868_s0 + $0x1d4] sm:$0xf] }
  0xd0   :  { %v1675_v59 = vor.u32 %v2054_v49, %v1674_v47  ;;  %v1740_v53 = vld [vmem:[%s2868_s0 + $0x1f0] sm:$0xf0] }
  0xd1   :  { %v2669_v5 = vadd.f32 %v1085_v60, %v1037_v63  ;;  %v991_v6 = vadd.f32 %v990_v1, %v942_v4  ;;  %1136 = vmatmul.bf16.gmra.mxu0 %v1611_v61  ;;  %v1679_v60 = vor.u32 %v2050_v50, %v1676_v51  ;;  %v1687_v1 = vor.u32 %v2051_v54, %v1684_v56  ;;  %v1738_v50 = vld [vmem:[%s2868_s0 + $0x1d0] sm:$0xf]  ;;  %v1746_v54 = vld [vmem:[%s2868_s0 + $0x1d8] sm:$0xf] }
  0xd2   :  { %1185 = vmatmul.bf16.gmra.mxu1 %v1615_v62  ;;  %v2070_v51 = vld [vmem:[%s2868_s0 + $0x1ec] sm:$0xf0]  ;;  %v2071_v56 = vld [vmem:[%s2868_s0 + $0x1f4] sm:$0xf0] }
  0xd3   :  { %1234 = vmatmul.bf16.gmra.mxu2 %v1619_v2 }
  0xd4   :  { %1283 = vmatmul.bf16.gmra.mxu3 %v1623_v3 }
  0xd6   :  { %v1039_v7 = vpop.f32.mrf.mxu2  ;;  %v943_v10 = vpop.f32.mrf.mxu0 }
  0xd7   :  { %v1088_v8 = vpop.f32.mrf.mxu3  ;;  %v1040_v9 = vadd.f32 %v1039_v7, %v991_v6  ;;  %v992_v12 = vpop.f32.mrf.mxu1  ;;  %v944_v13 = vadd.f32 %v2554_v32, %v943_v10 }
  0xd9   :  { %v2672_v14 = vadd.f32 %v1088_v8, %v1040_v9  ;;  %v993_v15 = vadd.f32 %v992_v12, %v944_v13 }
  0xde   :  { %v1041_v25 = vpop.f32.mrf.mxu2  ;;  %v946_v30 = vpop.f32.mrf.mxu0 }
  0xdf   :  { %v1090_v26 = vpop.f32.mrf.mxu3  ;;  %v1042_v29 = vadd.f32 %v1041_v25, %v993_v15  ;;  %v995_v31 = vpop.f32.mrf.mxu1  ;;  %v947_v35 = vadd.f32 %v2554_v32, %v946_v30 }
  0xe1   :  { %v2699_v36 = vadd.f32 %v1090_v26, %v1042_v29  ;;  %v996_v37 = vadd.f32 %v995_v31, %v947_v35  ;;  %1141 = vmatmul.bf16.gmra.mxu0 %v1643_v27  ;;  %v1707_v27 = vor.u32 %v2062_v17, %v1706_v16 }
  0xe2   :  { %1190 = vmatmul.bf16.gmra.mxu1 %v1647_v28  ;;  %v1711_v28 = vor.u32 %v2058_v18, %v1708_v20 }
  0xe3   :  { %1239 = vmatmul.bf16.gmra.mxu2 %v1651_v33  ;;  %v1715_v33 = vor.u32 %v2063_v22, %v1714_v21 }
  0xe4   :  { %1288 = vmatmul.bf16.gmra.mxu3 %v1655_v34  ;;  %v1719_v34 = vor.u32 %v2059_v23, %v1716_v24 }
  0xe6   :  { %v1044_v38 = vpop.f32.mrf.mxu2  ;;  %v948_v42 = vpop.f32.mrf.mxu0 }
  0xe7   :  { %v1093_v39 = vpop.f32.mrf.mxu3  ;;  %v1045_v41 = vadd.f32 %v1044_v38, %v996_v37  ;;  %v997_v43 = vpop.f32.mrf.mxu1  ;;  %v949_v44 = vadd.f32 %v2554_v32, %v948_v42 }
  0xe9   :  { %v2702_v45 = vadd.f32 %v1093_v39, %v1045_v41  ;;  %v998_v46 = vadd.f32 %v997_v43, %v949_v44 }
  0xee   :  { %v1046_v57 = vpop.f32.mrf.mxu2  ;;  %v951_v62 = vpop.f32.mrf.mxu0 }
  0xef   :  { %v1095_v58 = vpop.f32.mrf.mxu3  ;;  %v1047_v61 = vadd.f32 %v1046_v57, %v998_v46  ;;  %v1000_v63 = vpop.f32.mrf.mxu1  ;;  %v952_v2 = vadd.f32 %v2554_v32, %v951_v62  ;;  %v2067_v57 = vld [vmem:[%s2868_s0 + $0x1dc] sm:$0xf]  ;;  %v1743_v62 = vor.u32 %v2066_v52, %v1740_v53 }
  0xf1   :  { %v2729_v3 = vadd.f32 %v1095_v58, %v1047_v61  ;;  %v1001_v4 = vadd.f32 %v1000_v63, %v952_v2  ;;  %1146 = vmatmul.bf16.gmra.mxu0 %v1675_v59  ;;  %v1748_v58 = vld [vmem:[%s2868_s0 + $0x1f8] sm:$0xf0]  ;;  %v1739_v61 = vor.u32 %v2070_v51, %v1738_v50  ;;  %v1747_v2 = vor.u32 %v2071_v56, %v1746_v54 }
  0xf2   :  { %1195 = vmatmul.bf16.gmra.mxu1 %v1679_v60 }
  0xf3   :  { %1244 = vmatmul.bf16.gmra.mxu2 %v1683_v0 }
  0xf4   :  { %1293 = vmatmul.bf16.gmra.mxu3 %v1687_v1 }
  0xf6   :  { %v1049_v6 = vpop.f32.mrf.mxu2  ;;  %v953_v9 = vpop.f32.mrf.mxu0 }
  0xf7   :  { %v1098_v7 = vpop.f32.mrf.mxu3  ;;  %v1050_v8 = vadd.f32 %v1049_v6, %v1001_v4  ;;  %v1002_v10 = vpop.f32.mrf.mxu1  ;;  %v954_v12 = vadd.f32 %v2554_v32, %v953_v9  ;;  %v1751_v4 = vor.u32 %v2067_v57, %v1748_v58 }
  0xf9   :  { %v2732_v13 = vadd.f32 %v1098_v7, %v1050_v8  ;;  %v1003_v15 = vadd.f32 %v1002_v10, %v954_v12 }
  0xfe   :  { %v1051_v25 = vpop.f32.mrf.mxu2  ;;  %v956_v30 = vpop.f32.mrf.mxu0 }
  0xff   :  { %v1100_v26 = vpop.f32.mrf.mxu3  ;;  %v1052_v29 = vadd.f32 %v1051_v25, %v1003_v15  ;;  %v1005_v31 = vpop.f32.mrf.mxu1  ;;  %v957_v35 = vadd.f32 %v2554_v32, %v956_v30 }
 0x101   :  { %v2759_v37 = vadd.f32 %v1100_v26, %v1052_v29  ;;  %v1006_v38 = vadd.f32 %v1005_v31, %v957_v35  ;;  %1151 = vmatmul.bf16.gmra.mxu0 %v1707_v27 }
 0x102   :  { %1200 = vmatmul.bf16.gmra.mxu1 %v1711_v28 }
 0x103   :  { %1249 = vmatmul.bf16.gmra.mxu2 %v1715_v33 }
 0x104   :  { %1298 = vmatmul.bf16.gmra.mxu3 %v1719_v34 }
 0x106   :  { %v1054_v39 = vpop.f32.mrf.mxu2  ;;  %v958_v43 = vpop.f32.mrf.mxu0 }
 0x107   :  { %v1103_v41 = vpop.f32.mrf.mxu3  ;;  %v1055_v42 = vadd.f32 %v1054_v39, %v1006_v38  ;;  %v1007_v44 = vpop.f32.mrf.mxu1  ;;  %v959_v46 = vadd.f32 %v2554_v32, %v958_v43 }
 0x109   :  { %v2762_v47 = vadd.f32 %v1103_v41, %v1055_v42  ;;  %v1008_v49 = vadd.f32 %v1007_v44, %v959_v46 }
 0x10e   :  { %v1056_v59 = vpop.f32.mrf.mxu2  ;;  %v961_v0 = vpop.f32.mrf.mxu0 }
 0x10f   :  { %v1105_v60 = vpop.f32.mrf.mxu3  ;;  %v1057_v63 = vadd.f32 %v1056_v59, %v1008_v49  ;;  %v1010_v1 = vpop.f32.mrf.mxu1  ;;  %v962_v6 = vadd.f32 %v2554_v32, %v961_v0 }
 0x111   :  { %v2789_v7 = vadd.f32 %v1105_v60, %v1057_v63  ;;  %v1011_v8 = vadd.f32 %v1010_v1, %v962_v6  ;;  %1156 = vmatmul.bf16.gmra.mxu0 %v1739_v61 }
 0x112   :  { %1205 = vmatmul.bf16.gmra.mxu1 %v1743_v62 }
 0x113   :  { %1254 = vmatmul.bf16.gmra.mxu2 %v1747_v2 }
 0x114   :  { %1303 = vmatmul.bf16.gmra.mxu3 %v1751_v4 }
 0x116   :  { %v1059_v9 = vpop.f32.mrf.mxu2  ;;  %v963_v15 = vpop.f32.mrf.mxu0 }
 0x117   :  { %v1108_v10 = vpop.f32.mrf.mxu3  ;;  %v1060_v12 = vadd.f32 %v1059_v9, %v1011_v8  ;;  %v1012_v16 = vpop.f32.mrf.mxu1  ;;  %v964_v17 = vadd.f32 %v2554_v32, %v963_v15 }
 0x119   :  { %v2792_v18 = vadd.f32 %v1108_v10, %v1060_v12  ;;  %v1013_v20 = vadd.f32 %v1012_v16, %v964_v17 }
 0x11e   :  { %v1061_v21 = vpop.f32.mrf.mxu2  ;;  %v1122_v24 = vpop.f32.mrf.mxu0 }
 0x11f   :  { %v1110_v22 = vpop.f32.mrf.mxu3  ;;  %v1062_v23 = vadd.f32 %v1061_v21, %v1013_v20  ;;  %v1171_v25 = vpop.f32.mrf.mxu1  ;;  %v1123_v27 = vadd.f32 %v1122_v24, %v2582_v55 }
 0x121   :  { %v2794_v26 = vadd.f32 %v1110_v22, %v1062_v23  ;;  %v1172_v28 = vadd.f32 %v1171_v25, %v1123_v27 }
 0x126   :  { %v1220_v29 = vpop.f32.mrf.mxu2  ;;  %v1124_v33 = vpop.f32.mrf.mxu0 }
 0x127   :  { %v1269_v30 = vpop.f32.mrf.mxu3  ;;  %v1221_v31 = vadd.f32 %v1220_v29, %v1172_v28  ;;  %v1173_v34 = vpop.f32.mrf.mxu1  ;;  %v1125_v32 = vadd.f32 %v1124_v33, %v2609_v11 }
 0x129   :  { %v1270_v35 = vadd.f32 %v1269_v30, %v1221_v31  ;;  %v1174_v38 = vadd.f32 %v1173_v34, %v1125_v32 }
 0x12b   :  { %1468 = vst [vmem:[%s2869_s3] sm:$0xff] %v1270_v35  ;;  %v1430_v49 = vmul.f32 %v1270_v35, %v1270_v35 }
 0x12e   :  { %v1222_v39 = vpop.f32.mrf.mxu2  ;;  %v1127_v43 = vpop.f32.mrf.mxu0 }
 0x12f   :  { %v1271_v41 = vpop.f32.mrf.mxu3  ;;  %v1223_v42 = vadd.f32 %v1222_v39, %v1174_v38  ;;  %v1176_v44 = vpop.f32.mrf.mxu1  ;;  %v1128_v46 = vadd.f32 %v1127_v43, %v2612_v19 }
 0x131   :  { %v1272_v55 = vadd.f32 %v1271_v41, %v1223_v42  ;;  %v1177_v52 = vadd.f32 %v1176_v44, %v1128_v46 }
 0x133   :  { %v1408_v50 = vadd.f32 %v1272_v55, %v1270_v35  ;;  %v1431_v51 = vmul.f32 %v1272_v55, %v1272_v55  ;;  %1469 = vst [vmem:[%s2869_s3 + $0x8] sm:$0xff] %v1272_v55 }
 0x135   :  { %v1446_v11 = vadd.f32 %v1431_v51, %v1430_v49 }
 0x136   :  { %v1225_v53 = vpop.f32.mrf.mxu2  ;;  %v1129_v57 = vpop.f32.mrf.mxu0 }
 0x137   :  { %v1274_v54 = vpop.f32.mrf.mxu3  ;;  %v1226_v56 = vadd.f32 %v1225_v53, %v1177_v52  ;;  %v1178_v58 = vpop.f32.mrf.mxu1  ;;  %v1130_v60 = vadd.f32 %v1129_v57, %v2639_v40 }
 0x139   :  { %v1275_v59 = vadd.f32 %v1274_v54, %v1226_v56  ;;  %v1179_v63 = vadd.f32 %v1178_v58, %v1130_v60 }
 0x13b   :  { %v1409_v61 = vadd.f32 %v1408_v50, %v1275_v59  ;;  %v1432_v62 = vmul.f32 %v1275_v59, %v1275_v59  ;;  %1470 = vst [vmem:[%s2869_s3 + $0x10] sm:$0xff] %v1275_v59 }
 0x13d   :  { %v1447_v19 = vadd.f32 %v1446_v11, %v1432_v62 }
 0x13e   :  { %v1227_v0 = vpop.f32.mrf.mxu2  ;;  %v1132_v4 = vpop.f32.mrf.mxu0 }
 0x13f   :  { %v1276_v1 = vpop.f32.mrf.mxu3  ;;  %v1228_v2 = vadd.f32 %v1227_v0, %v1179_v63  ;;  %v1181_v6 = vpop.f32.mrf.mxu1  ;;  %v1133_v9 = vadd.f32 %v1132_v4, %v2642_v48 }
 0x141   :  { %v1277_v8 = vadd.f32 %v1276_v1, %v1228_v2  ;;  %v1182_v15 = vadd.f32 %v1181_v6, %v1133_v9 }
 0x143   :  { %v1410_v10 = vadd.f32 %v1409_v61, %v1277_v8  ;;  %v1433_v12 = vmul.f32 %v1277_v8, %v1277_v8  ;;  %1471 = vst [vmem:[%s2869_s3 + $0x18] sm:$0xff] %v1277_v8 }
 0x145   :  { %v1448_v40 = vadd.f32 %v1447_v19, %v1433_v12 }
 0x146   :  { %v1230_v16 = vpop.f32.mrf.mxu2  ;;  %v1134_v21 = vpop.f32.mrf.mxu0 }
 0x147   :  { %v1279_v17 = vpop.f32.mrf.mxu3  ;;  %v1231_v20 = vadd.f32 %v1230_v16, %v1182_v15  ;;  %v1183_v22 = vpop.f32.mrf.mxu1  ;;  %v1135_v24 = vadd.f32 %v1134_v21, %v2669_v5 }
 0x149   :  { %v1280_v23 = vadd.f32 %v1279_v17, %v1231_v20  ;;  %v1184_v28 = vadd.f32 %v1183_v22, %v1135_v24 }
 0x14b   :  { %v1411_v25 = vadd.f32 %v1410_v10, %v1280_v23  ;;  %v1434_v27 = vmul.f32 %v1280_v23, %v1280_v23  ;;  %1472 = vst [vmem:[%s2869_s3 + $0x20] sm:$0xff] %v1280_v23 }
 0x14d   :  { %v1449_v48 = vadd.f32 %v1448_v40, %v1434_v27 }
 0x14e   :  { %v1232_v29 = vpop.f32.mrf.mxu2  ;;  %v1137_v33 = vpop.f32.mrf.mxu0 }
 0x14f   :  { %v1281_v30 = vpop.f32.mrf.mxu3  ;;  %v1233_v31 = vadd.f32 %v1232_v29, %v1184_v28  ;;  %v1186_v34 = vpop.f32.mrf.mxu1  ;;  %v1138_v32 = vadd.f32 %v1137_v33, %v2672_v14 }
 0x151   :  { %v1282_v35 = vadd.f32 %v1281_v30, %v1233_v31  ;;  %v1187_v41 = vadd.f32 %v1186_v34, %v1138_v32 }
 0x153   :  { %v1412_v38 = vadd.f32 %v1411_v25, %v1282_v35  ;;  %v1435_v39 = vmul.f32 %v1282_v35, %v1282_v35  ;;  %1473 = vst [vmem:[%s2869_s3 + $0x28] sm:$0xff] %v1282_v35 }
 0x155   :  { %v1450_v5 = vadd.f32 %v1449_v48, %v1435_v39 }
 0x156   :  { %v1235_v42 = vpop.f32.mrf.mxu2  ;;  %v1139_v55 = vpop.f32.mrf.mxu0 }
 0x157   :  { %v1284_v43 = vpop.f32.mrf.mxu3  ;;  %v1236_v44 = vadd.f32 %v1235_v42, %v1187_v41  ;;  %v1188_v46 = vpop.f32.mrf.mxu1  ;;  %v1140_v50 = vadd.f32 %v1139_v55, %v2699_v36 }
 0x159   :  { %v1285_v49 = vadd.f32 %v1284_v43, %v1236_v44  ;;  %v1189_v52 = vadd.f32 %v1188_v46, %v1140_v50 }
 0x15b   :  { %v1413_v51 = vadd.f32 %v1412_v38, %v1285_v49  ;;  %v1436_v11 = vmul.f32 %v1285_v49, %v1285_v49  ;;  %1474 = vst [vmem:[%s2869_s3 + $0x30] sm:$0xff] %v1285_v49 }
 0x15d   :  { %v1451_v14 = vadd.f32 %v1450_v5, %v1436_v11 }
 0x15e   :  { %v1237_v53 = vpop.f32.mrf.mxu2  ;;  %v1142_v57 = vpop.f32.mrf.mxu0 }
 0x15f   :  { %v1286_v54 = vpop.f32.mrf.mxu3  ;;  %v1238_v56 = vadd.f32 %v1237_v53, %v1189_v52  ;;  %v1191_v58 = vpop.f32.mrf.mxu1  ;;  %v1143_v60 = vadd.f32 %v1142_v57, %v2702_v45 }
 0x161   :  { %v1287_v59 = vadd.f32 %v1286_v54, %v1238_v56  ;;  %v1192_v19 = vadd.f32 %v1191_v58, %v1143_v60 }
 0x163   :  { %v1414_v61 = vadd.f32 %v1413_v51, %v1287_v59  ;;  %v1437_v62 = vmul.f32 %v1287_v59, %v1287_v59  ;;  %1475 = vst [vmem:[%s2869_s3 + $0x38] sm:$0xff] %v1287_v59 }
 0x165   :  { %v1452_v36 = vadd.f32 %v1451_v14, %v1437_v62 }
 0x166   :  { %v1240_v63 = vpop.f32.mrf.mxu2  ;;  %v1144_v2 = vpop.f32.mrf.mxu0 }
 0x167   :  { %v1289_v0 = vpop.f32.mrf.mxu3  ;;  %v1241_v1 = vadd.f32 %v1240_v63, %v1192_v19  ;;  %v1193_v4 = vpop.f32.mrf.mxu1  ;;  %v1145_v8 = vadd.f32 %v1144_v2, %v2729_v3 }
 0x169   :  { %v1290_v6 = vadd.f32 %v1289_v0, %v1241_v1  ;;  %v1194_v12 = vadd.f32 %v1193_v4, %v1145_v8 }
 0x16b   :  { %v1415_v9 = vadd.f32 %v1414_v61, %v1290_v6  ;;  %v1438_v10 = vmul.f32 %v1290_v6, %v1290_v6  ;;  %1476 = vst [vmem:[%s2869_s3 + $0x40] sm:$0xff] %v1290_v6 }
 0x16d   :  { %v1453_v45 = vadd.f32 %v1452_v36, %v1438_v10 }
 0x16e   :  { %v1242_v40 = vpop.f32.mrf.mxu2  ;;  %v1147_v17 = vpop.f32.mrf.mxu0 }
 0x16f   :  { %v1291_v15 = vpop.f32.mrf.mxu3  ;;  %v1243_v16 = vadd.f32 %v1242_v40, %v1194_v12  ;;  %v1196_v20 = vpop.f32.mrf.mxu1  ;;  %v1148_v22 = vadd.f32 %v1147_v17, %v2732_v13 }
 0x171   :  { %v1292_v21 = vadd.f32 %v1291_v15, %v1243_v16  ;;  %v1197_v25 = vadd.f32 %v1196_v20, %v1148_v22 }
 0x173   :  { %v1416_v23 = vadd.f32 %v1415_v9, %v1292_v21  ;;  %v1439_v24 = vmul.f32 %v1292_v21, %v1292_v21  ;;  %1477 = vst [vmem:[%s2869_s3 + $0x48] sm:$0xff] %v1292_v21 }
 0x175   :  { %v1454_v3 = vadd.f32 %v1453_v45, %v1439_v24 }
 0x176   :  { %v1245_v27 = vpop.f32.mrf.mxu2  ;;  %v1149_v29 = vpop.f32.mrf.mxu0 }
 0x177   :  { %v1294_v48 = vpop.f32.mrf.mxu3  ;;  %v1246_v28 = vadd.f32 %v1245_v27, %v1197_v25  ;;  %v1198_v30 = vpop.f32.mrf.mxu1  ;;  %v1150_v33 = vadd.f32 %v1149_v29, %v2759_v37 }
 0x179   :  { %v1295_v31 = vadd.f32 %v1294_v48, %v1246_v28  ;;  %v1199_v32 = vadd.f32 %v1198_v30, %v1150_v33 }
 0x17b   :  { %v1417_v34 = vadd.f32 %v1416_v23, %v1295_v31  ;;  %v1440_v35 = vmul.f32 %v1295_v31, %v1295_v31  ;;  %1478 = vst [vmem:[%s2869_s3 + $0x50] sm:$0xff] %v1295_v31 }
 0x17d   :  { %v1455_v13 = vadd.f32 %v1454_v3, %v1440_v35 }
 0x17e   :  { %v1247_v38 = vpop.f32.mrf.mxu2  ;;  %v1152_v41 = vpop.f32.mrf.mxu0 }
 0x17f   :  { %v1296_v39 = vpop.f32.mrf.mxu3  ;;  %v1248_v5 = vadd.f32 %v1247_v38, %v1199_v32  ;;  %v1201_v42 = vpop.f32.mrf.mxu1  ;;  %v1153_v44 = vadd.f32 %v1152_v41, %v2762_v47 }
 0x181   :  { %v1297_v43 = vadd.f32 %v1296_v39, %v1248_v5  ;;  %v1202_v49 = vadd.f32 %v1201_v42, %v1153_v44 }
 0x183   :  { %v1418_v55 = vadd.f32 %v1417_v34, %v1297_v43  ;;  %v1441_v46 = vmul.f32 %v1297_v43, %v1297_v43  ;;  %1479 = vst [vmem:[%s2869_s3 + $0x58] sm:$0xff] %v1297_v43 }
 0x185   :  { %v1456_v37 = vadd.f32 %v1455_v13, %v1441_v46 }
 0x186   :  { %v1250_v50 = vpop.f32.mrf.mxu2  ;;  %v1154_v14 = vpop.f32.mrf.mxu0 }
 0x187   :  { %v1299_v51 = vpop.f32.mrf.mxu3  ;;  %v1251_v11 = vadd.f32 %v1250_v50, %v1202_v49  ;;  %v1203_v52 = vpop.f32.mrf.mxu1  ;;  %v1155_v54 = vadd.f32 %v1154_v14, %v2789_v7 }
 0x189   :  { %v1300_v53 = vadd.f32 %v1299_v51, %v1251_v11  ;;  %v1204_v58 = vadd.f32 %v1203_v52, %v1155_v54 }
 0x18b   :  { %v1419_v56 = vadd.f32 %v1418_v55, %v1300_v53  ;;  %v1442_v57 = vmul.f32 %v1300_v53, %v1300_v53  ;;  %1480 = vst [vmem:[%s2869_s3 + $0x60] sm:$0xff] %v1300_v53 }
 0x18d   :  { %v1457_v47 = vadd.f32 %v1456_v37, %v1442_v57 }
 0x18e   :  { %v1252_v59 = vpop.f32.mrf.mxu2  ;;  %v1157_v62 = vpop.f32.mrf.mxu0 }
 0x18f   :  { %v1301_v60 = vpop.f32.mrf.mxu3  ;;  %v1253_v61 = vadd.f32 %v1252_v59, %v1204_v58  ;;  %v1158_v19 = vadd.f32 %v1157_v62, %v2792_v18  ;;  %v1206_v63 = vpop.f32.mrf.mxu1 }
 0x191   :  { %v1302_v36 = vadd.f32 %v1301_v60, %v1253_v61  ;;  %v1207_v2 = vadd.f32 %v1206_v63, %v1158_v19 }
 0x193   :  { %v1420_v0 = vadd.f32 %v1419_v56, %v1302_v36  ;;  %v1443_v1 = vmul.f32 %v1302_v36, %v1302_v36  ;;  %1481 = vst [vmem:[%s2869_s3 + $0x68] sm:$0xff] %v1302_v36 }
 0x195   :  { %v1458_v7 = vadd.f32 %v1457_v47, %v1443_v1 }
 0x196   :  { %v1255_v4 = vpop.f32.mrf.mxu2  ;;  %v1159_v9 = vpop.f32.mrf.mxu0 }
 0x197   :  { %v1304_v6 = vpop.f32.mrf.mxu3  ;;  %v1256_v8 = vadd.f32 %v1255_v4, %v1207_v2  ;;  %v1160_v45 = vadd.f32 %v1159_v9, %v2794_v26  ;;  %v1208_v18 = vpop.f32.mrf.mxu1 }
 0x199   :  { %v1305_v10 = vadd.f32 %v1304_v6, %v1256_v8  ;;  %v1209_v16 = vadd.f32 %v1208_v18, %v1160_v45 }
 0x19b   :  { %v1421_v12 = vadd.f32 %v1420_v0, %v1305_v10  ;;  %v1444_v40 = vmul.f32 %v1305_v10, %v1305_v10  ;;  %1482 = vst [vmem:[%s2869_s3 + $0x70] sm:$0xff] %v1305_v10 }
 0x19d   :  { %v1459_v15 = vadd.f32 %v1458_v7, %v1444_v40 }
 0x19e   :  { %v1257_v17 = vpop.f32.mrf.mxu2 }
 0x19f   :  { %v1258_v20 = vadd.f32 %v1257_v17, %v1209_v16  ;;  %v1306_v21 = vpop.f32.mrf.mxu3 }
 0x1a1   :  { %v1307_v22 = vadd.f32 %v1306_v21, %v1258_v20 }
 0x1a3   :  { %v1422_v23 = vadd.f32 %v1421_v12, %v1307_v22  ;;  %v1445_v24 = vmul.f32 %v1307_v22, %v1307_v22  ;;  %1483 = vst [vmem:[%s2869_s3 + $0x78] sm:$0xff] %v1307_v22 }
 0x1a5   :  { %v1423_v26 = vrot.slane %v1422_v23, 4  ;;  %v1460_v3 = vadd.f32 %v1459_v15, %v1445_v24 }
 0x1a7   :  { %v1424_v25 = vadd.f32 %v1423_v26, %v1422_v23  ;;  %v1461_v27 = vrot.slane %v1460_v3, 4 }
 0x1a9   :  { %v1425_v48 = vrot.slane %v1424_v25, 2  ;;  %v1462_v28 = vadd.f32 %v1461_v27, %v1460_v3 }
 0x1ab   :  { %v1426_v29 = vadd.f32 %v1425_v48, %v1424_v25  ;;  %v1463_v30 = vrot.slane %v1462_v28, 2 }
 0x1ad   :  { %v1427_v31 = vrot.slane %v1426_v29, 1  ;;  %v1464_v33 = vadd.f32 %v1463_v30, %v1462_v28 }
 0x1af   :  { %v1428_v34 = vadd.f32 %v1427_v31, %v1426_v29  ;;  %v1465_v35 = vrot.slane %v1464_v33, 1 }
 0x1b1   :  { %1429 = vst [vmem:[%s2870_s4] sm:$0x1] %v1428_v34  ;;  %v1466_v13 = vadd.f32 %v1465_v35, %v1464_v33 }
 0x1b3   :  { %1467 = vst [vmem:[%s2871_s5] sm:$0x1] %v1466_v13 }

// kernel: discriminator_funiegan_forward.14
= control target key start
LH: loop header
LB: loop body
LE: loop exit
PB: predicated region body
PF: predicated region fallthrough
CT: control target
= control target key end

     0   :  { %s148_s0 = inlined_call_operand.vmem [shape: f32[32,256], index: 0, kind: input, shape index: {}]   ;;  %s149_s1 = inlined_call_operand.vmem [shape: f32[1,256], index: 1, kind: input, shape index: {}]   ;;  %s150_s2 = inlined_call_operand.vmem [shape: f32[1,256], index: 2, kind: input, shape index: {}]   ;;  %s151_s3 = inlined_call_operand.vmem [shape: bf16[32,256], index: 3, kind: output, shape index: {}]  }
   0x1   :  { %v14_v0 = vld [vmem:[%s148_s0] sm:$0xff]  ;;  %v15_v1 = vld [vmem:[%s148_s0 + $0x8] sm:$0xff]  ;;  %v16_v6 = vld [vmem:[%s148_s0 + $0x10] sm:$0xff] }
   0x2   :  { %v22_v2 = vld [vmem:[%s149_s1] sm:$0x3]  ;;  %v17_v7 = vld [vmem:[%s148_s0 + $0x18] sm:$0xff]  ;;  %v19_v11 = vld [vmem:[%s148_s0 + $0x28] sm:$0xff] }
   0x3   :  { %v24_v3 = vperm.slane %v22_v2, 0  ;;  %v25_v4 = vperm.slane %v22_v2, 1  ;;  %v36_v5 = vld [vmem:[%s150_s2] sm:$0x3]  ;;  %v20_v12 = vld [vmem:[%s148_s0 + $0x30] sm:$0xff]  ;;  %v21_v17 = vld [vmem:[%s148_s0 + $0x38] sm:$0xff] }
   0x4   :  { %v38_v8 = vperm.slane %v36_v5, 0  ;;  %v39_v9 = vperm.slane %v36_v5, 1  ;;  %v18_v10 = vld [vmem:[%s148_s0 + $0x20] sm:$0xff] }
   0x5   :  { %v28_v13 = vmul.f32 %v24_v3, %v14_v0  ;;  %v29_v14 = vmul.f32 %v25_v4, %v15_v1  ;;  %v30_v15 = vmul.f32 %v24_v3, %v16_v6  ;;  %v31_v16 = vmul.f32 %v25_v4, %v17_v7 }
   0x6   :  { %v32_v18 = vmul.f32 %v24_v3, %v18_v10  ;;  %v33_v19 = vmul.f32 %v25_v4, %v19_v11  ;;  %v34_v20 = vmul.f32 %v24_v3, %v20_v12  ;;  %v35_v21 = vmul.f32 %v25_v4, %v21_v17 }
   0x7   :  { %v42_v22 = vadd.f32 %v38_v8, %v28_v13  ;;  %v43_v23 = vadd.f32 %v39_v9, %v29_v14  ;;  %v44_v24 = vadd.f32 %v38_v8, %v30_v15  ;;  %v45_v25 = vadd.f32 %v39_v9, %v31_v16 }
   0x8   :  { %v46_v26 = vadd.f32 %v38_v8, %v32_v18  ;;  %v47_v27 = vadd.f32 %v39_v9, %v33_v19  ;;  %v48_v28 = vadd.f32 %v38_v8, %v34_v20  ;;  %v49_v29 = vadd.f32 %v39_v9, %v35_v21 }
   0x9   :  { %vm50_vm0 = vcmp.gt.f32.partialorder %v42_v22, 0.0  ;;  %vm51_vm1 = vcmp.gt.f32.partialorder %v43_v23, 0.0  ;;  %v58_v30 = vmul.f32 0.2, %v42_v22  ;;  %v59_v31 = vmul.f32 0.2, %v43_v23 }
   0xa   :  { %vm52_vm2 = vcmp.gt.f32.partialorder %v44_v24, 0.0  ;;  %vm53_vm3 = vcmp.gt.f32.partialorder %v45_v25, 0.0  ;;  %v60_v32 = vmul.f32 0.2, %v44_v24  ;;  %v61_v33 = vmul.f32 0.2, %v45_v25 }
   0xb   :  { %v66_v34 = vsel %vm50_vm0, %v42_v22, %v58_v30  ;;  %v67_v35 = vsel %vm51_vm1, %v43_v23, %v59_v31  ;;  %vm54_vm4 = vcmp.gt.f32.partialorder %v46_v26, 0.0  ;;  %vm55_vm5 = vcmp.gt.f32.partialorder %v47_v27, 0.0 }
   0xc   :  { %v74_v36 = vpack.c.bf16 %v67_v35, %v66_v34  ;;  %v68_v37 = vsel %vm52_vm2, %v44_v24, %v60_v32  ;;  %v69_v38 = vsel %vm53_vm3, %v45_v25, %v61_v33  ;;  %v62_v39 = vmul.f32 0.2, %v46_v26 }
   0xd   :  { %v75_v40 = vpack.c.bf16 %v69_v38, %v68_v37  ;;  %v63_v41 = vmul.f32 0.2, %v47_v27  ;;  %vm56_vm6 = vcmp.gt.f32.partialorder %v48_v28, 0.0  ;;  %vm57_vm7 = vcmp.gt.f32.partialorder %v49_v29, 0.0 }
   0xe   :  { %78 = vst [vmem:[%s151_s3] sm:$0xff] %v74_v36  ;;  %v70_v42 = vsel %vm54_vm4, %v46_v26, %v62_v39  ;;  %v64_v43 = vmul.f32 0.2, %v48_v28  ;;  %v65_v44 = vmul.f32 0.2, %v49_v29 }
   0xf   :  { %79 = vst [vmem:[%s151_s3 + $0x8] sm:$0xff] %v75_v40  ;;  %v71_v45 = vsel %vm55_vm5, %v47_v27, %v63_v41 }
  0x10   :  { %v76_v46 = vpack.c.bf16 %v71_v45, %v70_v42  ;;  %v72_v47 = vsel %vm56_vm6, %v48_v28, %v64_v43  ;;  %v73_v48 = vsel %vm57_vm7, %v49_v29, %v65_v44 }
  0x11   :  { %v77_v49 = vpack.c.bf16 %v73_v48, %v72_v47 }
  0x12   :  { %80 = vst [vmem:[%s151_s3 + $0x10] sm:$0xff] %v76_v46 }
  0x13   :  { %81 = vst [vmem:[%s151_s3 + $0x18] sm:$0xff] %v77_v49 }

// kernel: discriminator_funiegan_forward.13
= control target key start
LH: loop header
LB: loop body
LE: loop exit
PB: predicated region body
PF: predicated region fallthrough
CT: control target
= control target key end

     0   :  { %vm2411_vm0 = vcmask 1040384   ;;  %s5938_s1 = inlined_call_operand.vmem [shape: bf16[2048,256], index: 1, kind: input, shape index: {}]   ;;  %s5939_s0 = inlined_call_operand.vmem [shape: bf16[32,2048], index: 0, kind: input, shape index: {}]   ;;  %s5940_s2 = inlined_call_operand.vmem [shape: f32[1,256], index: 2, kind: input, shape index: {}]   ;;  %s5941_s3 = inlined_call_operand.vmem [shape: f32[32,256], index: 3, kind: output, shape index: {0}]   ;;  %s5942_s4 = inlined_call_operand.vmem [shape: f32[1,1,256], index: 4, kind: output, shape index: {1}]   ;;  %s5943_s5 = inlined_call_operand.vmem [shape: f32[1,1,256], index: 5, kind: output, shape index: {2}]  }
   0x1   :  { %v2657_v0 = vld [vmem:[%s5938_s1 + $0x70] sm:$0xf]  ;;  %v3670_v1 = vld [vmem:[%s5938_s1 + $0x74] sm:$0xf0]  ;;  %v2649_v11 = vld [vmem:[%s5938_s1 + $0x60] sm:$0xf] }
   0x2   :  { %v2721_v2 = vld [vmem:[%s5938_s1 + $0xf0] sm:$0xf]  ;;  %v2658_v3 = vor.u32 %v3670_v1, %v2657_v0  ;;  %v3686_v4 = vld [vmem:[%s5938_s1 + $0xf4] sm:$0xf0]  ;;  %v3668_v13 = vld [vmem:[%s5938_s1 + $0x64] sm:$0xf0] }
   0x3   :  { %v2785_v5 = vld [vmem:[%s5938_s1 + $0x170] sm:$0xf]  ;;  %v3702_v6 = vld [vmem:[%s5938_s1 + $0x174] sm:$0xf0]  ;;  %v2722_v7 = vor.u32 %v3686_v4, %v2721_v2  ;;  %v2713_v14 = vld [vmem:[%s5938_s1 + $0xe0] sm:$0xf]  ;;  %v2650_v16 = vor.u32 %v3668_v13, %v2649_v11 }
   0x4   :  { %v2786_v8 = vor.u32 %v3702_v6, %v2785_v5  ;;  %v2849_v9 = vld [vmem:[%s5938_s1 + $0x1f0] sm:$0xf]  ;;  %v3718_v10 = vld [vmem:[%s5938_s1 + $0x1f4] sm:$0xf0]  ;;  %1751 = vmatpush.bf16.msra.mxu0 %v2658_v3  ;;  %v3684_v15 = vld [vmem:[%s5938_s1 + $0xe4] sm:$0xf0] }
   0x5   :  { %v2850_v12 = vor.u32 %v3718_v10, %v2849_v9  ;;  %1770 = vmatpush.bf16.msra.mxu1 %v2722_v7  ;;  %v2714_v17 = vor.u32 %v3684_v15, %v2713_v14  ;;  %v2777_v18 = vld [vmem:[%s5938_s1 + $0x160] sm:$0xf]  ;;  %v3700_v19 = vld [vmem:[%s5938_s1 + $0x164] sm:$0xf0]  ;;  %v2641_v23 = vld [vmem:[%s5938_s1 + $0x50] sm:$0xf] }
   0x6   :  { %1789 = vmatpush.bf16.msra.mxu2 %v2786_v8  ;;  %v2841_v20 = vld [vmem:[%s5938_s1 + $0x1e0] sm:$0xf]  ;;  %v2778_v21 = vor.u32 %v3700_v19, %v2777_v18  ;;  %v3716_v22 = vld [vmem:[%s5938_s1 + $0x1e4] sm:$0xf0]  ;;  %v3666_v24 = vld [vmem:[%s5938_s1 + $0x54] sm:$0xf0] }
   0x7   :  { %1808 = vmatpush.bf16.msra.mxu3 %v2850_v12  ;;  %v2842_v25 = vor.u32 %v3716_v22, %v2841_v20  ;;  %v2705_v26 = vld [vmem:[%s5938_s1 + $0xd0] sm:$0xf]  ;;  %v3682_v27 = vld [vmem:[%s5938_s1 + $0xd4] sm:$0xf0]  ;;  %v2642_v29 = vor.u32 %v3666_v24, %v2641_v23  ;;  %v2633_v35 = vld [vmem:[%s5938_s1 + $0x40] sm:$0xf] }
   0x8   :  { %v2769_v28 = vld [vmem:[%s5938_s1 + $0x150] sm:$0xf]  ;;  %1752 = vmatpush.bf16.msra.mxu0 %v2650_v16  ;;  %v3698_v30 = vld [vmem:[%s5938_s1 + $0x154] sm:$0xf0]  ;;  %v2706_v33 = vor.u32 %v3682_v27, %v2705_v26  ;;  %v3664_v36 = vld [vmem:[%s5938_s1 + $0x44] sm:$0xf0] }
   0x9   :  { %v2833_v31 = vld [vmem:[%s5938_s1 + $0x1d0] sm:$0xf]  ;;  %v3714_v32 = vld [vmem:[%s5938_s1 + $0x1d4] sm:$0xf0]  ;;  %1771 = vmatpush.bf16.msra.mxu1 %v2714_v17  ;;  %v2770_v34 = vor.u32 %v3698_v30, %v2769_v28  ;;  %v2697_v37 = vld [vmem:[%s5938_s1 + $0xc0] sm:$0xf]  ;;  %v2634_v44 = vor.u32 %v3664_v36, %v2633_v35 }
   0xa   :  { %1790 = vmatpush.bf16.msra.mxu2 %v2778_v21  ;;  %v2834_v38 = vor.u32 %v3714_v32, %v2833_v31  ;;  %v3680_v39 = vld [vmem:[%s5938_s1 + $0xc4] sm:$0xf0]  ;;  %v2761_v40 = vld [vmem:[%s5938_s1 + $0x140] sm:$0xf]  ;;  %v2625_v47 = vld [vmem:[%s5938_s1 + $0x30] sm:$0xf] }
   0xb   :  { %1809 = vmatpush.bf16.msra.mxu3 %v2842_v25  ;;  %v3696_v41 = vld [vmem:[%s5938_s1 + $0x144] sm:$0xf0]  ;;  %v2825_v42 = vld [vmem:[%s5938_s1 + $0x1c0] sm:$0xf]  ;;  %v2698_v45 = vor.u32 %v3680_v39, %v2697_v37  ;;  %v3662_v48 = vld [vmem:[%s5938_s1 + $0x34] sm:$0xf0] }
   0xc   :  { %v3712_v43 = vld [vmem:[%s5938_s1 + $0x1c4] sm:$0xf0]  ;;  %1753 = vmatpush.bf16.msra.mxu0 %v2642_v29  ;;  %v2762_v46 = vor.u32 %v3696_v41, %v2761_v40  ;;  %v2689_v49 = vld [vmem:[%s5938_s1 + $0xb0] sm:$0xf]  ;;  %v3678_v51 = vld [vmem:[%s5938_s1 + $0xb4] sm:$0xf0]  ;;  %v2626_v56 = vor.u32 %v3662_v48, %v2625_v47 }
   0xd   :  { %1772 = vmatpush.bf16.msra.mxu1 %v2706_v33  ;;  %v2826_v50 = vor.u32 %v3712_v43, %v2825_v42  ;;  %v2753_v52 = vld [vmem:[%s5938_s1 + $0x130] sm:$0xf]  ;;  %v3694_v53 = vld [vmem:[%s5938_s1 + $0x134] sm:$0xf0]  ;;  %v2690_v57 = vor.u32 %v3678_v51, %v2689_v49  ;;  %v2617_v59 = vld [vmem:[%s5938_s1 + $0x20] sm:$0xf] }
   0xe   :  { %1791 = vmatpush.bf16.msra.mxu2 %v2770_v34  ;;  %v2817_v54 = vld [vmem:[%s5938_s1 + $0x1b0] sm:$0xf]  ;;  %v3710_v55 = vld [vmem:[%s5938_s1 + $0x1b4] sm:$0xf0]  ;;  %v2754_v58 = vor.u32 %v3694_v53, %v2753_v52  ;;  %v3660_v60 = vld [vmem:[%s5938_s1 + $0x24] sm:$0xf0] }
   0xf   :  { %1810 = vmatpush.bf16.msra.mxu3 %v2834_v38  ;;  %v2681_v61 = vld [vmem:[%s5938_s1 + $0xa0] sm:$0xf]  ;;  %v2818_v62 = vor.u32 %v3710_v55, %v2817_v54  ;;  %v3676_v63 = vld [vmem:[%s5938_s1 + $0xa4] sm:$0xf0]  ;;  %v2618_v4 = vor.u32 %v3660_v60, %v2617_v59  ;;  %v2609_v7 = vld [vmem:[%s5938_s1 + $0x10] sm:$0xf] }
  0x10   :  { %1754 = vmatpush.bf16.msra.mxu0 %v2634_v44  ;;  %v2745_v0 = vld [vmem:[%s5938_s1 + $0x120] sm:$0xf]  ;;  %v3692_v1 = vld [vmem:[%s5938_s1 + $0x124] sm:$0xf0]  ;;  %v2682_v5 = vor.u32 %v3676_v63, %v2681_v61  ;;  %v3658_v8 = vld [vmem:[%s5938_s1 + $0x14] sm:$0xf0] }
  0x11   :  { %1773 = vmatpush.bf16.msra.mxu1 %v2698_v45  ;;  %v2809_v2 = vld [vmem:[%s5938_s1 + $0x1a0] sm:$0xf]  ;;  %v3708_v3 = vld [vmem:[%s5938_s1 + $0x1a4] sm:$0xf0]  ;;  %v2746_v6 = vor.u32 %v3692_v1, %v2745_v0  ;;  %v2673_v9 = vld [vmem:[%s5938_s1 + $0x90] sm:$0xf]  ;;  %v2610_v17 = vor.u32 %v3658_v8, %v2609_v7 }
  0x12   :  { %1792 = vmatpush.bf16.msra.mxu2 %v2762_v46  ;;  %v2810_v10 = vor.u32 %v3708_v3, %v2809_v2  ;;  %v3674_v11 = vld [vmem:[%s5938_s1 + $0x94] sm:$0xf0]  ;;  %v2737_v12 = vld [vmem:[%s5938_s1 + $0x110] sm:$0xf]  ;;  %v2601_v16 = vld [vmem:[%s5938_s1] sm:$0xf] }
  0x13   :  { %1811 = vmatpush.bf16.msra.mxu3 %v2826_v50  ;;  %v3690_v13 = vld [vmem:[%s5938_s1 + $0x114] sm:$0xf0]  ;;  %v2801_v14 = vld [vmem:[%s5938_s1 + $0x190] sm:$0xf]  ;;  %v3656_v18 = vld [vmem:[%s5938_s1 + $0x4] sm:$0xf0]  ;;  %v2674_v21 = vor.u32 %v3674_v11, %v2673_v9 }
  0x14   :  { %1755 = vmatpush.bf16.msra.mxu0 %v2626_v56  ;;  %v3706_v15 = vld [vmem:[%s5938_s1 + $0x194] sm:$0xf0]  ;;  %v2665_v19 = vld [vmem:[%s5938_s1 + $0x80] sm:$0xf]  ;;  %v3672_v20 = vld [vmem:[%s5938_s1 + $0x84] sm:$0xf0]  ;;  %v2738_v22 = vor.u32 %v3690_v13, %v2737_v12  ;;  %v2602_v34 = vor.u32 %v3656_v18, %v2601_v16 }
  0x15   :  { %1774 = vmatpush.bf16.msra.mxu1 %v2690_v57  ;;  %v2729_v23 = vld [vmem:[%s5938_s1 + $0x100] sm:$0xf]  ;;  %v3688_v24 = vld [vmem:[%s5938_s1 + $0x104] sm:$0xf0]  ;;  %v2802_v26 = vor.u32 %v3706_v15, %v2801_v14  ;;  %v3623_v30 = vld [vmem:[%s5939_s0 + $0x4] sm:$0xf]  ;;  %v2666_v38 = vor.u32 %v3672_v20, %v2665_v19 }
  0x16   :  { %1793 = vmatpush.bf16.msra.mxu2 %v2754_v58  ;;  %v2793_v25 = vld [vmem:[%s5938_s1 + $0x180] sm:$0xf]  ;;  %v3704_v27 = vld [vmem:[%s5938_s1 + $0x184] sm:$0xf0]  ;;  %v2475_v31 = vld [vmem:[%s5939_s0 + $0x40] sm:$0xf0]  ;;  %v2730_v39 = vor.u32 %v3688_v24, %v2729_v23 }
  0x17   :  { %1812 = vmatpush.bf16.msra.mxu3 %v2818_v62  ;;  %v2473_v28 = vld [vmem:[%s5939_s0] sm:$0xf]  ;;  %v3041_v32 = vld [vmem:[%s5938_s1 + $0x370] sm:$0xf]  ;;  %v3766_v33 = vld [vmem:[%s5938_s1 + $0x374] sm:$0xf0]  ;;  %v2794_v43 = vor.u32 %v3704_v27, %v2793_v25  ;;  %v4190_v53 = vor.u32 %v3623_v30, %v2475_v31 }
  0x18   :  { %1756 = vmatpush.bf16.msra.mxu0 %v2618_v4  ;;  %v3631_v29 = vld [vmem:[%s5939_s0 + $0x3c] sm:$0xf0]  ;;  %v2481_v35 = vld [vmem:[%s5939_s0 + $0x8] sm:$0xf]  ;;  %v2977_v36 = vld [vmem:[%s5938_s1 + $0x2f0] sm:$0xf]  ;;  %v3042_v44 = vor.u32 %v3766_v33, %v3041_v32 }
  0x19   :  { %1775 = vmatpush.bf16.msra.mxu1 %v2682_v5  ;;  %v3750_v37 = vld [vmem:[%s5938_s1 + $0x2f4] sm:$0xf0]  ;;  %v3632_v40 = vld [vmem:[%s5939_s0 + $0x44] sm:$0xf0]  ;;  %v3624_v41 = vld [vmem:[%s5939_s0 + $0xc] sm:$0xf]  ;;  %v4179_v48 = vor.u32 %v3631_v29, %v2473_v28 }
  0x1a   :  { %1794 = vmatpush.bf16.msra.mxu2 %v2746_v6  ;;  %v2483_v42 = vld [vmem:[%s5939_s0 + $0x48] sm:$0xf0]  ;;  %v2913_v45 = vld [vmem:[%s5938_s1 + $0x270] sm:$0xf]  ;;  %v3734_v46 = vld [vmem:[%s5938_s1 + $0x274] sm:$0xf0]  ;;  %v2978_v49 = vor.u32 %v3750_v37, %v2977_v36  ;;  %v4192_v54 = vor.u32 %v3632_v40, %v2481_v35 }
  0x1b   :  { %1813 = vmatpush.bf16.msra.mxu3 %v2810_v10  ;;  %v3105_v47 = vld [vmem:[%s5938_s1 + $0x3f0] sm:$0xf]  ;;  %v3782_v50 = vld [vmem:[%s5938_s1 + $0x3f4] sm:$0xf0]  ;;  %v3033_v51 = vld [vmem:[%s5938_s1 + $0x360] sm:$0xf]  ;;  %v4200_v57 = vor.u32 %v3624_v41, %v2483_v42  ;;  %v2914_v58 = vor.u32 %v3734_v46, %v2913_v45 }
  0x1c   :  { %1757 = vmatpush.bf16.msra.mxu0 %v2610_v17  ;;  %v3764_v52 = vld [vmem:[%s5938_s1 + $0x364] sm:$0xf0]  ;;  %v2969_v55 = vld [vmem:[%s5938_s1 + $0x2e0] sm:$0xf]  ;;  %v3106_v59 = vor.u32 %v3782_v50, %v3105_v47  ;;  %v3025_v2 = vld [vmem:[%s5938_s1 + $0x350] sm:$0xf] }
  0x1d   :  { %1776 = vmatpush.bf16.msra.mxu1 %v2674_v21  ;;  %v3748_v56 = vld [vmem:[%s5938_s1 + $0x2e4] sm:$0xf0]  ;;  %v3034_v60 = vor.u32 %v3764_v52, %v3033_v51  ;;  %v2905_v61 = vld [vmem:[%s5938_s1 + $0x260] sm:$0xf]  ;;  %v3762_v3 = vld [vmem:[%s5938_s1 + $0x354] sm:$0xf0] }
  0x1e   :  { %1795 = vmatpush.bf16.msra.mxu2 %v2738_v22  ;;  %v3732_v62 = vld [vmem:[%s5938_s1 + $0x264] sm:$0xf0]  ;;  %v3097_v63 = vld [vmem:[%s5938_s1 + $0x3e0] sm:$0xf]  ;;  %v2970_v0 = vor.u32 %v3748_v56, %v2969_v55  ;;  %v2961_v4 = vld [vmem:[%s5938_s1 + $0x2d0] sm:$0xf]  ;;  %v3026_v8 = vor.u32 %v3762_v3, %v3025_v2 }
  0x1f   :  { %1814 = vmatpush.bf16.msra.mxu3 %v2802_v26  ;;  %v3780_v1 = vld [vmem:[%s5938_s1 + $0x3e4] sm:$0xf0]  ;;  %v3746_v5 = vld [vmem:[%s5938_s1 + $0x2d4] sm:$0xf0]  ;;  %v2906_v6 = vor.u32 %v3732_v62, %v2905_v61  ;;  %v2897_v9 = vld [vmem:[%s5938_s1 + $0x250] sm:$0xf] }
  0x20   :  { %1758 = vmatpush.bf16.msra.mxu0 %v2602_v34  ;;  %v3098_v7 = vor.u32 %v3780_v1, %v3097_v63  ;;  %v3730_v10 = vld [vmem:[%s5938_s1 + $0x254] sm:$0xf0]  ;;  %v3089_v11 = vld [vmem:[%s5938_s1 + $0x3d0] sm:$0xf]  ;;  %v2962_v12 = vor.u32 %v3746_v5, %v2961_v4  ;;  %v3017_v14 = vld [vmem:[%s5938_s1 + $0x340] sm:$0xf] }
  0x21   :  { %1777 = vmatpush.bf16.msra.mxu1 %v2666_v38  ;;  %v3778_v13 = vld [vmem:[%s5938_s1 + $0x3d4] sm:$0xf0]  ;;  %v3760_v15 = vld [vmem:[%s5938_s1 + $0x344] sm:$0xf0]  ;;  %v2953_v16 = vld [vmem:[%s5938_s1 + $0x2c0] sm:$0xf]  ;;  %v2898_v18 = vor.u32 %v3730_v10, %v2897_v9 }
  0x22   :  { %1796 = vmatpush.bf16.msra.mxu2 %v2730_v39  ;;  %v3744_v17 = vld [vmem:[%s5938_s1 + $0x2c4] sm:$0xf0]  ;;  %v2889_v19 = vld [vmem:[%s5938_s1 + $0x240] sm:$0xf]  ;;  %v3090_v22 = vor.u32 %v3778_v13, %v3089_v11  ;;  %v3018_v23 = vor.u32 %v3760_v15, %v3017_v14  ;;  %v3639_v28 = vld [vmem:[%s5939_s0 + $0x84] sm:$0xf] }
  0x23   :  { %1815 = vmatpush.bf16.msra.mxu3 %v2794_v43  ;;  %1759 = vmatmul.bf16.vlgmr.msra.gmra.mxu0 %v4179_v48  ;;  %v3728_v20 = vld [vmem:[%s5938_s1 + $0x244] sm:$0xf0]  ;;  %v3081_v21 = vld [vmem:[%s5938_s1 + $0x3c0] sm:$0xf]  ;;  %v2954_v27 = vor.u32 %v3744_v17, %v2953_v16  ;;  %v2539_v29 = vld [vmem:[%s5939_s0 + $0xc0] sm:$0xf0] }
  0x24   :  { %1778 = vmatmul.bf16.vlgmr.msra.gmra.mxu1 %v4190_v53  ;;  %1827 = vmatpush.bf16.msrb.mxu0 %v2914_v58  ;;  %v3776_v24 = vld [vmem:[%s5938_s1 + $0x3c4] sm:$0xf0]  ;;  %v2537_v25 = vld [vmem:[%s5939_s0 + $0x80] sm:$0xf]  ;;  %v3009_v30 = vld [vmem:[%s5938_s1 + $0x330] sm:$0xf]  ;;  %v2890_v35 = vor.u32 %v3728_v20, %v2889_v19  ;;  %v4322_v50 = vor.u32 %v3639_v28, %v2539_v29 }
  0x25   :  { %1846 = vmatpush.bf16.msrb.mxu1 %v2978_v49  ;;  %1797 = vmatmul.bf16.vlgmr.msra.gmra.mxu2 %v4192_v54  ;;  %v3647_v26 = vld [vmem:[%s5939_s0 + $0xbc] sm:$0xf0]  ;;  %v3758_v31 = vld [vmem:[%s5938_s1 + $0x334] sm:$0xf0]  ;;  %v2545_v32 = vld [vmem:[%s5939_s0 + $0x88] sm:$0xf]  ;;  %v3082_v39 = vor.u32 %v3776_v24, %v3081_v21 }
  0x26   :  { %1865 = vmatpush.bf16.msrb.mxu2 %v3042_v44  ;;  %1816 = vmatmul.bf16.vlgmr.msra.gmra.mxu3 %v4200_v57  ;;  %v2945_v33 = vld [vmem:[%s5938_s1 + $0x2b0] sm:$0xf]  ;;  %v3742_v34 = vld [vmem:[%s5938_s1 + $0x2b4] sm:$0xf0]  ;;  %v3648_v36 = vld [vmem:[%s5939_s0 + $0xc4] sm:$0xf0]  ;;  %v3010_v40 = vor.u32 %v3758_v31, %v3009_v30  ;;  %v4311_v44 = vor.u32 %v3647_v26, %v2537_v25 }
  0x27   :  { %1884 = vmatpush.bf16.msrb.mxu3 %v3106_v59  ;;  %v3640_v37 = vld [vmem:[%s5939_s0 + $0x8c] sm:$0xf]  ;;  %v2881_v41 = vld [vmem:[%s5938_s1 + $0x230] sm:$0xf]  ;;  %v3726_v42 = vld [vmem:[%s5938_s1 + $0x234] sm:$0xf0]  ;;  %v2946_v45 = vor.u32 %v3742_v34, %v2945_v33  ;;  %v4324_v51 = vor.u32 %v3648_v36, %v2545_v32 }
  0x28   :  { %1828 = vmatpush.bf16.msrb.mxu0 %v2906_v6  ;;  %v2547_v38 = vld [vmem:[%s5939_s0 + $0xc8] sm:$0xf0]  ;;  %v3073_v43 = vld [vmem:[%s5938_s1 + $0x3b0] sm:$0xf]  ;;  %v3774_v46 = vld [vmem:[%s5938_s1 + $0x3b4] sm:$0xf0]  ;;  %v2882_v58 = vor.u32 %v3726_v42, %v2881_v41 }
  0x29   :  { %1847 = vmatpush.bf16.msrb.mxu1 %v2970_v0  ;;  %v3001_v47 = vld [vmem:[%s5938_s1 + $0x320] sm:$0xf]  ;;  %v3756_v49 = vld [vmem:[%s5938_s1 + $0x324] sm:$0xf0]  ;;  %v4332_v56 = vor.u32 %v3640_v37, %v2547_v38  ;;  %v3074_v59 = vor.u32 %v3774_v46, %v3073_v43  ;;  %v2993_v2 = vld [vmem:[%s5938_s1 + $0x310] sm:$0xf] }
  0x2a   :  { %1866 = vmatpush.bf16.msrb.mxu2 %v3034_v60  ;;  %v2937_v52 = vld [vmem:[%s5938_s1 + $0x2a0] sm:$0xf]  ;;  %v3740_v55 = vld [vmem:[%s5938_s1 + $0x2a4] sm:$0xf0]  ;;  %v3002_v60 = vor.u32 %v3756_v49, %v3001_v47  ;;  %v3754_v3 = vld [vmem:[%s5938_s1 + $0x314] sm:$0xf0] }
  0x2b   :  { %1885 = vmatpush.bf16.msrb.mxu3 %v3098_v7  ;;  %v2873_v61 = vld [vmem:[%s5938_s1 + $0x220] sm:$0xf]  ;;  %v3724_v62 = vld [vmem:[%s5938_s1 + $0x224] sm:$0xf0]  ;;  %v2938_v0 = vor.u32 %v3740_v55, %v2937_v52  ;;  %v2929_v4 = vld [vmem:[%s5938_s1 + $0x290] sm:$0xf]  ;;  %v2994_v9 = vor.u32 %v3754_v3, %v2993_v2 }
  0x2c   :  { %1829 = vmatpush.bf16.msrb.mxu0 %v2898_v18  ;;  %v3065_v63 = vld [vmem:[%s5938_s1 + $0x3a0] sm:$0xf]  ;;  %v3772_v1 = vld [vmem:[%s5938_s1 + $0x3a4] sm:$0xf0]  ;;  %v3738_v5 = vld [vmem:[%s5938_s1 + $0x294] sm:$0xf0]  ;;  %v2874_v6 = vor.u32 %v3724_v62, %v2873_v61 }
  0x2d   :  { %1848 = vmatpush.bf16.msrb.mxu1 %v2962_v12  ;;  %v2865_v7 = vld [vmem:[%s5938_s1 + $0x210] sm:$0xf]  ;;  %v3722_v10 = vld [vmem:[%s5938_s1 + $0x214] sm:$0xf0]  ;;  %v2930_v13 = vor.u32 %v3738_v5, %v2929_v4  ;;  %v2985_v14 = vld [vmem:[%s5938_s1 + $0x300] sm:$0xf] }
  0x2e   :  { %1867 = vmatpush.bf16.msrb.mxu2 %v3026_v8  ;;  %v3066_v8 = vor.u32 %v3772_v1, %v3065_v63  ;;  %v3057_v11 = vld [vmem:[%s5938_s1 + $0x390] sm:$0xf]  ;;  %v3770_v12 = vld [vmem:[%s5938_s1 + $0x394] sm:$0xf0]  ;;  %v3752_v15 = vld [vmem:[%s5938_s1 + $0x304] sm:$0xf0]  ;;  %v2866_v20 = vor.u32 %v3722_v10, %v2865_v7 }
  0x2f   :  { %1886 = vmatpush.bf16.msrb.mxu3 %v3090_v22  ;;  %v2921_v16 = vld [vmem:[%s5938_s1 + $0x280] sm:$0xf]  ;;  %v3736_v17 = vld [vmem:[%s5938_s1 + $0x284] sm:$0xf0]  ;;  %v3297_v18 = vld [vmem:[%s5938_s1 + $0x570] sm:$0xf]  ;;  %v3058_v24 = vor.u32 %v3770_v12, %v3057_v11  ;;  %v2986_v25 = vor.u32 %v3752_v15, %v2985_v14 }
  0x30   :  { %1830 = vmatpush.bf16.msrb.mxu0 %v2890_v35  ;;  %v3830_v19 = vld [vmem:[%s5938_s1 + $0x574] sm:$0xf0]  ;;  %v2857_v21 = vld [vmem:[%s5938_s1 + $0x200] sm:$0xf]  ;;  %v3233_v22 = vld [vmem:[%s5938_s1 + $0x4f0] sm:$0xf]  ;;  %v2922_v29 = vor.u32 %v3736_v17, %v2921_v16 }
  0x31   :  { %1849 = vmatpush.bf16.msrb.mxu1 %v2954_v27  ;;  %v3720_v26 = vld [vmem:[%s5938_s1 + $0x204] sm:$0xf0]  ;;  %v3049_v27 = vld [vmem:[%s5938_s1 + $0x380] sm:$0xf]  ;;  %v2489_v30 = vld [vmem:[%s5939_s0 + $0x10] sm:$0xf]  ;;  %v3298_v34 = vor.u32 %v3830_v19, %v3297_v18 }
  0x32   :  { %1868 = vmatpush.bf16.msrb.mxu2 %v3018_v23  ;;  %v3814_v23 = vld [vmem:[%s5938_s1 + $0x4f4] sm:$0xf0]  ;;  %v3768_v28 = vld [vmem:[%s5938_s1 + $0x384] sm:$0xf0]  ;;  %v3633_v31 = vld [vmem:[%s5939_s0 + $0x4c] sm:$0xf0]  ;;  %v2858_v42 = vor.u32 %v3720_v26, %v2857_v21 }
  0x33   :  { %1887 = vmatpush.bf16.msrb.mxu3 %v3082_v39  ;;  %1764 = vmatmul.bf16.gmra.mxu0 %v4311_v44  ;;  %v3625_v32 = vld [vmem:[%s5939_s0 + $0x14] sm:$0xf]  ;;  %v3169_v35 = vld [vmem:[%s5938_s1 + $0x470] sm:$0xf]  ;;  %v3798_v36 = vld [vmem:[%s5938_s1 + $0x474] sm:$0xf0]  ;;  %v3234_v38 = vor.u32 %v3814_v23, %v3233_v22  ;;  %v3050_v47 = vor.u32 %v3768_v28, %v3049_v27 }
  0x34   :  { %1783 = vmatmul.bf16.gmra.mxu1 %v4322_v50  ;;  %1831 = vmatpush.bf16.msrb.mxu0 %v2882_v58  ;;  %v2491_v33 = vld [vmem:[%s5939_s0 + $0x50] sm:$0xf0]  ;;  %v3361_v37 = vld [vmem:[%s5938_s1 + $0x5f0] sm:$0xf]  ;;  %v3846_v39 = vld [vmem:[%s5938_s1 + $0x5f4] sm:$0xf0]  ;;  %v3170_v52 = vor.u32 %v3798_v36, %v3169_v35 }
  0x35   :  { %1850 = vmatpush.bf16.msrb.mxu1 %v2946_v45  ;;  %1802 = vmatmul.bf16.gmra.mxu2 %v4324_v51  ;;  %v3828_v41 = vld [vmem:[%s5938_s1 + $0x564] sm:$0xf0]  ;;  %v2497_v43 = vld [vmem:[%s5939_s0 + $0x18] sm:$0xf]  ;;  %v3626_v46 = vld [vmem:[%s5939_s0 + $0x1c] sm:$0xf]  ;;  %v4469_v1 = vor.u32 %v3625_v32, %v2491_v33 }
  0x36   :  { %1869 = vmatpush.bf16.msrb.mxu2 %v3010_v40  ;;  %1821 = vmatmul.bf16.gmra.mxu3 %v4332_v56  ;;  %v3289_v40 = vld [vmem:[%s5938_s1 + $0x560] sm:$0xf]  ;;  %v3634_v45 = vld [vmem:[%s5939_s0 + $0x54] sm:$0xf0]  ;;  %v2499_v49 = vld [vmem:[%s5939_s0 + $0x58] sm:$0xf0] }
  0x37   :  { %1888 = vmatpush.bf16.msrb.mxu3 %v3074_v59  ;;  %v3161_v55 = vld [vmem:[%s5938_s1 + $0x460] sm:$0xf]  ;;  %v3796_v58 = vld [vmem:[%s5938_s1 + $0x464] sm:$0xf0]  ;;  %v3362_v59 = vor.u32 %v3846_v39, %v3361_v37  ;;  %v3281_v3 = vld [vmem:[%s5938_s1 + $0x550] sm:$0xf]  ;;  %v4480_v5 = vor.u32 %v3634_v45, %v2497_v43 }
  0x38   :  { %1832 = vmatpush.bf16.msrb.mxu0 %v2874_v6  ;;  %v3225_v61 = vld [vmem:[%s5938_s1 + $0x4e0] sm:$0xf]  ;;  %v3812_v62 = vld [vmem:[%s5938_s1 + $0x4e4] sm:$0xf0]  ;;  %v3826_v4 = vld [vmem:[%s5938_s1 + $0x554] sm:$0xf0]  ;;  %v4482_v6 = vor.u32 %v3626_v46, %v2499_v49  ;;  %v3162_v7 = vor.u32 %v3796_v58, %v3161_v55 }
  0x39   :  { %1851 = vmatpush.bf16.msrb.mxu1 %v2938_v0  ;;  %v3353_v63 = vld [vmem:[%s5938_s1 + $0x5e0] sm:$0xf]  ;;  %v4467_v0 = vor.u32 %v3633_v31, %v2489_v30  ;;  %v3844_v2 = vld [vmem:[%s5938_s1 + $0x5e4] sm:$0xf0]  ;;  %v3794_v10 = vld [vmem:[%s5938_s1 + $0x454] sm:$0xf0]  ;;  %v3282_v12 = vor.u32 %v3826_v4, %v3281_v3 }
  0x3a   :  { %1870 = vmatpush.bf16.msrb.mxu2 %v3002_v60  ;;  %v3290_v60 = vor.u32 %v3828_v41, %v3289_v40  ;;  %v3354_v11 = vor.u32 %v3844_v2, %v3353_v63  ;;  %v3810_v14 = vld [vmem:[%s5938_s1 + $0x4d4] sm:$0xf0]  ;;  %v3345_v15 = vld [vmem:[%s5938_s1 + $0x5d0] sm:$0xf]  ;;  %v3273_v17 = vld [vmem:[%s5938_s1 + $0x540] sm:$0xf] }
  0x3b   :  { %1889 = vmatpush.bf16.msrb.mxu3 %v3066_v8  ;;  %v3226_v8 = vor.u32 %v3812_v62, %v3225_v61  ;;  %v3842_v16 = vld [vmem:[%s5938_s1 + $0x5d4] sm:$0xf0]  ;;  %v3824_v18 = vld [vmem:[%s5938_s1 + $0x544] sm:$0xf0]  ;;  %v3145_v21 = vld [vmem:[%s5938_s1 + $0x440] sm:$0xf] }
  0x3c   :  { %1833 = vmatpush.bf16.msrb.mxu0 %v2866_v20  ;;  %v3792_v22 = vld [vmem:[%s5938_s1 + $0x444] sm:$0xf0]  ;;  %v3346_v23 = vor.u32 %v3842_v16, %v3345_v15  ;;  %v3337_v27 = vld [vmem:[%s5938_s1 + $0x5c0] sm:$0xf]  ;;  %v3822_v30 = vld [vmem:[%s5938_s1 + $0x534] sm:$0xf0] }
  0x3d   :  { %1852 = vmatpush.bf16.msrb.mxu1 %v2930_v13  ;;  %v3217_v13 = vld [vmem:[%s5938_s1 + $0x4d0] sm:$0xf]  ;;  %v3808_v26 = vld [vmem:[%s5938_s1 + $0x4c4] sm:$0xf0]  ;;  %v3146_v31 = vor.u32 %v3792_v22, %v3145_v21  ;;  %v2555_v39 = vld [vmem:[%s5939_s0 + $0xd0] sm:$0xf0] }
  0x3e   :  { %1871 = vmatpush.bf16.msrb.mxu2 %v2994_v9  ;;  %v3153_v9 = vld [vmem:[%s5938_s1 + $0x450] sm:$0xf]  ;;  %v3218_v20 = vor.u32 %v3810_v14, %v3217_v13  ;;  %v3840_v28 = vld [vmem:[%s5938_s1 + $0x5c4] sm:$0xf0]  ;;  %v3838_v45 = vld [vmem:[%s5938_s1 + $0x5b4] sm:$0xf0] }
  0x3f   :  { %1890 = vmatpush.bf16.msrb.mxu3 %v3058_v24  ;;  %v3154_v19 = vor.u32 %v3794_v10, %v3153_v9  ;;  %v3274_v24 = vor.u32 %v3824_v18, %v3273_v17  ;;  %v3137_v33 = vld [vmem:[%s5938_s1 + $0x430] sm:$0xf]  ;;  %v3338_v35 = vor.u32 %v3840_v28, %v3337_v27  ;;  %v3257_v46 = vld [vmem:[%s5938_s1 + $0x520] sm:$0xf]  ;;  %v2561_v49 = vld [vmem:[%s5939_s0 + $0x98] sm:$0xf] }
  0x40   :  { %1834 = vmatpush.bf16.msrb.mxu0 %v2858_v42  ;;  %v2553_v36 = vld [vmem:[%s5939_s0 + $0x90] sm:$0xf]  ;;  %v3806_v42 = vld [vmem:[%s5938_s1 + $0x4b4] sm:$0xf0]  ;;  %v3642_v55 = vld [vmem:[%s5939_s0 + $0x9c] sm:$0xf] }
  0x41   :  { %1853 = vmatpush.bf16.msrb.mxu1 %v2922_v29  ;;  %v3265_v29 = vld [vmem:[%s5938_s1 + $0x530] sm:$0xf]  ;;  %v2563_v58 = vld [vmem:[%s5939_s0 + $0xd8] sm:$0xf0]  ;;  %v3129_v61 = vld [vmem:[%s5938_s1 + $0x420] sm:$0xf] }
  0x42   :  { %1872 = vmatpush.bf16.msrb.mxu2 %v2986_v25  ;;  %v3209_v25 = vld [vmem:[%s5938_s1 + $0x4c0] sm:$0xf]  ;;  %v3649_v37 = vld [vmem:[%s5939_s0 + $0xcc] sm:$0xf0]  ;;  %v3266_v40 = vor.u32 %v3822_v30, %v3265_v29  ;;  %v3788_v62 = vld [vmem:[%s5938_s1 + $0x424] sm:$0xf0]  ;;  %v4614_v14 = vor.u32 %v3642_v55, %v2563_v58 }
  0x43   :  { %1891 = vmatpush.bf16.msrb.mxu3 %v3050_v47  ;;  %1835 = vmatmul.bf16.vlgmr.msrb.gmra.mxu0 %v4467_v0  ;;  %v3210_v32 = vor.u32 %v3808_v26, %v3209_v25  ;;  %v3201_v41 = vld [vmem:[%s5938_s1 + $0x4b0] sm:$0xf]  ;;  %v3820_v47 = vld [vmem:[%s5938_s1 + $0x524] sm:$0xf0]  ;;  %v3193_v3 = vld [vmem:[%s5938_s1 + $0x4a0] sm:$0xf]  ;;  %v3130_v15 = vor.u32 %v3788_v62, %v3129_v61 }
  0x44   :  { %1903 = vmatpush.bf16.msra.mxu0 %v3170_v52  ;;  %1854 = vmatmul.bf16.vlgmr.msrb.gmra.mxu1 %v4469_v1  ;;  %v3329_v43 = vld [vmem:[%s5938_s1 + $0x5b0] sm:$0xf]  ;;  %v3650_v52 = vld [vmem:[%s5939_s0 + $0xd4] sm:$0xf0]  ;;  %v3258_v2 = vor.u32 %v3820_v47, %v3257_v46  ;;  %v3804_v4 = vld [vmem:[%s5938_s1 + $0x4a4] sm:$0xf0] }
  0x45   :  { %1922 = vmatpush.bf16.msra.mxu1 %v3234_v38  ;;  %1873 = vmatmul.bf16.vlgmr.msrb.gmra.mxu2 %v4480_v5  ;;  %v3641_v38 = vld [vmem:[%s5939_s0 + $0x94] sm:$0xf]  ;;  %v3330_v63 = vor.u32 %v3838_v45, %v3329_v43  ;;  %v3836_v10 = vld [vmem:[%s5938_s1 + $0x5a4] sm:$0xf0]  ;;  %v4612_v13 = vor.u32 %v3650_v52, %v2561_v49  ;;  %v3194_v16 = vor.u32 %v3804_v4, %v3193_v3  ;;  %v3121_v17 = vld [vmem:[%s5938_s1 + $0x410] sm:$0xf] }
  0x46   :  { %1941 = vmatpush.bf16.msra.mxu2 %v3298_v34  ;;  %1892 = vmatmul.bf16.vlgmr.msrb.gmra.mxu3 %v4482_v6  ;;  %v3790_v34 = vld [vmem:[%s5938_s1 + $0x434] sm:$0xf0]  ;;  %v4601_v9 = vor.u32 %v3641_v38, %v2555_v39  ;;  %v3185_v21 = vld [vmem:[%s5938_s1 + $0x490] sm:$0xf]  ;;  %v3241_v25 = vld [vmem:[%s5938_s1 + $0x500] sm:$0xf] }
  0x47   :  { %1960 = vmatpush.bf16.msra.mxu3 %v3362_v59  ;;  %v3138_v59 = vor.u32 %v3790_v34, %v3137_v33  ;;  %v3786_v18 = vld [vmem:[%s5938_s1 + $0x414] sm:$0xf0]  ;;  %v3816_v26 = vld [vmem:[%s5938_s1 + $0x504] sm:$0xf0]  ;;  %v3553_v27 = vld [vmem:[%s5938_s1 + $0x770] sm:$0xf] }
  0x48   :  { %1904 = vmatpush.bf16.msra.mxu0 %v3162_v7  ;;  %v3321_v7 = vld [vmem:[%s5938_s1 + $0x5a0] sm:$0xf]  ;;  %v3802_v22 = vld [vmem:[%s5938_s1 + $0x494] sm:$0xf0]  ;;  %v3122_v29 = vor.u32 %v3786_v18, %v3121_v17  ;;  %v3832_v38 = vld [vmem:[%s5938_s1 + $0x584] sm:$0xf0] }
  0x49   :  { %1923 = vmatpush.bf16.msra.mxu1 %v3226_v8  ;;  %v4599_v8 = vor.u32 %v3649_v37, %v2553_v36  ;;  %v3894_v28 = vld [vmem:[%s5938_s1 + $0x774] sm:$0xf0]  ;;  %v3186_v30 = vor.u32 %v3802_v22, %v3185_v21  ;;  %v3177_v33 = vld [vmem:[%s5938_s1 + $0x480] sm:$0xf]  ;;  %v3800_v36 = vld [vmem:[%s5938_s1 + $0x484] sm:$0xf0] }
  0x4a   :  { %1942 = vmatpush.bf16.msra.mxu2 %v3290_v60  ;;  %v3202_v60 = vor.u32 %v3806_v42, %v3201_v41  ;;  %v3305_v37 = vld [vmem:[%s5938_s1 + $0x580] sm:$0xf]  ;;  %v3554_v39 = vor.u32 %v3894_v28, %v3553_v27  ;;  %v3862_v41 = vld [vmem:[%s5938_s1 + $0x674] sm:$0xf0]  ;;  %v3489_v42 = vld [vmem:[%s5938_s1 + $0x6f0] sm:$0xf]  ;;  %v3178_v49 = vor.u32 %v3800_v36, %v3177_v33 }
  0x4b   :  { %1961 = vmatpush.bf16.msra.mxu3 %v3354_v11  ;;  %v3249_v11 = vld [vmem:[%s5938_s1 + $0x510] sm:$0xf]  ;;  %v3878_v43 = vld [vmem:[%s5938_s1 + $0x6f4] sm:$0xf0]  ;;  %v3545_v52 = vld [vmem:[%s5938_s1 + $0x760] sm:$0xf]  ;;  %v3306_v58 = vor.u32 %v3832_v38, %v3305_v37 }
  0x4c   :  { %1905 = vmatpush.bf16.msra.mxu0 %v3154_v19  ;;  %v3322_v19 = vor.u32 %v3836_v10, %v3321_v7  ;;  %v3617_v45 = vld [vmem:[%s5938_s1 + $0x7f0] sm:$0xf]  ;;  %v3910_v46 = vld [vmem:[%s5938_s1 + $0x7f4] sm:$0xf0]  ;;  %v3892_v55 = vld [vmem:[%s5938_s1 + $0x764] sm:$0xf0] }
  0x4d   :  { %1924 = vmatpush.bf16.msra.mxu1 %v3218_v20  ;;  %v3627_v61 = vld [vmem:[%s5939_s0 + $0x24] sm:$0xf]  ;;  %v3618_v3 = vor.u32 %v3910_v46, %v3617_v45  ;;  %v3417_v4 = vld [vmem:[%s5938_s1 + $0x660] sm:$0xf]  ;;  %v3860_v7 = vld [vmem:[%s5938_s1 + $0x664] sm:$0xf0] }
  0x4e   :  { %1943 = vmatpush.bf16.msra.mxu2 %v3282_v12  ;;  %v3818_v12 = vld [vmem:[%s5938_s1 + $0x514] sm:$0xf0]  ;;  %v2513_v10 = vld [vmem:[%s5939_s0 + $0x28] sm:$0xf]  ;;  %v3481_v17 = vld [vmem:[%s5938_s1 + $0x6e0] sm:$0xf] }
  0x4f   :  { %1962 = vmatpush.bf16.msra.mxu3 %v3346_v23  ;;  %v3250_v20 = vor.u32 %v3818_v12, %v3249_v11  ;;  %v3313_v23 = vld [vmem:[%s5938_s1 + $0x590] sm:$0xf]  ;;  %v3636_v11 = vld [vmem:[%s5939_s0 + $0x64] sm:$0xf0]  ;;  %v3628_v12 = vld [vmem:[%s5939_s0 + $0x2c] sm:$0xf] }
  0x50   :  { %1906 = vmatpush.bf16.msra.mxu0 %v3146_v31  ;;  %v3113_v31 = vld [vmem:[%s5938_s1 + $0x400] sm:$0xf]  ;;  %v3876_v18 = vld [vmem:[%s5938_s1 + $0x6e4] sm:$0xf0]  ;;  %v3537_v22 = vld [vmem:[%s5938_s1 + $0x750] sm:$0xf]  ;;  %v4750_v28 = vor.u32 %v3636_v11, %v2513_v10 }
  0x51   :  { %1925 = vmatpush.bf16.msra.mxu1 %v3210_v32  ;;  %v3784_v32 = vld [vmem:[%s5938_s1 + $0x404] sm:$0xf0]  ;;  %v3858_v27 = vld [vmem:[%s5938_s1 + $0x654] sm:$0xf0]  ;;  %v3601_v36 = vld [vmem:[%s5938_s1 + $0x7d0] sm:$0xf] }
  0x52   :  { %1944 = vmatpush.bf16.msra.mxu2 %v3274_v24  ;;  %v3834_v24 = vld [vmem:[%s5938_s1 + $0x594] sm:$0xf0]  ;;  %v3114_v47 = vor.u32 %v3784_v32, %v3113_v31  ;;  %v3908_v21 = vld [vmem:[%s5938_s1 + $0x7e4] sm:$0xf0]  ;;  %v3473_v32 = vld [vmem:[%s5938_s1 + $0x6d0] sm:$0xf] }
  0x53   :  { %1963 = vmatpush.bf16.msra.mxu3 %v3338_v35  ;;  %1840 = vmatmul.bf16.gmra.mxu0 %v4599_v8  ;;  %v3314_v34 = vor.u32 %v3834_v24, %v3313_v23  ;;  %v3242_v35 = vor.u32 %v3816_v26, %v3241_v25  ;;  %v3890_v25 = vld [vmem:[%s5938_s1 + $0x754] sm:$0xf0]  ;;  %v3409_v26 = vld [vmem:[%s5938_s1 + $0x650] sm:$0xf]  ;;  %v3529_v38 = vld [vmem:[%s5938_s1 + $0x740] sm:$0xf] }
  0x54   :  { %1907 = vmatpush.bf16.msra.mxu0 %v3138_v59  ;;  %1859 = vmatmul.bf16.gmra.mxu1 %v4601_v9  ;;  %v2505_v59 = vld [vmem:[%s5939_s0 + $0x20] sm:$0xf]  ;;  %v3874_v33 = vld [vmem:[%s5938_s1 + $0x6d4] sm:$0xf0]  ;;  %v3872_v46 = vld [vmem:[%s5938_s1 + $0x6c4] sm:$0xf0] }
  0x55   :  { %1926 = vmatpush.bf16.msra.mxu1 %v3202_v60  ;;  %1878 = vmatmul.bf16.gmra.mxu2 %v4612_v13  ;;  %v3635_v60 = vld [vmem:[%s5939_s0 + $0x5c] sm:$0xf0]  ;;  %v3906_v37 = vld [vmem:[%s5938_s1 + $0x7d4] sm:$0xf0]  ;;  %v3643_v10 = vld [vmem:[%s5939_s0 + $0xa4] sm:$0xf] }
  0x56   :  { %1945 = vmatpush.bf16.msra.mxu2 %v3266_v40  ;;  %1897 = vmatmul.bf16.gmra.mxu3 %v4614_v14  ;;  %v3425_v40 = vld [vmem:[%s5938_s1 + $0x670] sm:$0xf]  ;;  %v4737_v23 = vor.u32 %v3635_v60, %v2505_v59  ;;  %v3465_v45 = vld [vmem:[%s5938_s1 + $0x6c0] sm:$0xf]  ;;  %v3886_v59 = vld [vmem:[%s5938_s1 + $0x734] sm:$0xf0] }
  0x57   :  { %1964 = vmatpush.bf16.msra.mxu3 %v3330_v63  ;;  %v3426_v62 = vor.u32 %v3862_v41, %v3425_v40  ;;  %v2507_v63 = vld [vmem:[%s5939_s0 + $0x60] sm:$0xf0]  ;;  %v3401_v40 = vld [vmem:[%s5938_s1 + $0x640] sm:$0xf]  ;;  %v3856_v41 = vld [vmem:[%s5938_s1 + $0x644] sm:$0xf0] }
  0x58   :  { %1908 = vmatpush.bf16.msra.mxu0 %v3130_v15  ;;  %v3546_v15 = vor.u32 %v3892_v55, %v3545_v52  ;;  %v4739_v24 = vor.u32 %v3627_v61, %v2507_v63  ;;  %v3593_v52 = vld [vmem:[%s5938_s1 + $0x7c0] sm:$0xf]  ;;  %v3904_v55 = vld [vmem:[%s5938_s1 + $0x7c4] sm:$0xf0]  ;;  %v3393_v60 = vld [vmem:[%s5938_s1 + $0x630] sm:$0xf] }
  0x59   :  { %1927 = vmatpush.bf16.msra.mxu1 %v3194_v16  ;;  %v2515_v16 = vld [vmem:[%s5939_s0 + $0x68] sm:$0xf0]  ;;  %v3854_v61 = vld [vmem:[%s5938_s1 + $0x634] sm:$0xf0]  ;;  %v3594_v63 = vor.u32 %v3904_v55, %v3593_v52  ;;  %v2571_v11 = vld [vmem:[%s5939_s0 + $0xe0] sm:$0xf0] }
  0x5a   :  { %1946 = vmatpush.bf16.msra.mxu2 %v3258_v2  ;;  %v3490_v2 = vor.u32 %v3878_v43, %v3489_v42  ;;  %v3474_v42 = vor.u32 %v3874_v33, %v3473_v32  ;;  %v3602_v43 = vor.u32 %v3906_v37, %v3601_v36  ;;  %v3449_v32 = vld [vmem:[%s5938_s1 + $0x6a0] sm:$0xf]  ;;  %v3868_v33 = vld [vmem:[%s5938_s1 + $0x6a4] sm:$0xf0]  ;;  %v3441_v52 = vld [vmem:[%s5938_s1 + $0x690] sm:$0xf] }
  0x5b   :  { %1965 = vmatpush.bf16.msra.mxu3 %v3322_v19  ;;  %v3418_v19 = vor.u32 %v3860_v7, %v3417_v4  ;;  %v2569_v4 = vld [vmem:[%s5939_s0 + $0xa0] sm:$0xf]  ;;  %v3900_v37 = vld [vmem:[%s5938_s1 + $0x7a4] sm:$0xf0]  ;;  %v3866_v55 = vld [vmem:[%s5938_s1 + $0x694] sm:$0xf0] }
  0x5c   :  { %1909 = vmatpush.bf16.msra.mxu0 %v3122_v29  ;;  %v4752_v29 = vor.u32 %v3628_v12, %v2515_v16  ;;  %v3651_v7 = vld [vmem:[%s5939_s0 + $0xdc] sm:$0xf0]  ;;  %v3585_v16 = vld [vmem:[%s5938_s1 + $0x7b0] sm:$0xf] }
  0x5d   :  { %1928 = vmatpush.bf16.msra.mxu1 %v3186_v30  ;;  %v3482_v30 = vor.u32 %v3876_v18, %v3481_v17  ;;  %v3902_v17 = vld [vmem:[%s5938_s1 + $0x7b4] sm:$0xf0]  ;;  %v3513_v18 = vld [vmem:[%s5938_s1 + $0x720] sm:$0xf] }
  0x5e   :  { %1947 = vmatpush.bf16.msra.mxu2 %v3250_v20  ;;  %v3609_v20 = vld [vmem:[%s5938_s1 + $0x7e0] sm:$0xf] }
  0x5f   :  { %1966 = vmatpush.bf16.msra.mxu3 %v3314_v34  ;;  %v3610_v31 = vor.u32 %v3908_v21, %v3609_v20  ;;  %v3538_v34 = vor.u32 %v3890_v25, %v3537_v22  ;;  %v3385_v20 = vld [vmem:[%s5938_s1 + $0x620] sm:$0xf]  ;;  %v3852_v21 = vld [vmem:[%s5938_s1 + $0x624] sm:$0xf0] }
  0x60   :  { %1910 = vmatpush.bf16.msra.mxu0 %v3114_v47  ;;  %v2577_v22 = vld [vmem:[%s5939_s0 + $0xa8] sm:$0xf]  ;;  %v3577_v36 = vld [vmem:[%s5938_s1 + $0x7a0] sm:$0xf] }
  0x61   :  { %1929 = vmatpush.bf16.msra.mxu1 %v3178_v49  ;;  %v3402_v49 = vor.u32 %v3856_v41, %v3401_v40  ;;  %v3652_v25 = vld [vmem:[%s5939_s0 + $0xe4] sm:$0xf0]  ;;  %v4871_v40 = vor.u32 %v3643_v10, %v2571_v11  ;;  %v3882_v41 = vld [vmem:[%s5938_s1 + $0x714] sm:$0xf0]  ;;  %v3669_v10 = vld [vmem:[%s5938_s1 + $0x74] sm:$0xf] }
  0x62   :  { %1948 = vmatpush.bf16.msra.mxu2 %v3242_v35  ;;  %v3410_v35 = vor.u32 %v3858_v27, %v3409_v26  ;;  %v3644_v26 = vld [vmem:[%s5939_s0 + $0xac] sm:$0xf]  ;;  %v2659_v11 = vld [vmem:[%s5938_s1 + $0x78] sm:$0xf0] }
  0x63   :  { %1967 = vmatpush.bf16.msra.mxu3 %v3306_v58  ;;  %1911 = vmatmul.bf16.vlgmr.msra.gmra.mxu0 %v4737_v23  ;;  %v3521_v58 = vld [vmem:[%s5938_s1 + $0x730] sm:$0xf]  ;;  %v2579_v27 = vld [vmem:[%s5939_s0 + $0xe8] sm:$0xf0] }
  0x64   :  { %1979 = vmatpush.bf16.msrb.mxu0 %v3426_v62  ;;  %1930 = vmatmul.bf16.vlgmr.msra.gmra.mxu1 %v4739_v24  ;;  %v3466_v62 = vor.u32 %v3872_v46, %v3465_v45  ;;  %v3522_v12 = vor.u32 %v3886_v59, %v3521_v58  ;;  %v4882_v45 = vor.u32 %v3652_v25, %v2577_v22  ;;  %v3569_v58 = vld [vmem:[%s5938_s1 + $0x790] sm:$0xf]  ;;  %v3685_v22 = vld [vmem:[%s5938_s1 + $0xf4] sm:$0xf]  ;;  %v2723_v25 = vld [vmem:[%s5938_s1 + $0xf8] sm:$0xf0] }
  0x65   :  { %1998 = vmatpush.bf16.msrb.mxu1 %v3490_v2  ;;  %1949 = vmatmul.bf16.vlgmr.msra.gmra.mxu2 %v4750_v28  ;;  %v3457_v2 = vld [vmem:[%s5938_s1 + $0x6b0] sm:$0xf]  ;;  %v4884_v46 = vor.u32 %v3644_v26, %v2579_v27  ;;  %v2662_v27 = vor.u32 %v3669_v10, %v2659_v11 }
  0x66   :  { %2017 = vmatpush.bf16.msrb.mxu2 %v3554_v39  ;;  %v3888_v39 = vld [vmem:[%s5938_s1 + $0x744] sm:$0xf0]  ;;  %1968 = vmatmul.bf16.vlgmr.msra.gmra.mxu3 %v4752_v29 }
  0x67   :  { %2036 = vmatpush.bf16.msrb.mxu3 %v3618_v3  ;;  %v3530_v47 = vor.u32 %v3888_v39, %v3529_v38  ;;  %v3870_v3 = vld [vmem:[%s5938_s1 + $0x6b4] sm:$0xf0]  ;;  %v3505_v38 = vld [vmem:[%s5938_s1 + $0x710] sm:$0xf]  ;;  %v4869_v39 = vor.u32 %v3651_v7, %v2569_v4  ;;  %v3701_v4 = vld [vmem:[%s5938_s1 + $0x174] sm:$0xf] }
  0x68   :  { %1980 = vmatpush.bf16.msrb.mxu0 %v3418_v19  ;;  %v3884_v19 = vld [vmem:[%s5938_s1 + $0x724] sm:$0xf0]  ;;  %v3506_v59 = vor.u32 %v3882_v41, %v3505_v38  ;;  %v2787_v7 = vld [vmem:[%s5938_s1 + $0x178] sm:$0xf0]  ;;  %v2521_v38 = vld [vmem:[%s5939_s0 + $0x30] sm:$0xf] }
  0x69   :  { %1999 = vmatpush.bf16.msrb.mxu1 %v3482_v30  ;;  %v3458_v30 = vor.u32 %v3870_v3, %v3457_v2  ;;  %v3369_v2 = vld [vmem:[%s5938_s1 + $0x600] sm:$0xf]  ;;  %v3848_v3 = vld [vmem:[%s5938_s1 + $0x604] sm:$0xf0]  ;;  %v2790_v26 = vor.u32 %v3701_v4, %v2787_v7  ;;  %v3637_v41 = vld [vmem:[%s5939_s0 + $0x6c] sm:$0xf0] }
  0x6a   :  { %2018 = vmatpush.bf16.msrb.mxu2 %v3546_v15  ;;  %v3394_v15 = vor.u32 %v3854_v61, %v3393_v60  ;;  %v3898_v61 = vld [vmem:[%s5938_s1 + $0x794] sm:$0xf0]  ;;  %v3697_v4 = vld [vmem:[%s5938_s1 + $0x154] sm:$0xf]  ;;  %v2771_v7 = vld [vmem:[%s5938_s1 + $0x158] sm:$0xf0] }
  0x6b   :  { %2037 = vmatpush.bf16.msrb.mxu3 %v3610_v31  ;;  %v3586_v31 = vor.u32 %v3902_v17, %v3585_v16  ;;  %v3433_v16 = vld [vmem:[%s5938_s1 + $0x680] sm:$0xf]  ;;  %v3864_v17 = vld [vmem:[%s5938_s1 + $0x684] sm:$0xf0] }
  0x6c   :  { %1981 = vmatpush.bf16.msrb.mxu0 %v3410_v35  ;;  %v3386_v35 = vor.u32 %v3852_v21, %v3385_v20  ;;  %v3370_v20 = vor.u32 %v3848_v3, %v3369_v2  ;;  %v3896_v21 = vld [vmem:[%s5938_s1 + $0x784] sm:$0xf0]  ;;  %v3630_v2 = vld [vmem:[%s5939_s0 + $0x3c] sm:$0xf] }
  0x6d   :  { %2000 = vmatpush.bf16.msrb.mxu1 %v3474_v42  ;;  %v3377_v42 = vld [vmem:[%s5938_s1 + $0x610] sm:$0xf]  ;;  %v2531_v3 = vld [vmem:[%s5939_s0 + $0x78] sm:$0xf0] }
  0x6e   :  { %2019 = vmatpush.bf16.msrb.mxu2 %v3538_v34  ;;  %v3514_v34 = vor.u32 %v3884_v19, %v3513_v18  ;;  %v3561_v18 = vld [vmem:[%s5938_s1 + $0x780] sm:$0xf] }
  0x6f   :  { %2038 = vmatpush.bf16.msrb.mxu3 %v3602_v43  ;;  %v3850_v43 = vld [vmem:[%s5938_s1 + $0x614] sm:$0xf0] }
  0x70   :  { %1982 = vmatpush.bf16.msrb.mxu0 %v3402_v49  ;;  %v3578_v49 = vor.u32 %v3900_v37, %v3577_v36  ;;  %v3378_v60 = vor.u32 %v3850_v43, %v3377_v42  ;;  %v3434_v36 = vor.u32 %v3864_v17, %v3433_v16  ;;  %v3562_v37 = vor.u32 %v3896_v21, %v3561_v18  ;;  %v3629_v42 = vld [vmem:[%s5939_s0 + $0x34] sm:$0xf]  ;;  %v2835_v21 = vld [vmem:[%s5938_s1 + $0x1d8] sm:$0xf0] }
  0x71   :  { %2001 = vmatpush.bf16.msrb.mxu1 %v3466_v62  ;;  %v3497_v62 = vld [vmem:[%s5938_s1 + $0x700] sm:$0xf]  ;;  %v2523_v43 = vld [vmem:[%s5939_s0 + $0x70] sm:$0xf0]  ;;  %v5013_v17 = vor.u32 %v3637_v41, %v2521_v38  ;;  %v3711_v38 = vld [vmem:[%s5938_s1 + $0x1c4] sm:$0xf] }
  0x72   :  { %2020 = vmatpush.bf16.msrb.mxu2 %v3530_v47  ;;  %v3450_v47 = vor.u32 %v3868_v33, %v3449_v32  ;;  %v3699_v32 = vld [vmem:[%s5938_s1 + $0x164] sm:$0xf]  ;;  %v2779_v33 = vld [vmem:[%s5938_s1 + $0x168] sm:$0xf0]  ;;  %v3681_v16 = vld [vmem:[%s5938_s1 + $0xd4] sm:$0xf]  ;;  %v5015_v18 = vor.u32 %v3629_v42, %v2523_v43 }
  0x73   :  { %2039 = vmatpush.bf16.msrb.mxu3 %v3594_v63  ;;  %v3880_v63 = vld [vmem:[%s5938_s1 + $0x704] sm:$0xf0]  ;;  %1916 = vmatmul.bf16.gmra.mxu0 %v4869_v39  ;;  %v2827_v41 = vld [vmem:[%s5938_s1 + $0x1c8] sm:$0xf0] }
  0x74   :  { %1983 = vmatpush.bf16.msrb.mxu0 %v3394_v15  ;;  %1935 = vmatmul.bf16.gmra.mxu1 %v4871_v40  ;;  %v3570_v15 = vor.u32 %v3898_v61, %v3569_v58  ;;  %v3498_v19 = vor.u32 %v3880_v63, %v3497_v62  ;;  %v2843_v61 = vld [vmem:[%s5938_s1 + $0x1e8] sm:$0xf0]  ;;  %v2529_v62 = vld [vmem:[%s5939_s0 + $0x38] sm:$0xf] }
  0x75   :  { %2002 = vmatpush.bf16.msrb.mxu1 %v3458_v30  ;;  %1954 = vmatmul.bf16.gmra.mxu2 %v4882_v45  ;;  %v3717_v30 = vld [vmem:[%s5938_s1 + $0x1f4] sm:$0xf]  ;;  %v3638_v63 = vld [vmem:[%s5939_s0 + $0x74] sm:$0xf0] }
  0x76   :  { %2021 = vmatpush.bf16.msrb.mxu2 %v3522_v12  ;;  %1973 = vmatmul.bf16.gmra.mxu3 %v4884_v46  ;;  %v3442_v12 = vor.u32 %v3866_v55, %v3441_v52  ;;  %v3683_v52 = vld [vmem:[%s5938_s1 + $0xe4] sm:$0xf]  ;;  %v2782_v55 = vor.u32 %v3699_v32, %v2779_v33 }
  0x77   :  { %2040 = vmatpush.bf16.msrb.mxu3 %v3586_v31  ;;  %v2851_v31 = vld [vmem:[%s5938_s1 + $0x1f8] sm:$0xf0] }
  0x78   :  { %1984 = vmatpush.bf16.msrb.mxu0 %v3386_v35  ;;  %v2651_v35 = vld [vmem:[%s5938_s1 + $0x68] sm:$0xf0] }
  0x79   :  { %2003 = vmatpush.bf16.msrb.mxu1 %v3450_v47  ;;  %v2726_v47 = vor.u32 %v3685_v22, %v2723_v25  ;;  %v5026_v22 = vor.u32 %v3638_v63, %v2529_v62  ;;  %v5028_v25 = vor.u32 %v3630_v2, %v2531_v3  ;;  %v3709_v62 = vld [vmem:[%s5938_s1 + $0x1b4] sm:$0xf]  ;;  %v2819_v63 = vld [vmem:[%s5938_s1 + $0x1b8] sm:$0xf0] }
  0x7a   :  { %2022 = vmatpush.bf16.msrb.mxu2 %v3514_v34  ;;  %v3667_v34 = vld [vmem:[%s5938_s1 + $0x64] sm:$0xf] }
  0x7b   :  { %2041 = vmatpush.bf16.msrb.mxu3 %v3578_v49  ;;  %v2854_v49 = vor.u32 %v3717_v30, %v2851_v31  ;;  %v2654_v58 = vor.u32 %v3667_v34, %v2651_v35  ;;  %v3695_v30 = vld [vmem:[%s5938_s1 + $0x144] sm:$0xf]  ;;  %v2763_v31 = vld [vmem:[%s5938_s1 + $0x148] sm:$0xf0] }
  0x7c   :  { %1985 = vmatpush.bf16.msrb.mxu0 %v3378_v60  ;;  %v3715_v60 = vld [vmem:[%s5938_s1 + $0x1e4] sm:$0xf]  ;;  %v2635_v35 = vld [vmem:[%s5938_s1 + $0x48] sm:$0xf0]  ;;  %v2766_v42 = vor.u32 %v3695_v30, %v2763_v31 }
  0x7d   :  { %2004 = vmatpush.bf16.msrb.mxu1 %v3442_v12  ;;  %v2846_v11 = vor.u32 %v3715_v60, %v2843_v61  ;;  %v3665_v12 = vld [vmem:[%s5938_s1 + $0x54] sm:$0xf]  ;;  %v3663_v34 = vld [vmem:[%s5938_s1 + $0x44] sm:$0xf]  ;;  %v2691_v61 = vld [vmem:[%s5938_s1 + $0xb8] sm:$0xf0] }
  0x7e   :  { %2023 = vmatpush.bf16.msrb.mxu2 %v3506_v59  ;;  %v2715_v59 = vld [vmem:[%s5938_s1 + $0xe8] sm:$0xf0]  ;;  %v2638_v43 = vor.u32 %v3663_v34, %v2635_v35  ;;  %v3677_v60 = vld [vmem:[%s5938_s1 + $0xb4] sm:$0xf]  ;;  %v3707_v30 = vld [vmem:[%s5938_s1 + $0x1a4] sm:$0xf] }
  0x7f   :  { %2042 = vmatpush.bf16.msrb.mxu3 %v3570_v15  ;;  %v2718_v10 = vor.u32 %v3683_v52, %v2715_v59  ;;  %v2643_v15 = vld [vmem:[%s5938_s1 + $0x58] sm:$0xf0]  ;;  %v2811_v31 = vld [vmem:[%s5938_s1 + $0x1a8] sm:$0xf0] }
  0x80   :  { %1986 = vmatpush.bf16.msrb.mxu0 %v3370_v20  ;;  %v3713_v20 = vld [vmem:[%s5938_s1 + $0x1d4] sm:$0xf]  ;;  %v2627_v59 = vld [vmem:[%s5938_s1 + $0x38] sm:$0xf0] }
  0x81   :  { %2005 = vmatpush.bf16.msrb.mxu1 %v3434_v36  ;;  %v2838_v33 = vor.u32 %v3713_v20, %v2835_v21  ;;  %v3679_v36 = vld [vmem:[%s5938_s1 + $0xc4] sm:$0xf]  ;;  %v2619_v21 = vld [vmem:[%s5938_s1 + $0x28] sm:$0xf0]  ;;  %v3646_v34 = vld [vmem:[%s5939_s0 + $0xbc] sm:$0xf] }
  0x82   :  { %2024 = vmatpush.bf16.msrb.mxu2 %v3498_v19  ;;  %v2707_v19 = vld [vmem:[%s5938_s1 + $0xd8] sm:$0xf0]  ;;  %v3659_v20 = vld [vmem:[%s5938_s1 + $0x24] sm:$0xf] }
  0x83   :  { %2043 = vmatpush.bf16.msrb.mxu3 %v3562_v37  ;;  %v2710_v32 = vor.u32 %v3681_v16, %v2707_v19  ;;  %1987 = vmatmul.bf16.vlgmr.msrb.gmra.mxu0 %v5013_v17  ;;  %v2699_v37 = vld [vmem:[%s5938_s1 + $0xc8] sm:$0xf0]  ;;  %v2694_v16 = vor.u32 %v3677_v60, %v2691_v61  ;;  %v2822_v19 = vor.u32 %v3709_v62, %v2819_v63  ;;  %v2595_v35 = vld [vmem:[%s5939_s0 + $0xf8] sm:$0xf0]  ;;  %v3705_v60 = vld [vmem:[%s5938_s1 + $0x194] sm:$0xf] }
  0x84   :  { %2055 = vmatpush.bf16.msra.mxu0 %v2662_v27  ;;  %v2646_v27 = vor.u32 %v3665_v12, %v2643_v15  ;;  %2006 = vmatmul.bf16.vlgmr.msrb.gmra.mxu1 %v5015_v18  ;;  %v2702_v52 = vor.u32 %v3679_v36, %v2699_v37  ;;  %v3645_v12 = vld [vmem:[%s5939_s0 + $0xb4] sm:$0xf]  ;;  %v2622_v37 = vor.u32 %v3659_v20, %v2619_v21  ;;  %v2803_v61 = vld [vmem:[%s5938_s1 + $0x198] sm:$0xf0]  ;;  %v3703_v20 = vld [vmem:[%s5938_s1 + $0x184] sm:$0xf] }
  0x85   :  { %2074 = vmatpush.bf16.msra.mxu1 %v2726_v47  ;;  %2025 = vmatmul.bf16.vlgmr.msrb.gmra.mxu2 %v5026_v22  ;;  %v3693_v47 = vld [vmem:[%s5938_s1 + $0x134] sm:$0xf]  ;;  %v5160_v63 = vor.u32 %v3646_v34, %v2595_v35  ;;  %v2795_v21 = vld [vmem:[%s5938_s1 + $0x188] sm:$0xf0]  ;;  %v2979_v35 = vld [vmem:[%s5938_s1 + $0x2f8] sm:$0xf0] }
  0x86   :  { %2093 = vmatpush.bf16.msra.mxu2 %v2790_v26  ;;  %v2774_v26 = vor.u32 %v3697_v4, %v2771_v7  ;;  %2044 = vmatmul.bf16.vlgmr.msrb.gmra.mxu3 %v5028_v25  ;;  %v3691_v4 = vld [vmem:[%s5938_s1 + $0x124] sm:$0xf]  ;;  %v2747_v7 = vld [vmem:[%s5938_s1 + $0x128] sm:$0xf0]  ;;  %v2587_v15 = vld [vmem:[%s5939_s0 + $0xf0] sm:$0xf0] }
  0x87   :  { %2112 = vmatpush.bf16.msra.mxu3 %v2854_v49  ;;  %v2755_v49 = vld [vmem:[%s5938_s1 + $0x138] sm:$0xf0]  ;;  %v2750_v36 = vor.u32 %v3691_v4, %v2747_v7  ;;  %v2731_v7 = vld [vmem:[%s5938_s1 + $0x108] sm:$0xf0] }
  0x88   :  { %2056 = vmatpush.bf16.msra.mxu0 %v2654_v58  ;;  %v3661_v58 = vld [vmem:[%s5938_s1 + $0x34] sm:$0xf]  ;;  %v2758_v2 = vor.u32 %v3693_v47, %v2755_v49  ;;  %v2611_v49 = vld [vmem:[%s5938_s1 + $0x18] sm:$0xf0] }
  0x89   :  { %2075 = vmatpush.bf16.msra.mxu1 %v2718_v10  ;;  %v2630_v3 = vor.u32 %v3661_v58, %v2627_v59  ;;  %v2585_v10 = vld [vmem:[%s5939_s0 + $0xb0] sm:$0xf]  ;;  %v3657_v47 = vld [vmem:[%s5938_s1 + $0x14] sm:$0xf]  ;;  %v5147_v58 = vor.u32 %v3645_v12, %v2587_v15  ;;  %v2675_v59 = vld [vmem:[%s5938_s1 + $0x98] sm:$0xf0]  ;;  %v2806_v15 = vor.u32 %v3705_v60, %v2803_v61 }
  0x8a   :  { %2094 = vmatpush.bf16.msra.mxu2 %v2782_v55  ;;  %v2830_v55 = vor.u32 %v3711_v38, %v2827_v41  ;;  %v3689_v38 = vld [vmem:[%s5938_s1 + $0x114] sm:$0xf]  ;;  %v2739_v41 = vld [vmem:[%s5938_s1 + $0x118] sm:$0xf0]  ;;  %v2614_v4 = vor.u32 %v3657_v47, %v2611_v49  ;;  %v3763_v49 = vld [vmem:[%s5938_s1 + $0x364] sm:$0xf] }
  0x8b   :  { %2113 = vmatpush.bf16.msra.mxu3 %v2846_v11  ;;  %v3653_v11 = vld [vmem:[%s5939_s0 + $0xec] sm:$0xf0]  ;;  %v3731_v61 = vld [vmem:[%s5938_s1 + $0x264] sm:$0xf] }
  0x8c   :  { %2057 = vmatpush.bf16.msra.mxu0 %v2646_v27  ;;  %v2683_v27 = vld [vmem:[%s5938_s1 + $0xa8] sm:$0xf0] }
  0x8d   :  { %2076 = vmatpush.bf16.msra.mxu1 %v2710_v32  ;;  %v2593_v32 = vld [vmem:[%s5939_s0 + $0xb8] sm:$0xf] }
  0x8e   :  { %2095 = vmatpush.bf16.msra.mxu2 %v2774_v26  ;;  %v3675_v26 = vld [vmem:[%s5938_s1 + $0xa4] sm:$0xf] }
  0x8f   :  { %2114 = vmatpush.bf16.msra.mxu3 %v2838_v33  ;;  %v3654_v33 = vld [vmem:[%s5939_s0 + $0xf4] sm:$0xf0] }
  0x90   :  { %2058 = vmatpush.bf16.msra.mxu0 %v2638_v43  ;;  %v2814_v43 = vor.u32 %v3707_v30, %v2811_v31  ;;  %v5158_v62 = vor.u32 %v3654_v33, %v2593_v32  ;;  %v3733_v30 = vld [vmem:[%s5938_s1 + $0x274] sm:$0xf]  ;;  %v2915_v31 = vld [vmem:[%s5938_s1 + $0x278] sm:$0xf0] }
  0x91   :  { %2077 = vmatpush.bf16.msra.mxu1 %v2702_v52  ;;  %v3673_v52 = vld [vmem:[%s5938_s1 + $0x94] sm:$0xf]  ;;  %v2918_v47 = vor.u32 %v3733_v30, %v2915_v31 }
  0x92   :  { %2096 = vmatpush.bf16.msra.mxu2 %v2766_v42  ;;  %v2686_v42 = vor.u32 %v3675_v26, %v2683_v27  ;;  %v2678_v12 = vor.u32 %v3673_v52, %v2675_v59  ;;  %v3765_v26 = vld [vmem:[%s5938_s1 + $0x374] sm:$0xf]  ;;  %v3043_v27 = vld [vmem:[%s5938_s1 + $0x378] sm:$0xf0]  ;;  %v3035_v52 = vld [vmem:[%s5938_s1 + $0x368] sm:$0xf0] }
  0x93   :  { %2115 = vmatpush.bf16.msra.mxu3 %v2830_v55  ;;  %v5145_v55 = vor.u32 %v3653_v11, %v2585_v10  ;;  %v3655_v10 = vld [vmem:[%s5938_s1 + $0x4] sm:$0xf]  ;;  %v2603_v11 = vld [vmem:[%s5938_s1 + $0x8] sm:$0xf0]  ;;  %v3749_v32 = vld [vmem:[%s5938_s1 + $0x2f4] sm:$0xf] }
  0x94   :  { %2059 = vmatpush.bf16.msra.mxu0 %v2630_v3  ;;  %v2742_v3 = vor.u32 %v3689_v38, %v2739_v41  ;;  %2011 = vmatmul.bf16.gmra.mxu1 %v5147_v58  ;;  %v2606_v34 = vor.u32 %v3655_v10, %v2603_v11  ;;  %v2798_v41 = vor.u32 %v3703_v20, %v2795_v21  ;;  %v3099_v10 = vld [vmem:[%s5938_s1 + $0x3e8] sm:$0xf0]  ;;  %v3761_v20 = vld [vmem:[%s5938_s1 + $0x354] sm:$0xf]  ;;  %v3027_v21 = vld [vmem:[%s5938_s1 + $0x358] sm:$0xf0] }
  0x95   :  { %2078 = vmatpush.bf16.msra.mxu1 %v2694_v16  ;;  %v3671_v16 = vld [vmem:[%s5938_s1 + $0x84] sm:$0xf]  ;;  %1992 = vmatmul.bf16.gmra.mxu0 %v5145_v55  ;;  %v2982_v59 = vor.u32 %v3749_v32, %v2979_v35  ;;  %v3038_v11 = vor.u32 %v3763_v49, %v3035_v52  ;;  %v3745_v30 = vld [vmem:[%s5938_s1 + $0x2d4] sm:$0xf]  ;;  %v2963_v32 = vld [vmem:[%s5938_s1 + $0x2d8] sm:$0xf0] }
  0x96   :  { %2097 = vmatpush.bf16.msra.mxu2 %v2758_v2  ;;  %v3687_v2 = vld [vmem:[%s5938_s1 + $0x104] sm:$0xf]  ;;  %2049 = vmatmul.bf16.gmra.mxu3 %v5160_v63 }
  0x97   :  { %2116 = vmatpush.bf16.msra.mxu3 %v2822_v19  ;;  %v2667_v19 = vld [vmem:[%s5938_s1 + $0x88] sm:$0xf0]  ;;  %2030 = vmatmul.bf16.gmra.mxu2 %v5158_v62  ;;  %v2734_v33 = vor.u32 %v3687_v2, %v2731_v7  ;;  %v3779_v7 = vld [vmem:[%s5938_s1 + $0x3e4] sm:$0xf] }
  0x98   :  { %2060 = vmatpush.bf16.msra.mxu0 %v2622_v37  ;;  %v3107_v37 = vld [vmem:[%s5938_s1 + $0x3f8] sm:$0xf0]  ;;  %v2670_v38 = vor.u32 %v3671_v16, %v2667_v19  ;;  %v2907_v2 = vld [vmem:[%s5938_s1 + $0x268] sm:$0xf0]  ;;  %v3102_v19 = vor.u32 %v3779_v7, %v3099_v10  ;;  %v3727_v52 = vld [vmem:[%s5938_s1 + $0x244] sm:$0xf] }
  0x99   :  { %2079 = vmatpush.bf16.msra.mxu1 %v2686_v42  ;;  %v305_v42 = vld [vmem:[%s5940_s2] sm:$0x3]  ;;  %v3011_v7 = vld [vmem:[%s5938_s1 + $0x338] sm:$0xf0] }
  0x9a   :  { %2098 = vmatpush.bf16.msra.mxu2 %v2750_v36  ;;  %v3781_v36 = vld [vmem:[%s5938_s1 + $0x3f4] sm:$0xf] }
  0x9b   :  { %2117 = vmatpush.bf16.msra.mxu3 %v2814_v43  ;;  %v3046_v43 = vor.u32 %v3765_v26, %v3043_v27  ;;  %v3110_v60 = vor.u32 %v3781_v36, %v3107_v37  ;;  %v3729_v26 = vld [vmem:[%s5938_s1 + $0x254] sm:$0xf]  ;;  %v2899_v27 = vld [vmem:[%s5938_s1 + $0x258] sm:$0xf0]  ;;  %v3030_v37 = vor.u32 %v3761_v20, %v3027_v21 }
  0x9c   :  { %2061 = vmatpush.bf16.msra.mxu0 %v2614_v4  ;;  %v2971_v4 = vld [vmem:[%s5938_s1 + $0x2e8] sm:$0xf0] }
  0x9d   :  { %2080 = vmatpush.bf16.msra.mxu1 %v2678_v12  ;;  %v2910_v12 = vor.u32 %v3731_v61, %v2907_v2  ;;  %v2955_v61 = vld [vmem:[%s5938_s1 + $0x2c8] sm:$0xf0]  ;;  %v3775_v2 = vld [vmem:[%s5938_s1 + $0x3c4] sm:$0xf] }
  0x9e   :  { %2099 = vmatpush.bf16.msra.mxu2 %v2742_v3  ;;  %v3747_v3 = vld [vmem:[%s5938_s1 + $0x2e4] sm:$0xf] }
  0x9f   :  { %2118 = vmatpush.bf16.msra.mxu3 %v2806_v15  ;;  %v5241_v15 = vperm.slane %v305_v42, 0  ;;  %v2974_v16 = vor.u32 %v3747_v3, %v2971_v4  ;;  %v3019_v42 = vld [vmem:[%s5938_s1 + $0x348] sm:$0xf0]  ;;  %v3757_v4 = vld [vmem:[%s5938_s1 + $0x334] sm:$0xf] }
  0xa0   :  { %2062 = vmatpush.bf16.msra.mxu0 %v2606_v34  ;;  %v1760_v31 = vpop.f32.mrf.mxu0  ;;  %v3091_v34 = vld [vmem:[%s5938_s1 + $0x3d8] sm:$0xf0]  ;;  %v3083_v3 = vld [vmem:[%s5938_s1 + $0x3c8] sm:$0xf0] }
  0xa1   :  { %2081 = vmatpush.bf16.msra.mxu1 %v2670_v38  ;;  %v1761_v35 = vadd.f32 %v1760_v31, %v5241_v15  ;;  %v1779_v36 = vpop.f32.mrf.mxu1  ;;  %v2902_v38 = vor.u32 %v3729_v26, %v2899_v27  ;;  %v2947_v26 = vld [vmem:[%s5938_s1 + $0x2b8] sm:$0xf0]  ;;  %v3773_v27 = vld [vmem:[%s5938_s1 + $0x3b4] sm:$0xf] }
  0xa2   :  { %2100 = vmatpush.bf16.msra.mxu2 %v2734_v33  ;;  %v3777_v33 = vld [vmem:[%s5938_s1 + $0x3d4] sm:$0xf] }
  0xa3   :  { %2119 = vmatpush.bf16.msra.mxu3 %v2798_v41  ;;  %v3759_v41 = vld [vmem:[%s5938_s1 + $0x344] sm:$0xf]  ;;  %v3094_v49 = vor.u32 %v3777_v33, %v3091_v34  ;;  %v3014_v34 = vor.u32 %v3757_v4, %v3011_v7 }
  0xa4   :  { %2131 = vmatpush.bf16.msrb.mxu0 %v2918_v47  ;;  %v2966_v47 = vor.u32 %v3745_v30, %v2963_v32  ;;  %2082 = vmatmul.bf16.vlgmr.msra.gmra.mxu1 %v4190_v53  ;;  %v3075_v30 = vld [vmem:[%s5938_s1 + $0x3b8] sm:$0xf0] }
  0xa5   :  { %2150 = vmatpush.bf16.msrb.mxu1 %v2982_v59  ;;  %v2891_v59 = vld [vmem:[%s5938_s1 + $0x248] sm:$0xf0]  ;;  %2063 = vmatmul.bf16.vlgmr.msra.gmra.mxu0 %v4179_v48  ;;  %v3022_v48 = vor.u32 %v3759_v41, %v3019_v42  ;;  %v3078_v42 = vor.u32 %v3773_v27, %v3075_v30  ;;  %v3751_v30 = vld [vmem:[%s5938_s1 + $0x304] sm:$0xf] }
  0xa6   :  { %2169 = vmatpush.bf16.msrb.mxu2 %v3046_v43  ;;  %v1780_v43 = vadd.f32 %v1779_v36, %v1761_v35  ;;  %2120 = vmatmul.bf16.vlgmr.msra.gmra.mxu3 %v4200_v57  ;;  %v2894_v53 = vor.u32 %v3727_v52, %v2891_v59  ;;  %v2883_v57 = vld [vmem:[%s5938_s1 + $0x238] sm:$0xf0]  ;;  %v3755_v36 = vld [vmem:[%s5938_s1 + $0x324] sm:$0xf]  ;;  %v2939_v52 = vld [vmem:[%s5938_s1 + $0x2a8] sm:$0xf0] }
  0xa7   :  { %2188 = vmatpush.bf16.msrb.mxu3 %v3110_v60  ;;  %v3743_v60 = vld [vmem:[%s5938_s1 + $0x2c4] sm:$0xf]  ;;  %2101 = vmatmul.bf16.vlgmr.msra.gmra.mxu2 %v4192_v54  ;;  %v3725_v54 = vld [vmem:[%s5938_s1 + $0x234] sm:$0xf] }
  0xa8   :  { %2132 = vmatpush.bf16.msrb.mxu0 %v2910_v12  ;;  %v1798_v10 = vpop.f32.mrf.mxu2  ;;  %v3086_v12 = vor.u32 %v3775_v2, %v3083_v3  ;;  %v1762_v21 = vpop.f32.mrf.mxu0  ;;  %v2886_v35 = vor.u32 %v3725_v54, %v2883_v57  ;;  %v3771_v59 = vld [vmem:[%s5938_s1 + $0x3a4] sm:$0xf]  ;;  %v3753_v3 = vld [vmem:[%s5938_s1 + $0x314] sm:$0xf] }
  0xa9   :  { %2151 = vmatpush.bf16.msrb.mxu1 %v2974_v16  ;;  %v3741_v16 = vld [vmem:[%s5938_s1 + $0x2b4] sm:$0xf]  ;;  %v1817_v20 = vpop.f32.mrf.mxu3  ;;  %v1763_v31 = vadd.f32 %v1762_v21, %v5241_v15  ;;  %v1781_v32 = vpop.f32.mrf.mxu1  ;;  %v3059_v21 = vld [vmem:[%s5938_s1 + $0x398] sm:$0xf0] }
  0xaa   :  { %2170 = vmatpush.bf16.msrb.mxu2 %v3038_v11  ;;  %v2958_v11 = vor.u32 %v3743_v60, %v2955_v61  ;;  %v2950_v41 = vor.u32 %v3741_v16, %v2947_v26  ;;  %v3067_v60 = vld [vmem:[%s5938_s1 + $0x3a8] sm:$0xf0] }
  0xab   :  { %2189 = vmatpush.bf16.msrb.mxu3 %v3102_v19  ;;  %v1799_v19 = vadd.f32 %v1798_v10, %v1780_v43  ;;  %v3723_v43 = vld [vmem:[%s5938_s1 + $0x224] sm:$0xf]  ;;  %v3070_v7 = vor.u32 %v3771_v59, %v3067_v60  ;;  %v3721_v10 = vld [vmem:[%s5938_s1 + $0x214] sm:$0xf]  ;;  %v3299_v60 = vld [vmem:[%s5938_s1 + $0x578] sm:$0xf0] }
  0xac   :  { %2133 = vmatpush.bf16.msrb.mxu0 %v2902_v38  ;;  %v1782_v38 = vadd.f32 %v1781_v32, %v1763_v31  ;;  %v3829_v59 = vld [vmem:[%s5938_s1 + $0x574] sm:$0xf] }
  0xad   :  { %2152 = vmatpush.bf16.msrb.mxu1 %v2966_v47  ;;  %v5321_v33 = vadd.f32 %v1817_v20, %v1799_v19  ;;  %v2875_v47 = vld [vmem:[%s5938_s1 + $0x228] sm:$0xf0]  ;;  %v2931_v19 = vld [vmem:[%s5938_s1 + $0x298] sm:$0xf0]  ;;  %v3769_v20 = vld [vmem:[%s5938_s1 + $0x394] sm:$0xf] }
  0xae   :  { %2171 = vmatpush.bf16.msrb.mxu2 %v3030_v37  ;;  %v3003_v37 = vld [vmem:[%s5938_s1 + $0x328] sm:$0xf0]  ;;  %v2878_v2 = vor.u32 %v3723_v43, %v2875_v47  ;;  %v3735_v43 = vld [vmem:[%s5938_s1 + $0x284] sm:$0xf] }
  0xaf   :  { %2190 = vmatpush.bf16.msrb.mxu3 %v3094_v49  ;;  %v3739_v49 = vld [vmem:[%s5938_s1 + $0x2a4] sm:$0xf]  ;;  %v3006_v61 = vor.u32 %v3755_v36, %v3003_v37  ;;  %v2859_v37 = vld [vmem:[%s5938_s1 + $0x208] sm:$0xf0] }
  0xb0   :  { %2134 = vmatpush.bf16.msrb.mxu0 %v2894_v53  ;;  %v1800_v53 = vpop.f32.mrf.mxu2  ;;  %v2942_v4 = vor.u32 %v3739_v49, %v2939_v52  ;;  %v1765_v16 = vpop.f32.mrf.mxu0  ;;  %v3719_v36 = vld [vmem:[%s5938_s1 + $0x204] sm:$0xf]  ;;  %v2923_v47 = vld [vmem:[%s5938_s1 + $0x288] sm:$0xf0] }
  0xb1   :  { %2153 = vmatpush.bf16.msrb.mxu1 %v2958_v11  ;;  %v2867_v11 = vld [vmem:[%s5938_s1 + $0x218] sm:$0xf0]  ;;  %v1801_v54 = vadd.f32 %v1800_v53, %v1782_v38  ;;  %v1819_v57 = vpop.f32.mrf.mxu3  ;;  %v1766_v26 = vadd.f32 %v1765_v16, %v5241_v15  ;;  %v1784_v27 = vpop.f32.mrf.mxu1  ;;  %v3767_v49 = vld [vmem:[%s5938_s1 + $0x384] sm:$0xf]  ;;  %v3051_v52 = vld [vmem:[%s5938_s1 + $0x388] sm:$0xf0] }
  0xb2   :  { %2172 = vmatpush.bf16.msrb.mxu2 %v3022_v48  ;;  %v2995_v48 = vld [vmem:[%s5938_s1 + $0x318] sm:$0xf0]  ;;  %v3827_v16 = vld [vmem:[%s5938_s1 + $0x564] sm:$0xf] }
  0xb3   :  { %2191 = vmatpush.bf16.msrb.mxu3 %v3086_v12  ;;  %v3737_v12 = vld [vmem:[%s5938_s1 + $0x294] sm:$0xf]  ;;  %v5375_v31 = vadd.f32 %v1819_v57, %v1801_v54  ;;  %v2998_v32 = vor.u32 %v3753_v3, %v2995_v48  ;;  %v1785_v38 = vadd.f32 %v1784_v27, %v1766_v26  ;;  %v2862_v3 = vor.u32 %v3719_v36, %v2859_v37  ;;  %v3363_v48 = vld [vmem:[%s5938_s1 + $0x5f8] sm:$0xf0]  ;;  %v3843_v36 = vld [vmem:[%s5938_s1 + $0x5e4] sm:$0xf] }
  0xb4   :  { %2135 = vmatpush.bf16.msrb.mxu0 %v2886_v35  ;;  %v2987_v35 = vld [vmem:[%s5938_s1 + $0x308] sm:$0xf0]  ;;  %2087 = vmatmul.bf16.gmra.mxu1 %v4322_v50  ;;  %v3171_v50 = vld [vmem:[%s5938_s1 + $0x478] sm:$0xf0]  ;;  %v3302_v54 = vor.u32 %v3829_v59, %v3299_v60  ;;  %v3793_v60 = vld [vmem:[%s5938_s1 + $0x454] sm:$0xf] }
  0xb5   :  { %2154 = vmatpush.bf16.msrb.mxu1 %v2950_v41  ;;  %v2934_v41 = vor.u32 %v3737_v12, %v2931_v19  ;;  %2068 = vmatmul.bf16.gmra.mxu0 %v4311_v44  ;;  %v3797_v44 = vld [vmem:[%s5938_s1 + $0x474] sm:$0xf]  ;;  %v3291_v19 = vld [vmem:[%s5938_s1 + $0x568] sm:$0xf0] }
  0xb6   :  { %2173 = vmatpush.bf16.msrb.mxu2 %v3014_v34  ;;  %v2870_v34 = vor.u32 %v3721_v10, %v2867_v11  ;;  %2125 = vmatmul.bf16.gmra.mxu3 %v4332_v56  ;;  %v3845_v56 = vld [vmem:[%s5938_s1 + $0x5f4] sm:$0xf]  ;;  %v3174_v57 = vor.u32 %v3797_v44, %v3171_v50  ;;  %v3355_v37 = vld [vmem:[%s5938_s1 + $0x5e8] sm:$0xf0]  ;;  %v3155_v44 = vld [vmem:[%s5938_s1 + $0x458] sm:$0xf0] }
  0xb7   :  { %2192 = vmatpush.bf16.msrb.mxu3 %v3078_v42  ;;  %v3062_v42 = vor.u32 %v3769_v20, %v3059_v21  ;;  %2106 = vmatmul.bf16.gmra.mxu2 %v4324_v51  ;;  %v3235_v51 = vld [vmem:[%s5938_s1 + $0x4f8] sm:$0xf0]  ;;  %v3366_v27 = vor.u32 %v3845_v56, %v3363_v48  ;;  %v3809_v50 = vld [vmem:[%s5938_s1 + $0x4d4] sm:$0xf] }
  0xb8   :  { %2136 = vmatpush.bf16.msrb.mxu0 %v2878_v2  ;;  %v2990_v2 = vor.u32 %v3751_v30, %v2987_v35  ;;  %v1803_v53 = vpop.f32.mrf.mxu2  ;;  %v1767_v12 = vpop.f32.mrf.mxu0  ;;  %v3795_v30 = vld [vmem:[%s5938_s1 + $0x464] sm:$0xf]  ;;  %v3347_v56 = vld [vmem:[%s5938_s1 + $0x5d8] sm:$0xf0] }
  0xb9   :  { %2155 = vmatpush.bf16.msrb.mxu1 %v2942_v4  ;;  %v2926_v4 = vor.u32 %v3735_v43, %v2923_v47  ;;  %v1804_v10 = vadd.f32 %v1803_v53, %v1785_v38  ;;  %v1822_v11 = vpop.f32.mrf.mxu3  ;;  %v1768_v20 = vadd.f32 %v1767_v12, %v5241_v15  ;;  %v1786_v21 = vpop.f32.mrf.mxu1  ;;  %v3227_v15 = vld [vmem:[%s5938_s1 + $0x4e8] sm:$0xf0]  ;;  %v3358_v47 = vor.u32 %v3843_v36, %v3355_v37  ;;  %v3805_v36 = vld [vmem:[%s5938_s1 + $0x4b4] sm:$0xf] }
  0xba   :  { %2174 = vmatpush.bf16.msrb.mxu2 %v3006_v61  ;;  %v3813_v61 = vld [vmem:[%s5938_s1 + $0x4f4] sm:$0xf]  ;;  %v3275_v12 = vld [vmem:[%s5938_s1 + $0x548] sm:$0xf0] }
  0xbb   :  { %2193 = vmatpush.bf16.msrb.mxu3 %v3070_v7  ;;  %v3054_v7 = vor.u32 %v3767_v49, %v3051_v52  ;;  %v3238_v26 = vor.u32 %v3813_v61, %v3235_v51  ;;  %v5442_v35 = vadd.f32 %v1822_v11, %v1804_v10  ;;  %v1787_v38 = vadd.f32 %v1786_v21, %v1768_v20  ;;  %v3825_v49 = vld [vmem:[%s5938_s1 + $0x554] sm:$0xf]  ;;  %v3283_v52 = vld [vmem:[%s5938_s1 + $0x558] sm:$0xf0]  ;;  %v3823_v11 = vld [vmem:[%s5938_s1 + $0x544] sm:$0xf] }
  0xbc   :  { %2137 = vmatpush.bf16.msrb.mxu0 %v2870_v34  ;;  %v3811_v34 = vld [vmem:[%s5938_s1 + $0x4e4] sm:$0xf]  ;;  %v3841_v51 = vld [vmem:[%s5938_s1 + $0x5d4] sm:$0xf]  ;;  %v3158_v10 = vor.u32 %v3793_v60, %v3155_v44  ;;  %v3211_v21 = vld [vmem:[%s5938_s1 + $0x4c8] sm:$0xf0] }
  0xbd   :  { %2156 = vmatpush.bf16.msrb.mxu1 %v2934_v41  ;;  %v3294_v41 = vor.u32 %v3827_v16, %v3291_v19  ;;  %v3230_v43 = vor.u32 %v3811_v34, %v3227_v15  ;;  %v3791_v16 = vld [vmem:[%s5938_s1 + $0x444] sm:$0xf]  ;;  %v3147_v19 = vld [vmem:[%s5938_s1 + $0x448] sm:$0xf0] }
  0xbe   :  { %2175 = vmatpush.bf16.msrb.mxu2 %v2998_v32  ;;  %v3163_v32 = vld [vmem:[%s5938_s1 + $0x468] sm:$0xf0]  ;;  %v3807_v20 = vld [vmem:[%s5938_s1 + $0x4c4] sm:$0xf] }
  0xbf   :  { %2194 = vmatpush.bf16.msrb.mxu3 %v3062_v42  ;;  %v3166_v42 = vor.u32 %v3795_v30, %v3163_v32  ;;  %v3821_v30 = vld [vmem:[%s5938_s1 + $0x534] sm:$0xf]  ;;  %v3267_v32 = vld [vmem:[%s5938_s1 + $0x538] sm:$0xf0]  ;;  %v3214_v34 = vor.u32 %v3807_v20, %v3211_v21  ;;  %v3819_v60 = vld [vmem:[%s5938_s1 + $0x524] sm:$0xf] }
  0xc0   :  { %2138 = vmatpush.bf16.msrb.mxu0 %v2862_v3  ;;  %v1805_v59 = vpop.f32.mrf.mxu2  ;;  %v3219_v3 = vld [vmem:[%s5938_s1 + $0x4d8] sm:$0xf0]  ;;  %v5477_v48 = vpop.f32.mrf.mxu0  ;;  %v3259_v44 = vld [vmem:[%s5938_s1 + $0x528] sm:$0xf0]  ;;  %v3785_v20 = vld [vmem:[%s5938_s1 + $0x414] sm:$0xf] }
  0xc1   :  { %2157 = vmatpush.bf16.msrb.mxu1 %v2926_v4  ;;  %v1806_v61 = vadd.f32 %v1805_v59, %v1787_v38  ;;  %v5479_v53 = vpop.f32.mrf.mxu1  ;;  %v3123_v21 = vld [vmem:[%s5938_s1 + $0x418] sm:$0xf0] }
  0xc2   :  { %2176 = vmatpush.bf16.msrb.mxu2 %v2990_v2  ;;  %v1824_v2 = vpop.f32.mrf.mxu3 }
  0xc3   :  { %2195 = vmatpush.bf16.msrb.mxu3 %v3054_v7  ;;  %v5481_v4 = vadd.f32 %v1824_v2, %v1806_v61  ;;  %v3286_v7 = vor.u32 %v3825_v49, %v3283_v52  ;;  %v3270_v52 = vor.u32 %v3821_v30, %v3267_v32  ;;  %v3787_v2 = vld [vmem:[%s5938_s1 + $0x424] sm:$0xf]  ;;  %v3833_v30 = vld [vmem:[%s5938_s1 + $0x594] sm:$0xf]  ;;  %v3315_v32 = vld [vmem:[%s5938_s1 + $0x598] sm:$0xf0] }
  0xc4   :  { %2207 = vmatpush.bf16.msra.mxu0 %v3174_v57  ;;  %v3350_v57 = vor.u32 %v3841_v51, %v3347_v56  ;;  %2158 = vmatmul.bf16.vlgmr.msrb.gmra.mxu1 %v4469_v1  ;;  %v3150_v1 = vor.u32 %v3791_v16, %v3147_v19  ;;  %v3803_v51 = vld [vmem:[%s5938_s1 + $0x4a4] sm:$0xf]  ;;  %v3195_v56 = vld [vmem:[%s5938_s1 + $0x4a8] sm:$0xf0] }
  0xc5   :  { %2226 = vmatpush.bf16.msra.mxu1 %v3238_v26  ;;  %2139 = vmatmul.bf16.vlgmr.msrb.gmra.mxu0 %v4467_v0  ;;  %v3839_v26 = vld [vmem:[%s5938_s1 + $0x5c4] sm:$0xf]  ;;  %v3278_v0 = vor.u32 %v3823_v11, %v3275_v12  ;;  %v3262_v11 = vor.u32 %v3819_v60, %v3259_v44  ;;  %v3198_v16 = vor.u32 %v3803_v51, %v3195_v56  ;;  %v3179_v44 = vld [vmem:[%s5938_s1 + $0x488] sm:$0xf0]  ;;  %v3877_v51 = vld [vmem:[%s5938_s1 + $0x6f4] sm:$0xf] }
  0xc6   :  { %2245 = vmatpush.bf16.msra.mxu2 %v3302_v54  ;;  %v3222_v54 = vor.u32 %v3809_v50, %v3219_v3  ;;  %2196 = vmatmul.bf16.vlgmr.msrb.gmra.mxu3 %v4482_v6  ;;  %v3139_v6 = vld [vmem:[%s5938_s1 + $0x438] sm:$0xf0]  ;;  %v3131_v3 = vld [vmem:[%s5938_s1 + $0x428] sm:$0xf0]  ;;  %v3799_v60 = vld [vmem:[%s5938_s1 + $0x484] sm:$0xf] }
  0xc7   :  { %2264 = vmatpush.bf16.msra.mxu3 %v3366_v27  ;;  %v3339_v27 = vld [vmem:[%s5938_s1 + $0x5c8] sm:$0xf0]  ;;  %2177 = vmatmul.bf16.vlgmr.msrb.gmra.mxu2 %v4480_v5  ;;  %v3789_v5 = vld [vmem:[%s5938_s1 + $0x434] sm:$0xf]  ;;  %v3134_v12 = vor.u32 %v3787_v2, %v3131_v3  ;;  %v3555_v3 = vld [vmem:[%s5938_s1 + $0x778] sm:$0xf0] }
  0xc8   :  { %2208 = vmatpush.bf16.msra.mxu0 %v3166_v42  ;;  %v3342_v15 = vor.u32 %v3839_v26, %v3339_v27  ;;  %v5526_v37 = vpop.f32.mrf.mxu2  ;;  %v3837_v42 = vld [vmem:[%s5938_s1 + $0x5b4] sm:$0xf]  ;;  %v3142_v59 = vor.u32 %v3789_v5, %v3139_v6  ;;  %v3815_v5 = vld [vmem:[%s5938_s1 + $0x504] sm:$0xf] }
  0xc9   :  { %2227 = vmatpush.bf16.msra.mxu1 %v3230_v43  ;;  %v3331_v43 = vld [vmem:[%s5938_s1 + $0x5b8] sm:$0xf0]  ;;  %v5541_v49 = vpop.f32.mrf.mxu1  ;;  %v3801_v26 = vld [vmem:[%s5938_s1 + $0x494] sm:$0xf] }
  0xca   :  { %2246 = vmatpush.bf16.msra.mxu2 %v3294_v41  ;;  %v5528_v38 = vpop.f32.mrf.mxu3  ;;  %v3203_v41 = vld [vmem:[%s5938_s1 + $0x4b8] sm:$0xf0]  ;;  %v3334_v61 = vor.u32 %v3837_v42, %v3331_v43  ;;  %v3783_v42 = vld [vmem:[%s5938_s1 + $0x404] sm:$0xf]  ;;  %v3115_v43 = vld [vmem:[%s5938_s1 + $0x408] sm:$0xf0] }
  0xcb   :  { %2265 = vmatpush.bf16.msra.mxu3 %v3358_v47  ;;  %v5539_v47 = vpop.f32.mrf.mxu0  ;;  %v3206_v50 = vor.u32 %v3805_v36, %v3203_v41  ;;  %v3126_v36 = vor.u32 %v3785_v20, %v3123_v21  ;;  %v3243_v41 = vld [vmem:[%s5938_s1 + $0x508] sm:$0xf0]  ;;  %v3893_v2 = vld [vmem:[%s5938_s1 + $0x774] sm:$0xf]  ;;  %v3891_v20 = vld [vmem:[%s5938_s1 + $0x764] sm:$0xf] }
  0xcc   :  { %2209 = vmatpush.bf16.msra.mxu0 %v3158_v10  ;;  %v3323_v10 = vld [vmem:[%s5938_s1 + $0x5a8] sm:$0xf0]  ;;  %v3246_v56 = vor.u32 %v3815_v5, %v3243_v41  ;;  %v3859_v5 = vld [vmem:[%s5938_s1 + $0x664] sm:$0xf] }
  0xcd   :  { %2228 = vmatpush.bf16.msra.mxu1 %v3222_v54  ;;  %v3817_v54 = vld [vmem:[%s5938_s1 + $0x514] sm:$0xf]  ;;  %v3547_v21 = vld [vmem:[%s5938_s1 + $0x768] sm:$0xf0] }
  0xce   :  { %2247 = vmatpush.bf16.msra.mxu2 %v3286_v7  ;;  %v3835_v7 = vld [vmem:[%s5938_s1 + $0x5a4] sm:$0xf]  ;;  %v3483_v41 = vld [vmem:[%s5938_s1 + $0x6e8] sm:$0xf0] }
  0xcf   :  { %2266 = vmatpush.bf16.msra.mxu3 %v3350_v57  ;;  %v3251_v57 = vld [vmem:[%s5938_s1 + $0x518] sm:$0xf0]  ;;  %v3326_v19 = vor.u32 %v3835_v7, %v3323_v10  ;;  %v3118_v7 = vor.u32 %v3783_v42, %v3115_v43  ;;  %v3907_v42 = vld [vmem:[%s5938_s1 + $0x7e4] sm:$0xf]  ;;  %v3611_v43 = vld [vmem:[%s5938_s1 + $0x7e8] sm:$0xf0] }
  0xd0   :  { %2210 = vmatpush.bf16.msra.mxu0 %v3150_v1  ;;  %v5582_v27 = vpop.f32.mrf.mxu2  ;;  %v3187_v1 = vld [vmem:[%s5938_s1 + $0x498] sm:$0xf0]  ;;  %v3254_v6 = vor.u32 %v3817_v54, %v3251_v57 }
  0xd1   :  { %2229 = vmatpush.bf16.msra.mxu1 %v3214_v34  ;;  %v3619_v10 = vld [vmem:[%s5938_s1 + $0x7f8] sm:$0xf0] }
  0xd2   :  { %2248 = vmatpush.bf16.msra.mxu2 %v3278_v0  ;;  %v5584_v0 = vpop.f32.mrf.mxu3 }
  0xd3   :  { %2267 = vmatpush.bf16.msra.mxu3 %v3342_v15  ;;  %v5595_v34 = vpop.f32.mrf.mxu0  ;;  %v5597_v15 = vpop.f32.mrf.mxu1 }
  0xd4   :  { %2211 = vmatpush.bf16.msra.mxu0 %v3142_v59  ;;  %v3318_v59 = vor.u32 %v3833_v30, %v3315_v32  ;;  %2163 = vmatmul.bf16.gmra.mxu1 %v4601_v9  ;;  %v3427_v9 = vld [vmem:[%s5938_s1 + $0x678] sm:$0xf0] }
  0xd5   :  { %2230 = vmatpush.bf16.msra.mxu1 %v3206_v50  ;;  %v3831_v50 = vld [vmem:[%s5938_s1 + $0x584] sm:$0xf]  ;;  %2144 = vmatmul.bf16.gmra.mxu0 %v4599_v8  ;;  %v3861_v8 = vld [vmem:[%s5938_s1 + $0x674] sm:$0xf] }
  0xd6   :  { %2249 = vmatpush.bf16.msra.mxu2 %v3270_v52  ;;  %v3190_v52 = vor.u32 %v3801_v26, %v3187_v1  ;;  %2201 = vmatmul.bf16.gmra.mxu3 %v4614_v14  ;;  %v3909_v14 = vld [vmem:[%s5938_s1 + $0x7f4] sm:$0xf] }
  0xd7   :  { %2268 = vmatpush.bf16.msra.mxu3 %v3334_v61  ;;  %v3307_v61 = vld [vmem:[%s5938_s1 + $0x588] sm:$0xf0]  ;;  %2182 = vmatmul.bf16.gmra.mxu2 %v4612_v13  ;;  %v3491_v13 = vld [vmem:[%s5938_s1 + $0x6f8] sm:$0xf0]  ;;  %v3622_v32 = vor.u32 %v3909_v14, %v3619_v10 }
  0xd8   :  { %2212 = vmatpush.bf16.msra.mxu0 %v3134_v12  ;;  %v3310_v12 = vor.u32 %v3831_v50, %v3307_v61  ;;  %v5651_v54 = vpop.f32.mrf.mxu2  ;;  %v3494_v30 = vor.u32 %v3877_v51, %v3491_v13  ;;  %v3889_v50 = vld [vmem:[%s5938_s1 + $0x754] sm:$0xf]  ;;  %v3539_v61 = vld [vmem:[%s5938_s1 + $0x758] sm:$0xf0] }
  0xd9   :  { %2231 = vmatpush.bf16.msra.mxu1 %v3198_v16  ;;  %v3558_v16 = vor.u32 %v3893_v2, %v3555_v3  ;;  %v3857_v2 = vld [vmem:[%s5938_s1 + $0x654] sm:$0xf]  ;;  %v3411_v3 = vld [vmem:[%s5938_s1 + $0x658] sm:$0xf0] }
  0xda   :  { %2250 = vmatpush.bf16.msra.mxu2 %v3262_v11  ;;  %v3182_v11 = vor.u32 %v3799_v60, %v3179_v44  ;;  %v5653_v57 = vpop.f32.mrf.mxu3  ;;  %v3614_v44 = vor.u32 %v3907_v42, %v3611_v43  ;;  %v3603_v13 = vld [vmem:[%s5938_s1 + $0x7d8] sm:$0xf0]  ;;  %v3885_v42 = vld [vmem:[%s5938_s1 + $0x734] sm:$0xf] }
  0xdb   :  { %2269 = vmatpush.bf16.msra.mxu3 %v3326_v19  ;;  %v3430_v19 = vor.u32 %v3861_v8, %v3427_v9  ;;  %v5661_v26 = vpop.f32.mrf.mxu0  ;;  %v5663_v1 = vpop.f32.mrf.mxu1  ;;  %v3873_v8 = vld [vmem:[%s5938_s1 + $0x6d4] sm:$0xf]  ;;  %v3523_v43 = vld [vmem:[%s5938_s1 + $0x738] sm:$0xf0] }
  0xdc   :  { %2213 = vmatpush.bf16.msra.mxu0 %v3126_v36  ;;  %v3875_v36 = vld [vmem:[%s5938_s1 + $0x6e4] sm:$0xf] }
  0xdd   :  { %2232 = vmatpush.bf16.msra.mxu1 %v3190_v52  ;;  %v3550_v52 = vor.u32 %v3891_v20, %v3547_v21  ;;  %v3486_v60 = vor.u32 %v3875_v36, %v3483_v41  ;;  %v3903_v36 = vld [vmem:[%s5938_s1 + $0x7c4] sm:$0xf]  ;;  %v3595_v41 = vld [vmem:[%s5938_s1 + $0x7c8] sm:$0xf0] }
  0xde   :  { %2251 = vmatpush.bf16.msra.mxu2 %v3254_v6  ;;  %v3419_v6 = vld [vmem:[%s5938_s1 + $0x668] sm:$0xf0] }
  0xdf   :  { %2270 = vmatpush.bf16.msra.mxu3 %v3318_v59  ;;  %v3422_v59 = vor.u32 %v3859_v5, %v3419_v6  ;;  %v3871_v5 = vld [vmem:[%s5938_s1 + $0x6c4] sm:$0xf]  ;;  %v3467_v6 = vld [vmem:[%s5938_s1 + $0x6c8] sm:$0xf0] }
  0xe0   :  { %2214 = vmatpush.bf16.msra.mxu0 %v3118_v7  ;;  %v5698_v9 = vpop.f32.mrf.mxu2  ;;  %v3905_v7 = vld [vmem:[%s5938_s1 + $0x7d4] sm:$0xf] }
  0xe1   :  { %2233 = vmatpush.bf16.msra.mxu1 %v3182_v11  ;;  %v3542_v11 = vor.u32 %v3889_v50, %v3539_v61  ;;  %v3606_v21 = vor.u32 %v3905_v7, %v3603_v13  ;;  %v3459_v61 = vld [vmem:[%s5938_s1 + $0x6b8] sm:$0xf0]  ;;  %v3526_v7 = vor.u32 %v3885_v42, %v3523_v43 }
  0xe2   :  { %2252 = vmatpush.bf16.msra.mxu2 %v3246_v56  ;;  %v5700_v51 = vpop.f32.mrf.mxu3  ;;  %v3475_v56 = vld [vmem:[%s5938_s1 + $0x6d8] sm:$0xf0] }
  0xe3   :  { %2271 = vmatpush.bf16.msra.mxu3 %v3310_v12  ;;  %v5711_v14 = vpop.f32.mrf.mxu0  ;;  %v5713_v10 = vpop.f32.mrf.mxu1  ;;  %v3414_v12 = vor.u32 %v3857_v2, %v3411_v3  ;;  %v3478_v20 = vor.u32 %v3873_v8, %v3475_v56  ;;  %v3901_v2 = vld [vmem:[%s5938_s1 + $0x7b4] sm:$0xf]  ;;  %v3587_v3 = vld [vmem:[%s5938_s1 + $0x7b8] sm:$0xf0] }
  0xe4   :  { %2283 = vmatpush.bf16.msrb.mxu0 %v3430_v19  ;;  %v3531_v19 = vld [vmem:[%s5938_s1 + $0x748] sm:$0xf0]  ;;  %2234 = vmatmul.bf16.vlgmr.msra.gmra.mxu1 %v4739_v24 }
  0xe5   :  { %2302 = vmatpush.bf16.msrb.mxu1 %v3494_v30  ;;  %v3855_v30 = vld [vmem:[%s5938_s1 + $0x644] sm:$0xf]  ;;  %2215 = vmatmul.bf16.vlgmr.msra.gmra.mxu0 %v4737_v23 }
  0xe6   :  { %2321 = vmatpush.bf16.msrb.mxu2 %v3558_v16  ;;  %v3887_v16 = vld [vmem:[%s5938_s1 + $0x744] sm:$0xf]  ;;  %2272 = vmatmul.bf16.vlgmr.msra.gmra.mxu3 %v4752_v29  ;;  %v3395_v29 = vld [vmem:[%s5938_s1 + $0x638] sm:$0xf0] }
  0xe7   :  { %2340 = vmatpush.bf16.msrb.mxu3 %v3622_v32  ;;  %v3403_v32 = vld [vmem:[%s5938_s1 + $0x648] sm:$0xf0]  ;;  %2253 = vmatmul.bf16.vlgmr.msra.gmra.mxu2 %v4750_v28  ;;  %v3534_v23 = vor.u32 %v3887_v16, %v3531_v19  ;;  %v3853_v28 = vld [vmem:[%s5938_s1 + $0x634] sm:$0xf]  ;;  %v1837_v16 = vadd.f32 %v5477_v48, %v5321_v33  ;;  %v3899_v48 = vld [vmem:[%s5938_s1 + $0x7a4] sm:$0xf] }
  0xe8   :  { %2284 = vmatpush.bf16.msrb.mxu0 %v3422_v59  ;;  %v3406_v24 = vor.u32 %v3855_v30, %v3403_v32  ;;  %v3598_v59 = vor.u32 %v3903_v36, %v3595_v41  ;;  %v3398_v13 = vor.u32 %v3853_v28, %v3395_v29  ;;  %v3387_v30 = vld [vmem:[%s5938_s1 + $0x628] sm:$0xf0]  ;;  %v3867_v32 = vld [vmem:[%s5938_s1 + $0x6a4] sm:$0xf]  ;;  %v3881_v41 = vld [vmem:[%s5938_s1 + $0x714] sm:$0xf] }
  0xe9   :  { %2303 = vmatpush.bf16.msrb.mxu1 %v3486_v60  ;;  %v3869_v60 = vld [vmem:[%s5938_s1 + $0x6b4] sm:$0xf]  ;;  %v3451_v33 = vld [vmem:[%s5938_s1 + $0x6a8] sm:$0xf0] }
  0xea   :  { %2322 = vmatpush.bf16.msrb.mxu2 %v3550_v52  ;;  %v3470_v52 = vor.u32 %v3871_v5, %v3467_v6  ;;  %v5760_v50 = vpop.f32.mrf.mxu3  ;;  %v3462_v19 = vor.u32 %v3869_v60, %v3459_v61  ;;  %v3579_v5 = vld [vmem:[%s5938_s1 + $0x7a8] sm:$0xf0]  ;;  %v3454_v42 = vor.u32 %v3867_v32, %v3451_v33  ;;  %v3865_v28 = vld [vmem:[%s5938_s1 + $0x694] sm:$0xf]  ;;  %v3895_v33 = vld [vmem:[%s5938_s1 + $0x784] sm:$0xf] }
  0xeb   :  { %2341 = vmatpush.bf16.msrb.mxu3 %v3614_v44  ;;  %v5758_v44 = vpop.f32.mrf.mxu2  ;;  %v5771_v8 = vpop.f32.mrf.mxu0  ;;  %v3582_v43 = vor.u32 %v3899_v48, %v3579_v5  ;;  %v3897_v61 = vld [vmem:[%s5938_s1 + $0x794] sm:$0xf]  ;;  %v3435_v32 = vld [vmem:[%s5938_s1 + $0x688] sm:$0xf0] }
  0xec   :  { %2285 = vmatpush.bf16.msrb.mxu0 %v3414_v12  ;;  %v5773_v56 = vpop.f32.mrf.mxu1  ;;  %v3515_v12 = vld [vmem:[%s5938_s1 + $0x728] sm:$0xf0] }
  0xed   :  { %2304 = vmatpush.bf16.msrb.mxu1 %v3478_v20  ;;  %v3590_v20 = vor.u32 %v3901_v2, %v3587_v3  ;;  %v3571_v2 = vld [vmem:[%s5938_s1 + $0x798] sm:$0xf0]  ;;  %v3563_v48 = vld [vmem:[%s5938_s1 + $0x788] sm:$0xf0] }
  0xee   :  { %2323 = vmatpush.bf16.msrb.mxu2 %v3542_v11  ;;  %v3883_v11 = vld [vmem:[%s5938_s1 + $0x724] sm:$0xf] }
  0xef   :  { %2342 = vmatpush.bf16.msrb.mxu3 %v3606_v21  ;;  %v3851_v21 = vld [vmem:[%s5938_s1 + $0x624] sm:$0xf]  ;;  %v3518_v6 = vor.u32 %v3883_v11, %v3515_v12  ;;  %v1839_v11 = vadd.f32 %v5539_v47, %v5375_v31  ;;  %v3371_v47 = vld [vmem:[%s5938_s1 + $0x608] sm:$0xf0] }
  0xf0   :  { %2286 = vmatpush.bf16.msrb.mxu0 %v3406_v24  ;;  %v3390_v36 = vor.u32 %v3851_v21, %v3387_v30  ;;  %v1856_v24 = vadd.f32 %v5479_v53, %v1837_v16  ;;  %v3443_v53 = vld [vmem:[%s5938_s1 + $0x698] sm:$0xf0]  ;;  %v3574_v21 = vor.u32 %v3897_v61, %v3571_v2  ;;  %v3847_v31 = vld [vmem:[%s5938_s1 + $0x604] sm:$0xf] }
  0xf1   :  { %2305 = vmatpush.bf16.msrb.mxu1 %v3470_v52  ;;  %v3849_v52 = vld [vmem:[%s5938_s1 + $0x614] sm:$0xf]  ;;  %v3863_v30 = vld [vmem:[%s5938_s1 + $0x684] sm:$0xf] }
  0xf2   :  { %2324 = vmatpush.bf16.msrb.mxu2 %v3534_v23  ;;  %v3507_v23 = vld [vmem:[%s5938_s1 + $0x718] sm:$0xf0]  ;;  %v5819_v60 = vpop.f32.mrf.mxu3  ;;  %v1875_v3 = vadd.f32 %v5526_v37, %v1856_v24  ;;  %v3446_v37 = vor.u32 %v3865_v28, %v3443_v53 }
  0xf3   :  { %2343 = vmatpush.bf16.msrb.mxu3 %v3598_v59  ;;  %v3379_v59 = vld [vmem:[%s5938_s1 + $0x618] sm:$0xf0]  ;;  %v5817_v29 = vpop.f32.mrf.mxu2  ;;  %v3510_v12 = vor.u32 %v3881_v41, %v3507_v23  ;;  %v3438_v41 = vor.u32 %v3863_v30, %v3435_v32  ;;  %v3566_v23 = vor.u32 %v3895_v33, %v3563_v48 }
  0xf4   :  { %2287 = vmatpush.bf16.msrb.mxu0 %v3398_v13  ;;  %v5833_v13 = vpop.f32.mrf.mxu1  ;;  %v3382_v16 = vor.u32 %v3849_v52, %v3379_v59  ;;  %2239 = vmatmul.bf16.gmra.mxu1 %v4871_v40  ;;  %v1894_v5 = vadd.f32 %v5528_v38, %v1875_v3 }
  0xf5   :  { %2306 = vmatpush.bf16.msrb.mxu1 %v3462_v19  ;;  %v3879_v19 = vld [vmem:[%s5938_s1 + $0x704] sm:$0xf]  ;;  %2220 = vmatmul.bf16.gmra.mxu0 %v4869_v39  ;;  %v1858_v39 = vadd.f32 %v5541_v49, %v1839_v11 }
  0xf6   :  { %2325 = vmatpush.bf16.msrb.mxu2 %v3526_v7  ;;  %v5831_v7 = vpop.f32.mrf.mxu0  ;;  %2277 = vmatmul.bf16.gmra.mxu3 %v4884_v46  ;;  %v1842_v46 = vadd.f32 %v5595_v34, %v5442_v35  ;;  %v1844_v34 = vadd.f32 %v5661_v26, %v5481_v4 }
  0xf7   :  { %2344 = vmatpush.bf16.msrb.mxu3 %v3590_v20  ;;  %v3499_v20 = vld [vmem:[%s5938_s1 + $0x708] sm:$0xf0]  ;;  %2258 = vmatmul.bf16.gmra.mxu2 %v4882_v45  ;;  %v1877_v38 = vadd.f32 %v5582_v27, %v1858_v39 }
  0xf8   :  { %2288 = vmatpush.bf16.msrb.mxu0 %v3390_v36  ;;  %v3502_v40 = vor.u32 %v3879_v19, %v3499_v20  ;;  %v1913_v36 = vadd.f32 %v5711_v14, %v1894_v5  ;;  %v1861_v59 = vadd.f32 %v5597_v15, %v1842_v46 }
  0xf9   :  { %2307 = vmatpush.bf16.msrb.mxu1 %v3454_v42  ;;  %v1896_v14 = vadd.f32 %v5584_v0, %v1877_v38 }
  0xfa   :  { %2326 = vmatpush.bf16.msrb.mxu2 %v3518_v6  ;;  %v3374_v6 = vor.u32 %v3847_v31, %v3371_v47  ;;  %v1974_v42 = vpop.f32.mrf.mxu3  ;;  %v1932_v49 = vadd.f32 %v5713_v10, %v1913_v36  ;;  %v1880_v61 = vadd.f32 %v5651_v54, %v1861_v59  ;;  %v1863_v54 = vadd.f32 %v5663_v1, %v1844_v34 }
  0xfb   :  { %2345 = vmatpush.bf16.msrb.mxu3 %v3582_v43  ;;  %v1955_v24 = vpop.f32.mrf.mxu2  ;;  %v1915_v28 = vadd.f32 %v5771_v8, %v1896_v14 }
  0xfc   :  { %2289 = vmatpush.bf16.msrb.mxu0 %v3382_v16  ;;  %v1938_v45 = vpop.f32.mrf.mxu1  ;;  %v1951_v52 = vadd.f32 %v5758_v44, %v1932_v49  ;;  %v1899_v15 = vadd.f32 %v5653_v57, %v1880_v61  ;;  %v1882_v26 = vadd.f32 %v5698_v9, %v1863_v54 }
  0xfd   :  { %2308 = vmatpush.bf16.msrb.mxu1 %v3446_v37  ;;  %v1934_v10 = vadd.f32 %v5773_v56, %v1915_v28 }
  0xfe   :  { %2327 = vmatpush.bf16.msrb.mxu2 %v3510_v12  ;;  %v1919_v43 = vpop.f32.mrf.mxu0  ;;  %v1970_v2 = vadd.f32 %v5760_v50, %v1951_v52  ;;  %v1918_v50 = vadd.f32 %v5831_v7, %v1899_v15 }
  0xff   :  { %2346 = vmatpush.bf16.msrb.mxu3 %v3574_v21  ;;  %v1953_v44 = vadd.f32 %v5817_v29, %v1934_v10 }
 0x100   :  { %2290 = vmatpush.bf16.msrb.mxu0 %v3374_v6  ;;  %v1937_v29 = vadd.f32 %v5833_v13, %v1918_v50 }
 0x101   :  { %2309 = vmatpush.bf16.msrb.mxu1 %v3438_v41 }
 0x102   :  { %2328 = vmatpush.bf16.msrb.mxu2 %v3502_v40  ;;  %v1976_v53 = vpop.f32.mrf.mxu3  ;;  %v1956_v16 = vadd.f32 %v1955_v24, %v1937_v29 }
 0x103   :  { %2347 = vmatpush.bf16.msrb.mxu3 %v3566_v23  ;;  %v1957_v27 = vpop.f32.mrf.mxu2 }
 0x104   :  { %v2007_v35 = vpop.f32.mrf.mxu1  ;;  %2310 = vmatmul.bf16.vlgmr.msrb.gmra.mxu1 %v5015_v18  ;;  %v1975_v20 = vadd.f32 %v1974_v42, %v1956_v16 }
 0x105   :  { %2291 = vmatmul.bf16.vlgmr.msrb.gmra.mxu0 %v5013_v17  ;;  %v1972_v17 = vadd.f32 %v5819_v60, %v1953_v44 }
 0x106   :  { %v1988_v3 = vpop.f32.mrf.mxu0  ;;  %2348 = vmatmul.bf16.vlgmr.msrb.gmra.mxu3 %v5028_v25  ;;  %v1901_v25 = vadd.f32 %v5700_v51, %v1882_v26 }
 0x107   :  { %v1989_v0 = vadd.f32 %v1988_v3, %v1970_v2  ;;  %2329 = vmatmul.bf16.vlgmr.msrb.gmra.mxu2 %v5026_v22 }
 0x108   :  { %v1920_v1 = vadd.f32 %v1919_v43, %v1901_v25 }
 0x109   :  { %v2008_v4 = vadd.f32 %v2007_v35, %v1989_v0 }
 0x10a   :  { %v2045_v56 = vpop.f32.mrf.mxu3  ;;  %v1939_v31 = vadd.f32 %v1938_v45, %v1920_v1 }
 0x10b   :  { %v2026_v8 = vpop.f32.mrf.mxu2 }
 0x10c   :  { %v2027_v18 = vadd.f32 %v2026_v8, %v2008_v4  ;;  %v2009_v57 = vpop.f32.mrf.mxu1  ;;  %v1958_v30 = vadd.f32 %v1957_v27, %v1939_v31 }
 0x10e   :  { %v1990_v11 = vpop.f32.mrf.mxu0  ;;  %v2046_v12 = vadd.f32 %v2045_v56, %v2027_v18  ;;  %v1977_v6 = vadd.f32 %v1976_v53, %v1958_v30 }
 0x10f   :  { %v1991_v22 = vadd.f32 %v1990_v11, %v1972_v17 }
 0x110   :  { %2451 = vst [vmem:[%s5941_s3] sm:$0xff] %v2046_v12  ;;  %v2419_v51 = vmul.f32 %v2046_v12, %v2046_v12 }
 0x111   :  { %v2010_v9 = vadd.f32 %v2009_v57, %v1991_v22 }
 0x112   :  { %v2047_v19 = vpop.f32.mrf.mxu3 }
 0x113   :  { %v2028_v7 = vpop.f32.mrf.mxu2 }
 0x114   :  { %v2029_v60 = vadd.f32 %v2028_v7, %v2010_v9  ;;  %v2012_v21 = vpop.f32.mrf.mxu1  ;;  %2315 = vmatmul.bf16.gmra.mxu1 %v5147_v58 }
 0x115   :  { %2296 = vmatmul.bf16.gmra.mxu0 %v5145_v55 }
 0x116   :  { %v1993_v37 = vpop.f32.mrf.mxu0  ;;  %v2048_v47 = vadd.f32 %v2047_v19, %v2029_v60  ;;  %2353 = vmatmul.bf16.gmra.mxu3 %v5160_v63 }
 0x117   :  { %v1994_v13 = vadd.f32 %v1993_v37, %v1975_v20  ;;  %2334 = vmatmul.bf16.gmra.mxu2 %v5158_v62  ;;  %v3911_v62 = vld [vmem:[%s5940_s2] sm:$0x3] }
 0x118   :  { %v2390_v32 = vadd.f32 %v2048_v47, %v2046_v12  ;;  %v2421_v33 = vmul.f32 %v2048_v47, %v2048_v47  ;;  %2453 = vst [vmem:[%s5941_s3 + $0x10] sm:$0xff] %v2048_v47  ;;  %v308_v63 = vperm.slane %v3911_v62, 1 }
 0x119   :  { %v2013_v5 = vadd.f32 %v2012_v21, %v1994_v13 }
 0x11a   :  { %v2427_v48 = vadd.f32 %v2421_v33, %v2419_v51  ;;  %v2050_v40 = vpop.f32.mrf.mxu3 }
 0x11b   :  { %v2031_v39 = vpop.f32.mrf.mxu2 }
 0x11c   :  { %v2032_v36 = vadd.f32 %v2031_v39, %v2013_v5  ;;  %v2014_v41 = vpop.f32.mrf.mxu1 }
 0x11e   :  { %v1995_v55 = vpop.f32.mrf.mxu0  ;;  %v2051_v58 = vadd.f32 %v2050_v40, %v2032_v36 }
 0x11f   :  { %v1996_v23 = vadd.f32 %v1995_v55, %v1977_v6 }
 0x120   :  { %v2391_v24 = vadd.f32 %v2390_v32, %v2051_v58  ;;  %v2423_v42 = vmul.f32 %v2051_v58, %v2051_v58  ;;  %2455 = vst [vmem:[%s5941_s3 + $0x20] sm:$0xff] %v2051_v58 }
 0x121   :  { %v2015_v43 = vadd.f32 %v2014_v41, %v1996_v23 }
 0x122   :  { %v2428_v38 = vadd.f32 %v2427_v48, %v2423_v42  ;;  %v2052_v46 = vpop.f32.mrf.mxu3 }
 0x123   :  { %v2033_v45 = vpop.f32.mrf.mxu2 }
 0x124   :  { %v2034_v49 = vadd.f32 %v2033_v45, %v2015_v43  ;;  %v2083_v52 = vpop.f32.mrf.mxu1 }
 0x126   :  { %v2064_v14 = vpop.f32.mrf.mxu0  ;;  %v2053_v28 = vadd.f32 %v2052_v46, %v2034_v49 }
 0x127   :  { %v2065_v59 = vadd.f32 %v2064_v14, %v308_v63 }
 0x128   :  { %v5909_v53 = vadd.f32 %v2391_v24, %v2053_v28  ;;  %v2425_v61 = vmul.f32 %v2053_v28, %v2053_v28  ;;  %2457 = vst [vmem:[%s5941_s3 + $0x30] sm:$0xff] %v2053_v28 }
 0x129   :  { %v2084_v27 = vadd.f32 %v2083_v52, %v2065_v59 }
 0x12a   :  { %v5914_v2 = vadd.f32 %v2428_v38, %v2425_v61  ;;  %v2121_v35 = vpop.f32.mrf.mxu3 }
 0x12b   :  { %v2102_v3 = vpop.f32.mrf.mxu2 }
 0x12c   :  { %v2103_v34 = vadd.f32 %v2102_v3, %v2084_v27  ;;  %v2085_v0 = vpop.f32.mrf.mxu1 }
 0x12e   :  { %v2066_v10 = vpop.f32.mrf.mxu0  ;;  %v2122_v44 = vadd.f32 %v2121_v35, %v2103_v34 }
 0x12f   :  { %v2067_v15 = vadd.f32 %v2066_v10, %v308_v63 }
 0x131   :  { %v2086_v54 = vadd.f32 %v2085_v0, %v2067_v15 }
 0x132   :  { %v2123_v4 = vpop.f32.mrf.mxu3 }
 0x133   :  { %v2104_v50 = vpop.f32.mrf.mxu2 }
 0x134   :  { %v2105_v26 = vadd.f32 %v2104_v50, %v2086_v54  ;;  %v2088_v56 = vpop.f32.mrf.mxu1 }
 0x136   :  { %v2069_v8 = vpop.f32.mrf.mxu0  ;;  %v2124_v18 = vadd.f32 %v2123_v4, %v2105_v26 }
 0x137   :  { %v2070_v17 = vadd.f32 %v2069_v8, %v308_v63 }
 0x139   :  { %v2089_v11 = vadd.f32 %v2088_v56, %v2070_v17 }
 0x13a   :  { %v2126_v29 = vpop.f32.mrf.mxu3 }
 0x13b   :  { %v2107_v57 = vpop.f32.mrf.mxu2 }
 0x13c   :  { %v2108_v12 = vadd.f32 %v2107_v57, %v2089_v11  ;;  %v2090_v25 = vpop.f32.mrf.mxu1 }
 0x13e   :  { %v2071_v22 = vpop.f32.mrf.mxu0  ;;  %v2127_v1 = vadd.f32 %v2126_v29, %v2108_v12 }
 0x13f   :  { %v2072_v16 = vadd.f32 %v2071_v22, %v308_v63 }
 0x141   :  { %v2091_v9 = vadd.f32 %v2090_v25, %v2072_v16 }
 0x142   :  { %v2128_v19 = vpop.f32.mrf.mxu3 }
 0x143   :  { %v2109_v7 = vpop.f32.mrf.mxu2 }
 0x144   :  { %v2110_v20 = vadd.f32 %v2109_v7, %v2091_v9  ;;  %v2159_v37 = vpop.f32.mrf.mxu1 }
 0x146   :  { %v2140_v60 = vpop.f32.mrf.mxu0  ;;  %v2129_v21 = vadd.f32 %v2128_v19, %v2110_v20 }
 0x147   :  { %v2141_v63 = vadd.f32 %v2140_v60, %v2122_v44 }
 0x149   :  { %v2160_v38 = vadd.f32 %v2159_v37, %v2141_v63 }
 0x14a   :  { %v2197_v47 = vpop.f32.mrf.mxu3 }
 0x14b   :  { %v2178_v31 = vpop.f32.mrf.mxu2 }
 0x14c   :  { %v2161_v30 = vpop.f32.mrf.mxu1  ;;  %v2179_v46 = vadd.f32 %v2178_v31, %v2160_v38 }
 0x14e   :  { %v2142_v13 = vpop.f32.mrf.mxu0  ;;  %v2198_v59 = vadd.f32 %v2197_v47, %v2179_v46 }
 0x14f   :  { %v2143_v52 = vadd.f32 %v2142_v13, %v2124_v18 }
 0x151   :  { %v2162_v28 = vadd.f32 %v2161_v30, %v2143_v52 }
 0x152   :  { %v2199_v32 = vpop.f32.mrf.mxu3 }
 0x153   :  { %v2180_v51 = vpop.f32.mrf.mxu2 }
 0x154   :  { %v2164_v48 = vpop.f32.mrf.mxu1  ;;  %v2181_v35 = vadd.f32 %v2180_v51, %v2162_v28 }
 0x156   :  { %v2145_v33 = vpop.f32.mrf.mxu0  ;;  %v2200_v54 = vadd.f32 %v2199_v32, %v2181_v35  ;;  %v2393_v35 = vrot.slane %v5909_v53, 4 }
 0x157   :  { %v2146_v0 = vadd.f32 %v2145_v33, %v2127_v1 }
 0x159   :  { %v2165_v44 = vadd.f32 %v2164_v48, %v2146_v0 }
 0x15a   :  { %v2202_v39 = vpop.f32.mrf.mxu3 }
 0x15b   :  { %v2183_v5 = vpop.f32.mrf.mxu2 }
 0x15c   :  { %v2166_v6 = vpop.f32.mrf.mxu1  ;;  %v2184_v56 = vadd.f32 %v2183_v5, %v2165_v44  ;;  %v2394_v44 = vadd.f32 %v2393_v35, %v5909_v53 }
 0x15e   :  { %v2147_v40 = vpop.f32.mrf.mxu0  ;;  %v2203_v22 = vadd.f32 %v2202_v39, %v2184_v56 }
 0x15f   :  { %v2148_v57 = vadd.f32 %v2147_v40, %v2129_v21 }
 0x161   :  { %v2167_v16 = vadd.f32 %v2166_v6, %v2148_v57 }
 0x162   :  { %v2204_v55 = vpop.f32.mrf.mxu3 }
 0x163   :  { %v2185_v36 = vpop.f32.mrf.mxu2 }
 0x164   :  { %v2235_v58 = vpop.f32.mrf.mxu1  ;;  %v2186_v20 = vadd.f32 %v2185_v36, %v2167_v16 }
 0x166   :  { %v2216_v41 = vpop.f32.mrf.mxu0  ;;  %v2205_v32 = vadd.f32 %v2204_v55, %v2186_v20 }
 0x167   :  { %v2217_v27 = vadd.f32 %v2216_v41, %v2198_v59 }
 0x169   :  { %v2236_v15 = vadd.f32 %v2235_v58, %v2217_v27 }
 0x16a   :  { %v2273_v24 = vpop.f32.mrf.mxu3 }
 0x16b   :  { %v2254_v23 = vpop.f32.mrf.mxu2 }
 0x16c   :  { %v2237_v62 = vpop.f32.mrf.mxu1  ;;  %v2255_v50 = vadd.f32 %v2254_v23, %v2236_v15  ;;  %v2430_v15 = vrot.slane %v5914_v2, 4 }
 0x16e   :  { %v2218_v42 = vpop.f32.mrf.mxu0  ;;  %v2274_v17 = vadd.f32 %v2273_v24, %v2255_v50 }
 0x16f   :  { %v2219_v4 = vadd.f32 %v2218_v42, %v2200_v54 }
 0x171   :  { %v2238_v29 = vadd.f32 %v2237_v62, %v2219_v4 }
 0x172   :  { %v2275_v45 = vpop.f32.mrf.mxu3 }
 0x173   :  { %v2256_v43 = vpop.f32.mrf.mxu2 }
 0x174   :  { %v2240_v14 = vpop.f32.mrf.mxu1  ;;  %v2257_v25 = vadd.f32 %v2256_v43, %v2238_v29 }
 0x176   :  { %v2221_v49 = vpop.f32.mrf.mxu0  ;;  %v2276_v60 = vadd.f32 %v2275_v45, %v2257_v25 }
 0x177   :  { %v2222_v9 = vadd.f32 %v2221_v49, %v2203_v22 }
 0x179   :  { %v2241_v13 = vadd.f32 %v2240_v14, %v2222_v9 }
 0x17a   :  { %v2278_v3 = vpop.f32.mrf.mxu3 }
 0x17b   :  { %v2259_v61 = vpop.f32.mrf.mxu2 }
 0x17c   :  { %v2242_v10 = vpop.f32.mrf.mxu1  ;;  %v2260_v33 = vadd.f32 %v2259_v61, %v2241_v13 }
 0x17e   :  { %v2223_v34 = vpop.f32.mrf.mxu0  ;;  %v2279_v40 = vadd.f32 %v2278_v3, %v2260_v33 }
 0x17f   :  { %v2224_v21 = vadd.f32 %v2223_v34, %v2205_v32 }
 0x181   :  { %v2243_v41 = vadd.f32 %v2242_v10, %v2224_v21 }
 0x182   :  { %v2280_v8 = vpop.f32.mrf.mxu3 }
 0x183   :  { %v2261_v26 = vpop.f32.mrf.mxu2 }
 0x184   :  { %v2311_v18 = vpop.f32.mrf.mxu1  ;;  %v2262_v42 = vadd.f32 %v2261_v26, %v2243_v41  ;;  %v2431_v26 = vadd.f32 %v2430_v15, %v5914_v2 }
 0x186   :  { %v2292_v11 = vpop.f32.mrf.mxu0  ;;  %v2281_v49 = vadd.f32 %v2280_v8, %v2262_v42  ;;  %v2432_v57 = vrot.slane %v2431_v26, 2 }
 0x187   :  { %v2293_v12 = vadd.f32 %v2292_v11, %v2274_v17  ;;  %v2395_v17 = vrot.slane %v2394_v44, 2 }
 0x188   :  { %v2433_v9 = vadd.f32 %v2432_v57, %v2431_v26 }
 0x189   :  { %v2312_v7 = vadd.f32 %v2311_v18, %v2293_v12  ;;  %v2396_v22 = vadd.f32 %v2395_v17, %v2394_v44 }
 0x18a   :  { %v2349_v19 = vpop.f32.mrf.mxu3 }
 0x18b   :  { %v2330_v1 = vpop.f32.mrf.mxu2 }
 0x18c   :  { %v2331_v37 = vadd.f32 %v2330_v1, %v2312_v7  ;;  %v2313_v47 = vpop.f32.mrf.mxu1  ;;  %v2397_v1 = vrot.slane %v2396_v22, 1 }
 0x18e   :  { %v2294_v31 = vpop.f32.mrf.mxu0  ;;  %v2350_v30 = vadd.f32 %v2349_v19, %v2331_v37  ;;  %v2414_v19 = vlaneseq }
 0x18f   :  { %v2295_v51 = vadd.f32 %v2294_v31, %v2276_v60  ;;  %v2434_v60 = vrot.slane %v2433_v9, 1 }
 0x190   :  { %2452 = vst [vmem:[%s5941_s3 + $0x8] sm:$0xff] %v2350_v30  ;;  %v2420_v62 = vmul.f32 %v2350_v30, %v2350_v30  ;;  %vm2416_vm1 = vcmp.lt.s32.totalorder %v2414_v19, 256 }
 0x191   :  { %v2314_v48 = vadd.f32 %v2313_v47, %v2295_v51  ;;  %v2398_v47 = vadd.f32 %v2397_v1, %v2396_v22  ;;  %v2435_v51 = vadd.f32 %v2434_v60, %v2433_v9 }
 0x192   :  { %v2351_v39 = vpop.f32.mrf.mxu3 }
 0x193   :  { %v2332_v5 = vpop.f32.mrf.mxu2 }
 0x194   :  { %v2333_v6 = vadd.f32 %v2332_v5, %v2314_v48  ;;  %v2316_v24 = vpop.f32.mrf.mxu1 }
 0x196   :  { %v2297_v36 = vpop.f32.mrf.mxu0  ;;  %v2352_v58 = vadd.f32 %v2351_v39, %v2333_v6 }
 0x197   :  { %v2298_v23 = vadd.f32 %v2297_v36, %v2279_v40 }
 0x198   :  { %v2399_v63 = vadd.f32 %v2352_v58, %v2350_v30  ;;  %v2422_v55 = vmul.f32 %v2352_v58, %v2352_v58  ;;  %2454 = vst [vmem:[%s5941_s3 + $0x18] sm:$0xff] %v2352_v58 }
 0x199   :  { %v2317_v43 = vadd.f32 %v2316_v24, %v2298_v23 }
 0x19a   :  { %v2436_v38 = vadd.f32 %v2422_v55, %v2420_v62  ;;  %v2354_v46 = vpop.f32.mrf.mxu3 }
 0x19b   :  { %v2335_v45 = vpop.f32.mrf.mxu2 }
 0x19c   :  { %v2336_v14 = vadd.f32 %v2335_v45, %v2317_v43  ;;  %v2318_v3 = vpop.f32.mrf.mxu1 }
 0x19e   :  { %v2299_v52 = vpop.f32.mrf.mxu0  ;;  %v2355_v59 = vadd.f32 %v2354_v46, %v2336_v14 }
 0x19f   :  { %v2300_v28 = vadd.f32 %v2299_v52, %v2281_v49 }
 0x1a0   :  { %v2400_v27 = vadd.f32 %v2399_v63, %v2355_v59  ;;  %v2424_v61 = vmul.f32 %v2355_v59, %v2355_v59  ;;  %2456 = vst [vmem:[%s5941_s3 + $0x28] sm:$0xff] %v2355_v59 }
 0x1a1   :  { %v2319_v10 = vadd.f32 %v2318_v3, %v2300_v28 }
 0x1a2   :  { %v2437_v34 = vadd.f32 %v2436_v38, %v2424_v61  ;;  %v2356_v50 = vpop.f32.mrf.mxu3 }
 0x1a3   :  { %v2337_v0 = vpop.f32.mrf.mxu2 }
 0x1a4   :  { %v2338_v54 = vadd.f32 %v2337_v0, %v2319_v10 }
 0x1a6   :  { %v2357_v4 = vadd.f32 %v2356_v50, %v2338_v54 }
 0x1a8   :  { %v2401_v8 = vadd.f32 %v2400_v27, %v2357_v4  ;;  %v2426_v56 = vmul.f32 %v2357_v4, %v2357_v4  ;;  %2458 = vst [vmem:[%s5941_s3 + $0x38] sm:$0xff] %v2357_v4 }
 0x1aa   :  { %v2402_v11 = vrot.slane %v2401_v8, 4  ;;  %v2438_v18 = vadd.f32 %v2437_v34, %v2426_v56 }
 0x1ac   :  { %v2403_v29 = vadd.f32 %v2402_v11, %v2401_v8  ;;  %v2439_v12 = vrot.slane %v2438_v18, 4 }
 0x1ae   :  { %v2404_v25 = vrot.slane %v2403_v29, 2  ;;  %v2440_v16 = vadd.f32 %v2439_v12, %v2438_v18 }
 0x1b0   :  { %v2405_v53 = vadd.f32 %v2404_v25, %v2403_v29  ;;  %v2441_v7 = vrot.slane %v2440_v16, 2 }
 0x1b2   :  { %v2406_v2 = vrot.slane %v2405_v53, 1  ;;  %v2442_v20 = vadd.f32 %v2441_v7, %v2440_v16 }
 0x1b4   :  { %v2407_v37 = vadd.f32 %v2406_v2, %v2405_v53  ;;  %v2443_v31 = vrot.slane %v2442_v20, 1 }
 0x1b6   :  { %v2410_v13 = vrot.slane %v2407_v37, 7  ;;  %v2444_v30 = vadd.f32 %v2443_v31, %v2442_v20 }
 0x1b8   :  { %v2412_v32 = vsel %vm2411_vm0, %v2398_v47, %v2410_v13  ;;  %v2447_v33 = vrot.slane %v2444_v30, 7 }
 0x1b9   :  { %2418 = vst.msk [vmem:[%s5942_s4] sm:$0x3] %vm2416_vm1, %v2412_v32 }
 0x1ba   :  { %v2448_v21 = vsel %vm2411_vm0, %v2435_v51, %v2447_v33 }
 0x1bb   :  { %2450 = vst.msk [vmem:[%s5943_s5] sm:$0x3] %vm2416_vm1, %v2448_v21 }

// kernel: discriminator_funiegan_forward.15
= control target key start
LH: loop header
LB: loop body
LE: loop exit
PB: predicated region body
PF: predicated region fallthrough
CT: control target
= control target key end

     0   :  { %s5865_s1 = inlined_call_operand.vmem [shape: bf16[4096,128], index: 1, kind: input, shape index: {}]   ;;  %s5866_s0 = inlined_call_operand.vmem [shape: bf16[32,4096], index: 0, kind: input, shape index: {}]   ;;  %s5867_s2 = inlined_call_operand.vmem [shape: f32[32,128], index: 2, kind: output, shape index: {}]  }
   0x1   :  { %v4410_v0 = vld [vmem:[%s5865_s1 + $0x38] sm:$0xff]  ;;  %v4409_v4 = vld [vmem:[%s5865_s1 + $0x30] sm:$0xff]  ;;  %v4408_v8 = vld [vmem:[%s5865_s1 + $0x28] sm:$0xff] }
   0x2   :  { %v4418_v1 = vld [vmem:[%s5865_s1 + $0x78] sm:$0xff]  ;;  %2443 = vmatpush.bf16.msra.mxu0 %v4410_v0  ;;  %v4417_v5 = vld [vmem:[%s5865_s1 + $0x70] sm:$0xff]  ;;  %v4416_v9 = vld [vmem:[%s5865_s1 + $0x68] sm:$0xff] }
   0x3   :  { %v4426_v2 = vld [vmem:[%s5865_s1 + $0xb8] sm:$0xff]  ;;  %2462 = vmatpush.bf16.msra.mxu1 %v4418_v1  ;;  %v4425_v6 = vld [vmem:[%s5865_s1 + $0xb0] sm:$0xff]  ;;  %v4424_v10 = vld [vmem:[%s5865_s1 + $0xa8] sm:$0xff] }
   0x4   :  { %v4434_v3 = vld [vmem:[%s5865_s1 + $0xf8] sm:$0xff]  ;;  %2481 = vmatpush.bf16.msra.mxu2 %v4426_v2  ;;  %v4433_v7 = vld [vmem:[%s5865_s1 + $0xf0] sm:$0xff]  ;;  %v4432_v11 = vld [vmem:[%s5865_s1 + $0xe8] sm:$0xff] }
   0x5   :  { %2500 = vmatpush.bf16.msra.mxu3 %v4434_v3  ;;  %v4407_v12 = vld [vmem:[%s5865_s1 + $0x20] sm:$0xff]  ;;  %v4406_v16 = vld [vmem:[%s5865_s1 + $0x18] sm:$0xff]  ;;  %v4405_v20 = vld [vmem:[%s5865_s1 + $0x10] sm:$0xff] }
   0x6   :  { %2444 = vmatpush.bf16.msra.mxu0 %v4409_v4  ;;  %v4415_v13 = vld [vmem:[%s5865_s1 + $0x60] sm:$0xff]  ;;  %v4414_v17 = vld [vmem:[%s5865_s1 + $0x58] sm:$0xff]  ;;  %v4413_v21 = vld [vmem:[%s5865_s1 + $0x50] sm:$0xff] }
   0x7   :  { %2463 = vmatpush.bf16.msra.mxu1 %v4417_v5  ;;  %v4423_v14 = vld [vmem:[%s5865_s1 + $0xa0] sm:$0xff]  ;;  %v4422_v18 = vld [vmem:[%s5865_s1 + $0x98] sm:$0xff]  ;;  %v4421_v22 = vld [vmem:[%s5865_s1 + $0x90] sm:$0xff] }
   0x8   :  { %2482 = vmatpush.bf16.msra.mxu2 %v4425_v6  ;;  %v4431_v15 = vld [vmem:[%s5865_s1 + $0xe0] sm:$0xff]  ;;  %v4430_v19 = vld [vmem:[%s5865_s1 + $0xd8] sm:$0xff]  ;;  %v4429_v23 = vld [vmem:[%s5865_s1 + $0xd0] sm:$0xff] }
   0x9   :  { %2501 = vmatpush.bf16.msra.mxu3 %v4433_v7  ;;  %v4404_v24 = vld [vmem:[%s5865_s1 + $0x8] sm:$0xff]  ;;  %v4403_v28 = vld [vmem:[%s5865_s1] sm:$0xff]  ;;  %v4458_v40 = vld [vmem:[%s5865_s1 + $0x1b8] sm:$0xff] }
   0xa   :  { %2445 = vmatpush.bf16.msra.mxu0 %v4408_v8  ;;  %v4412_v25 = vld [vmem:[%s5865_s1 + $0x48] sm:$0xff]  ;;  %v4411_v29 = vld [vmem:[%s5865_s1 + $0x40] sm:$0xff]  ;;  %v4442_v41 = vld [vmem:[%s5865_s1 + $0x138] sm:$0xff] }
   0xb   :  { %2464 = vmatpush.bf16.msra.mxu1 %v4416_v9  ;;  %v4420_v26 = vld [vmem:[%s5865_s1 + $0x88] sm:$0xff]  ;;  %v4419_v30 = vld [vmem:[%s5865_s1 + $0x80] sm:$0xff]  ;;  %v4450_v46 = vld [vmem:[%s5865_s1 + $0x178] sm:$0xff] }
   0xc   :  { %2483 = vmatpush.bf16.msra.mxu2 %v4424_v10  ;;  %v4428_v27 = vld [vmem:[%s5865_s1 + $0xc8] sm:$0xff]  ;;  %v4427_v31 = vld [vmem:[%s5865_s1 + $0xc0] sm:$0xff]  ;;  %v4466_v47 = vld [vmem:[%s5865_s1 + $0x1f8] sm:$0xff] }
   0xd   :  { %2502 = vmatpush.bf16.msra.mxu3 %v4432_v11  ;;  %v3061_v32 = vld [vmem:[%s5866_s0] sm:$0xf]  ;;  %v4339_v34 = vld [vmem:[%s5866_s0 + $0x4] sm:$0xf]  ;;  %v3069_v36 = vld [vmem:[%s5866_s0 + $0x8] sm:$0xf] }
   0xe   :  { %2446 = vmatpush.bf16.msra.mxu0 %v4407_v12  ;;  %v4355_v33 = vld [vmem:[%s5866_s0 + $0x7c] sm:$0xf0]  ;;  %v3063_v35 = vld [vmem:[%s5866_s0 + $0x80] sm:$0xf0]  ;;  %v4356_v37 = vld [vmem:[%s5866_s0 + $0x84] sm:$0xf0] }
   0xf   :  { %2465 = vmatpush.bf16.msra.mxu1 %v4415_v13  ;;  %v4340_v38 = vld [vmem:[%s5866_s0 + $0xc] sm:$0xf]  ;;  %v3062_v42 = vor.u32 %v4355_v33, %v3061_v32  ;;  %v3066_v43 = vor.u32 %v4339_v34, %v3063_v35  ;;  %v3070_v44 = vor.u32 %v4356_v37, %v3069_v36  ;;  %v4457_v48 = vld [vmem:[%s5865_s1 + $0x1b0] sm:$0xff]  ;;  %v4455_v56 = vld [vmem:[%s5865_s1 + $0x1a0] sm:$0xff] }
  0x10   :  { %2484 = vmatpush.bf16.msra.mxu2 %v4423_v14  ;;  %v3071_v39 = vld [vmem:[%s5866_s0 + $0x88] sm:$0xf0]  ;;  %v4441_v49 = vld [vmem:[%s5865_s1 + $0x130] sm:$0xff]  ;;  %v4439_v57 = vld [vmem:[%s5865_s1 + $0x120] sm:$0xff] }
  0x11   :  { %2503 = vmatpush.bf16.msra.mxu3 %v4431_v15  ;;  %v3074_v45 = vor.u32 %v4340_v38, %v3071_v39  ;;  %v4449_v50 = vld [vmem:[%s5865_s1 + $0x170] sm:$0xff]  ;;  %v4456_v52 = vld [vmem:[%s5865_s1 + $0x1a8] sm:$0xff]  ;;  %v4447_v58 = vld [vmem:[%s5865_s1 + $0x160] sm:$0xff] }
  0x12   :  { %2447 = vmatpush.bf16.msra.mxu0 %v4406_v16  ;;  %v4465_v51 = vld [vmem:[%s5865_s1 + $0x1f0] sm:$0xff]  ;;  %v4440_v53 = vld [vmem:[%s5865_s1 + $0x128] sm:$0xff]  ;;  %v4463_v59 = vld [vmem:[%s5865_s1 + $0x1e0] sm:$0xff] }
  0x13   :  { %2466 = vmatpush.bf16.msra.mxu1 %v4414_v17  ;;  %v4448_v54 = vld [vmem:[%s5865_s1 + $0x168] sm:$0xff]  ;;  %v3189_v60 = vld [vmem:[%s5866_s0 + $0x100] sm:$0xf]  ;;  %v4371_v62 = vld [vmem:[%s5866_s0 + $0x104] sm:$0xf] }
  0x14   :  { %2485 = vmatpush.bf16.msra.mxu2 %v4422_v18  ;;  %v4464_v55 = vld [vmem:[%s5865_s1 + $0x1e8] sm:$0xff]  ;;  %v4387_v61 = vld [vmem:[%s5866_s0 + $0x17c] sm:$0xf0]  ;;  %v3191_v63 = vld [vmem:[%s5866_s0 + $0x180] sm:$0xf0] }
  0x15   :  { %2504 = vmatpush.bf16.msra.mxu3 %v4430_v19  ;;  %v3197_v0 = vld [vmem:[%s5866_s0 + $0x108] sm:$0xf]  ;;  %v4372_v2 = vld [vmem:[%s5866_s0 + $0x10c] sm:$0xf]  ;;  %v4454_v4 = vld [vmem:[%s5865_s1 + $0x198] sm:$0xff]  ;;  %v3190_v6 = vor.u32 %v4387_v61, %v3189_v60  ;;  %v3194_v7 = vor.u32 %v4371_v62, %v3191_v63 }
  0x16   :  { %2448 = vmatpush.bf16.msra.mxu0 %v4405_v20  ;;  %v4388_v1 = vld [vmem:[%s5866_s0 + $0x184] sm:$0xf0]  ;;  %v3199_v3 = vld [vmem:[%s5866_s0 + $0x188] sm:$0xf0]  ;;  %v4438_v5 = vld [vmem:[%s5865_s1 + $0x118] sm:$0xff] }
  0x17   :  { %2467 = vmatpush.bf16.msra.mxu1 %v4413_v21  ;;  %v3198_v8 = vor.u32 %v4388_v1, %v3197_v0  ;;  %v3202_v9 = vor.u32 %v4372_v2, %v3199_v3  ;;  %v4446_v10 = vld [vmem:[%s5865_s1 + $0x158] sm:$0xff]  ;;  %v4453_v12 = vld [vmem:[%s5865_s1 + $0x190] sm:$0xff]  ;;  %v4452_v16 = vld [vmem:[%s5865_s1 + $0x188] sm:$0xff] }
  0x18   :  { %2486 = vmatpush.bf16.msra.mxu2 %v4421_v22  ;;  %v4462_v11 = vld [vmem:[%s5865_s1 + $0x1d8] sm:$0xff]  ;;  %v4437_v13 = vld [vmem:[%s5865_s1 + $0x110] sm:$0xff]  ;;  %v4436_v17 = vld [vmem:[%s5865_s1 + $0x108] sm:$0xff] }
  0x19   :  { %2505 = vmatpush.bf16.msra.mxu3 %v4429_v23  ;;  %v4445_v14 = vld [vmem:[%s5865_s1 + $0x150] sm:$0xff]  ;;  %v4444_v18 = vld [vmem:[%s5865_s1 + $0x148] sm:$0xff]  ;;  %v4451_v20 = vld [vmem:[%s5865_s1 + $0x180] sm:$0xff] }
  0x1a   :  { %2449 = vmatpush.bf16.msra.mxu0 %v4404_v24  ;;  %v4461_v15 = vld [vmem:[%s5865_s1 + $0x1d0] sm:$0xff]  ;;  %v4460_v19 = vld [vmem:[%s5865_s1 + $0x1c8] sm:$0xff]  ;;  %v4435_v21 = vld [vmem:[%s5865_s1 + $0x100] sm:$0xff] }
  0x1b   :  { %2468 = vmatpush.bf16.msra.mxu1 %v4412_v25  ;;  %v4443_v22 = vld [vmem:[%s5865_s1 + $0x140] sm:$0xff]  ;;  %v3077_v24 = vld [vmem:[%s5866_s0 + $0x10] sm:$0xf]  ;;  %v4490_v25 = vld [vmem:[%s5865_s1 + $0x2b8] sm:$0xff] }
  0x1c   :  { %2487 = vmatpush.bf16.msra.mxu2 %v4420_v26  ;;  %v4459_v23 = vld [vmem:[%s5865_s1 + $0x1c0] sm:$0xff]  ;;  %v4474_v26 = vld [vmem:[%s5865_s1 + $0x238] sm:$0xff]  ;;  %v4489_v37 = vld [vmem:[%s5865_s1 + $0x2b0] sm:$0xff] }
  0x1d   :  { %2506 = vmatpush.bf16.msra.mxu3 %v4428_v27  ;;  %v4357_v27 = vld [vmem:[%s5866_s0 + $0x8c] sm:$0xf0]  ;;  %v4342_v32 = vld [vmem:[%s5866_s0 + $0x1c] sm:$0xf] }
  0x1e   :  { %2450 = vmatpush.bf16.msra.mxu0 %v4403_v28  ;;  %v4341_v28 = vld [vmem:[%s5866_s0 + $0x14] sm:$0xf]  ;;  %v3087_v33 = vld [vmem:[%s5866_s0 + $0x98] sm:$0xf0]  ;;  %v3078_v36 = vor.u32 %v4357_v27, %v3077_v24  ;;  %v3095_v24 = vld [vmem:[%s5866_s0 + $0xa0] sm:$0xf0] }
  0x1f   :  { %2469 = vmatpush.bf16.msra.mxu1 %v4411_v29  ;;  %v3079_v29 = vld [vmem:[%s5866_s0 + $0x90] sm:$0xf0]  ;;  %v4482_v34 = vld [vmem:[%s5865_s1 + $0x278] sm:$0xff]  ;;  %v4344_v27 = vld [vmem:[%s5866_s0 + $0x2c] sm:$0xf] }
  0x20   :  { %2488 = vmatpush.bf16.msra.mxu2 %v4419_v30  ;;  %v3085_v30 = vld [vmem:[%s5866_s0 + $0x18] sm:$0xf]  ;;  %v3082_v38 = vor.u32 %v4341_v28, %v3079_v29  ;;  %v3215_v61 = vld [vmem:[%s5866_s0 + $0x198] sm:$0xf0]  ;;  %v4485_v1 = vld [vmem:[%s5865_s1 + $0x290] sm:$0xff] }
  0x21   :  { %2507 = vmatpush.bf16.msra.mxu3 %v4427_v31  ;;  %2451 = vmatmul.bf16.vlgmr.msra.gmra.mxu0 %v3062_v42  ;;  %v4358_v31 = vld [vmem:[%s5866_s0 + $0x94] sm:$0xf0]  ;;  %v4481_v42 = vld [vmem:[%s5865_s1 + $0x270] sm:$0xff]  ;;  %v3103_v28 = vld [vmem:[%s5866_s0 + $0xa8] sm:$0xf0] }
  0x22   :  { %2519 = vmatpush.bf16.msrb.mxu0 %v4442_v41  ;;  %2470 = vmatmul.bf16.vlgmr.msra.gmra.mxu1 %v3066_v43  ;;  %v4498_v35 = vld [vmem:[%s5865_s1 + $0x2f8] sm:$0xff]  ;;  %v3086_v39 = vor.u32 %v4358_v31, %v3085_v30  ;;  %v4473_v41 = vld [vmem:[%s5865_s1 + $0x230] sm:$0xff] }
  0x23   :  { %2489 = vmatmul.bf16.vlgmr.msra.gmra.mxu2 %v3070_v44  ;;  %2538 = vmatpush.bf16.msrb.mxu1 %v4450_v46  ;;  %v4497_v43 = vld [vmem:[%s5865_s1 + $0x2f0] sm:$0xff]  ;;  %v4488_v44 = vld [vmem:[%s5865_s1 + $0x2a8] sm:$0xff]  ;;  %v4470_v60 = vld [vmem:[%s5865_s1 + $0x218] sm:$0xff] }
  0x24   :  { %2557 = vmatpush.bf16.msrb.mxu2 %v4458_v40  ;;  %2508 = vmatmul.bf16.vlgmr.msra.gmra.mxu3 %v3074_v45  ;;  %v3090_v40 = vor.u32 %v4342_v32, %v3087_v33  ;;  %v4472_v45 = vld [vmem:[%s5865_s1 + $0x228] sm:$0xff]  ;;  %v4478_v62 = vld [vmem:[%s5865_s1 + $0x258] sm:$0xff]  ;;  %v4513_v30 = vld [vmem:[%s5865_s1 + $0x370] sm:$0xff]  ;;  %v3106_v33 = vor.u32 %v4344_v27, %v3103_v28 }
  0x25   :  { %2576 = vmatpush.bf16.msrb.mxu3 %v4466_v47  ;;  %v4480_v46 = vld [vmem:[%s5865_s1 + $0x268] sm:$0xff]  ;;  %v4494_v63 = vld [vmem:[%s5865_s1 + $0x2d8] sm:$0xff] }
  0x26   :  { %2520 = vmatpush.bf16.msrb.mxu0 %v4441_v49  ;;  %v4496_v47 = vld [vmem:[%s5865_s1 + $0x2e8] sm:$0xff]  ;;  %v4471_v49 = vld [vmem:[%s5865_s1 + $0x220] sm:$0xff] }
  0x27   :  { %2539 = vmatpush.bf16.msrb.mxu1 %v4449_v50  ;;  %v4479_v50 = vld [vmem:[%s5865_s1 + $0x260] sm:$0xff]  ;;  %v4552_v28 = vld [vmem:[%s5865_s1 + $0x4a8] sm:$0xff] }
  0x28   :  { %2558 = vmatpush.bf16.msrb.mxu2 %v4457_v48  ;;  %v4487_v48 = vld [vmem:[%s5865_s1 + $0x2a0] sm:$0xff] }
  0x29   :  { %2577 = vmatpush.bf16.msrb.mxu3 %v4465_v51  ;;  %v4495_v51 = vld [vmem:[%s5865_s1 + $0x2e0] sm:$0xff] }
  0x2a   :  { %2521 = vmatpush.bf16.msrb.mxu0 %v4440_v53  ;;  %v4389_v53 = vld [vmem:[%s5866_s0 + $0x18c] sm:$0xf0] }
  0x2b   :  { %2540 = vmatpush.bf16.msrb.mxu1 %v4448_v54  ;;  %v4486_v54 = vld [vmem:[%s5865_s1 + $0x298] sm:$0xff] }
  0x2c   :  { %2559 = vmatpush.bf16.msrb.mxu2 %v4456_v52  ;;  %v3205_v52 = vld [vmem:[%s5866_s0 + $0x110] sm:$0xf] }
  0x2d   :  { %2578 = vmatpush.bf16.msrb.mxu3 %v4464_v55  ;;  %v4373_v55 = vld [vmem:[%s5866_s0 + $0x114] sm:$0xf]  ;;  %v3206_v0 = vor.u32 %v4389_v53, %v3205_v52  ;;  %v4376_v52 = vld [vmem:[%s5866_s0 + $0x12c] sm:$0xf]  ;;  %v4502_v53 = vld [vmem:[%s5865_s1 + $0x318] sm:$0xff] }
  0x2e   :  { %2522 = vmatpush.bf16.msrb.mxu0 %v4439_v57  ;;  %v3213_v57 = vld [vmem:[%s5866_s0 + $0x118] sm:$0xf] }
  0x2f   :  { %2541 = vmatpush.bf16.msrb.mxu1 %v4447_v58  ;;  %v4390_v58 = vld [vmem:[%s5866_s0 + $0x194] sm:$0xf0] }
  0x30   :  { %2560 = vmatpush.bf16.msrb.mxu2 %v4455_v56  ;;  %v3207_v56 = vld [vmem:[%s5866_s0 + $0x190] sm:$0xf0]  ;;  %v3214_v3 = vor.u32 %v4390_v58, %v3213_v57 }
  0x31   :  { %2579 = vmatpush.bf16.msrb.mxu3 %v4463_v59  ;;  %2456 = vmatmul.bf16.gmra.mxu0 %v3190_v6  ;;  %v4374_v59 = vld [vmem:[%s5866_s0 + $0x11c] sm:$0xf]  ;;  %v3210_v2 = vor.u32 %v4373_v55, %v3207_v56  ;;  %v4477_v6 = vld [vmem:[%s5865_s1 + $0x250] sm:$0xff] }
  0x32   :  { %2523 = vmatpush.bf16.msrb.mxu0 %v4438_v5  ;;  %2475 = vmatmul.bf16.gmra.mxu1 %v3194_v7  ;;  %v4469_v5 = vld [vmem:[%s5865_s1 + $0x210] sm:$0xff]  ;;  %v4526_v55 = vld [vmem:[%s5865_s1 + $0x3d8] sm:$0xff] }
  0x33   :  { %2494 = vmatmul.bf16.gmra.mxu2 %v3198_v8  ;;  %2542 = vmatpush.bf16.msrb.mxu1 %v4446_v10  ;;  %v4493_v7 = vld [vmem:[%s5865_s1 + $0x2d0] sm:$0xff]  ;;  %v4484_v8 = vld [vmem:[%s5865_s1 + $0x288] sm:$0xff] }
  0x34   :  { %2561 = vmatpush.bf16.msrb.mxu2 %v4454_v4  ;;  %2513 = vmatmul.bf16.gmra.mxu3 %v3202_v9  ;;  %v3218_v4 = vor.u32 %v4374_v59, %v3215_v61  ;;  %v4468_v9 = vld [vmem:[%s5865_s1 + $0x208] sm:$0xff]  ;;  %v4517_v56 = vld [vmem:[%s5865_s1 + $0x390] sm:$0xff] }
  0x35   :  { %2580 = vmatpush.bf16.msrb.mxu3 %v4462_v11  ;;  %v4476_v10 = vld [vmem:[%s5865_s1 + $0x248] sm:$0xff]  ;;  %v4509_v58 = vld [vmem:[%s5865_s1 + $0x350] sm:$0xff] }
  0x36   :  { %2524 = vmatpush.bf16.msrb.mxu0 %v4437_v13  ;;  %v4492_v11 = vld [vmem:[%s5865_s1 + $0x2c8] sm:$0xff]  ;;  %v4522_v13 = vld [vmem:[%s5865_s1 + $0x3b8] sm:$0xff] }
  0x37   :  { %2543 = vmatpush.bf16.msrb.mxu1 %v4445_v14  ;;  %v4467_v14 = vld [vmem:[%s5865_s1 + $0x200] sm:$0xff] }
  0x38   :  { %2562 = vmatpush.bf16.msrb.mxu2 %v4453_v12  ;;  %v4483_v12 = vld [vmem:[%s5865_s1 + $0x280] sm:$0xff] }
  0x39   :  { %2581 = vmatpush.bf16.msrb.mxu3 %v4461_v15  ;;  %v4475_v15 = vld [vmem:[%s5865_s1 + $0x240] sm:$0xff] }
  0x3a   :  { %2525 = vmatpush.bf16.msrb.mxu0 %v4436_v17  ;;  %v3093_v17 = vld [vmem:[%s5866_s0 + $0x20] sm:$0xf] }
  0x3b   :  { %2544 = vmatpush.bf16.msrb.mxu1 %v4444_v18  ;;  %v4359_v18 = vld [vmem:[%s5866_s0 + $0x9c] sm:$0xf0] }
  0x3c   :  { %2563 = vmatpush.bf16.msrb.mxu2 %v4452_v16  ;;  %v4491_v16 = vld [vmem:[%s5865_s1 + $0x2c0] sm:$0xff]  ;;  %v3094_v29 = vor.u32 %v4359_v18, %v3093_v17  ;;  %v3111_v17 = vld [vmem:[%s5866_s0 + $0xb0] sm:$0xf0]  ;;  %v3117_v18 = vld [vmem:[%s5866_s0 + $0x38] sm:$0xf] }
  0x3d   :  { %2582 = vmatpush.bf16.msrb.mxu3 %v4460_v19  ;;  %v4506_v19 = vld [vmem:[%s5865_s1 + $0x338] sm:$0xff] }
  0x3e   :  { %2526 = vmatpush.bf16.msrb.mxu0 %v4435_v21  ;;  %v4343_v21 = vld [vmem:[%s5866_s0 + $0x24] sm:$0xf] }
  0x3f   :  { %2545 = vmatpush.bf16.msrb.mxu1 %v4443_v22  ;;  %v4530_v22 = vld [vmem:[%s5865_s1 + $0x3f8] sm:$0xff]  ;;  %v3098_v31 = vor.u32 %v4343_v21, %v3095_v24  ;;  %v4561_v24 = vld [vmem:[%s5865_s1 + $0x4f0] sm:$0xff] }
  0x40   :  { %2564 = vmatpush.bf16.msrb.mxu2 %v4451_v20  ;;  %v4514_v20 = vld [vmem:[%s5865_s1 + $0x378] sm:$0xff] }
  0x41   :  { %2583 = vmatpush.bf16.msrb.mxu3 %v4459_v23  ;;  %2527 = vmatmul.bf16.vlgmr.msrb.gmra.mxu0 %v3078_v36  ;;  %v4521_v23 = vld [vmem:[%s5865_s1 + $0x3b0] sm:$0xff]  ;;  %v4520_v36 = vld [vmem:[%s5865_s1 + $0x3a8] sm:$0xff]  ;;  %v3119_v21 = vld [vmem:[%s5866_s0 + $0xb8] sm:$0xf0] }
  0x42   :  { %2595 = vmatpush.bf16.msra.mxu0 %v4474_v26  ;;  %2546 = vmatmul.bf16.vlgmr.msrb.gmra.mxu1 %v3082_v38  ;;  %v4360_v26 = vld [vmem:[%s5866_s0 + $0xa4] sm:$0xf0] }
  0x43   :  { %2614 = vmatpush.bf16.msra.mxu1 %v4482_v34  ;;  %2565 = vmatmul.bf16.vlgmr.msrb.gmra.mxu2 %v3086_v39  ;;  %v4505_v34 = vld [vmem:[%s5865_s1 + $0x330] sm:$0xff]  ;;  %v4504_v38 = vld [vmem:[%s5865_s1 + $0x328] sm:$0xff] }
  0x44   :  { %2633 = vmatpush.bf16.msra.mxu2 %v4490_v25  ;;  %2584 = vmatmul.bf16.vlgmr.msrb.gmra.mxu3 %v3090_v40  ;;  %v3101_v25 = vld [vmem:[%s5866_s0 + $0x28] sm:$0xf]  ;;  %v4519_v40 = vld [vmem:[%s5865_s1 + $0x3a0] sm:$0xff] }
  0x45   :  { %2652 = vmatpush.bf16.msra.mxu3 %v4498_v35  ;;  %v3102_v32 = vor.u32 %v4360_v26, %v3101_v25  ;;  %v4529_v35 = vld [vmem:[%s5865_s1 + $0x3f0] sm:$0xff]  ;;  %v4528_v39 = vld [vmem:[%s5865_s1 + $0x3e8] sm:$0xff] }
  0x46   :  { %2596 = vmatpush.bf16.msra.mxu0 %v4473_v41  ;;  %v4511_v41 = vld [vmem:[%s5865_s1 + $0x360] sm:$0xff] }
  0x47   :  { %2615 = vmatpush.bf16.msra.mxu1 %v4481_v42  ;;  %v4503_v42 = vld [vmem:[%s5865_s1 + $0x320] sm:$0xff] }
  0x48   :  { %2634 = vmatpush.bf16.msra.mxu2 %v4489_v37  ;;  %v4512_v37 = vld [vmem:[%s5865_s1 + $0x368] sm:$0xff] }
  0x49   :  { %2653 = vmatpush.bf16.msra.mxu3 %v4497_v43  ;;  %v4527_v43 = vld [vmem:[%s5865_s1 + $0x3e0] sm:$0xff] }
  0x4a   :  { %2597 = vmatpush.bf16.msra.mxu0 %v4472_v45  ;;  %v3221_v45 = vld [vmem:[%s5866_s0 + $0x120] sm:$0xf] }
  0x4b   :  { %2616 = vmatpush.bf16.msra.mxu1 %v4480_v46  ;;  %v4391_v46 = vld [vmem:[%s5866_s0 + $0x19c] sm:$0xf0] }
  0x4c   :  { %2635 = vmatpush.bf16.msra.mxu2 %v4488_v44  ;;  %v4518_v44 = vld [vmem:[%s5865_s1 + $0x398] sm:$0xff]  ;;  %v3222_v57 = vor.u32 %v4391_v46, %v3221_v45 }
  0x4d   :  { %2654 = vmatpush.bf16.msra.mxu3 %v4496_v47  ;;  %v4510_v47 = vld [vmem:[%s5865_s1 + $0x358] sm:$0xff] }
  0x4e   :  { %2598 = vmatpush.bf16.msra.mxu0 %v4471_v49  ;;  %v3223_v49 = vld [vmem:[%s5866_s0 + $0x1a0] sm:$0xf0]  ;;  %v4394_v45 = vld [vmem:[%s5866_s0 + $0x1b4] sm:$0xf0]  ;;  %v4378_v46 = vld [vmem:[%s5866_s0 + $0x13c] sm:$0xf] }
  0x4f   :  { %2617 = vmatpush.bf16.msra.mxu1 %v4479_v50  ;;  %v3229_v50 = vld [vmem:[%s5866_s0 + $0x128] sm:$0xf] }
  0x50   :  { %2636 = vmatpush.bf16.msra.mxu2 %v4487_v48  ;;  %v4375_v48 = vld [vmem:[%s5866_s0 + $0x124] sm:$0xf] }
  0x51   :  { %2655 = vmatpush.bf16.msra.mxu3 %v4495_v51  ;;  %2532 = vmatmul.bf16.gmra.mxu0 %v3206_v0  ;;  %v4392_v51 = vld [vmem:[%s5866_s0 + $0x1a4] sm:$0xf0]  ;;  %v3226_v59 = vor.u32 %v4375_v48, %v3223_v49  ;;  %v3247_v48 = vld [vmem:[%s5866_s0 + $0x1b8] sm:$0xf0]  ;;  %v4533_v49 = vld [vmem:[%s5865_s1 + $0x410] sm:$0xff] }
  0x52   :  { %2599 = vmatpush.bf16.msra.mxu0 %v4470_v60  ;;  %2551 = vmatmul.bf16.gmra.mxu1 %v3210_v2  ;;  %v3230_v60 = vor.u32 %v4392_v51, %v3229_v50  ;;  %v4516_v0 = vld [vmem:[%s5865_s1 + $0x388] sm:$0xff]  ;;  %v4541_v50 = vld [vmem:[%s5865_s1 + $0x450] sm:$0xff] }
  0x53   :  { %2618 = vmatpush.bf16.msra.mxu1 %v4478_v62  ;;  %2570 = vmatmul.bf16.gmra.mxu2 %v3214_v3  ;;  %v4501_v62 = vld [vmem:[%s5865_s1 + $0x310] sm:$0xff]  ;;  %v4500_v2 = vld [vmem:[%s5865_s1 + $0x308] sm:$0xff] }
  0x54   :  { %2637 = vmatpush.bf16.msra.mxu2 %v4486_v54  ;;  %2589 = vmatmul.bf16.gmra.mxu3 %v3218_v4  ;;  %v3231_v54 = vld [vmem:[%s5866_s0 + $0x1a8] sm:$0xf0]  ;;  %v4515_v4 = vld [vmem:[%s5865_s1 + $0x380] sm:$0xff] }
  0x55   :  { %2656 = vmatpush.bf16.msra.mxu3 %v4494_v63  ;;  %v3234_v61 = vor.u32 %v4376_v52, %v3231_v54  ;;  %v4525_v63 = vld [vmem:[%s5865_s1 + $0x3d0] sm:$0xff]  ;;  %v4524_v3 = vld [vmem:[%s5865_s1 + $0x3c8] sm:$0xff] }
  0x56   :  { %2600 = vmatpush.bf16.msra.mxu0 %v4469_v5  ;;  %v4507_v5 = vld [vmem:[%s5865_s1 + $0x340] sm:$0xff]  ;;  %v4557_v52 = vld [vmem:[%s5865_s1 + $0x4d0] sm:$0xff] }
  0x57   :  { %2619 = vmatpush.bf16.msra.mxu1 %v4477_v6  ;;  %v4554_v6 = vld [vmem:[%s5865_s1 + $0x4b8] sm:$0xff] }
  0x58   :  { %2638 = vmatpush.bf16.msra.mxu2 %v4485_v1  ;;  %v4508_v1 = vld [vmem:[%s5865_s1 + $0x348] sm:$0xff] }
  0x59   :  { %2657 = vmatpush.bf16.msra.mxu3 %v4493_v7  ;;  %v4546_v7 = vld [vmem:[%s5865_s1 + $0x478] sm:$0xff] }
  0x5a   :  { %2601 = vmatpush.bf16.msra.mxu0 %v4468_v9  ;;  %v4523_v9 = vld [vmem:[%s5865_s1 + $0x3c0] sm:$0xff] }
  0x5b   :  { %2620 = vmatpush.bf16.msra.mxu1 %v4476_v10  ;;  %v4538_v10 = vld [vmem:[%s5865_s1 + $0x438] sm:$0xff] }
  0x5c   :  { %2639 = vmatpush.bf16.msra.mxu2 %v4484_v8  ;;  %v4499_v8 = vld [vmem:[%s5865_s1 + $0x300] sm:$0xff] }
  0x5d   :  { %2658 = vmatpush.bf16.msra.mxu3 %v4492_v11  ;;  %v3109_v11 = vld [vmem:[%s5866_s0 + $0x30] sm:$0xf] }
  0x5e   :  { %2602 = vmatpush.bf16.msra.mxu0 %v4467_v14  ;;  %v4361_v14 = vld [vmem:[%s5866_s0 + $0xac] sm:$0xf0] }
  0x5f   :  { %2621 = vmatpush.bf16.msra.mxu1 %v4475_v15  ;;  %v4345_v15 = vld [vmem:[%s5866_s0 + $0x34] sm:$0xf] }
  0x60   :  { %2640 = vmatpush.bf16.msra.mxu2 %v4483_v12  ;;  %v4562_v12 = vld [vmem:[%s5865_s1 + $0x4f8] sm:$0xff]  ;;  %v3114_v25 = vor.u32 %v4345_v15, %v3111_v17  ;;  %v3135_v15 = vld [vmem:[%s5866_s0 + $0xc8] sm:$0xf0] }
  0x61   :  { %2659 = vmatpush.bf16.msra.mxu3 %v4491_v16  ;;  %2603 = vmatmul.bf16.vlgmr.msra.gmra.mxu0 %v3094_v29  ;;  %v4545_v16 = vld [vmem:[%s5865_s1 + $0x470] sm:$0xff]  ;;  %v4536_v29 = vld [vmem:[%s5865_s1 + $0x428] sm:$0xff] }
  0x62   :  { %2671 = vmatpush.bf16.msrb.mxu0 %v4506_v19  ;;  %2622 = vmatmul.bf16.vlgmr.msra.gmra.mxu1 %v3098_v31  ;;  %v4362_v19 = vld [vmem:[%s5866_s0 + $0xb4] sm:$0xf0]  ;;  %v4560_v31 = vld [vmem:[%s5865_s1 + $0x4e8] sm:$0xff] }
  0x63   :  { %2690 = vmatpush.bf16.msrb.mxu1 %v4514_v20  ;;  %2641 = vmatmul.bf16.vlgmr.msra.gmra.mxu2 %v3102_v32  ;;  %v4346_v20 = vld [vmem:[%s5866_s0 + $0x3c] sm:$0xf]  ;;  %v3118_v26 = vor.u32 %v4362_v19, %v3117_v18  ;;  %v4551_v32 = vld [vmem:[%s5865_s1 + $0x4a0] sm:$0xff]  ;;  %v4584_v17 = vld [vmem:[%s5865_s1 + $0x5a8] sm:$0xff] }
  0x64   :  { %2709 = vmatpush.bf16.msrb.mxu2 %v4522_v13  ;;  %2660 = vmatmul.bf16.vlgmr.msra.gmra.mxu3 %v3106_v33  ;;  %v4553_v13 = vld [vmem:[%s5865_s1 + $0x4b0] sm:$0xff]  ;;  %v3122_v27 = vor.u32 %v4346_v20, %v3119_v21  ;;  %v4535_v33 = vld [vmem:[%s5865_s1 + $0x420] sm:$0xff] }
  0x65   :  { %2728 = vmatpush.bf16.msrb.mxu3 %v4530_v22  ;;  %v4537_v22 = vld [vmem:[%s5865_s1 + $0x430] sm:$0xff] }
  0x66   :  { %2672 = vmatpush.bf16.msrb.mxu0 %v4505_v34  ;;  %v4543_v34 = vld [vmem:[%s5865_s1 + $0x460] sm:$0xff] }
  0x67   :  { %2691 = vmatpush.bf16.msrb.mxu1 %v4513_v30  ;;  %v4544_v30 = vld [vmem:[%s5865_s1 + $0x468] sm:$0xff] }
  0x68   :  { %2710 = vmatpush.bf16.msrb.mxu2 %v4521_v23  ;;  %v3110_v23 = vor.u32 %v4361_v14, %v3109_v11  ;;  %v3133_v11 = vld [vmem:[%s5866_s0 + $0x48] sm:$0xf]  ;;  %v4348_v14 = vld [vmem:[%s5866_s0 + $0x4c] sm:$0xf] }
  0x69   :  { %2729 = vmatpush.bf16.msrb.mxu3 %v4529_v35  ;;  %v4559_v35 = vld [vmem:[%s5865_s1 + $0x4e0] sm:$0xff] }
  0x6a   :  { %2673 = vmatpush.bf16.msrb.mxu0 %v4504_v38  ;;  %v4542_v38 = vld [vmem:[%s5865_s1 + $0x458] sm:$0xff] }
  0x6b   :  { %2692 = vmatpush.bf16.msrb.mxu1 %v4512_v37  ;;  %v4534_v37 = vld [vmem:[%s5865_s1 + $0x418] sm:$0xff] }
  0x6c   :  { %2711 = vmatpush.bf16.msrb.mxu2 %v4520_v36  ;;  %v4550_v36 = vld [vmem:[%s5865_s1 + $0x498] sm:$0xff] }
  0x6d   :  { %2730 = vmatpush.bf16.msrb.mxu3 %v4528_v39  ;;  %v3237_v39 = vld [vmem:[%s5866_s0 + $0x130] sm:$0xf] }
  0x6e   :  { %2674 = vmatpush.bf16.msrb.mxu0 %v4503_v42  ;;  %v4377_v42 = vld [vmem:[%s5866_s0 + $0x134] sm:$0xf] }
  0x6f   :  { %2693 = vmatpush.bf16.msrb.mxu1 %v4511_v41  ;;  %v4558_v41 = vld [vmem:[%s5865_s1 + $0x4d8] sm:$0xff] }
  0x70   :  { %2712 = vmatpush.bf16.msrb.mxu2 %v4519_v40  ;;  %v4393_v40 = vld [vmem:[%s5866_s0 + $0x1ac] sm:$0xf0] }
  0x71   :  { %2731 = vmatpush.bf16.msrb.mxu3 %v4527_v43  ;;  %2608 = vmatmul.bf16.gmra.mxu0 %v3222_v57  ;;  %v3239_v43 = vld [vmem:[%s5866_s0 + $0x1b0] sm:$0xf0]  ;;  %v3238_v51 = vor.u32 %v4393_v40, %v3237_v39  ;;  %v4532_v57 = vld [vmem:[%s5865_s1 + $0x408] sm:$0xff]  ;;  %v4574_v40 = vld [vmem:[%s5865_s1 + $0x558] sm:$0xff] }
  0x72   :  { %2675 = vmatpush.bf16.msrb.mxu0 %v4502_v53  ;;  %2627 = vmatmul.bf16.gmra.mxu1 %v3226_v59  ;;  %v3242_v53 = vor.u32 %v4377_v42, %v3239_v43  ;;  %v4556_v59 = vld [vmem:[%s5865_s1 + $0x4c8] sm:$0xff]  ;;  %v3253_v42 = vld [vmem:[%s5866_s0 + $0x140] sm:$0xf] }
  0x73   :  { %2694 = vmatpush.bf16.msrb.mxu1 %v4510_v47  ;;  %2646 = vmatmul.bf16.gmra.mxu2 %v3230_v60  ;;  %v4549_v47 = vld [vmem:[%s5865_s1 + $0x490] sm:$0xff]  ;;  %v4547_v60 = vld [vmem:[%s5865_s1 + $0x480] sm:$0xff] }
  0x74   :  { %2713 = vmatpush.bf16.msrb.mxu2 %v4518_v44  ;;  %2665 = vmatmul.bf16.gmra.mxu3 %v3234_v61  ;;  %v3245_v44 = vld [vmem:[%s5866_s0 + $0x138] sm:$0xf]  ;;  %v4531_v61 = vld [vmem:[%s5865_s1 + $0x400] sm:$0xff] }
  0x75   :  { %2732 = vmatpush.bf16.msrb.mxu3 %v4526_v55  ;;  %v3246_v54 = vor.u32 %v4394_v45, %v3245_v44  ;;  %v3250_v55 = vor.u32 %v4378_v46, %v3247_v48  ;;  %v4395_v43 = vld [vmem:[%s5866_s0 + $0x1bc] sm:$0xf0]  ;;  %v4581_v44 = vld [vmem:[%s5865_s1 + $0x590] sm:$0xff]  ;;  %v4379_v45 = vld [vmem:[%s5866_s0 + $0x144] sm:$0xf] }
  0x76   :  { %2676 = vmatpush.bf16.msrb.mxu0 %v4501_v62  ;;  %v4539_v62 = vld [vmem:[%s5865_s1 + $0x440] sm:$0xff]  ;;  %v4396_v48 = vld [vmem:[%s5866_s0 + $0x1c4] sm:$0xf0] }
  0x77   :  { %2695 = vmatpush.bf16.msrb.mxu1 %v4509_v58  ;;  %v4540_v58 = vld [vmem:[%s5865_s1 + $0x448] sm:$0xff]  ;;  %v3255_v46 = vld [vmem:[%s5866_s0 + $0x1c0] sm:$0xf0] }
  0x78   :  { %2714 = vmatpush.bf16.msrb.mxu2 %v4517_v56  ;;  %v4548_v56 = vld [vmem:[%s5865_s1 + $0x488] sm:$0xff] }
  0x79   :  { %2733 = vmatpush.bf16.msrb.mxu3 %v4525_v63  ;;  %v4555_v63 = vld [vmem:[%s5865_s1 + $0x4c0] sm:$0xff] }
  0x7a   :  { %2677 = vmatpush.bf16.msrb.mxu0 %v4500_v2  ;;  %v4578_v2 = vld [vmem:[%s5865_s1 + $0x578] sm:$0xff] }
  0x7b   :  { %2696 = vmatpush.bf16.msrb.mxu1 %v4508_v1  ;;  %v4570_v1 = vld [vmem:[%s5865_s1 + $0x538] sm:$0xff] }
  0x7c   :  { %2715 = vmatpush.bf16.msrb.mxu2 %v4516_v0  ;;  %v4586_v0 = vld [vmem:[%s5865_s1 + $0x5b8] sm:$0xff] }
  0x7d   :  { %2734 = vmatpush.bf16.msrb.mxu3 %v4524_v3  ;;  %v4594_v3 = vld [vmem:[%s5865_s1 + $0x5f8] sm:$0xff] }
  0x7e   :  { %2678 = vmatpush.bf16.msrb.mxu0 %v4499_v8  ;;  %v3127_v8 = vld [vmem:[%s5866_s0 + $0xc0] sm:$0xf0] }
  0x7f   :  { %2697 = vmatpush.bf16.msrb.mxu1 %v4507_v5  ;;  %v4363_v5 = vld [vmem:[%s5866_s0 + $0xbc] sm:$0xf0] }
  0x80   :  { %2716 = vmatpush.bf16.msrb.mxu2 %v4515_v4  ;;  %v3125_v4 = vld [vmem:[%s5866_s0 + $0x40] sm:$0xf] }
  0x81   :  { %2735 = vmatpush.bf16.msrb.mxu3 %v4523_v9  ;;  %2679 = vmatmul.bf16.vlgmr.msrb.gmra.mxu0 %v3110_v23  ;;  %v4569_v9 = vld [vmem:[%s5865_s1 + $0x530] sm:$0xff]  ;;  %v3138_v23 = vor.u32 %v4348_v14, %v3135_v15 }
  0x82   :  { %2747 = vmatpush.bf16.msra.mxu0 %v4538_v10  ;;  %2698 = vmatmul.bf16.vlgmr.msrb.gmra.mxu1 %v3114_v25  ;;  %v4577_v10 = vld [vmem:[%s5865_s1 + $0x570] sm:$0xff]  ;;  %v4576_v25 = vld [vmem:[%s5865_s1 + $0x568] sm:$0xff] }
  0x83   :  { %2766 = vmatpush.bf16.msra.mxu1 %v4546_v7  ;;  %2717 = vmatmul.bf16.vlgmr.msrb.gmra.mxu2 %v3118_v26  ;;  %v4585_v7 = vld [vmem:[%s5865_s1 + $0x5b0] sm:$0xff]  ;;  %v4592_v26 = vld [vmem:[%s5865_s1 + $0x5e8] sm:$0xff] }
  0x84   :  { %2785 = vmatpush.bf16.msra.mxu2 %v4554_v6  ;;  %2736 = vmatmul.bf16.vlgmr.msrb.gmra.mxu3 %v3122_v27  ;;  %v4347_v6 = vld [vmem:[%s5866_s0 + $0x44] sm:$0xf] }
  0x85   :  { %2804 = vmatpush.bf16.msra.mxu3 %v4562_v12  ;;  %v4364_v12 = vld [vmem:[%s5866_s0 + $0xc4] sm:$0xf0]  ;;  %v3130_v20 = vor.u32 %v4347_v6, %v3127_v8  ;;  %v4583_v27 = vld [vmem:[%s5865_s1 + $0x5a0] sm:$0xff]  ;;  %v4618_v6 = vld [vmem:[%s5865_s1 + $0x6b8] sm:$0xff] }
  0x86   :  { %2748 = vmatpush.bf16.msra.mxu0 %v4537_v22  ;;  %v3134_v21 = vor.u32 %v4364_v12, %v3133_v11  ;;  %v4571_v8 = vld [vmem:[%s5865_s1 + $0x540] sm:$0xff]  ;;  %v4602_v12 = vld [vmem:[%s5865_s1 + $0x638] sm:$0xff] }
  0x87   :  { %2767 = vmatpush.bf16.msra.mxu1 %v4545_v16  ;;  %v3126_v16 = vor.u32 %v4363_v5, %v3125_v4  ;;  %v4588_v4 = vld [vmem:[%s5865_s1 + $0x5c8] sm:$0xff]  ;;  %v4579_v5 = vld [vmem:[%s5865_s1 + $0x580] sm:$0xff] }
  0x88   :  { %2786 = vmatpush.bf16.msra.mxu2 %v4553_v13  ;;  %v4593_v13 = vld [vmem:[%s5865_s1 + $0x5f0] sm:$0xff] }
  0x89   :  { %2805 = vmatpush.bf16.msra.mxu3 %v4561_v24  ;;  %v4568_v24 = vld [vmem:[%s5865_s1 + $0x528] sm:$0xff] }
  0x8a   :  { %2749 = vmatpush.bf16.msra.mxu0 %v4536_v29  ;;  %v4575_v29 = vld [vmem:[%s5865_s1 + $0x560] sm:$0xff] }
  0x8b   :  { %2768 = vmatpush.bf16.msra.mxu1 %v4544_v30  ;;  %v4591_v30 = vld [vmem:[%s5865_s1 + $0x5e0] sm:$0xff] }
  0x8c   :  { %2787 = vmatpush.bf16.msra.mxu2 %v4552_v28  ;;  %v4567_v28 = vld [vmem:[%s5865_s1 + $0x520] sm:$0xff] }
  0x8d   :  { %2806 = vmatpush.bf16.msra.mxu3 %v4560_v31 }
  0x8e   :  { %2750 = vmatpush.bf16.msra.mxu0 %v4535_v33  ;;  %v4582_v33 = vld [vmem:[%s5865_s1 + $0x598] sm:$0xff] }
  0x8f   :  { %2769 = vmatpush.bf16.msra.mxu1 %v4543_v34 }
  0x90   :  { %2788 = vmatpush.bf16.msra.mxu2 %v4551_v32 }
  0x91   :  { %2807 = vmatpush.bf16.msra.mxu3 %v4559_v35  ;;  %2684 = vmatmul.bf16.gmra.mxu0 %v3238_v51  ;;  %v3263_v51 = vld [vmem:[%s5866_s0 + $0x1c8] sm:$0xf0] }
  0x92   :  { %2751 = vmatpush.bf16.msra.mxu0 %v4534_v37  ;;  %2703 = vmatmul.bf16.gmra.mxu1 %v3242_v53  ;;  %v4589_v53 = vld [vmem:[%s5865_s1 + $0x5d0] sm:$0xff] }
  0x93   :  { %2770 = vmatpush.bf16.msra.mxu1 %v4542_v38  ;;  %2722 = vmatmul.bf16.gmra.mxu2 %v3246_v54  ;;  %v4566_v38 = vld [vmem:[%s5865_s1 + $0x518] sm:$0xff] }
  0x94   :  { %2789 = vmatpush.bf16.msra.mxu2 %v4550_v36  ;;  %2741 = vmatmul.bf16.gmra.mxu3 %v3250_v55 }
  0x95   :  { %2808 = vmatpush.bf16.msra.mxu3 %v4558_v41  ;;  %v4590_v41 = vld [vmem:[%s5865_s1 + $0x5d8] sm:$0xff] }
  0x96   :  { %2752 = vmatpush.bf16.msra.mxu0 %v4533_v49  ;;  %v4380_v49 = vld [vmem:[%s5866_s0 + $0x14c] sm:$0xf] }
  0x97   :  { %2771 = vmatpush.bf16.msra.mxu1 %v4541_v50  ;;  %v4565_v50 = vld [vmem:[%s5865_s1 + $0x510] sm:$0xff] }
  0x98   :  { %2790 = vmatpush.bf16.msra.mxu2 %v4549_v47  ;;  %v3261_v47 = vld [vmem:[%s5866_s0 + $0x148] sm:$0xf] }
  0x99   :  { %2809 = vmatpush.bf16.msra.mxu3 %v4557_v52  ;;  %v4573_v52 = vld [vmem:[%s5865_s1 + $0x550] sm:$0xff] }
  0x9a   :  { %2753 = vmatpush.bf16.msra.mxu0 %v4532_v57  ;;  %v4580_v57 = vld [vmem:[%s5865_s1 + $0x588] sm:$0xff] }
  0x9b   :  { %2772 = vmatpush.bf16.msra.mxu1 %v4540_v58 }
  0x9c   :  { %2791 = vmatpush.bf16.msra.mxu2 %v4548_v56  ;;  %v3254_v56 = vor.u32 %v4395_v43, %v3253_v42 }
  0x9d   :  { %2810 = vmatpush.bf16.msra.mxu3 %v4556_v59 }
  0x9e   :  { %2754 = vmatpush.bf16.msra.mxu0 %v4531_v61  ;;  %v2452_v18 = vpop.f32.mrf.mxu0  ;;  %v3258_v61 = vor.u32 %v4379_v45, %v3255_v46  ;;  %v4600_v45 = vld [vmem:[%s5865_s1 + $0x628] sm:$0xff] }
  0x9f   :  { %2773 = vmatpush.bf16.msra.mxu1 %v4539_v62  ;;  %v2471_v19 = vpop.f32.mrf.mxu1  ;;  %v3262_v62 = vor.u32 %v4396_v48, %v3261_v47  ;;  %v4624_v47 = vld [vmem:[%s5865_s1 + $0x6e8] sm:$0xff]  ;;  %v4615_v48 = vld [vmem:[%s5865_s1 + $0x6a0] sm:$0xff] }
  0xa0   :  { %2792 = vmatpush.bf16.msra.mxu2 %v4547_v60  ;;  %v2472_v22 = vadd.f32 %v2471_v19, %v2452_v18  ;;  %v4617_v18 = vld [vmem:[%s5865_s1 + $0x6b0] sm:$0xff] }
  0xa1   :  { %2811 = vmatpush.bf16.msra.mxu3 %v4555_v63  ;;  %2755 = vmatmul.bf16.vlgmr.msra.gmra.mxu0 %v3126_v16 }
  0xa2   :  { %2823 = vmatpush.bf16.msrb.mxu0 %v4570_v1  ;;  %2774 = vmatmul.bf16.vlgmr.msra.gmra.mxu1 %v3130_v20  ;;  %v4564_v1 = vld [vmem:[%s5865_s1 + $0x508] sm:$0xff] }
  0xa3   :  { %2842 = vmatpush.bf16.msrb.mxu1 %v4578_v2  ;;  %2793 = vmatmul.bf16.vlgmr.msra.gmra.mxu2 %v3134_v21  ;;  %v3141_v21 = vld [vmem:[%s5866_s0 + $0x50] sm:$0xf] }
  0xa4   :  { %2861 = vmatpush.bf16.msrb.mxu2 %v4586_v0  ;;  %2812 = vmatmul.bf16.vlgmr.msra.gmra.mxu3 %v3138_v23  ;;  %v3266_v0 = vor.u32 %v4380_v49, %v3263_v51  ;;  %v4601_v23 = vld [vmem:[%s5865_s1 + $0x630] sm:$0xff]  ;;  %v4623_v51 = vld [vmem:[%s5865_s1 + $0x6e0] sm:$0xff] }
  0xa5   :  { %2880 = vmatpush.bf16.msrb.mxu3 %v4594_v3  ;;  %v4572_v3 = vld [vmem:[%s5865_s1 + $0x548] sm:$0xff] }
  0xa6   :  { %2824 = vmatpush.bf16.msrb.mxu0 %v4569_v9  ;;  %v2490_v31 = vpop.f32.mrf.mxu2  ;;  %v2454_v35 = vpop.f32.mrf.mxu0  ;;  %v4587_v9 = vld [vmem:[%s5865_s1 + $0x5c0] sm:$0xff] }
  0xa7   :  { %2843 = vmatpush.bf16.msrb.mxu1 %v4577_v10  ;;  %v2509_v32 = vpop.f32.mrf.mxu3  ;;  %v2491_v34 = vadd.f32 %v2490_v31, %v2472_v22  ;;  %v2473_v36 = vpop.f32.mrf.mxu1  ;;  %v4365_v22 = vld [vmem:[%s5866_s0 + $0xcc] sm:$0xf0]  ;;  %v4350_v31 = vld [vmem:[%s5866_s0 + $0x5c] sm:$0xf] }
  0xa8   :  { %2862 = vmatpush.bf16.msrb.mxu2 %v4585_v7  ;;  %v2474_v37 = vadd.f32 %v2473_v36, %v2454_v35  ;;  %v4563_v7 = vld [vmem:[%s5865_s1 + $0x500] sm:$0xff]  ;;  %v3142_v35 = vor.u32 %v4365_v22, %v3141_v21  ;;  %v4608_v36 = vld [vmem:[%s5865_s1 + $0x668] sm:$0xff] }
  0xa9   :  { %2881 = vmatpush.bf16.msrb.mxu3 %v4593_v13  ;;  %v5424_v39 = vadd.f32 %v2509_v32, %v2491_v34  ;;  %v4610_v13 = vld [vmem:[%s5865_s1 + $0x678] sm:$0xff] }
  0xaa   :  { %2825 = vmatpush.bf16.msrb.mxu0 %v4568_v24  ;;  %v4609_v24 = vld [vmem:[%s5865_s1 + $0x670] sm:$0xff]  ;;  %v3151_v32 = vld [vmem:[%s5866_s0 + $0xd8] sm:$0xf0] }
  0xab   :  { %2844 = vmatpush.bf16.msrb.mxu1 %v4576_v25  ;;  %v4349_v25 = vld [vmem:[%s5866_s0 + $0x54] sm:$0xf] }
  0xac   :  { %2863 = vmatpush.bf16.msrb.mxu2 %v4584_v17  ;;  %v4626_v17 = vld [vmem:[%s5865_s1 + $0x6f8] sm:$0xff] }
  0xad   :  { %2882 = vmatpush.bf16.msrb.mxu3 %v4592_v26  ;;  %v4625_v26 = vld [vmem:[%s5865_s1 + $0x6f0] sm:$0xff] }
  0xae   :  { %2826 = vmatpush.bf16.msrb.mxu0 %v4567_v28  ;;  %v2492_v54 = vpop.f32.mrf.mxu2  ;;  %v2457_v59 = vpop.f32.mrf.mxu0  ;;  %v3143_v28 = vld [vmem:[%s5866_s0 + $0xd0] sm:$0xf0] }
  0xaf   :  { %2845 = vmatpush.bf16.msrb.mxu1 %v4575_v29  ;;  %v2511_v55 = vpop.f32.mrf.mxu3  ;;  %v2493_v58 = vadd.f32 %v2492_v54, %v2474_v37  ;;  %v2476_v60 = vpop.f32.mrf.mxu1  ;;  %v3149_v29 = vld [vmem:[%s5866_s0 + $0x58] sm:$0xf] }
  0xb0   :  { %2864 = vmatpush.bf16.msrb.mxu2 %v4583_v27  ;;  %v2477_v63 = vadd.f32 %v2476_v60, %v2457_v59  ;;  %v4616_v27 = vld [vmem:[%s5865_s1 + $0x6a8] sm:$0xff]  ;;  %v4606_v54 = vld [vmem:[%s5865_s1 + $0x658] sm:$0xff] }
  0xb1   :  { %2883 = vmatpush.bf16.msrb.mxu3 %v4591_v30  ;;  %v5474_v2 = vadd.f32 %v2511_v55, %v2493_v58  ;;  %2760 = vmatmul.bf16.gmra.mxu0 %v3254_v56  ;;  %v4366_v30 = vld [vmem:[%s5866_s0 + $0xd4] sm:$0xf0] }
  0xb2   :  { %2827 = vmatpush.bf16.msrb.mxu0 %v4566_v38  ;;  %2779 = vmatmul.bf16.gmra.mxu1 %v3258_v61  ;;  %v4598_v60 = vld [vmem:[%s5865_s1 + $0x618] sm:$0xff] }
  0xb3   :  { %2846 = vmatpush.bf16.msrb.mxu1 %v4574_v40  ;;  %2798 = vmatmul.bf16.gmra.mxu2 %v3262_v62  ;;  %v3146_v40 = vor.u32 %v4349_v25, %v3143_v28  ;;  %v4622_v62 = vld [vmem:[%s5865_s1 + $0x6d8] sm:$0xff]  ;;  %v4596_v25 = vld [vmem:[%s5865_s1 + $0x608] sm:$0xff]  ;;  %v4611_v28 = vld [vmem:[%s5865_s1 + $0x680] sm:$0xff] }
  0xb4   :  { %2865 = vmatpush.bf16.msrb.mxu2 %v4582_v33  ;;  %2817 = vmatmul.bf16.gmra.mxu3 %v3266_v0 }
  0xb5   :  { %2884 = vmatpush.bf16.msrb.mxu3 %v4590_v41  ;;  %v3150_v41 = vor.u32 %v4366_v30, %v3149_v29  ;;  %v4603_v29 = vld [vmem:[%s5865_s1 + $0x640] sm:$0xff]  ;;  %v4650_v30 = vld [vmem:[%s5865_s1 + $0x7b8] sm:$0xff] }
  0xb6   :  { %2828 = vmatpush.bf16.msrb.mxu0 %v4565_v50  ;;  %v2495_v10 = vpop.f32.mrf.mxu2  ;;  %v2459_v15 = vpop.f32.mrf.mxu0  ;;  %v4599_v50 = vld [vmem:[%s5865_s1 + $0x620] sm:$0xff] }
  0xb7   :  { %2847 = vmatpush.bf16.msrb.mxu1 %v4573_v52  ;;  %v2514_v11 = vpop.f32.mrf.mxu3  ;;  %v2496_v14 = vadd.f32 %v2495_v10, %v2477_v63  ;;  %v2478_v16 = vpop.f32.mrf.mxu1  ;;  %v4614_v52 = vld [vmem:[%s5865_s1 + $0x698] sm:$0xff]  ;;  %v4613_v63 = vld [vmem:[%s5865_s1 + $0x690] sm:$0xff] }
  0xb8   :  { %2866 = vmatpush.bf16.msrb.mxu2 %v4581_v44  ;;  %v2479_v19 = vadd.f32 %v2478_v16, %v2459_v15  ;;  %v3154_v44 = vor.u32 %v4350_v31, %v3151_v32  ;;  %v3279_v10 = vld [vmem:[%s5866_s0 + $0x1d8] sm:$0xf0]  ;;  %v4604_v15 = vld [vmem:[%s5865_s1 + $0x648] sm:$0xff]  ;;  %v4595_v32 = vld [vmem:[%s5865_s1 + $0x600] sm:$0xff] }
  0xb9   :  { %2885 = vmatpush.bf16.msrb.mxu3 %v4589_v53  ;;  %v5509_v20 = vadd.f32 %v2514_v11, %v2496_v14  ;;  %v4621_v11 = vld [vmem:[%s5865_s1 + $0x6d0] sm:$0xff]  ;;  %v4642_v31 = vld [vmem:[%s5865_s1 + $0x778] sm:$0xff] }
  0xba   :  { %2829 = vmatpush.bf16.msrb.mxu0 %v4564_v1  ;;  %v3269_v1 = vld [vmem:[%s5866_s0 + $0x150] sm:$0xf] }
  0xbb   :  { %2848 = vmatpush.bf16.msrb.mxu1 %v4572_v3  ;;  %v4605_v3 = vld [vmem:[%s5865_s1 + $0x650] sm:$0xff] }
  0xbc   :  { %2867 = vmatpush.bf16.msrb.mxu2 %v4580_v57 }
  0xbd   :  { %2886 = vmatpush.bf16.msrb.mxu3 %v4588_v4  ;;  %v4381_v4 = vld [vmem:[%s5866_s0 + $0x154] sm:$0xf] }
  0xbe   :  { %2830 = vmatpush.bf16.msrb.mxu0 %v4563_v7  ;;  %v2497_v33 = vpop.f32.mrf.mxu2  ;;  %v2528_v38 = vpop.f32.mrf.mxu0  ;;  %v4398_v7 = vld [vmem:[%s5866_s0 + $0x1d4] sm:$0xf0] }
  0xbf   :  { %2849 = vmatpush.bf16.msrb.mxu1 %v4571_v8  ;;  %v2516_v34 = vpop.f32.mrf.mxu3  ;;  %v2498_v37 = vadd.f32 %v2497_v33, %v2479_v19  ;;  %v2529_v42 = vadd.f32 %v2528_v38, %v5424_v39  ;;  %v2547_v43 = vpop.f32.mrf.mxu1  ;;  %v4607_v39 = vld [vmem:[%s5865_s1 + $0x660] sm:$0xff]  ;;  %v4382_v8 = vld [vmem:[%s5866_s0 + $0x15c] sm:$0xf] }
  0xc0   :  { %2868 = vmatpush.bf16.msrb.mxu2 %v4579_v5  ;;  %v3271_v5 = vld [vmem:[%s5866_s0 + $0x1d0] sm:$0xf0]  ;;  %v4619_v33 = vld [vmem:[%s5865_s1 + $0x6c0] sm:$0xff] }
  0xc1   :  { %2887 = vmatpush.bf16.msrb.mxu3 %v4587_v9  ;;  %v5554_v46 = vadd.f32 %v2516_v34, %v2498_v37  ;;  %v2548_v49 = vadd.f32 %v2547_v43, %v2529_v42  ;;  %2831 = vmatmul.bf16.vlgmr.msrb.gmra.mxu0 %v3142_v35  ;;  %v4597_v9 = vld [vmem:[%s5865_s1 + $0x610] sm:$0xff]  ;;  %v3274_v19 = vor.u32 %v4381_v4, %v3271_v5  ;;  %v4634_v34 = vld [vmem:[%s5865_s1 + $0x738] sm:$0xff] }
  0xc2   :  { %2899 = vmatpush.bf16.msra.mxu0 %v4602_v12  ;;  %2850 = vmatmul.bf16.vlgmr.msrb.gmra.mxu1 %v3146_v40  ;;  %v4612_v12 = vld [vmem:[%s5865_s1 + $0x688] sm:$0xff]  ;;  %v4649_v37 = vld [vmem:[%s5865_s1 + $0x7b0] sm:$0xff] }
  0xc3   :  { %2918 = vmatpush.bf16.msra.mxu1 %v4610_v13  ;;  %2869 = vmatmul.bf16.vlgmr.msrb.gmra.mxu2 %v3150_v41  ;;  %v4641_v42 = vld [vmem:[%s5865_s1 + $0x770] sm:$0xff] }
  0xc4   :  { %2937 = vmatpush.bf16.msra.mxu2 %v4618_v6  ;;  %2888 = vmatmul.bf16.vlgmr.msrb.gmra.mxu3 %v3154_v44  ;;  %v3277_v6 = vld [vmem:[%s5866_s0 + $0x158] sm:$0xf] }
  0xc5   :  { %2956 = vmatpush.bf16.msra.mxu3 %v4626_v17  ;;  %v3278_v21 = vor.u32 %v4398_v7, %v3277_v6  ;;  %v4647_v7 = vld [vmem:[%s5865_s1 + $0x7a0] sm:$0xff] }
  0xc6   :  { %2900 = vmatpush.bf16.msra.mxu0 %v4601_v23  ;;  %v2566_v53 = vpop.f32.mrf.mxu2  ;;  %v2530_v57 = vpop.f32.mrf.mxu0 }
  0xc7   :  { %2919 = vmatpush.bf16.msra.mxu1 %v4609_v24  ;;  %v2567_v55 = vadd.f32 %v2566_v53, %v2548_v49  ;;  %v2585_v56 = vpop.f32.mrf.mxu3  ;;  %v2531_v58 = vadd.f32 %v2530_v57, %v5474_v2  ;;  %v2549_v59 = vpop.f32.mrf.mxu1  ;;  %v4397_v2 = vld [vmem:[%s5866_s0 + $0x1cc] sm:$0xf0]  ;;  %v3282_v24 = vor.u32 %v4382_v8, %v3279_v10  ;;  %v3157_v49 = vld [vmem:[%s5866_s0 + $0x60] sm:$0xf]  ;;  %v3159_v53 = vld [vmem:[%s5866_s0 + $0xe0] sm:$0xf0] }
  0xc8   :  { %2938 = vmatpush.bf16.msra.mxu2 %v4617_v18  ;;  %v3270_v14 = vor.u32 %v4397_v2, %v3269_v1  ;;  %v3167_v57 = vld [vmem:[%s5866_s0 + $0xe8] sm:$0xf0]  ;;  %v4639_v10 = vld [vmem:[%s5865_s1 + $0x760] sm:$0xff] }
  0xc9   :  { %2957 = vmatpush.bf16.msra.mxu3 %v4625_v26  ;;  %v5581_v61 = vadd.f32 %v2585_v56, %v2567_v55  ;;  %v2550_v0 = vadd.f32 %v2549_v59, %v2531_v58  ;;  %v4368_v55 = vld [vmem:[%s5866_s0 + $0xe4] sm:$0xf0]  ;;  %v4352_v56 = vld [vmem:[%s5866_s0 + $0x6c] sm:$0xf] }
  0xca   :  { %2901 = vmatpush.bf16.msra.mxu0 %v4600_v45  ;;  %v4632_v58 = vld [vmem:[%s5865_s1 + $0x728] sm:$0xff]  ;;  %v3170_v6 = vor.u32 %v4352_v56, %v3167_v57 }
  0xcb   :  { %2920 = vmatpush.bf16.msra.mxu1 %v4608_v36  ;;  %v4658_v36 = vld [vmem:[%s5865_s1 + $0x7f8] sm:$0xff] }
  0xcc   :  { %2939 = vmatpush.bf16.msra.mxu2 %v4616_v27  ;;  %v4620_v27 = vld [vmem:[%s5865_s1 + $0x6c8] sm:$0xff] }
  0xcd   :  { %2958 = vmatpush.bf16.msra.mxu3 %v4624_v47  ;;  %v4633_v47 = vld [vmem:[%s5865_s1 + $0x730] sm:$0xff] }
  0xce   :  { %2902 = vmatpush.bf16.msra.mxu0 %v4599_v50  ;;  %v2568_v13 = vpop.f32.mrf.mxu2  ;;  %v2533_v18 = vpop.f32.mrf.mxu0  ;;  %v4367_v50 = vld [vmem:[%s5866_s0 + $0xdc] sm:$0xf0] }
  0xcf   :  { %2921 = vmatpush.bf16.msra.mxu1 %v4607_v39  ;;  %v2569_v16 = vadd.f32 %v2568_v13, %v2550_v0  ;;  %v2587_v17 = vpop.f32.mrf.mxu3  ;;  %v2534_v22 = vadd.f32 %v2533_v18, %v5509_v20  ;;  %v2552_v23 = vpop.f32.mrf.mxu1  ;;  %v4648_v39 = vld [vmem:[%s5865_s1 + $0x7a8] sm:$0xff]  ;;  %v4630_v13 = vld [vmem:[%s5865_s1 + $0x718] sm:$0xff] }
  0xd0   :  { %2940 = vmatpush.bf16.msra.mxu2 %v4615_v48 }
  0xd1   :  { %2959 = vmatpush.bf16.msra.mxu3 %v4623_v51  ;;  %v5632_v26 = vadd.f32 %v2587_v17, %v2569_v16  ;;  %v2553_v20 = vadd.f32 %v2552_v23, %v2534_v22  ;;  %2836 = vmatmul.bf16.gmra.mxu0 %v3270_v14  ;;  %v4351_v51 = vld [vmem:[%s5866_s0 + $0x64] sm:$0xf]  ;;  %v4638_v14 = vld [vmem:[%s5865_s1 + $0x758] sm:$0xff]  ;;  %v4645_v23 = vld [vmem:[%s5865_s1 + $0x790] sm:$0xff] }
  0xd2   :  { %2903 = vmatpush.bf16.msra.mxu0 %v4598_v60  ;;  %2855 = vmatmul.bf16.gmra.mxu1 %v3274_v19  ;;  %v3158_v60 = vor.u32 %v4367_v50, %v3157_v49  ;;  %v3162_v2 = vor.u32 %v4351_v51, %v3159_v53  ;;  %v4654_v16 = vld [vmem:[%s5865_s1 + $0x7d8] sm:$0xff]  ;;  %v4643_v51 = vld [vmem:[%s5865_s1 + $0x780] sm:$0xff] }
  0xd3   :  { %2922 = vmatpush.bf16.msra.mxu1 %v4606_v54  ;;  %2874 = vmatmul.bf16.gmra.mxu2 %v3278_v21  ;;  %v3165_v54 = vld [vmem:[%s5866_s0 + $0x68] sm:$0xf]  ;;  %v4627_v53 = vld [vmem:[%s5865_s1 + $0x700] sm:$0xff] }
  0xd4   :  { %2941 = vmatpush.bf16.msra.mxu2 %v4614_v52  ;;  %2893 = vmatmul.bf16.gmra.mxu3 %v3282_v24  ;;  %v4640_v52 = vld [vmem:[%s5865_s1 + $0x768] sm:$0xff] }
  0xd5   :  { %2960 = vmatpush.bf16.msra.mxu3 %v4622_v62  ;;  %v4656_v62 = vld [vmem:[%s5865_s1 + $0x7e8] sm:$0xff] }
  0xd6   :  { %2904 = vmatpush.bf16.msra.mxu0 %v4597_v9  ;;  %v2571_v35 = vpop.f32.mrf.mxu2  ;;  %v2535_v41 = vpop.f32.mrf.mxu0  ;;  %v4631_v9 = vld [vmem:[%s5865_s1 + $0x720] sm:$0xff] }
  0xd7   :  { %2923 = vmatpush.bf16.msra.mxu1 %v4605_v3  ;;  %v2572_v38 = vadd.f32 %v2571_v35, %v2553_v20  ;;  %v2590_v40 = vpop.f32.mrf.mxu3  ;;  %v2536_v43 = vadd.f32 %v2535_v41, %v5554_v46  ;;  %v2554_v44 = vpop.f32.mrf.mxu1  ;;  %v4657_v46 = vld [vmem:[%s5865_s1 + $0x7f0] sm:$0xff]  ;;  %v3166_v3 = vor.u32 %v4368_v55, %v3165_v54  ;;  %v4399_v20 = vld [vmem:[%s5866_s0 + $0x1dc] sm:$0xf0]  ;;  %v4644_v35 = vld [vmem:[%s5865_s1 + $0x788] sm:$0xff] }
  0xd8   :  { %2942 = vmatpush.bf16.msra.mxu2 %v4613_v63  ;;  %v4635_v54 = vld [vmem:[%s5865_s1 + $0x740] sm:$0xff] }
  0xd9   :  { %2961 = vmatpush.bf16.msra.mxu3 %v4621_v11  ;;  %v5668_v45 = vadd.f32 %v2590_v40, %v2572_v38  ;;  %v2555_v48 = vadd.f32 %v2554_v44, %v2536_v43  ;;  %v4636_v38 = vld [vmem:[%s5865_s1 + $0x748] sm:$0xff] }
  0xda   :  { %2905 = vmatpush.bf16.msra.mxu0 %v4596_v25  ;;  %v4629_v25 = vld [vmem:[%s5865_s1 + $0x710] sm:$0xff] }
  0xdb   :  { %2924 = vmatpush.bf16.msra.mxu1 %v4604_v15 }
  0xdc   :  { %2943 = vmatpush.bf16.msra.mxu2 %v4612_v12  ;;  %v4646_v12 = vld [vmem:[%s5865_s1 + $0x798] sm:$0xff] }
  0xdd   :  { %2962 = vmatpush.bf16.msra.mxu3 %v4620_v27  ;;  %v4637_v27 = vld [vmem:[%s5865_s1 + $0x750] sm:$0xff] }
  0xde   :  { %2906 = vmatpush.bf16.msra.mxu0 %v4595_v32  ;;  %v2573_v59 = vpop.f32.mrf.mxu2  ;;  %v2604_v1 = vpop.f32.mrf.mxu0  ;;  %v3293_v32 = vld [vmem:[%s5866_s0 + $0x168] sm:$0xf] }
  0xdf   :  { %2925 = vmatpush.bf16.msra.mxu1 %v4603_v29  ;;  %v2574_v63 = vadd.f32 %v2573_v59, %v2555_v48  ;;  %v2592_v0 = vpop.f32.mrf.mxu3  ;;  %v2605_v4 = vadd.f32 %v2604_v1, %v5581_v61  ;;  %v2623_v5 = vpop.f32.mrf.mxu1  ;;  %v4655_v61 = vld [vmem:[%s5865_s1 + $0x7e0] sm:$0xff]  ;;  %v4653_v29 = vld [vmem:[%s5865_s1 + $0x7d0] sm:$0xff] }
  0xe0   :  { %2944 = vmatpush.bf16.msra.mxu2 %v4611_v28  ;;  %v3173_v1 = vld [vmem:[%s5866_s0 + $0x70] sm:$0xf] }
  0xe1   :  { %2963 = vmatpush.bf16.msra.mxu3 %v4619_v33  ;;  %v5716_v8 = vadd.f32 %v2592_v0, %v2574_v63  ;;  %v2624_v11 = vadd.f32 %v2623_v5, %v2605_v4  ;;  %2907 = vmatmul.bf16.vlgmr.msra.gmra.mxu0 %v3158_v60  ;;  %v4400_v33 = vld [vmem:[%s5866_s0 + $0x1e4] sm:$0xf0]  ;;  %v3175_v4 = vld [vmem:[%s5866_s0 + $0xf0] sm:$0xf0]  ;;  %v3181_v5 = vld [vmem:[%s5866_s0 + $0x78] sm:$0xf] }
  0xe2   :  { %2975 = vmatpush.bf16.msrb.mxu0 %v4634_v34  ;;  %2926 = vmatmul.bf16.vlgmr.msra.gmra.mxu1 %v3162_v2  ;;  %v4384_v34 = vld [vmem:[%s5866_s0 + $0x16c] sm:$0xf]  ;;  %v3294_v49 = vor.u32 %v4400_v33, %v3293_v32  ;;  %v4369_v2 = vld [vmem:[%s5866_s0 + $0xec] sm:$0xf0]  ;;  %v3309_v32 = vld [vmem:[%s5866_s0 + $0x178] sm:$0xf] }
  0xe3   :  { %2994 = vmatpush.bf16.msrb.mxu1 %v4642_v31  ;;  %2945 = vmatmul.bf16.vlgmr.msra.gmra.mxu2 %v3166_v3  ;;  %v3287_v31 = vld [vmem:[%s5866_s0 + $0x1e0] sm:$0xf0]  ;;  %v4353_v3 = vld [vmem:[%s5866_s0 + $0x74] sm:$0xf]  ;;  %v4402_v33 = vld [vmem:[%s5866_s0 + $0x1f4] sm:$0xf0] }
  0xe4   :  { %3013 = vmatpush.bf16.msrb.mxu2 %v4650_v30  ;;  %2964 = vmatmul.bf16.vlgmr.msra.gmra.mxu3 %v3170_v6  ;;  %v4383_v30 = vld [vmem:[%s5866_s0 + $0x164] sm:$0xf]  ;;  %v4370_v6 = vld [vmem:[%s5866_s0 + $0xf4] sm:$0xf0] }
  0xe5   :  { %3032 = vmatpush.bf16.msrb.mxu3 %v4658_v36  ;;  %v3295_v36 = vld [vmem:[%s5866_s0 + $0x1e8] sm:$0xf0]  ;;  %v3290_v48 = vor.u32 %v4383_v30, %v3287_v31  ;;  %v4385_v30 = vld [vmem:[%s5866_s0 + $0x174] sm:$0xf] }
  0xe6   :  { %2976 = vmatpush.bf16.msrb.mxu0 %v4633_v47  ;;  %v2642_v15 = vpop.f32.mrf.mxu2  ;;  %v2606_v19 = vpop.f32.mrf.mxu0  ;;  %v3298_v50 = vor.u32 %v4384_v34, %v3295_v36  ;;  %v3303_v31 = vld [vmem:[%s5866_s0 + $0x1f0] sm:$0xf0]  ;;  %v4386_v34 = vld [vmem:[%s5866_s0 + $0x17c] sm:$0xf] }
  0xe7   :  { %2995 = vmatpush.bf16.msrb.mxu1 %v4641_v42  ;;  %v2643_v17 = vadd.f32 %v2642_v15, %v2624_v11  ;;  %v2661_v18 = vpop.f32.mrf.mxu3  ;;  %v2607_v21 = vadd.f32 %v2606_v19, %v5632_v26  ;;  %v2625_v22 = vpop.f32.mrf.mxu1  ;;  %v3285_v26 = vld [vmem:[%s5866_s0 + $0x160] sm:$0xf]  ;;  %v4652_v42 = vld [vmem:[%s5865_s1 + $0x7c8] sm:$0xff] }
  0xe8   :  { %3014 = vmatpush.bf16.msrb.mxu2 %v4649_v37  ;;  %v4628_v37 = vld [vmem:[%s5865_s1 + $0x708] sm:$0xff]  ;;  %v3286_v41 = vor.u32 %v4399_v20, %v3285_v26 }
  0xe9   :  { %3033 = vmatpush.bf16.msrb.mxu3 %v4657_v46  ;;  %v5743_v24 = vadd.f32 %v2661_v18, %v2643_v17  ;;  %v2626_v28 = vadd.f32 %v2625_v22, %v2607_v21 }
  0xea   :  { %2977 = vmatpush.bf16.msrb.mxu0 %v4632_v58 }
  0xeb   :  { %2996 = vmatpush.bf16.msrb.mxu1 %v4640_v52 }
  0xec   :  { %3015 = vmatpush.bf16.msrb.mxu2 %v4648_v39 }
  0xed   :  { %3034 = vmatpush.bf16.msrb.mxu3 %v4656_v62 }
  0xee   :  { %2978 = vmatpush.bf16.msrb.mxu0 %v4631_v9  ;;  %v2644_v40 = vpop.f32.mrf.mxu2  ;;  %v2609_v47 = vpop.f32.mrf.mxu0 }
  0xef   :  { %2997 = vmatpush.bf16.msrb.mxu1 %v4639_v10  ;;  %v2645_v43 = vadd.f32 %v2644_v40, %v2626_v28  ;;  %v2663_v44 = vpop.f32.mrf.mxu3  ;;  %v2610_v46 = vadd.f32 %v2609_v47, %v5668_v45  ;;  %v2628_v39 = vpop.f32.mrf.mxu1  ;;  %v4651_v45 = vld [vmem:[%s5865_s1 + $0x7c0] sm:$0xff]  ;;  %v3174_v10 = vor.u32 %v4369_v2, %v3173_v1 }
  0xf0   :  { %3016 = vmatpush.bf16.msrb.mxu2 %v4647_v7  ;;  %v4354_v7 = vld [vmem:[%s5866_s0 + $0x7c] sm:$0xf] }
  0xf1   :  { %3035 = vmatpush.bf16.msrb.mxu3 %v4655_v61  ;;  %v2664_v52 = vadd.f32 %v2663_v44, %v2645_v43  ;;  %v2629_v55 = vadd.f32 %v2628_v39, %v2610_v46  ;;  %2912 = vmatmul.bf16.gmra.mxu0 %v3286_v41  ;;  %v3310_v43 = vor.u32 %v4402_v33, %v3309_v32 }
  0xf2   :  { %2979 = vmatpush.bf16.msrb.mxu0 %v4630_v13  ;;  %2931 = vmatmul.bf16.gmra.mxu1 %v3290_v48  ;;  %v3178_v13 = vor.u32 %v4353_v3, %v3175_v4 }
  0xf3   :  { %2998 = vmatpush.bf16.msrb.mxu1 %v4638_v14  ;;  %2950 = vmatmul.bf16.gmra.mxu2 %v3294_v49  ;;  %v3182_v14 = vor.u32 %v4370_v6, %v3181_v5 }
  0xf4   :  { %3017 = vmatpush.bf16.msrb.mxu2 %v4646_v12  ;;  %2969 = vmatmul.bf16.gmra.mxu3 %v3298_v50 }
  0xf5   :  { %3036 = vmatpush.bf16.msrb.mxu3 %v4654_v16 }
  0xf6   :  { %2980 = vmatpush.bf16.msrb.mxu0 %v4629_v25  ;;  %v2647_v56 = vpop.f32.mrf.mxu2  ;;  %v2611_v59 = vpop.f32.mrf.mxu0 }
  0xf7   :  { %2999 = vmatpush.bf16.msrb.mxu1 %v4637_v27  ;;  %v2648_v57 = vadd.f32 %v2647_v56, %v2629_v55  ;;  %v2666_v58 = vpop.f32.mrf.mxu3  ;;  %v2612_v60 = vadd.f32 %v2611_v59, %v5716_v8  ;;  %v2630_v62 = vpop.f32.mrf.mxu1  ;;  %v3183_v8 = vld [vmem:[%s5866_s0 + $0xf8] sm:$0xf0] }
  0xf8   :  { %3018 = vmatpush.bf16.msrb.mxu2 %v4645_v23  ;;  %v3186_v17 = vor.u32 %v4354_v7, %v3183_v8 }
  0xf9   :  { %3037 = vmatpush.bf16.msrb.mxu3 %v4653_v29  ;;  %v2667_v63 = vadd.f32 %v2666_v58, %v2648_v57  ;;  %v2631_v0 = vadd.f32 %v2630_v62, %v2612_v60  ;;  %v4401_v29 = vld [vmem:[%s5866_s0 + $0x1ec] sm:$0xf0] }
  0xfa   :  { %2981 = vmatpush.bf16.msrb.mxu0 %v4628_v37 }
  0xfb   :  { %3000 = vmatpush.bf16.msrb.mxu1 %v4636_v38 }
  0xfc   :  { %3019 = vmatpush.bf16.msrb.mxu2 %v4644_v35  ;;  %v3311_v35 = vld [vmem:[%s5866_s0 + $0x1f8] sm:$0xf0] }
  0xfd   :  { %3038 = vmatpush.bf16.msrb.mxu3 %v4652_v42  ;;  %v3306_v42 = vor.u32 %v4385_v30, %v3303_v31  ;;  %v3314_v48 = vor.u32 %v4386_v34, %v3311_v35 }
  0xfe   :  { %2982 = vmatpush.bf16.msrb.mxu0 %v4627_v53  ;;  %v2649_v9 = vpop.f32.mrf.mxu2  ;;  %v2680_v12 = vpop.f32.mrf.mxu0 }
  0xff   :  { %3001 = vmatpush.bf16.msrb.mxu1 %v4635_v54  ;;  %v2650_v11 = vadd.f32 %v2649_v9, %v2631_v0  ;;  %v2668_v61 = vpop.f32.mrf.mxu3  ;;  %v2681_v15 = vadd.f32 %v2680_v12, %v5743_v24  ;;  %v2699_v16 = vpop.f32.mrf.mxu1  ;;  %v3301_v24 = vld [vmem:[%s5866_s0 + $0x170] sm:$0xf] }
 0x100   :  { %3020 = vmatpush.bf16.msrb.mxu2 %v4643_v51  ;;  %v3302_v37 = vor.u32 %v4401_v29, %v3301_v24 }
 0x101   :  { %3039 = vmatpush.bf16.msrb.mxu3 %v4651_v45  ;;  %v2669_v18 = vadd.f32 %v2668_v61, %v2650_v11  ;;  %v2700_v19 = vadd.f32 %v2699_v16, %v2681_v15  ;;  %2983 = vmatmul.bf16.vlgmr.msrb.gmra.mxu0 %v3174_v10 }
 0x102   :  { %3002 = vmatmul.bf16.vlgmr.msrb.gmra.mxu1 %v3178_v13 }
 0x103   :  { %3021 = vmatmul.bf16.vlgmr.msrb.gmra.mxu2 %v3182_v14 }
 0x104   :  { %3040 = vmatmul.bf16.vlgmr.msrb.gmra.mxu3 %v3186_v17 }
 0x106   :  { %v2718_v21 = vpop.f32.mrf.mxu2  ;;  %v2682_v25 = vpop.f32.mrf.mxu0 }
 0x107   :  { %v2719_v22 = vadd.f32 %v2718_v21, %v2700_v19  ;;  %v2737_v23 = vpop.f32.mrf.mxu3  ;;  %v2683_v27 = vadd.f32 %v2682_v25, %v2664_v52  ;;  %v2701_v28 = vpop.f32.mrf.mxu1 }
 0x109   :  { %v2738_v26 = vadd.f32 %v2737_v23, %v2719_v22  ;;  %v2702_v20 = vadd.f32 %v2701_v28, %v2683_v27 }
 0x10e   :  { %v2720_v36 = vpop.f32.mrf.mxu2  ;;  %v2685_v41 = vpop.f32.mrf.mxu0 }
 0x10f   :  { %v2721_v38 = vadd.f32 %v2720_v36, %v2702_v20  ;;  %v2739_v40 = vpop.f32.mrf.mxu3  ;;  %v2686_v44 = vadd.f32 %v2685_v41, %v2667_v63  ;;  %v2704_v47 = vpop.f32.mrf.mxu1 }
 0x111   :  { %v2740_v49 = vadd.f32 %v2739_v40, %v2721_v38  ;;  %v2705_v46 = vadd.f32 %v2704_v47, %v2686_v44  ;;  %2988 = vmatmul.bf16.gmra.mxu0 %v3302_v37 }
 0x112   :  { %3007 = vmatmul.bf16.gmra.mxu1 %v3306_v42 }
 0x113   :  { %3026 = vmatmul.bf16.gmra.mxu2 %v3310_v43 }
 0x114   :  { %3045 = vmatmul.bf16.gmra.mxu3 %v3314_v48 }
 0x116   :  { %v2723_v39 = vpop.f32.mrf.mxu2  ;;  %v2687_v52 = vpop.f32.mrf.mxu0 }
 0x117   :  { %v2724_v50 = vadd.f32 %v2723_v39, %v2705_v46  ;;  %v2742_v51 = vpop.f32.mrf.mxu3  ;;  %v2688_v53 = vadd.f32 %v2687_v52, %v2669_v18  ;;  %v2706_v54 = vpop.f32.mrf.mxu1 }
 0x119   :  { %v2743_v55 = vadd.f32 %v2742_v51, %v2724_v50  ;;  %v2707_v45 = vadd.f32 %v2706_v54, %v2688_v53 }
 0x11e   :  { %v2725_v56 = vpop.f32.mrf.mxu2  ;;  %v2756_v59 = vpop.f32.mrf.mxu0 }
 0x11f   :  { %v2726_v57 = vadd.f32 %v2725_v56, %v2707_v45  ;;  %v2744_v58 = vpop.f32.mrf.mxu3  ;;  %v2757_v60 = vadd.f32 %v2756_v59, %v2738_v26  ;;  %v2775_v62 = vpop.f32.mrf.mxu1 }
 0x121   :  { %v2745_v63 = vadd.f32 %v2744_v58, %v2726_v57  ;;  %v2776_v0 = vadd.f32 %v2775_v62, %v2757_v60 }
 0x126   :  { %v2794_v1 = vpop.f32.mrf.mxu2  ;;  %v2758_v4 = vpop.f32.mrf.mxu0 }
 0x127   :  { %v2795_v2 = vadd.f32 %v2794_v1, %v2776_v0  ;;  %v2813_v3 = vpop.f32.mrf.mxu3  ;;  %v2759_v5 = vadd.f32 %v2758_v4, %v2740_v49  ;;  %v2777_v6 = vpop.f32.mrf.mxu1 }
 0x129   :  { %v2814_v7 = vadd.f32 %v2813_v3, %v2795_v2  ;;  %v2778_v8 = vadd.f32 %v2777_v6, %v2759_v5 }
 0x12e   :  { %v2796_v9 = vpop.f32.mrf.mxu2  ;;  %v2761_v61 = vpop.f32.mrf.mxu0 }
 0x12f   :  { %v2797_v10 = vadd.f32 %v2796_v9, %v2778_v8  ;;  %v2815_v11 = vpop.f32.mrf.mxu3  ;;  %v2762_v12 = vadd.f32 %v2761_v61, %v2743_v55  ;;  %v2780_v13 = vpop.f32.mrf.mxu1 }
 0x131   :  { %v2816_v14 = vadd.f32 %v2815_v11, %v2797_v10  ;;  %v2781_v15 = vadd.f32 %v2780_v13, %v2762_v12 }
 0x136   :  { %v2799_v16 = vpop.f32.mrf.mxu2  ;;  %v2763_v19 = vpop.f32.mrf.mxu0 }
 0x137   :  { %v2800_v17 = vadd.f32 %v2799_v16, %v2781_v15  ;;  %v2818_v18 = vpop.f32.mrf.mxu3  ;;  %v2764_v21 = vadd.f32 %v2763_v19, %v2745_v63  ;;  %v2782_v22 = vpop.f32.mrf.mxu1 }
 0x139   :  { %v2819_v23 = vadd.f32 %v2818_v18, %v2800_v17  ;;  %v2783_v25 = vadd.f32 %v2782_v22, %v2764_v21 }
 0x13e   :  { %v2801_v27 = vpop.f32.mrf.mxu2  ;;  %v2832_v20 = vpop.f32.mrf.mxu0 }
 0x13f   :  { %v2802_v28 = vadd.f32 %v2801_v27, %v2783_v25  ;;  %v2820_v26 = vpop.f32.mrf.mxu3  ;;  %v2851_v24 = vpop.f32.mrf.mxu1  ;;  %v2833_v51 = vadd.f32 %v2832_v20, %v2814_v7 }
 0x141   :  { %v2821_v29 = vadd.f32 %v2820_v26, %v2802_v28  ;;  %v2852_v52 = vadd.f32 %v2851_v24, %v2833_v51 }
 0x146   :  { %v2870_v30 = vpop.f32.mrf.mxu2  ;;  %v2834_v32 = vpop.f32.mrf.mxu0 }
 0x147   :  { %v2889_v31 = vpop.f32.mrf.mxu3  ;;  %v2853_v33 = vpop.f32.mrf.mxu1  ;;  %v2871_v54 = vadd.f32 %v2870_v30, %v2852_v52  ;;  %v2835_v57 = vadd.f32 %v2834_v32, %v2816_v14 }
 0x149   :  { %v2890_v58 = vadd.f32 %v2889_v31, %v2871_v54  ;;  %v2854_v59 = vadd.f32 %v2853_v33, %v2835_v57 }
 0x14e   :  { %v2872_v34 = vpop.f32.mrf.mxu2  ;;  %v2837_v36 = vpop.f32.mrf.mxu0 }
 0x14f   :  { %v2891_v35 = vpop.f32.mrf.mxu3  ;;  %v2856_v37 = vpop.f32.mrf.mxu1  ;;  %v2873_v63 = vadd.f32 %v2872_v34, %v2854_v59  ;;  %v2838_v3 = vadd.f32 %v2837_v36, %v2819_v23 }
 0x151   :  { %v2892_v5 = vadd.f32 %v2891_v35, %v2873_v63  ;;  %v2857_v7 = vadd.f32 %v2856_v37, %v2838_v3 }
 0x156   :  { %v2875_v38 = vpop.f32.mrf.mxu2  ;;  %v2839_v41 = vpop.f32.mrf.mxu0 }
 0x157   :  { %v2894_v40 = vpop.f32.mrf.mxu3  ;;  %v2858_v42 = vpop.f32.mrf.mxu1  ;;  %v2876_v10 = vadd.f32 %v2875_v38, %v2857_v7  ;;  %v2840_v14 = vadd.f32 %v2839_v41, %v2821_v29 }
 0x159   :  { %v2895_v17 = vadd.f32 %v2894_v40, %v2876_v10  ;;  %v2859_v19 = vadd.f32 %v2858_v42, %v2840_v14 }
 0x15e   :  { %v2877_v43 = vpop.f32.mrf.mxu2  ;;  %v2908_v47 = vpop.f32.mrf.mxu0 }
 0x15f   :  { %v2896_v44 = vpop.f32.mrf.mxu3  ;;  %v2927_v48 = vpop.f32.mrf.mxu1  ;;  %v2909_v60 = vadd.f32 %v2908_v47, %v2890_v58  ;;  %v2878_v25 = vadd.f32 %v2877_v43, %v2859_v19 }
 0x161   :  { %v2928_v4 = vadd.f32 %v2927_v48, %v2909_v60  ;;  %v2897_v33 = vadd.f32 %v2896_v44, %v2878_v25 }
 0x166   :  { %v2946_v49 = vpop.f32.mrf.mxu2  ;;  %v2910_v39 = vpop.f32.mrf.mxu0 }
 0x167   :  { %v2965_v46 = vpop.f32.mrf.mxu3  ;;  %v2929_v50 = vpop.f32.mrf.mxu1  ;;  %v2947_v6 = vadd.f32 %v2946_v49, %v2928_v4  ;;  %v2911_v8 = vadd.f32 %v2910_v39, %v2892_v5 }
 0x169   :  { %v2966_v11 = vadd.f32 %v2965_v46, %v2947_v6  ;;  %v2930_v15 = vadd.f32 %v2929_v50, %v2911_v8 }
 0x16e   :  { %v2948_v53 = vpop.f32.mrf.mxu2  ;;  %v2913_v45 = vpop.f32.mrf.mxu0 }
 0x16f   :  { %v2967_v55 = vpop.f32.mrf.mxu3  ;;  %v2932_v56 = vpop.f32.mrf.mxu1  ;;  %v2949_v18 = vadd.f32 %v2948_v53, %v2930_v15  ;;  %v2914_v21 = vadd.f32 %v2913_v45, %v2895_v17 }
 0x171   :  { %v2968_v27 = vadd.f32 %v2967_v55, %v2949_v18  ;;  %v2933_v30 = vadd.f32 %v2932_v56, %v2914_v21 }
 0x176   :  { %v2951_v62 = vpop.f32.mrf.mxu2  ;;  %v2915_v1 = vpop.f32.mrf.mxu0 }
 0x177   :  { %v2970_v0 = vpop.f32.mrf.mxu3  ;;  %v2934_v2 = vpop.f32.mrf.mxu1  ;;  %v2952_v34 = vadd.f32 %v2951_v62, %v2933_v30  ;;  %v2916_v29 = vadd.f32 %v2915_v1, %v2897_v33 }
 0x179   :  { %v2971_v37 = vadd.f32 %v2970_v0, %v2952_v34  ;;  %v2935_v42 = vadd.f32 %v2934_v2, %v2916_v29 }
 0x17e   :  { %v2953_v9 = vpop.f32.mrf.mxu2  ;;  %v2984_v12 = vpop.f32.mrf.mxu0 }
 0x17f   :  { %v2972_v61 = vpop.f32.mrf.mxu3  ;;  %v3003_v13 = vpop.f32.mrf.mxu1  ;;  %v2985_v16 = vadd.f32 %v2984_v12, %v2966_v11  ;;  %v2954_v49 = vadd.f32 %v2953_v9, %v2935_v42 }
 0x181   :  { %v3004_v22 = vadd.f32 %v3003_v13, %v2985_v16  ;;  %v2973_v39 = vadd.f32 %v2972_v61, %v2954_v49 }
 0x186   :  { %v3022_v23 = vpop.f32.mrf.mxu2  ;;  %v2986_v20 = vpop.f32.mrf.mxu0 }
 0x187   :  { %v3023_v28 = vadd.f32 %v3022_v23, %v3004_v22  ;;  %v3041_v26 = vpop.f32.mrf.mxu3  ;;  %v3005_v24 = vpop.f32.mrf.mxu1  ;;  %v2987_v32 = vadd.f32 %v2986_v20, %v2968_v27 }
 0x189   :  { %v3042_v31 = vadd.f32 %v3041_v26, %v3023_v28  ;;  %v3006_v35 = vadd.f32 %v3005_v24, %v2987_v32 }
 0x18b   :  { %3051 = vst [vmem:[%s5867_s2] sm:$0xff] %v3042_v31 }
 0x18e   :  { %v3024_v36 = vpop.f32.mrf.mxu2  ;;  %v2989_v41 = vpop.f32.mrf.mxu0 }
 0x18f   :  { %v3025_v38 = vadd.f32 %v3024_v36, %v3006_v35  ;;  %v3043_v40 = vpop.f32.mrf.mxu3  ;;  %v2990_v47 = vadd.f32 %v2989_v41, %v2971_v37  ;;  %v3008_v48 = vpop.f32.mrf.mxu1 }
 0x191   :  { %v3044_v43 = vadd.f32 %v3043_v40, %v3025_v38  ;;  %v3009_v44 = vadd.f32 %v3008_v48, %v2990_v47 }
 0x193   :  { %3052 = vst [vmem:[%s5867_s2 + $0x8] sm:$0xff] %v3044_v43 }
 0x196   :  { %v3027_v46 = vpop.f32.mrf.mxu2  ;;  %v2991_v52 = vpop.f32.mrf.mxu0 }
 0x197   :  { %v3028_v50 = vadd.f32 %v3027_v46, %v3009_v44  ;;  %v3046_v51 = vpop.f32.mrf.mxu3  ;;  %v2992_v54 = vadd.f32 %v2991_v52, %v2973_v39  ;;  %v3010_v55 = vpop.f32.mrf.mxu1 }
 0x199   :  { %v3047_v53 = vadd.f32 %v3046_v51, %v3028_v50  ;;  %v3011_v45 = vadd.f32 %v3010_v55, %v2992_v54 }
 0x19b   :  { %3053 = vst [vmem:[%s5867_s2 + $0x10] sm:$0xff] %v3047_v53 }
 0x19e   :  { %v3029_v56 = vpop.f32.mrf.mxu2 }
 0x19f   :  { %v3030_v57 = vadd.f32 %v3029_v56, %v3011_v45  ;;  %v3048_v58 = vpop.f32.mrf.mxu3 }
 0x1a1   :  { %v3049_v59 = vadd.f32 %v3048_v58, %v3030_v57 }
 0x1a3   :  { %3054 = vst [vmem:[%s5867_s2 + $0x18] sm:$0xff] %v3049_v59 }

</bundles_post_ra>
